<compile_context>
chip_gen: v7x
topology: tpu7x:2x2x1
jax: 0.10.0
libtpu: 0.0.40
codegen_flags: <defaults>
</compile_context>

<pallas_src>
import functools
import math

import jax
import jax.numpy as jnp
from jax import lax
from jax.experimental import pallas as pl
from jax.experimental.pallas import tpu as pltpu


# ----------------------------------------------------------------------------
# helpers
# ----------------------------------------------------------------------------

def _round_up(x, m):
    return ((x + m - 1) // m) * m


def _apply_act(y, act):
    if act == "relu":
        return jnp.maximum(y, 0.0)
    if act == "silu":
        return y * jax.nn.sigmoid(y)
    if act == "sigmoid":
        return jax.nn.sigmoid(y)
    if act == "tanh":
        return jnp.tanh(y)
    return y


# ----------------------------------------------------------------------------
# Pallas kernels
# ----------------------------------------------------------------------------

def _matmul_epi_kernel(a_ref, b_ref, s_ref, c_ref, o_ref, acc_ref, *, act):
    @pl.when(pl.program_id(2) == 0)
    def _init():
        acc_ref[...] = jnp.zeros_like(acc_ref)

    acc_ref[...] += jnp.dot(a_ref[...], b_ref[...],
                            preferred_element_type=jnp.float32)

    @pl.when(pl.program_id(2) == pl.num_programs(2) - 1)
    def _store():
        y = acc_ref[...] * s_ref[...] + c_ref[...]
        o_ref[...] = _apply_act(y, act).astype(o_ref.dtype)


def matmul_act(a, b, scale=None, shift=None, act="none"):
    """act((A @ B) * scale + shift), scale/shift broadcast per output column.

    A, B are fed to the MXU as bf16 (f32 accumulation).  Tile sizes adapt to
    skinny shapes so tiny contraction / output dims are not padded to 128."""
    M, K = a.shape
    K2, N = b.shape
    assert K == K2
    if scale is None:
        scale = jnp.ones((N,), jnp.float32)
    if shift is None:
        shift = jnp.zeros((N,), jnp.float32)

    tm = 256 if M >= 256 else _round_up(M, 16)
    Mp = _round_up(M, tm)
    Np = _round_up(N, 128)
    tn = 256 if (Np % 256 == 0) else 128
    tk = _round_up(K, 16) if K <= 256 else 256
    Kp = _round_up(K, tk)

    a_p = jnp.pad(a.astype(jnp.bfloat16), ((0, Mp - M), (0, Kp - K)))
    b_p = jnp.pad(b.astype(jnp.bfloat16), ((0, Kp - K), (0, Np - N)))
    s_p = jnp.pad(scale.astype(jnp.float32).reshape(1, N), ((0, 0), (0, Np - N)))
    c_p = jnp.pad(shift.astype(jnp.float32).reshape(1, N), ((0, 0), (0, Np - N)))

    out = pl.pallas_call(
        functools.partial(_matmul_epi_kernel, act=act),
        out_shape=jax.ShapeDtypeStruct((Mp, Np), jnp.float32),
        grid_spec=pltpu.PrefetchScalarGridSpec(
            num_scalar_prefetch=0,
            grid=(Mp // tm, Np // tn, Kp // tk),
            in_specs=[pl.BlockSpec((tm, tk), lambda i, j, k: (i, k)),
                      pl.BlockSpec((tk, tn), lambda i, j, k: (k, j)),
                      pl.BlockSpec((1, tn), lambda i, j, k: (0, j)),
                      pl.BlockSpec((1, tn), lambda i, j, k: (0, j))],
            out_specs=pl.BlockSpec((tm, tn), lambda i, j, k: (i, j)),
            scratch_shapes=[pltpu.VMEM((tm, tn), jnp.float32)]),
        compiler_params=pltpu.CompilerParams(
            dimension_semantics=("parallel", "parallel", "arbitrary")),
    )(a_p, b_p, s_p, c_p)
    return out[:M, :N]


def _affine_act_kernel(x_ref, s_ref, c_ref, o_ref, *, act):
    o_ref[...] = _apply_act(x_ref[...] * s_ref[...] + c_ref[...], act)


def affine_act_2d(x, scale, shift, act="none"):
    """y = act(x * scale + shift), per-column scale/shift; x: (M, C)."""
    M, C = x.shape
    tm = 512 if M >= 512 else _round_up(M, 8)
    Mp = _round_up(M, tm)
    x_p = jnp.pad(x.astype(jnp.float32), ((0, Mp - M), (0, 0)))
    out = pl.pallas_call(
        functools.partial(_affine_act_kernel, act=act),
        out_shape=jax.ShapeDtypeStruct((Mp, C), jnp.float32),
        grid=(Mp // tm,),
        in_specs=[pl.BlockSpec((tm, C), lambda i: (i, 0)),
                  pl.BlockSpec((1, C), lambda i: (0, 0)),
                  pl.BlockSpec((1, C), lambda i: (0, 0))],
        out_specs=pl.BlockSpec((tm, C), lambda i: (i, 0)),
        compiler_params=pltpu.CompilerParams(dimension_semantics=("parallel",)),
    )(x_p, scale.reshape(1, C).astype(jnp.float32),
      shift.reshape(1, C).astype(jnp.float32))
    return out[:M]


def _affine_split_gate_kernel(x_ref, s_ref, c_ref, o_ref, *, half, act_a, act_b):
    y = x_ref[...] * s_ref[...] + c_ref[...]
    o_ref[...] = _apply_act(y[:, :half], act_a) * _apply_act(y[:, half:], act_b)


def affine_split_gate_2d(x, scale=None, shift=None, act_a="none", act_b="sigmoid"):
    """Fused (affine ->) split-in-half -> act_a(left) * act_b(right); x: (M, 2H)."""
    M, C2 = x.shape
    half = C2 // 2
    if scale is None:
        scale = jnp.ones((C2,), jnp.float32)
    if shift is None:
        shift = jnp.zeros((C2,), jnp.float32)
    tm = 512 if M >= 512 else _round_up(M, 8)
    Mp = _round_up(M, tm)
    x_p = jnp.pad(x.astype(jnp.float32), ((0, Mp - M), (0, 0)))
    out = pl.pallas_call(
        functools.partial(_affine_split_gate_kernel, half=half,
                          act_a=act_a, act_b=act_b),
        out_shape=jax.ShapeDtypeStruct((Mp, half), jnp.float32),
        grid=(Mp // tm,),
        in_specs=[pl.BlockSpec((tm, C2), lambda i: (i, 0)),
                  pl.BlockSpec((1, C2), lambda i: (0, 0)),
                  pl.BlockSpec((1, C2), lambda i: (0, 0))],
        out_specs=pl.BlockSpec((tm, half), lambda i: (i, 0)),
        compiler_params=pltpu.CompilerParams(dimension_semantics=("parallel",)),
    )(x_p, scale.reshape(1, C2).astype(jnp.float32),
      shift.reshape(1, C2).astype(jnp.float32))
    return out[:M]


def _mul_act_kernel(a_ref, b_ref, o_ref, *, act_a, act_b):
    o_ref[...] = _apply_act(a_ref[...], act_a) * _apply_act(b_ref[...], act_b)


def mul_act_2d(a, b, act_a="none", act_b="none"):
    """Elementwise act_a(a) * act_b(b); a, b: (M, C)."""
    M, C = a.shape
    tm = 512 if M >= 512 else _round_up(M, 8)
    Mp = _round_up(M, tm)
    a_p = jnp.pad(a.astype(jnp.float32), ((0, Mp - M), (0, 0)))
    b_p = jnp.pad(b.astype(jnp.float32), ((0, Mp - M), (0, 0)))
    out = pl.pallas_call(
        functools.partial(_mul_act_kernel, act_a=act_a, act_b=act_b),
        out_shape=jax.ShapeDtypeStruct((Mp, C), jnp.float32),
        grid=(Mp // tm,),
        in_specs=[pl.BlockSpec((tm, C), lambda i: (i, 0)),
                  pl.BlockSpec((tm, C), lambda i: (i, 0))],
        out_specs=pl.BlockSpec((tm, C), lambda i: (i, 0)),
        compiler_params=pltpu.CompilerParams(dimension_semantics=("parallel",)),
    )(a_p, b_p)
    return out[:M]


def _channel_gate_kernel(x_ref, s_ref, o_ref):
    o_ref[...] = x_ref[...] * s_ref[...]        # (1,T,C) * (1,1,C), in-kernel broadcast


def channel_gate(x, s):
    """x: (B, T, C); s: (B, C) per-(batch,channel) gate, broadcast inside the kernel."""
    B, T, C = x.shape
    return pl.pallas_call(
        _channel_gate_kernel,
        out_shape=jax.ShapeDtypeStruct((B, T, C), jnp.float32),
        grid=(B,),
        in_specs=[pl.BlockSpec((1, T, C), lambda i: (i, 0, 0)),
                  pl.BlockSpec((1, 1, C), lambda i: (i, 0, 0))],
        out_specs=pl.BlockSpec((1, T, C), lambda i: (i, 0, 0)),
        compiler_params=pltpu.CompilerParams(dimension_semantics=("parallel",)),
    )(x.astype(jnp.float32), s.reshape(B, 1, C).astype(jnp.float32))


def _depthwise_kernel(xp_ref, w_ref, b_ref, o_ref, *, K, pad_left, gated):
    T = o_ref.shape[1]
    C = o_ref.shape[2]
    xp = xp_ref[0]                              # (T + K - 1, C) padded input tile
    acc = jnp.zeros((T, C), jnp.float32)
    for k in range(K):                          # unrolled VPU shift-and-add
        acc = acc + xp[k:k + T, :] * w_ref[k:k + 1, :]
    acc = acc + b_ref[...]
    if gated:                                   # fused x * sigmoid(dwconv(x) + b)
        acc = xp[pad_left:pad_left + T, :] * jax.nn.sigmoid(acc)
    o_ref[0] = acc


def depthwise_conv1d_nwc(x, w, b, pad, gated=False):
    """Depthwise conv (groups == C) on NWC input.  w: (C, 1, K) torch layout."""
    # TODO(synk): tile the time axis for very long sequences (full-T block per batch here).
    B, T, C = x.shape
    K = w.shape[-1]
    pad_l, pad_r = pad
    xp = jnp.pad(x.astype(jnp.float32), ((0, 0), (pad_l, pad_r), (0, 0)))
    Tp = T + pad_l + pad_r
    T_out = Tp - K + 1
    w2 = jnp.transpose(w[:, 0, :], (1, 0)).astype(jnp.float32)     # (K, C)
    b2 = b.reshape(1, C).astype(jnp.float32)
    return pl.pallas_call(
        functools.partial(_depthwise_kernel, K=K, pad_left=pad_l, gated=gated),
        out_shape=jax.ShapeDtypeStruct((B, T_out, C), jnp.float32),
        grid=(B,),
        in_specs=[pl.BlockSpec((1, Tp, C), lambda i: (i, 0, 0)),
                  pl.BlockSpec((K, C), lambda i: (0, 0)),
                  pl.BlockSpec((1, C), lambda i: (0, 0))],
        out_specs=pl.BlockSpec((1, T_out, C), lambda i: (i, 0, 0)),
        compiler_params=pltpu.CompilerParams(dimension_semantics=("parallel",)),
    )(xp, w2, b2)


def _attn_kernel(q_ref, k_ref, v_ref, o_ref, *, scale):
    q = q_ref[0]                                # (T, D)
    k = k_ref[0]                                # (T, D)
    v = v_ref[0]                                # (T, D)
    s = lax.dot_general(q, k, (((1,), (1,)), ((), ())),
                        preferred_element_type=jnp.float32) * scale
    s = s - jnp.max(s, axis=-1, keepdims=True)
    p = jnp.exp(s)
    inv = pl.reciprocal(jnp.sum(p, axis=-1, keepdims=True), approx=True)
    o_ref[0] = jnp.dot(p * inv, v, preferred_element_type=jnp.float32)


def attention_pallas(q, k, v):
    """Softmax attention per (batch*head). q, k, v: (BH, T, D)."""
    # TODO(synk): switch to an online-softmax (flash) KV-tiled form for long T (v7x VMEM).
    BH, T, D = q.shape
    scale = 1.0 / math.sqrt(D)
    spec = pl.BlockSpec((1, T, D), lambda i: (i, 0, 0))
    return pl.pallas_call(
        functools.partial(_attn_kernel, scale=scale),
        out_shape=jax.ShapeDtypeStruct((BH, T, D), jnp.float32),
        grid=(BH,),
        in_specs=[spec, spec, spec],
        out_specs=spec,
        compiler_params=pltpu.CompilerParams(dimension_semantics=("parallel",)),
    )(q.astype(jnp.float32), k.astype(jnp.float32), v.astype(jnp.float32))


# ----------------------------------------------------------------------------
# Conv / norm building blocks (thin glue around the Pallas kernels, NWC layout)
# ----------------------------------------------------------------------------

def conv1d_nwc(x, w, b=None, stride=1, padding=0, act="none"):
    """PyTorch-semantics Conv1d on NWC activations.
    x: (B, T, Cin); w: (Cout, Cin, K).  Returns act(conv + bias) as (B, T_out, Cout).
    1x1/stride-1 convs are a pure reshape + matmul; K>1 convs concatenate K strided
    tap slices on the channel axis (no im2col gather / big transpose)."""
    if isinstance(padding, int):
        padding = (padding, padding)
    if padding != (0, 0):
        x = jnp.pad(x, ((0, 0), padding, (0, 0)))
    B, T, Cin = x.shape
    Cout, _, K = w.shape
    if K == 1 and stride == 1:
        T_out = T
        a = x.reshape(B * T, Cin)
        w2 = w[:, :, 0].T                                           # (Cin, Cout)
    else:
        T_out = (T - K) // stride + 1
        span = stride * (T_out - 1) + 1
        taps = [x[:, k:k + span:stride, :] for k in range(K)]
        a = jnp.concatenate(taps, axis=-1).reshape(B * T_out, K * Cin)
        w2 = jnp.transpose(w, (2, 1, 0)).reshape(K * Cin, Cout)     # [(k,ci), co]
    y = matmul_act(a, w2, shift=b, act=act)
    return y.reshape(B, T_out, Cout)


def conv_transpose1d_nwc(x, w, b=None, stride=1):
    """PyTorch-semantics ConvTranspose1d on NWC activations, without zero-insertion:
    one matmul over all K taps of the un-upsampled input + strided scatter-add.
    x: (B, L, Cin); w: (Cin, Cout, K)."""
    B, L, Cin = x.shape
    _, Cout, K = w.shape
    wk = jnp.transpose(w, (0, 2, 1)).reshape(Cin, K * Cout)         # columns [(k, co)]
    z = matmul_act(x.reshape(B * L, Cin), wk).reshape(B, L, K, Cout)
    T_out = (L - 1) * stride + K
    span = stride * (L - 1) + 1
    out = jnp.zeros((B, T_out, Cout), jnp.float32)
    for k in range(K):
        out = out.at[:, k:k + span:stride, :].add(z[:, :, k, :])
    if b is not None:
        out = out + b.reshape(1, 1, Cout).astype(jnp.float32)
    return out


def _bn_scale_shift(y, gamma, beta, eps=1e-5):
    """Training-mode (batch) statistics, matching a freshly constructed torch module."""
    mean = jnp.mean(y, axis=(0, 1))
    mean2 = jnp.mean(y * y, axis=(0, 1))
    var = jnp.maximum(mean2 - mean * mean, 0.0)
    scale = gamma * lax.rsqrt(var + eps)
    shift = beta - mean * scale
    return scale, shift


def batchnorm_act_nwc(x, gamma, beta, act="none", eps=1e-5):
    B, T, C = x.shape
    scale, shift = _bn_scale_shift(x, gamma, beta, eps)
    return affine_act_2d(x.reshape(B * T, C), scale, shift, act).reshape(B, T, C)


# ----------------------------------------------------------------------------
# Deterministic parameter construction (synthetic; mirrors the torch shapes)
# ----------------------------------------------------------------------------

RESCALE_REFERENCE = 0.1   # MANNER.rescale


class KeyGen:
    def __init__(self, key):
        self._key = key

    def __call__(self):
        self._key, sub = jax.random.split(self._key)
        return sub


def _uniform(key, shape, bound):
    return jax.random.uniform(key, shape, jnp.float32, -bound, bound)


def _rescale(w, b):
    # rescale_module(..., reference=0.1): divide conv weights/bias by sqrt(std/ref)
    scale = jnp.sqrt(jnp.std(w) / RESCALE_REFERENCE)
    return w / scale, (None if b is None else b / scale)


def init_conv1d(kg, cin, cout, k, groups=1, rescale=True):
    fan_in = (cin // groups) * k
    bound = 1.0 / math.sqrt(fan_in)
    w = _uniform(kg(), (cout, cin // groups, k), bound)
    b = _uniform(kg(), (cout,), bound)
    if rescale:
        w, b = _rescale(w, b)
    return {"w": w, "b": b}


def init_convT1d(kg, cin, cout, k, rescale=True):
    fan_in = cout * k
    bound = 1.0 / math.sqrt(fan_in)
    w = _uniform(kg(), (cin, cout, k), bound)
    b = _uniform(kg(), (cout,), bound)
    if rescale:
        w, b = _rescale(w, b)
    return {"w": w, "b": b}


def init_bn(c):
    return {"g": jnp.ones((c,), jnp.float32), "b": jnp.zeros((c,), jnp.float32)}


def init_resconblock(kg, cin, growth1, growth2):
    c1 = int(cin * growth1)
    c2 = int(cin * growth2)
    return {
        "pc1": {"conv": init_conv1d(kg, cin, c1, 1), "bn": init_bn(c1)},
        "dc": {"conv": init_conv1d(kg, cin, cin, 3, groups=cin), "bn": init_bn(cin)},
        "pc2": {"conv": init_conv1d(kg, cin, c2, 1), "bn": init_bn(c2)},
        "res": init_conv1d(kg, cin, c2, 1),
    }


def init_attnblock(kg, c, segment_len):
    r = max(c // 4, 1)
    return {
        "q": init_conv1d(kg, c, c, 1),
        "k": init_conv1d(kg, c, c, 1),
        "v": init_conv1d(kg, c, c, 1),
        "g_out": init_conv1d(kg, c, c, 1),
        "local_dw": init_conv1d(kg, c, c, segment_len, groups=c),
        "se_w1": _uniform(kg(), (c, r), 1.0 / math.sqrt(c)),
        "se_b1": jnp.zeros((r,), jnp.float32),
        "se_w2": _uniform(kg(), (r, c), 1.0 / math.sqrt(r)),
        "se_b2": jnp.zeros((c,), jnp.float32),
        "out": init_conv1d(kg, c, c, 1),
    }


def init_encoder(kg, cin, cout, K, seg, head, layer, depth):
    p = {"down": {"conv": init_conv1d(kg, cin, cin, K), "bn": init_bn(cin)},
         "res": init_resconblock(kg, cin, growth1=2, growth2=2)}
    if layer == depth - 1:
        p["attn"] = init_attnblock(kg, cout, seg)
    return p


def init_decoder(kg, cin, cout, K, seg, head, layer, depth):
    p = {"res": init_resconblock(kg, cin, growth1=2, growth2=0.5),
         "up": {"conv": init_convT1d(kg, cout, cout, K), "bn": init_bn(cout)}}
    if layer == depth - 1:
        p["attn"] = init_attnblock(kg, cout, seg)
    return p


def init_maskgate(kg, c):
    return {"out": init_conv1d(kg, c, c, 1),
            "gate": init_conv1d(kg, c, c, 1),
            "mask": init_conv1d(kg, c, c, 1)}


def init_manner_block(kg, in_ch, out_ch, hidden, depth, K, S, growth, head, seg):
    p = {"in_conv": {"conv": init_conv1d(kg, in_ch, hidden, 3), "bn": init_bn(hidden)},
         "out_conv": init_conv1d(kg, hidden, in_ch, 3)}
    ic = in_ch * hidden
    oc = out_ch * growth
    enc, dec = [], []
    for layer in range(depth):
        enc.append(init_encoder(kg, ic, oc * hidden, K, seg, head, layer, depth))
        dec.append(init_decoder(kg, oc * hidden, ic, K, seg, head, layer, depth))
        ic = hidden * 2 ** (layer + 1)
        oc *= growth
    dec.reverse()
    p["enc"] = enc
    p["dec"] = dec
    hdim = hidden * growth ** depth
    p["linear_w"] = _uniform(kg(), (hdim, hdim), 1.0 / math.sqrt(hdim))  # (out, in), no bias
    p["mask_gate"] = init_maskgate(kg, hidden)
    return p


def init_manner(key, in_ch, out_ch, hidden, depth, K, S, growth, head, seg):
    kg = KeyGen(key)
    return {"block": init_manner_block(kg, in_ch, out_ch, hidden, depth, K, S,
                                       growth, head, seg)}


# ----------------------------------------------------------------------------
# Forward pass (NWC activations: (B, T, C))
# ----------------------------------------------------------------------------

def resconblock_fwd(p, x):
    B, T, C = x.shape
    # point_conv1 (1x1) -> BN -> GLU ; BN affine + GLU fused in one Pallas kernel
    h = conv1d_nwc(x, p["pc1"]["conv"]["w"], p["pc1"]["conv"]["b"])
    C2 = h.shape[-1]
    scale, shift = _bn_scale_shift(h, p["pc1"]["bn"]["g"], p["pc1"]["bn"]["b"])
    h = affine_split_gate_2d(h.reshape(B * T, C2), scale, shift,
                             act_a="none", act_b="sigmoid").reshape(B, T, C2 // 2)
    # depthwise conv (k=3, 'same') -> BN -> Swish(SiLU)
    h = depthwise_conv1d_nwc(h, p["dc"]["conv"]["w"], p["dc"]["conv"]["b"], pad=(1, 1))
    h = batchnorm_act_nwc(h, p["dc"]["bn"]["g"], p["dc"]["bn"]["b"], "silu")
    # point_conv2 (1x1) -> BN -> ReLU
    h = conv1d_nwc(h, p["pc2"]["conv"]["w"], p["pc2"]["conv"]["b"])
    h = batchnorm_act_nwc(h, p["pc2"]["bn"]["g"], p["pc2"]["bn"]["b"], "relu")
    # residual 1x1 conv
    return h + conv1d_nwc(x, p["res"]["w"], p["res"]["b"])


def multiview_attention_fwd(p, x, head):
    # TODO(synk): MultiviewAttentionBlock source (MANNER/src/models_small.py) was not
    # provided; reconstructed as the paper's three views (global multi-head attention
    # over time, a local gated depthwise view of width segment_len, and a squeeze-excite
    # channel view) fused by a 1x1 conv with a residual connection.
    B, T, C = x.shape
    dh = C // head
    x2d = x.reshape(B * T, C)

    # global view: fused q/k/v projection (single matmul over concatenated weights)
    w_qkv = jnp.concatenate([p["q"]["w"][:, :, 0].T, p["k"]["w"][:, :, 0].T,
                             p["v"]["w"][:, :, 0].T], axis=1)          # (C, 3C)
    b_qkv = jnp.concatenate([p["q"]["b"], p["k"]["b"], p["v"]["b"]])
    qkv = matmul_act(x2d, w_qkv, shift=b_qkv).reshape(B, T, 3 * C)

    def split_heads(t):
        return (t.reshape(B, T, head, dh).transpose(0, 2, 1, 3)
                 .reshape(B * head, T, dh))

    o = attention_pallas(split_heads(qkv[..., :C]),
                         split_heads(qkv[..., C:2 * C]),
                         split_heads(qkv[..., 2 * C:]))
    o = o.reshape(B, head, T, dh).transpose(0, 2, 1, 3).reshape(B, T, C)
    y_global = conv1d_nwc(o, p["g_out"]["w"], p["g_out"]["b"])

    # local view: gated depthwise conv, sigmoid gate fused into the depthwise kernel
    Kl = p["local_dw"]["w"].shape[-1]
    y_local = depthwise_conv1d_nwc(x, p["local_dw"]["w"], p["local_dw"]["b"],
                                   pad=((Kl - 1) // 2, Kl // 2), gated=True)

    # channel view: squeeze-excite gate (relu/sigmoid fused in the matmul epilogue)
    pooled = jnp.mean(x, axis=1)                                         # (B, C)
    hse = matmul_act(pooled, p["se_w1"], shift=p["se_b1"], act="relu")
    s = matmul_act(hse, p["se_w2"], shift=p["se_b2"], act="sigmoid")     # (B, C)
    y_channel = channel_gate(x, s)

    y = conv1d_nwc(y_global + y_local + y_channel, p["out"]["w"], p["out"]["b"])
    return x + y


def encoder_fwd(p, x, K, S, head):
    x = conv1d_nwc(x, p["down"]["conv"]["w"], p["down"]["conv"]["b"], stride=S)
    x = batchnorm_act_nwc(x, p["down"]["bn"]["g"], p["down"]["bn"]["b"], "relu")
    x = resconblock_fwd(p["res"], x)
    if "attn" in p:
        x = multiview_attention_fwd(p["attn"], x, head)
    return x


def decoder_fwd(p, x, K, S, head):
    x = resconblock_fwd(p["res"], x)
    x = conv_transpose1d_nwc(x, p["up"]["conv"]["w"], p["up"]["conv"]["b"], stride=S)
    x = batchnorm_act_nwc(x, p["up"]["bn"]["g"], p["up"]["bn"]["b"], "relu")
    if "attn" in p:
        x = multiview_attention_fwd(p["attn"], x, head)
    return x


def maskgate_fwd(p, x):
    B, T, C = x.shape
    # tanh-conv and sigmoid-conv share the input: one matmul, then a fused split-gate
    w_og = jnp.concatenate([p["out"]["w"][:, :, 0].T, p["gate"]["w"][:, :, 0].T], axis=1)
    b_og = jnp.concatenate([p["out"]["b"], p["gate"]["b"]])
    og = matmul_act(x.reshape(B * T, C), w_og, shift=b_og)               # (B*T, 2C)
    m = affine_split_gate_2d(og, act_a="tanh", act_b="sigmoid").reshape(B, T, C)
    return conv1d_nwc(m, p["mask"]["w"], p["mask"]["b"], act="relu")


def manner_block_fwd(p, x, K, S, depth, head):
    x = conv1d_nwc(x, p["in_conv"]["conv"]["w"], p["in_conv"]["conv"]["b"], padding=1)
    x = batchnorm_act_nwc(x, p["in_conv"]["bn"]["g"], p["in_conv"]["bn"]["b"], "relu")
    enc_out = x

    skips = []
    for layer in range(depth):
        x = encoder_fwd(p["enc"][layer], x, K, S, head)
        skips.append(x)

    # bottleneck: Linear (no bias) + ReLU -- already channel-last, no permutes needed
    B, T, C = x.shape
    x = matmul_act(x.reshape(B * T, C), p["linear_w"].T, act="relu").reshape(B, T, C)

    for i in range(depth):
        skip = skips.pop(-1)
        x = x + skip[:, :x.shape[1], :]
        x = decoder_fwd(p["dec"][i], x, K, S, head)

    mask = maskgate_fwd(p["mask_gate"], x)
    B, T, C = x.shape
    x = mul_act_2d(enc_out.reshape(B * T, C), mask.reshape(B * T, C)).reshape(B, T, C)
    x = conv1d_nwc(x, p["out_conv"]["w"], p["out_conv"]["b"], padding=1)
    return x


def _padded_length(length, K, S, depth):
    length = math.ceil(length)
    for _ in range(depth):
        length = math.ceil((length - K) / S) + 1
        length = max(length, 1)
    for _ in range(depth):
        length = (length - 1) * S + K
    return int(math.ceil(length))


def manner_forward(params, x, K, S, depth, head, eps=1e-3):
    x = x.astype(jnp.float32)                               # (B, Cin, T) torch layout
    x2 = jnp.mean(x, axis=1, keepdims=True)
    std = jnp.std(x2, axis=-1, keepdims=True, ddof=1)       # torch .std(): unbiased
    x = x / (eps + std)
    length = x.shape[-1]
    target = _padded_length(length, K, S, depth)
    x = jnp.pad(x, ((0, 0), (0, 0), (0, target - length)))
    x_nwc = jnp.transpose(x, (0, 2, 1))                     # NCW -> NWC once
    y_nwc = manner_block_fwd(params["block"], x_nwc, K, S, depth, head)
    y = jnp.transpose(y_nwc, (0, 2, 1))[..., :length]       # back to NCW once
    return std * y


# ----------------------------------------------------------------------------

if __name__ == "__main__":
    # Small config: MANNER(in=1, out=1, hidden=8, depth=2, kernel_size=4,
    # stride=2, growth=2, head=2, segment_len=8); input x: (B=2, C=1, T=64).
    B, T = 2, 64
    in_channels, out_channels = 1, 1
    hidden, depth = 8, 2
    kernel_size, stride = 4, 2
    growth, head, segment_len = 2, 2, 8

    root = jax.random.PRNGKey(0)
    pkey, xkey = jax.random.split(root)
    params = init_manner(pkey, in_channels, out_channels, hidden, depth,
                         kernel_size, stride, growth, head, segment_len)
    x = jax.random.normal(xkey, (B, in_channels, T), jnp.float32)

    run = jax.jit(functools.partial(manner_forward, params,
                                    K=kernel_size, S=stride,
                                    depth=depth, head=head))
    y = run(x)
    jax.block_until_ready(y)
    assert y.shape == (B, in_channels, T), y.shape
    assert bool(jnp.all(jnp.isfinite(y)))
    print("KERNEL_OK")
</pallas_src>

<mosaic_0001>
module attributes {stable_mosaic.version = 11 : i64} {
  func.func @_matmul_epi_kernel(%arg0: i32, %arg1: i32, %arg2: i32, %arg3: memref<144x16xbf16, #tpu.memory_space<vmem>>, %arg4: memref<16x128xbf16, #tpu.memory_space<vmem>>, %arg5: memref<1x128xf32, #tpu.memory_space<vmem>>, %arg6: memref<1x128xf32, #tpu.memory_space<vmem>>, %arg7: memref<144x128xf32, #tpu.memory_space<vmem>>, %arg8: memref<144x128xf32, #tpu.memory_space<vmem>>) attributes {dimension_semantics = [#tpu.dimension_semantics<parallel>, #tpu.dimension_semantics<parallel>, #tpu.dimension_semantics<arbitrary>], iteration_bounds = array<i64: 1, 1, 1>, scalar_prefetch = 0 : i64, scratch_operands = 1 : i64, tpu.core_type = #tpu.core_type<tc>, window_params = [{transform_indices = @transform_0, window_bounds = array<i64: 144, 16>}, {transform_indices = @transform_1, window_bounds = array<i64: 16, 128>}, {transform_indices = @transform_2, window_bounds = array<i64: 1, 128>}, {transform_indices = @transform_3, window_bounds = array<i64: 1, 128>}, {transform_indices = @transform_4, window_bounds = array<i64: 144, 128>}]} {
    %c0_i32 = arith.constant 0 : i32
    %0 = arith.cmpi eq, %arg2, %c0_i32 : i32
    %1 = arith.extui %0 : i1 to i32
    %c0_i32_0 = arith.constant 0 : i32
    %2 = arith.cmpi ne, %1, %c0_i32_0 : i32
    scf.if %2 {
      %cst_10 = arith.constant 0.000000e+00 : f32
      %12 = vector.broadcast %cst_10 : f32 to vector<144x128xf32>
      %c0_11 = arith.constant 0 : index
      %c0_12 = arith.constant 0 : index
      %13 = vector.load %arg8[%c0_11, %c0_12] : memref<144x128xf32, #tpu.memory_space<vmem>>, vector<144x128xf32>
      tpu.vector_store %arg8[%c0_11, %c0_12], %12 {strides = array<i32>} : memref<144x128xf32, #tpu.memory_space<vmem>>, vector<144x128xf32>,
    } else {
    }
    %c0 = arith.constant 0 : index
    %c0_1 = arith.constant 0 : index
    %3 = vector.load %arg8[%c0, %c0_1] : memref<144x128xf32, #tpu.memory_space<vmem>>, vector<144x128xf32>
    %c0_2 = arith.constant 0 : index
    %c0_3 = arith.constant 0 : index
    %4 = vector.load %arg3[%c0_2, %c0_3] : memref<144x16xbf16, #tpu.memory_space<vmem>>, vector<144x16xbf16>
    %c0_4 = arith.constant 0 : index
    %c0_5 = arith.constant 0 : index
    %5 = vector.load %arg4[%c0_4, %c0_5] : memref<16x128xbf16, #tpu.memory_space<vmem>>, vector<16x128xbf16>
    %cst = arith.constant dense<0.000000e+00> : vector<144x128xf32>
    %6 = tpu.matmul %4, %5, %cst {dimension_numbers = #tpu.dot_dimension_numbers<[1], [0], [0], [1], [0, 0, 1, 1], [], []>} : vector<144x16xbf16>, vector<16x128xbf16>, vector<144x128xf32> -> vector<144x128xf32>
    %7 = arith.addf %3, %6 : vector<144x128xf32>
    %c0_6 = arith.constant 0 : index
    %c0_7 = arith.constant 0 : index
    %8 = vector.load %arg8[%c0_6, %c0_7] : memref<144x128xf32, #tpu.memory_space<vmem>>, vector<144x128xf32>
    tpu.vector_store %arg8[%c0_6, %c0_7], %7 {strides = array<i32>} : memref<144x128xf32, #tpu.memory_space<vmem>>, vector<144x128xf32>,
    %c0_i32_8 = arith.constant 0 : i32
    %9 = arith.cmpi eq, %arg2, %c0_i32_8 : i32
    %10 = arith.extui %9 : i1 to i32
    %c0_i32_9 = arith.constant 0 : i32
    %11 = arith.cmpi ne, %10, %c0_i32_9 : i32
    scf.if %11 {
      %c0_10 = arith.constant 0 : index
      %c0_11 = arith.constant 0 : index
      %12 = vector.load %arg8[%c0_10, %c0_11] : memref<144x128xf32, #tpu.memory_space<vmem>>, vector<144x128xf32>
      %c0_12 = arith.constant 0 : index
      %c0_13 = arith.constant 0 : index
      %13 = vector.load %arg5[%c0_12, %c0_13] : memref<1x128xf32, #tpu.memory_space<vmem>>, vector<1x128xf32>
      %14 = vector.broadcast %13 : vector<1x128xf32> to vector<144x128xf32>
      %15 = arith.mulf %12, %14 : vector<144x128xf32>
      %c0_14 = arith.constant 0 : index
      %c0_15 = arith.constant 0 : index
      %16 = vector.load %arg6[%c0_14, %c0_15] : memref<1x128xf32, #tpu.memory_space<vmem>>, vector<1x128xf32>
      %17 = vector.broadcast %16 : vector<1x128xf32> to vector<144x128xf32>
      %18 = arith.addf %15, %17 : vector<144x128xf32>
      %c0_16 = arith.constant 0 : index
      %c0_17 = arith.constant 0 : index
      %19 = vector.load %arg7[%c0_16, %c0_17] : memref<144x128xf32, #tpu.memory_space<vmem>>, vector<144x128xf32>
      tpu.vector_store %arg7[%c0_16, %c0_17], %18 {strides = array<i32>} : memref<144x128xf32, #tpu.memory_space<vmem>>, vector<144x128xf32>,
    } else {
    }
    return
  }
  func.func @transform_0(%arg0: i32, %arg1: i32, %arg2: i32) -> (i32, i32) {
    %c0_i32 = arith.constant 0 : i32
    return %arg0, %arg2 : i32, i32
  }
  func.func @transform_1(%arg0: i32, %arg1: i32, %arg2: i32) -> (i32, i32) {
    %c0_i32 = arith.constant 0 : i32
    return %arg2, %arg1 : i32, i32
  }
  func.func @transform_2(%arg0: i32, %arg1: i32, %arg2: i32) -> (i32, i32) {
    %c0_i32 = arith.constant 0 : i32
    %c0_i32_0 = arith.constant 0 : i32
    return %c0_i32, %arg1 : i32, i32
  }
  func.func @transform_3(%arg0: i32, %arg1: i32, %arg2: i32) -> (i32, i32) {
    %c0_i32 = arith.constant 0 : i32
    %c0_i32_0 = arith.constant 0 : i32
    return %c0_i32, %arg1 : i32, i32
  }
  func.func @transform_4(%arg0: i32, %arg1: i32, %arg2: i32) -> (i32, i32) {
    %c0_i32 = arith.constant 0 : i32
    return %arg0, %arg1 : i32, i32
  }
}

module attributes {stable_mosaic.version = 11 : i64} {
  func.func @_affine_act_kernel(%arg0: i32, %arg1: memref<136x8xf32, #tpu.memory_space<vmem>>, %arg2: memref<1x8xf32, #tpu.memory_space<vmem>>, %arg3: memref<1x8xf32, #tpu.memory_space<vmem>>, %arg4: memref<136x8xf32, #tpu.memory_space<vmem>>) attributes {dimension_semantics = [#tpu.dimension_semantics<parallel>], iteration_bounds = array<i64: 1>, scalar_prefetch = 0 : i64, scratch_operands = 0 : i64, tpu.core_type = #tpu.core_type<tc>, window_params = [{transform_indices = @transform_0, window_bounds = array<i64: 136, 8>}, {pipeline_mode = #tpu.pipeline_mode<synchronous>, transform_indices = @transform_1, window_bounds = array<i64: 1, 8>}, {pipeline_mode = #tpu.pipeline_mode<synchronous>, transform_indices = @transform_2, window_bounds = array<i64: 1, 8>}, {transform_indices = @transform_3, window_bounds = array<i64: 136, 8>}]} {
    %c0 = arith.constant 0 : index
    %c0_0 = arith.constant 0 : index
    %0 = vector.load %arg1[%c0, %c0_0] : memref<136x8xf32, #tpu.memory_space<vmem>>, vector<136x8xf32>
    %c0_1 = arith.constant 0 : index
    %c0_2 = arith.constant 0 : index
    %1 = vector.load %arg2[%c0_1, %c0_2] : memref<1x8xf32, #tpu.memory_space<vmem>>, vector<1x8xf32>
    %2 = vector.broadcast %1 : vector<1x8xf32> to vector<136x8xf32>
    %3 = arith.mulf %0, %2 : vector<136x8xf32>
    %c0_3 = arith.constant 0 : index
    %c0_4 = arith.constant 0 : index
    %4 = vector.load %arg3[%c0_3, %c0_4] : memref<1x8xf32, #tpu.memory_space<vmem>>, vector<1x8xf32>
    %5 = vector.broadcast %4 : vector<1x8xf32> to vector<136x8xf32>
    %6 = arith.addf %3, %5 : vector<136x8xf32>
    %cst = arith.constant 0.000000e+00 : f32
    %7 = vector.broadcast %cst : f32 to vector<136x8xf32>
    %8 = arith.maximumf %6, %7 : vector<136x8xf32>
    %c0_5 = arith.constant 0 : index
    %c0_6 = arith.constant 0 : index
    %9 = vector.load %arg4[%c0_5, %c0_6] : memref<136x8xf32, #tpu.memory_space<vmem>>, vector<136x8xf32>
    tpu.vector_store %arg4[%c0_5, %c0_6], %8 {strides = array<i32>} : memref<136x8xf32, #tpu.memory_space<vmem>>, vector<136x8xf32>,
    return
  }
  func.func @transform_0(%arg0: i32) -> (i32, i32) {
    %c0_i32 = arith.constant 0 : i32
    %c0_i32_0 = arith.constant 0 : i32
    return %arg0, %c0_i32 : i32, i32
  }
  func.func @transform_1(%arg0: i32) -> (i32, i32) {
    %c0_i32 = arith.constant 0 : i32
    %c0_i32_0 = arith.constant 0 : i32
    %c0_i32_1 = arith.constant 0 : i32
    return %c0_i32, %c0_i32_0 : i32, i32
  }
  func.func @transform_2(%arg0: i32) -> (i32, i32) {
    %c0_i32 = arith.constant 0 : i32
    %c0_i32_0 = arith.constant 0 : i32
    %c0_i32_1 = arith.constant 0 : i32
    return %c0_i32, %c0_i32_0 : i32, i32
  }
  func.func @transform_3(%arg0: i32) -> (i32, i32) {
    %c0_i32 = arith.constant 0 : i32
    %c0_i32_0 = arith.constant 0 : i32
    return %arg0, %c0_i32 : i32, i32
  }
}

module attributes {stable_mosaic.version = 11 : i64} {
  func.func @_matmul_epi_kernel(%arg0: i32, %arg1: i32, %arg2: i32, %arg3: memref<64x32xbf16, #tpu.memory_space<vmem>>, %arg4: memref<32x128xbf16, #tpu.memory_space<vmem>>, %arg5: memref<1x128xf32, #tpu.memory_space<vmem>>, %arg6: memref<1x128xf32, #tpu.memory_space<vmem>>, %arg7: memref<64x128xf32, #tpu.memory_space<vmem>>, %arg8: memref<64x128xf32, #tpu.memory_space<vmem>>) attributes {dimension_semantics = [#tpu.dimension_semantics<parallel>, #tpu.dimension_semantics<parallel>, #tpu.dimension_semantics<arbitrary>], iteration_bounds = array<i64: 1, 1, 1>, scalar_prefetch = 0 : i64, scratch_operands = 1 : i64, tpu.core_type = #tpu.core_type<tc>, window_params = [{transform_indices = @transform_0, window_bounds = array<i64: 64, 32>}, {transform_indices = @transform_1, window_bounds = array<i64: 32, 128>}, {transform_indices = @transform_2, window_bounds = array<i64: 1, 128>}, {transform_indices = @transform_3, window_bounds = array<i64: 1, 128>}, {transform_indices = @transform_4, window_bounds = array<i64: 64, 128>}]} {
    %c0_i32 = arith.constant 0 : i32
    %0 = arith.cmpi eq, %arg2, %c0_i32 : i32
    %1 = arith.extui %0 : i1 to i32
    %c0_i32_0 = arith.constant 0 : i32
    %2 = arith.cmpi ne, %1, %c0_i32_0 : i32
    scf.if %2 {
      %cst_10 = arith.constant 0.000000e+00 : f32
      %12 = vector.broadcast %cst_10 : f32 to vector<64x128xf32>
      %c0_11 = arith.constant 0 : index
      %c0_12 = arith.constant 0 : index
      %13 = vector.load %arg8[%c0_11, %c0_12] : memref<64x128xf32, #tpu.memory_space<vmem>>, vector<64x128xf32>
      tpu.vector_store %arg8[%c0_11, %c0_12], %12 {strides = array<i32>} : memref<64x128xf32, #tpu.memory_space<vmem>>, vector<64x128xf32>,
    } else {
    }
    %c0 = arith.constant 0 : index
    %c0_1 = arith.constant 0 : index
    %3 = vector.load %arg8[%c0, %c0_1] : memref<64x128xf32, #tpu.memory_space<vmem>>, vector<64x128xf32>
    %c0_2 = arith.constant 0 : index
    %c0_3 = arith.constant 0 : index
    %4 = vector.load %arg3[%c0_2, %c0_3] : memref<64x32xbf16, #tpu.memory_space<vmem>>, vector<64x32xbf16>
    %c0_4 = arith.constant 0 : index
    %c0_5 = arith.constant 0 : index
    %5 = vector.load %arg4[%c0_4, %c0_5] : memref<32x128xbf16, #tpu.memory_space<vmem>>, vector<32x128xbf16>
    %cst = arith.constant dense<0.000000e+00> : vector<64x128xf32>
    %6 = tpu.matmul %4, %5, %cst {dimension_numbers = #tpu.dot_dimension_numbers<[1], [0], [0], [1], [0, 0, 1, 1], [], []>} : vector<64x32xbf16>, vector<32x128xbf16>, vector<64x128xf32> -> vector<64x128xf32>
    %7 = arith.addf %3, %6 : vector<64x128xf32>
    %c0_6 = arith.constant 0 : index
    %c0_7 = arith.constant 0 : index
    %8 = vector.load %arg8[%c0_6, %c0_7] : memref<64x128xf32, #tpu.memory_space<vmem>>, vector<64x128xf32>
    tpu.vector_store %arg8[%c0_6, %c0_7], %7 {strides = array<i32>} : memref<64x128xf32, #tpu.memory_space<vmem>>, vector<64x128xf32>,
    %c0_i32_8 = arith.constant 0 : i32
    %9 = arith.cmpi eq, %arg2, %c0_i32_8 : i32
    %10 = arith.extui %9 : i1 to i32
    %c0_i32_9 = arith.constant 0 : i32
    %11 = arith.cmpi ne, %10, %c0_i32_9 : i32
    scf.if %11 {
      %c0_10 = arith.constant 0 : index
      %c0_11 = arith.constant 0 : index
      %12 = vector.load %arg8[%c0_10, %c0_11] : memref<64x128xf32, #tpu.memory_space<vmem>>, vector<64x128xf32>
      %c0_12 = arith.constant 0 : index
      %c0_13 = arith.constant 0 : index
      %13 = vector.load %arg5[%c0_12, %c0_13] : memref<1x128xf32, #tpu.memory_space<vmem>>, vector<1x128xf32>
      %14 = vector.broadcast %13 : vector<1x128xf32> to vector<64x128xf32>
      %15 = arith.mulf %12, %14 : vector<64x128xf32>
      %c0_14 = arith.constant 0 : index
      %c0_15 = arith.constant 0 : index
      %16 = vector.load %arg6[%c0_14, %c0_15] : memref<1x128xf32, #tpu.memory_space<vmem>>, vector<1x128xf32>
      %17 = vector.broadcast %16 : vector<1x128xf32> to vector<64x128xf32>
      %18 = arith.addf %15, %17 : vector<64x128xf32>
      %c0_16 = arith.constant 0 : index
      %c0_17 = arith.constant 0 : index
      %19 = vector.load %arg7[%c0_16, %c0_17] : memref<64x128xf32, #tpu.memory_space<vmem>>, vector<64x128xf32>
      tpu.vector_store %arg7[%c0_16, %c0_17], %18 {strides = array<i32>} : memref<64x128xf32, #tpu.memory_space<vmem>>, vector<64x128xf32>,
    } else {
    }
    return
  }
  func.func @transform_0(%arg0: i32, %arg1: i32, %arg2: i32) -> (i32, i32) {
    %c0_i32 = arith.constant 0 : i32
    return %arg0, %arg2 : i32, i32
  }
  func.func @transform_1(%arg0: i32, %arg1: i32, %arg2: i32) -> (i32, i32) {
    %c0_i32 = arith.constant 0 : i32
    return %arg2, %arg1 : i32, i32
  }
  func.func @transform_2(%arg0: i32, %arg1: i32, %arg2: i32) -> (i32, i32) {
    %c0_i32 = arith.constant 0 : i32
    %c0_i32_0 = arith.constant 0 : i32
    return %c0_i32, %arg1 : i32, i32
  }
  func.func @transform_3(%arg0: i32, %arg1: i32, %arg2: i32) -> (i32, i32) {
    %c0_i32 = arith.constant 0 : i32
    %c0_i32_0 = arith.constant 0 : i32
    return %c0_i32, %arg1 : i32, i32
  }
  func.func @transform_4(%arg0: i32, %arg1: i32, %arg2: i32) -> (i32, i32) {
    %c0_i32 = arith.constant 0 : i32
    return %arg0, %arg1 : i32, i32
  }
}

module attributes {stable_mosaic.version = 11 : i64} {
  func.func @_affine_act_kernel(%arg0: i32, %arg1: memref<64x8xf32, #tpu.memory_space<vmem>>, %arg2: memref<1x8xf32, #tpu.memory_space<vmem>>, %arg3: memref<1x8xf32, #tpu.memory_space<vmem>>, %arg4: memref<64x8xf32, #tpu.memory_space<vmem>>) attributes {dimension_semantics = [#tpu.dimension_semantics<parallel>], iteration_bounds = array<i64: 1>, scalar_prefetch = 0 : i64, scratch_operands = 0 : i64, tpu.core_type = #tpu.core_type<tc>, window_params = [{transform_indices = @transform_0, window_bounds = array<i64: 64, 8>}, {pipeline_mode = #tpu.pipeline_mode<synchronous>, transform_indices = @transform_1, window_bounds = array<i64: 1, 8>}, {pipeline_mode = #tpu.pipeline_mode<synchronous>, transform_indices = @transform_2, window_bounds = array<i64: 1, 8>}, {transform_indices = @transform_3, window_bounds = array<i64: 64, 8>}]} {
    %c0 = arith.constant 0 : index
    %c0_0 = arith.constant 0 : index
    %0 = vector.load %arg1[%c0, %c0_0] : memref<64x8xf32, #tpu.memory_space<vmem>>, vector<64x8xf32>
    %c0_1 = arith.constant 0 : index
    %c0_2 = arith.constant 0 : index
    %1 = vector.load %arg2[%c0_1, %c0_2] : memref<1x8xf32, #tpu.memory_space<vmem>>, vector<1x8xf32>
    %2 = vector.broadcast %1 : vector<1x8xf32> to vector<64x8xf32>
    %3 = arith.mulf %0, %2 : vector<64x8xf32>
    %c0_3 = arith.constant 0 : index
    %c0_4 = arith.constant 0 : index
    %4 = vector.load %arg3[%c0_3, %c0_4] : memref<1x8xf32, #tpu.memory_space<vmem>>, vector<1x8xf32>
    %5 = vector.broadcast %4 : vector<1x8xf32> to vector<64x8xf32>
    %6 = arith.addf %3, %5 : vector<64x8xf32>
    %cst = arith.constant 0.000000e+00 : f32
    %7 = vector.broadcast %cst : f32 to vector<64x8xf32>
    %8 = arith.maximumf %6, %7 : vector<64x8xf32>
    %c0_5 = arith.constant 0 : index
    %c0_6 = arith.constant 0 : index
    %9 = vector.load %arg4[%c0_5, %c0_6] : memref<64x8xf32, #tpu.memory_space<vmem>>, vector<64x8xf32>
    tpu.vector_store %arg4[%c0_5, %c0_6], %8 {strides = array<i32>} : memref<64x8xf32, #tpu.memory_space<vmem>>, vector<64x8xf32>,
    return
  }
  func.func @transform_0(%arg0: i32) -> (i32, i32) {
    %c0_i32 = arith.constant 0 : i32
    %c0_i32_0 = arith.constant 0 : i32
    return %arg0, %c0_i32 : i32, i32
  }
  func.func @transform_1(%arg0: i32) -> (i32, i32) {
    %c0_i32 = arith.constant 0 : i32
    %c0_i32_0 = arith.constant 0 : i32
    %c0_i32_1 = arith.constant 0 : i32
    return %c0_i32, %c0_i32_0 : i32, i32
  }
  func.func @transform_2(%arg0: i32) -> (i32, i32) {
    %c0_i32 = arith.constant 0 : i32
    %c0_i32_0 = arith.constant 0 : i32
    %c0_i32_1 = arith.constant 0 : i32
    return %c0_i32, %c0_i32_0 : i32, i32
  }
  func.func @transform_3(%arg0: i32) -> (i32, i32) {
    %c0_i32 = arith.constant 0 : i32
    %c0_i32_0 = arith.constant 0 : i32
    return %arg0, %c0_i32 : i32, i32
  }
}

module attributes {stable_mosaic.version = 11 : i64} {
  func.func @_depthwise_kernel(%arg0: i32, %arg1: memref<1x34x8xf32, #tpu.memory_space<vmem>>, %arg2: memref<3x8xf32, #tpu.memory_space<vmem>>, %arg3: memref<1x8xf32, #tpu.memory_space<vmem>>, %arg4: memref<1x32x8xf32, #tpu.memory_space<vmem>>) attributes {dimension_semantics = [#tpu.dimension_semantics<parallel>], iteration_bounds = array<i64: 2>, scalar_prefetch = 0 : i64, scratch_operands = 0 : i64, tpu.core_type = #tpu.core_type<tc>, window_params = [{transform_indices = @transform_0, window_bounds = array<i64: 1, 34, 8>}, {pipeline_mode = #tpu.pipeline_mode<synchronous>, transform_indices = @transform_1, window_bounds = array<i64: 3, 8>}, {pipeline_mode = #tpu.pipeline_mode<synchronous>, transform_indices = @transform_2, window_bounds = array<i64: 1, 8>}, {transform_indices = @transform_3, window_bounds = array<i64: 1, 32, 8>}]} {
    %c0 = arith.constant 0 : index
    %c0_0 = arith.constant 0 : index
    %c0_1 = arith.constant 0 : index
    %0 = vector.load %arg1[%c0, %c0_0, %c0_1] : memref<1x34x8xf32, #tpu.memory_space<vmem>>, vector<1x34x8xf32>
    %1 = vector.shape_cast %0 : vector<1x34x8xf32> to vector<34x8xf32>
    %cst = arith.constant 0.000000e+00 : f32
    %2 = vector.broadcast %cst : f32 to vector<32x8xf32>
    %3 = vector.extract_strided_slice %1 {offsets = [0, 0], sizes = [32, 8], strides = [1, 1]} : vector<34x8xf32> to vector<32x8xf32>
    %c0_2 = arith.constant 0 : index
    %c0_3 = arith.constant 0 : index
    %4 = vector.load %arg2[%c0_2, %c0_3] : memref<3x8xf32, #tpu.memory_space<vmem>>, vector<1x8xf32>
    %5 = vector.broadcast %4 : vector<1x8xf32> to vector<32x8xf32>
    %6 = arith.mulf %3, %5 : vector<32x8xf32>
    %7 = arith.addf %2, %6 : vector<32x8xf32>
    %8 = vector.extract_strided_slice %1 {offsets = [1, 0], sizes = [32, 8], strides = [1, 1]} : vector<34x8xf32> to vector<32x8xf32>
    %c1 = arith.constant 1 : index
    %c0_4 = arith.constant 0 : index
    %9 = vector.load %arg2[%c1, %c0_4] : memref<3x8xf32, #tpu.memory_space<vmem>>, vector<1x8xf32>
    %10 = vector.broadcast %9 : vector<1x8xf32> to vector<32x8xf32>
    %11 = arith.mulf %8, %10 : vector<32x8xf32>
    %12 = arith.addf %7, %11 : vector<32x8xf32>
    %13 = vector.extract_strided_slice %1 {offsets = [2, 0], sizes = [32, 8], strides = [1, 1]} : vector<34x8xf32> to vector<32x8xf32>
    %c2 = arith.constant 2 : index
    %c0_5 = arith.constant 0 : index
    %14 = vector.load %arg2[%c2, %c0_5] : memref<3x8xf32, #tpu.memory_space<vmem>>, vector<1x8xf32>
    %15 = vector.broadcast %14 : vector<1x8xf32> to vector<32x8xf32>
    %16 = arith.mulf %13, %15 : vector<32x8xf32>
    %17 = arith.addf %12, %16 : vector<32x8xf32>
    %c0_6 = arith.constant 0 : index
    %c0_7 = arith.constant 0 : index
    %18 = vector.load %arg3[%c0_6, %c0_7] : memref<1x8xf32, #tpu.memory_space<vmem>>, vector<1x8xf32>
    %19 = vector.broadcast %18 : vector<1x8xf32> to vector<32x8xf32>
    %20 = arith.addf %17, %19 : vector<32x8xf32>
    %c0_8 = arith.constant 0 : index
    %c0_9 = arith.constant 0 : index
    %c0_10 = arith.constant 0 : index
    %21 = vector.load %arg4[%c0_8, %c0_9, %c0_10] : memref<1x32x8xf32, #tpu.memory_space<vmem>>, vector<1x32x8xf32>
    %22 = vector.shape_cast %21 : vector<1x32x8xf32> to vector<32x8xf32>
    %23 = vector.shape_cast %20 : vector<32x8xf32> to vector<1x32x8xf32>
    tpu.vector_store %arg4[%c0_8, %c0_9, %c0_10], %23 {strides = array<i32>} : memref<1x32x8xf32, #tpu.memory_space<vmem>>, vector<1x32x8xf32>,
    return
  }
  func.func @transform_0(%arg0: i32) -> (i32, i32, i32) {
    %c0_i32 = arith.constant 0 : i32
    %c0_i32_0 = arith.constant 0 : i32
    %c0_i32_1 = arith.constant 0 : i32
    return %arg0, %c0_i32, %c0_i32_0 : i32, i32, i32
  }
  func.func @transform_1(%arg0: i32) -> (i32, i32) {
    %c0_i32 = arith.constant 0 : i32
    %c0_i32_0 = arith.constant 0 : i32
    %c0_i32_1 = arith.constant 0 : i32
    return %c0_i32, %c0_i32_0 : i32, i32
  }
  func.func @transform_2(%arg0: i32) -> (i32, i32) {
    %c0_i32 = arith.constant 0 : i32
    %c0_i32_0 = arith.constant 0 : i32
    %c0_i32_1 = arith.constant 0 : i32
    return %c0_i32, %c0_i32_0 : i32, i32
  }
  func.func @transform_3(%arg0: i32) -> (i32, i32, i32) {
    %c0_i32 = arith.constant 0 : i32
    %c0_i32_0 = arith.constant 0 : i32
    %c0_i32_1 = arith.constant 0 : i32
    return %arg0, %c0_i32, %c0_i32_0 : i32, i32, i32
  }
}

module attributes {stable_mosaic.version = 11 : i64} {
  func.func @_matmul_epi_kernel(%arg0: i32, %arg1: i32, %arg2: i32, %arg3: memref<64x16xbf16, #tpu.memory_space<vmem>>, %arg4: memref<16x128xbf16, #tpu.memory_space<vmem>>, %arg5: memref<1x128xf32, #tpu.memory_space<vmem>>, %arg6: memref<1x128xf32, #tpu.memory_space<vmem>>, %arg7: memref<64x128xf32, #tpu.memory_space<vmem>>, %arg8: memref<64x128xf32, #tpu.memory_space<vmem>>) attributes {dimension_semantics = [#tpu.dimension_semantics<parallel>, #tpu.dimension_semantics<parallel>, #tpu.dimension_semantics<arbitrary>], iteration_bounds = array<i64: 1, 1, 1>, scalar_prefetch = 0 : i64, scratch_operands = 1 : i64, tpu.core_type = #tpu.core_type<tc>, window_params = [{transform_indices = @transform_0, window_bounds = array<i64: 64, 16>}, {transform_indices = @transform_1, window_bounds = array<i64: 16, 128>}, {transform_indices = @transform_2, window_bounds = array<i64: 1, 128>}, {transform_indices = @transform_3, window_bounds = array<i64: 1, 128>}, {transform_indices = @transform_4, window_bounds = array<i64: 64, 128>}]} {
    %c0_i32 = arith.constant 0 : i32
    %0 = arith.cmpi eq, %arg2, %c0_i32 : i32
    %1 = arith.extui %0 : i1 to i32
    %c0_i32_0 = arith.constant 0 : i32
    %2 = arith.cmpi ne, %1, %c0_i32_0 : i32
    scf.if %2 {
      %cst_10 = arith.constant 0.000000e+00 : f32
      %12 = vector.broadcast %cst_10 : f32 to vector<64x128xf32>
      %c0_11 = arith.constant 0 : index
      %c0_12 = arith.constant 0 : index
      %13 = vector.load %arg8[%c0_11, %c0_12] : memref<64x128xf32, #tpu.memory_space<vmem>>, vector<64x128xf32>
      tpu.vector_store %arg8[%c0_11, %c0_12], %12 {strides = array<i32>} : memref<64x128xf32, #tpu.memory_space<vmem>>, vector<64x128xf32>,
    } else {
    }
    %c0 = arith.constant 0 : index
    %c0_1 = arith.constant 0 : index
    %3 = vector.load %arg8[%c0, %c0_1] : memref<64x128xf32, #tpu.memory_space<vmem>>, vector<64x128xf32>
    %c0_2 = arith.constant 0 : index
    %c0_3 = arith.constant 0 : index
    %4 = vector.load %arg3[%c0_2, %c0_3] : memref<64x16xbf16, #tpu.memory_space<vmem>>, vector<64x16xbf16>
    %c0_4 = arith.constant 0 : index
    %c0_5 = arith.constant 0 : index
    %5 = vector.load %arg4[%c0_4, %c0_5] : memref<16x128xbf16, #tpu.memory_space<vmem>>, vector<16x128xbf16>
    %cst = arith.constant dense<0.000000e+00> : vector<64x128xf32>
    %6 = tpu.matmul %4, %5, %cst {dimension_numbers = #tpu.dot_dimension_numbers<[1], [0], [0], [1], [0, 0, 1, 1], [], []>} : vector<64x16xbf16>, vector<16x128xbf16>, vector<64x128xf32> -> vector<64x128xf32>
    %7 = arith.addf %3, %6 : vector<64x128xf32>
    %c0_6 = arith.constant 0 : index
    %c0_7 = arith.constant 0 : index
    %8 = vector.load %arg8[%c0_6, %c0_7] : memref<64x128xf32, #tpu.memory_space<vmem>>, vector<64x128xf32>
    tpu.vector_store %arg8[%c0_6, %c0_7], %7 {strides = array<i32>} : memref<64x128xf32, #tpu.memory_space<vmem>>, vector<64x128xf32>,
    %c0_i32_8 = arith.constant 0 : i32
    %9 = arith.cmpi eq, %arg2, %c0_i32_8 : i32
    %10 = arith.extui %9 : i1 to i32
    %c0_i32_9 = arith.constant 0 : i32
    %11 = arith.cmpi ne, %10, %c0_i32_9 : i32
    scf.if %11 {
      %c0_10 = arith.constant 0 : index
      %c0_11 = arith.constant 0 : index
      %12 = vector.load %arg8[%c0_10, %c0_11] : memref<64x128xf32, #tpu.memory_space<vmem>>, vector<64x128xf32>
      %c0_12 = arith.constant 0 : index
      %c0_13 = arith.constant 0 : index
      %13 = vector.load %arg5[%c0_12, %c0_13] : memref<1x128xf32, #tpu.memory_space<vmem>>, vector<1x128xf32>
      %14 = vector.broadcast %13 : vector<1x128xf32> to vector<64x128xf32>
      %15 = arith.mulf %12, %14 : vector<64x128xf32>
      %c0_14 = arith.constant 0 : index
      %c0_15 = arith.constant 0 : index
      %16 = vector.load %arg6[%c0_14, %c0_15] : memref<1x128xf32, #tpu.memory_space<vmem>>, vector<1x128xf32>
      %17 = vector.broadcast %16 : vector<1x128xf32> to vector<64x128xf32>
      %18 = arith.addf %15, %17 : vector<64x128xf32>
      %c0_16 = arith.constant 0 : index
      %c0_17 = arith.constant 0 : index
      %19 = vector.load %arg7[%c0_16, %c0_17] : memref<64x128xf32, #tpu.memory_space<vmem>>, vector<64x128xf32>
      tpu.vector_store %arg7[%c0_16, %c0_17], %18 {strides = array<i32>} : memref<64x128xf32, #tpu.memory_space<vmem>>, vector<64x128xf32>,
    } else {
    }
    return
  }
  func.func @transform_0(%arg0: i32, %arg1: i32, %arg2: i32) -> (i32, i32) {
    %c0_i32 = arith.constant 0 : i32
    return %arg0, %arg2 : i32, i32
  }
  func.func @transform_1(%arg0: i32, %arg1: i32, %arg2: i32) -> (i32, i32) {
    %c0_i32 = arith.constant 0 : i32
    return %arg2, %arg1 : i32, i32
  }
  func.func @transform_2(%arg0: i32, %arg1: i32, %arg2: i32) -> (i32, i32) {
    %c0_i32 = arith.constant 0 : i32
    %c0_i32_0 = arith.constant 0 : i32
    return %c0_i32, %arg1 : i32, i32
  }
  func.func @transform_3(%arg0: i32, %arg1: i32, %arg2: i32) -> (i32, i32) {
    %c0_i32 = arith.constant 0 : i32
    %c0_i32_0 = arith.constant 0 : i32
    return %c0_i32, %arg1 : i32, i32
  }
  func.func @transform_4(%arg0: i32, %arg1: i32, %arg2: i32) -> (i32, i32) {
    %c0_i32 = arith.constant 0 : i32
    return %arg0, %arg1 : i32, i32
  }
}

module attributes {stable_mosaic.version = 11 : i64} {
  func.func @_affine_split_gate_kernel(%arg0: i32, %arg1: memref<64x16xf32, #tpu.memory_space<vmem>>, %arg2: memref<1x16xf32, #tpu.memory_space<vmem>>, %arg3: memref<1x16xf32, #tpu.memory_space<vmem>>, %arg4: memref<64x8xf32, #tpu.memory_space<vmem>>) attributes {dimension_semantics = [#tpu.dimension_semantics<parallel>], iteration_bounds = array<i64: 1>, scalar_prefetch = 0 : i64, scratch_operands = 0 : i64, tpu.core_type = #tpu.core_type<tc>, window_params = [{transform_indices = @transform_0, window_bounds = array<i64: 64, 16>}, {pipeline_mode = #tpu.pipeline_mode<synchronous>, transform_indices = @transform_1, window_bounds = array<i64: 1, 16>}, {pipeline_mode = #tpu.pipeline_mode<synchronous>, transform_indices = @transform_2, window_bounds = array<i64: 1, 16>}, {transform_indices = @transform_3, window_bounds = array<i64: 64, 8>}]} {
    %c0 = arith.constant 0 : index
    %c0_0 = arith.constant 0 : index
    %0 = vector.load %arg1[%c0, %c0_0] : memref<64x16xf32, #tpu.memory_space<vmem>>, vector<64x16xf32>
    %c0_1 = arith.constant 0 : index
    %c0_2 = arith.constant 0 : index
    %1 = vector.load %arg2[%c0_1, %c0_2] : memref<1x16xf32, #tpu.memory_space<vmem>>, vector<1x16xf32>
    %2 = vector.broadcast %1 : vector<1x16xf32> to vector<64x16xf32>
    %3 = arith.mulf %0, %2 : vector<64x16xf32>
    %c0_3 = arith.constant 0 : index
    %c0_4 = arith.constant 0 : index
    %4 = vector.load %arg3[%c0_3, %c0_4] : memref<1x16xf32, #tpu.memory_space<vmem>>, vector<1x16xf32>
    %5 = vector.broadcast %4 : vector<1x16xf32> to vector<64x16xf32>
    %6 = arith.addf %3, %5 : vector<64x16xf32>
    %7 = vector.extract_strided_slice %6 {offsets = [0, 0], sizes = [64, 8], strides = [1, 1]} : vector<64x16xf32> to vector<64x8xf32>
    %8 = vector.extract_strided_slice %6 {offsets = [0, 8], sizes = [64, 8], strides = [1, 1]} : vector<64x16xf32> to vector<64x8xf32>
    %9 = arith.negf %8 : vector<64x8xf32>
    %10 = math.exp %9 : vector<64x8xf32>
    %cst = arith.constant 1.000000e+00 : f32
    %11 = vector.broadcast %cst : f32 to vector<64x8xf32>
    %12 = arith.addf %11, %10 : vector<64x8xf32>
    %13 = arith.divf %11, %12 : vector<64x8xf32>
    %14 = arith.mulf %7, %13 : vector<64x8xf32>
    %c0_5 = arith.constant 0 : index
    %c0_6 = arith.constant 0 : index
    %15 = vector.load %arg4[%c0_5, %c0_6] : memref<64x8xf32, #tpu.memory_space<vmem>>, vector<64x8xf32>
    tpu.vector_store %arg4[%c0_5, %c0_6], %14 {strides = array<i32>} : memref<64x8xf32, #tpu.memory_space<vmem>>, vector<64x8xf32>,
    return
  }
  func.func @transform_0(%arg0: i32) -> (i32, i32) {
    %c0_i32 = arith.constant 0 : i32
    %c0_i32_0 = arith.constant 0 : i32
    return %arg0, %c0_i32 : i32, i32
  }
  func.func @transform_1(%arg0: i32) -> (i32, i32) {
    %c0_i32 = arith.constant 0 : i32
    %c0_i32_0 = arith.constant 0 : i32
    %c0_i32_1 = arith.constant 0 : i32
    return %c0_i32, %c0_i32_0 : i32, i32
  }
  func.func @transform_2(%arg0: i32) -> (i32, i32) {
    %c0_i32 = arith.constant 0 : i32
    %c0_i32_0 = arith.constant 0 : i32
    %c0_i32_1 = arith.constant 0 : i32
    return %c0_i32, %c0_i32_0 : i32, i32
  }
  func.func @transform_3(%arg0: i32) -> (i32, i32) {
    %c0_i32 = arith.constant 0 : i32
    %c0_i32_0 = arith.constant 0 : i32
    return %arg0, %c0_i32 : i32, i32
  }
}

module attributes {stable_mosaic.version = 11 : i64} {
  func.func @_affine_act_kernel(%arg0: i32, %arg1: memref<64x8xf32, #tpu.memory_space<vmem>>, %arg2: memref<1x8xf32, #tpu.memory_space<vmem>>, %arg3: memref<1x8xf32, #tpu.memory_space<vmem>>, %arg4: memref<64x8xf32, #tpu.memory_space<vmem>>) attributes {dimension_semantics = [#tpu.dimension_semantics<parallel>], iteration_bounds = array<i64: 1>, scalar_prefetch = 0 : i64, scratch_operands = 0 : i64, tpu.core_type = #tpu.core_type<tc>, window_params = [{transform_indices = @transform_0, window_bounds = array<i64: 64, 8>}, {pipeline_mode = #tpu.pipeline_mode<synchronous>, transform_indices = @transform_1, window_bounds = array<i64: 1, 8>}, {pipeline_mode = #tpu.pipeline_mode<synchronous>, transform_indices = @transform_2, window_bounds = array<i64: 1, 8>}, {transform_indices = @transform_3, window_bounds = array<i64: 64, 8>}]} {
    %c0 = arith.constant 0 : index
    %c0_0 = arith.constant 0 : index
    %0 = vector.load %arg1[%c0, %c0_0] : memref<64x8xf32, #tpu.memory_space<vmem>>, vector<64x8xf32>
    %c0_1 = arith.constant 0 : index
    %c0_2 = arith.constant 0 : index
    %1 = vector.load %arg2[%c0_1, %c0_2] : memref<1x8xf32, #tpu.memory_space<vmem>>, vector<1x8xf32>
    %2 = vector.broadcast %1 : vector<1x8xf32> to vector<64x8xf32>
    %3 = arith.mulf %0, %2 : vector<64x8xf32>
    %c0_3 = arith.constant 0 : index
    %c0_4 = arith.constant 0 : index
    %4 = vector.load %arg3[%c0_3, %c0_4] : memref<1x8xf32, #tpu.memory_space<vmem>>, vector<1x8xf32>
    %5 = vector.broadcast %4 : vector<1x8xf32> to vector<64x8xf32>
    %6 = arith.addf %3, %5 : vector<64x8xf32>
    %7 = arith.negf %6 : vector<64x8xf32>
    %8 = math.exp %7 : vector<64x8xf32>
    %cst = arith.constant 1.000000e+00 : f32
    %9 = vector.broadcast %cst : f32 to vector<64x8xf32>
    %10 = arith.addf %9, %8 : vector<64x8xf32>
    %11 = arith.divf %9, %10 : vector<64x8xf32>
    %12 = arith.mulf %6, %11 : vector<64x8xf32>
    %c0_5 = arith.constant 0 : index
    %c0_6 = arith.constant 0 : index
    %13 = vector.load %arg4[%c0_5, %c0_6] : memref<64x8xf32, #tpu.memory_space<vmem>>, vector<64x8xf32>
    tpu.vector_store %arg4[%c0_5, %c0_6], %12 {strides = array<i32>} : memref<64x8xf32, #tpu.memory_space<vmem>>, vector<64x8xf32>,
    return
  }
  func.func @transform_0(%arg0: i32) -> (i32, i32) {
    %c0_i32 = arith.constant 0 : i32
    %c0_i32_0 = arith.constant 0 : i32
    return %arg0, %c0_i32 : i32, i32
  }
  func.func @transform_1(%arg0: i32) -> (i32, i32) {
    %c0_i32 = arith.constant 0 : i32
    %c0_i32_0 = arith.constant 0 : i32
    %c0_i32_1 = arith.constant 0 : i32
    return %c0_i32, %c0_i32_0 : i32, i32
  }
  func.func @transform_2(%arg0: i32) -> (i32, i32) {
    %c0_i32 = arith.constant 0 : i32
    %c0_i32_0 = arith.constant 0 : i32
    %c0_i32_1 = arith.constant 0 : i32
    return %c0_i32, %c0_i32_0 : i32, i32
  }
  func.func @transform_3(%arg0: i32) -> (i32, i32) {
    %c0_i32 = arith.constant 0 : i32
    %c0_i32_0 = arith.constant 0 : i32
    return %arg0, %c0_i32 : i32, i32
  }
}

module attributes {stable_mosaic.version = 11 : i64} {
  func.func @_affine_act_kernel(%arg0: i32, %arg1: memref<64x16xf32, #tpu.memory_space<vmem>>, %arg2: memref<1x16xf32, #tpu.memory_space<vmem>>, %arg3: memref<1x16xf32, #tpu.memory_space<vmem>>, %arg4: memref<64x16xf32, #tpu.memory_space<vmem>>) attributes {dimension_semantics = [#tpu.dimension_semantics<parallel>], iteration_bounds = array<i64: 1>, scalar_prefetch = 0 : i64, scratch_operands = 0 : i64, tpu.core_type = #tpu.core_type<tc>, window_params = [{transform_indices = @transform_0, window_bounds = array<i64: 64, 16>}, {pipeline_mode = #tpu.pipeline_mode<synchronous>, transform_indices = @transform_1, window_bounds = array<i64: 1, 16>}, {pipeline_mode = #tpu.pipeline_mode<synchronous>, transform_indices = @transform_2, window_bounds = array<i64: 1, 16>}, {transform_indices = @transform_3, window_bounds = array<i64: 64, 16>}]} {
    %c0 = arith.constant 0 : index
    %c0_0 = arith.constant 0 : index
    %0 = vector.load %arg1[%c0, %c0_0] : memref<64x16xf32, #tpu.memory_space<vmem>>, vector<64x16xf32>
    %c0_1 = arith.constant 0 : index
    %c0_2 = arith.constant 0 : index
    %1 = vector.load %arg2[%c0_1, %c0_2] : memref<1x16xf32, #tpu.memory_space<vmem>>, vector<1x16xf32>
    %2 = vector.broadcast %1 : vector<1x16xf32> to vector<64x16xf32>
    %3 = arith.mulf %0, %2 : vector<64x16xf32>
    %c0_3 = arith.constant 0 : index
    %c0_4 = arith.constant 0 : index
    %4 = vector.load %arg3[%c0_3, %c0_4] : memref<1x16xf32, #tpu.memory_space<vmem>>, vector<1x16xf32>
    %5 = vector.broadcast %4 : vector<1x16xf32> to vector<64x16xf32>
    %6 = arith.addf %3, %5 : vector<64x16xf32>
    %cst = arith.constant 0.000000e+00 : f32
    %7 = vector.broadcast %cst : f32 to vector<64x16xf32>
    %8 = arith.maximumf %6, %7 : vector<64x16xf32>
    %c0_5 = arith.constant 0 : index
    %c0_6 = arith.constant 0 : index
    %9 = vector.load %arg4[%c0_5, %c0_6] : memref<64x16xf32, #tpu.memory_space<vmem>>, vector<64x16xf32>
    tpu.vector_store %arg4[%c0_5, %c0_6], %8 {strides = array<i32>} : memref<64x16xf32, #tpu.memory_space<vmem>>, vector<64x16xf32>,
    return
  }
  func.func @transform_0(%arg0: i32) -> (i32, i32) {
    %c0_i32 = arith.constant 0 : i32
    %c0_i32_0 = arith.constant 0 : i32
    return %arg0, %c0_i32 : i32, i32
  }
  func.func @transform_1(%arg0: i32) -> (i32, i32) {
    %c0_i32 = arith.constant 0 : i32
    %c0_i32_0 = arith.constant 0 : i32
    %c0_i32_1 = arith.constant 0 : i32
    return %c0_i32, %c0_i32_0 : i32, i32
  }
  func.func @transform_2(%arg0: i32) -> (i32, i32) {
    %c0_i32 = arith.constant 0 : i32
    %c0_i32_0 = arith.constant 0 : i32
    %c0_i32_1 = arith.constant 0 : i32
    return %c0_i32, %c0_i32_0 : i32, i32
  }
  func.func @transform_3(%arg0: i32) -> (i32, i32) {
    %c0_i32 = arith.constant 0 : i32
    %c0_i32_0 = arith.constant 0 : i32
    return %arg0, %c0_i32 : i32, i32
  }
}

module attributes {stable_mosaic.version = 11 : i64} {
  func.func @_affine_act_kernel(%arg0: i32, %arg1: memref<32x16xf32, #tpu.memory_space<vmem>>, %arg2: memref<1x16xf32, #tpu.memory_space<vmem>>, %arg3: memref<1x16xf32, #tpu.memory_space<vmem>>, %arg4: memref<32x16xf32, #tpu.memory_space<vmem>>) attributes {dimension_semantics = [#tpu.dimension_semantics<parallel>], iteration_bounds = array<i64: 1>, scalar_prefetch = 0 : i64, scratch_operands = 0 : i64, tpu.core_type = #tpu.core_type<tc>, window_params = [{transform_indices = @transform_0, window_bounds = array<i64: 32, 16>}, {pipeline_mode = #tpu.pipeline_mode<synchronous>, transform_indices = @transform_1, window_bounds = array<i64: 1, 16>}, {pipeline_mode = #tpu.pipeline_mode<synchronous>, transform_indices = @transform_2, window_bounds = array<i64: 1, 16>}, {transform_indices = @transform_3, window_bounds = array<i64: 32, 16>}]} {
    %c0 = arith.constant 0 : index
    %c0_0 = arith.constant 0 : index
    %0 = vector.load %arg1[%c0, %c0_0] : memref<32x16xf32, #tpu.memory_space<vmem>>, vector<32x16xf32>
    %c0_1 = arith.constant 0 : index
    %c0_2 = arith.constant 0 : index
    %1 = vector.load %arg2[%c0_1, %c0_2] : memref<1x16xf32, #tpu.memory_space<vmem>>, vector<1x16xf32>
    %2 = vector.broadcast %1 : vector<1x16xf32> to vector<32x16xf32>
    %3 = arith.mulf %0, %2 : vector<32x16xf32>
    %c0_3 = arith.constant 0 : index
    %c0_4 = arith.constant 0 : index
    %4 = vector.load %arg3[%c0_3, %c0_4] : memref<1x16xf32, #tpu.memory_space<vmem>>, vector<1x16xf32>
    %5 = vector.broadcast %4 : vector<1x16xf32> to vector<32x16xf32>
    %6 = arith.addf %3, %5 : vector<32x16xf32>
    %cst = arith.constant 0.000000e+00 : f32
    %7 = vector.broadcast %cst : f32 to vector<32x16xf32>
    %8 = arith.maximumf %6, %7 : vector<32x16xf32>
    %c0_5 = arith.constant 0 : index
    %c0_6 = arith.constant 0 : index
    %9 = vector.load %arg4[%c0_5, %c0_6] : memref<32x16xf32, #tpu.memory_space<vmem>>, vector<32x16xf32>
    tpu.vector_store %arg4[%c0_5, %c0_6], %8 {strides = array<i32>} : memref<32x16xf32, #tpu.memory_space<vmem>>, vector<32x16xf32>,
    return
  }
  func.func @transform_0(%arg0: i32) -> (i32, i32) {
    %c0_i32 = arith.constant 0 : i32
    %c0_i32_0 = arith.constant 0 : i32
    return %arg0, %c0_i32 : i32, i32
  }
  func.func @transform_1(%arg0: i32) -> (i32, i32) {
    %c0_i32 = arith.constant 0 : i32
    %c0_i32_0 = arith.constant 0 : i32
    %c0_i32_1 = arith.constant 0 : i32
    return %c0_i32, %c0_i32_0 : i32, i32
  }
  func.func @transform_2(%arg0: i32) -> (i32, i32) {
    %c0_i32 = arith.constant 0 : i32
    %c0_i32_0 = arith.constant 0 : i32
    %c0_i32_1 = arith.constant 0 : i32
    return %c0_i32, %c0_i32_0 : i32, i32
  }
  func.func @transform_3(%arg0: i32) -> (i32, i32) {
    %c0_i32 = arith.constant 0 : i32
    %c0_i32_0 = arith.constant 0 : i32
    return %arg0, %c0_i32 : i32, i32
  }
}

module attributes {stable_mosaic.version = 11 : i64} {
  func.func @_matmul_epi_kernel(%arg0: i32, %arg1: i32, %arg2: i32, %arg3: memref<32x64xbf16, #tpu.memory_space<vmem>>, %arg4: memref<64x128xbf16, #tpu.memory_space<vmem>>, %arg5: memref<1x128xf32, #tpu.memory_space<vmem>>, %arg6: memref<1x128xf32, #tpu.memory_space<vmem>>, %arg7: memref<32x128xf32, #tpu.memory_space<vmem>>, %arg8: memref<32x128xf32, #tpu.memory_space<vmem>>) attributes {dimension_semantics = [#tpu.dimension_semantics<parallel>, #tpu.dimension_semantics<parallel>, #tpu.dimension_semantics<arbitrary>], iteration_bounds = array<i64: 1, 1, 1>, scalar_prefetch = 0 : i64, scratch_operands = 1 : i64, tpu.core_type = #tpu.core_type<tc>, window_params = [{transform_indices = @transform_0, window_bounds = array<i64: 32, 64>}, {transform_indices = @transform_1, window_bounds = array<i64: 64, 128>}, {transform_indices = @transform_2, window_bounds = array<i64: 1, 128>}, {transform_indices = @transform_3, window_bounds = array<i64: 1, 128>}, {transform_indices = @transform_4, window_bounds = array<i64: 32, 128>}]} {
    %c0_i32 = arith.constant 0 : i32
    %0 = arith.cmpi eq, %arg2, %c0_i32 : i32
    %1 = arith.extui %0 : i1 to i32
    %c0_i32_0 = arith.constant 0 : i32
    %2 = arith.cmpi ne, %1, %c0_i32_0 : i32
    scf.if %2 {
      %cst_10 = arith.constant 0.000000e+00 : f32
      %12 = vector.broadcast %cst_10 : f32 to vector<32x128xf32>
      %c0_11 = arith.constant 0 : index
      %c0_12 = arith.constant 0 : index
      %13 = vector.load %arg8[%c0_11, %c0_12] : memref<32x128xf32, #tpu.memory_space<vmem>>, vector<32x128xf32>
      tpu.vector_store %arg8[%c0_11, %c0_12], %12 {strides = array<i32>} : memref<32x128xf32, #tpu.memory_space<vmem>>, vector<32x128xf32>,
    } else {
    }
    %c0 = arith.constant 0 : index
    %c0_1 = arith.constant 0 : index
    %3 = vector.load %arg8[%c0, %c0_1] : memref<32x128xf32, #tpu.memory_space<vmem>>, vector<32x128xf32>
    %c0_2 = arith.constant 0 : index
    %c0_3 = arith.constant 0 : index
    %4 = vector.load %arg3[%c0_2, %c0_3] : memref<32x64xbf16, #tpu.memory_space<vmem>>, vector<32x64xbf16>
    %c0_4 = arith.constant 0 : index
    %c0_5 = arith.constant 0 : index
    %5 = vector.load %arg4[%c0_4, %c0_5] : memref<64x128xbf16, #tpu.memory_space<vmem>>, vector<64x128xbf16>
    %cst = arith.constant dense<0.000000e+00> : vector<32x128xf32>
    %6 = tpu.matmul %4, %5, %cst {dimension_numbers = #tpu.dot_dimension_numbers<[1], [0], [0], [1], [0, 0, 1, 1], [], []>} : vector<32x64xbf16>, vector<64x128xbf16>, vector<32x128xf32> -> vector<32x128xf32>
    %7 = arith.addf %3, %6 : vector<32x128xf32>
    %c0_6 = arith.constant 0 : index
    %c0_7 = arith.constant 0 : index
    %8 = vector.load %arg8[%c0_6, %c0_7] : memref<32x128xf32, #tpu.memory_space<vmem>>, vector<32x128xf32>
    tpu.vector_store %arg8[%c0_6, %c0_7], %7 {strides = array<i32>} : memref<32x128xf32, #tpu.memory_space<vmem>>, vector<32x128xf32>,
    %c0_i32_8 = arith.constant 0 : i32
    %9 = arith.cmpi eq, %arg2, %c0_i32_8 : i32
    %10 = arith.extui %9 : i1 to i32
    %c0_i32_9 = arith.constant 0 : i32
    %11 = arith.cmpi ne, %10, %c0_i32_9 : i32
    scf.if %11 {
      %c0_10 = arith.constant 0 : index
      %c0_11 = arith.constant 0 : index
      %12 = vector.load %arg8[%c0_10, %c0_11] : memref<32x128xf32, #tpu.memory_space<vmem>>, vector<32x128xf32>
      %c0_12 = arith.constant 0 : index
      %c0_13 = arith.constant 0 : index
      %13 = vector.load %arg5[%c0_12, %c0_13] : memref<1x128xf32, #tpu.memory_space<vmem>>, vector<1x128xf32>
      %14 = vector.broadcast %13 : vector<1x128xf32> to vector<32x128xf32>
      %15 = arith.mulf %12, %14 : vector<32x128xf32>
      %c0_14 = arith.constant 0 : index
      %c0_15 = arith.constant 0 : index
      %16 = vector.load %arg6[%c0_14, %c0_15] : memref<1x128xf32, #tpu.memory_space<vmem>>, vector<1x128xf32>
      %17 = vector.broadcast %16 : vector<1x128xf32> to vector<32x128xf32>
      %18 = arith.addf %15, %17 : vector<32x128xf32>
      %c0_16 = arith.constant 0 : index
      %c0_17 = arith.constant 0 : index
      %19 = vector.load %arg7[%c0_16, %c0_17] : memref<32x128xf32, #tpu.memory_space<vmem>>, vector<32x128xf32>
      tpu.vector_store %arg7[%c0_16, %c0_17], %18 {strides = array<i32>} : memref<32x128xf32, #tpu.memory_space<vmem>>, vector<32x128xf32>,
    } else {
    }
    return
  }
  func.func @transform_0(%arg0: i32, %arg1: i32, %arg2: i32) -> (i32, i32) {
    %c0_i32 = arith.constant 0 : i32
    return %arg0, %arg2 : i32, i32
  }
  func.func @transform_1(%arg0: i32, %arg1: i32, %arg2: i32) -> (i32, i32) {
    %c0_i32 = arith.constant 0 : i32
    return %arg2, %arg1 : i32, i32
  }
  func.func @transform_2(%arg0: i32, %arg1: i32, %arg2: i32) -> (i32, i32) {
    %c0_i32 = arith.constant 0 : i32
    %c0_i32_0 = arith.constant 0 : i32
    return %c0_i32, %arg1 : i32, i32
  }
  func.func @transform_3(%arg0: i32, %arg1: i32, %arg2: i32) -> (i32, i32) {
    %c0_i32 = arith.constant 0 : i32
    %c0_i32_0 = arith.constant 0 : i32
    return %c0_i32, %arg1 : i32, i32
  }
  func.func @transform_4(%arg0: i32, %arg1: i32, %arg2: i32) -> (i32, i32) {
    %c0_i32 = arith.constant 0 : i32
    return %arg0, %arg1 : i32, i32
  }
}

module attributes {stable_mosaic.version = 11 : i64} {
  func.func @_matmul_epi_kernel(%arg0: i32, %arg1: i32, %arg2: i32, %arg3: memref<32x16xbf16, #tpu.memory_space<vmem>>, %arg4: memref<16x128xbf16, #tpu.memory_space<vmem>>, %arg5: memref<1x128xf32, #tpu.memory_space<vmem>>, %arg6: memref<1x128xf32, #tpu.memory_space<vmem>>, %arg7: memref<32x128xf32, #tpu.memory_space<vmem>>, %arg8: memref<32x128xf32, #tpu.memory_space<vmem>>) attributes {dimension_semantics = [#tpu.dimension_semantics<parallel>, #tpu.dimension_semantics<parallel>, #tpu.dimension_semantics<arbitrary>], iteration_bounds = array<i64: 1, 1, 1>, scalar_prefetch = 0 : i64, scratch_operands = 1 : i64, tpu.core_type = #tpu.core_type<tc>, window_params = [{transform_indices = @transform_0, window_bounds = array<i64: 32, 16>}, {transform_indices = @transform_1, window_bounds = array<i64: 16, 128>}, {transform_indices = @transform_2, window_bounds = array<i64: 1, 128>}, {transform_indices = @transform_3, window_bounds = array<i64: 1, 128>}, {transform_indices = @transform_4, window_bounds = array<i64: 32, 128>}]} {
    %c0_i32 = arith.constant 0 : i32
    %0 = arith.cmpi eq, %arg2, %c0_i32 : i32
    %1 = arith.extui %0 : i1 to i32
    %c0_i32_0 = arith.constant 0 : i32
    %2 = arith.cmpi ne, %1, %c0_i32_0 : i32
    scf.if %2 {
      %cst_10 = arith.constant 0.000000e+00 : f32
      %12 = vector.broadcast %cst_10 : f32 to vector<32x128xf32>
      %c0_11 = arith.constant 0 : index
      %c0_12 = arith.constant 0 : index
      %13 = vector.load %arg8[%c0_11, %c0_12] : memref<32x128xf32, #tpu.memory_space<vmem>>, vector<32x128xf32>
      tpu.vector_store %arg8[%c0_11, %c0_12], %12 {strides = array<i32>} : memref<32x128xf32, #tpu.memory_space<vmem>>, vector<32x128xf32>,
    } else {
    }
    %c0 = arith.constant 0 : index
    %c0_1 = arith.constant 0 : index
    %3 = vector.load %arg8[%c0, %c0_1] : memref<32x128xf32, #tpu.memory_space<vmem>>, vector<32x128xf32>
    %c0_2 = arith.constant 0 : index
    %c0_3 = arith.constant 0 : index
    %4 = vector.load %arg3[%c0_2, %c0_3] : memref<32x16xbf16, #tpu.memory_space<vmem>>, vector<32x16xbf16>
    %c0_4 = arith.constant 0 : index
    %c0_5 = arith.constant 0 : index
    %5 = vector.load %arg4[%c0_4, %c0_5] : memref<16x128xbf16, #tpu.memory_space<vmem>>, vector<16x128xbf16>
    %cst = arith.constant dense<0.000000e+00> : vector<32x128xf32>
    %6 = tpu.matmul %4, %5, %cst {dimension_numbers = #tpu.dot_dimension_numbers<[1], [0], [0], [1], [0, 0, 1, 1], [], []>} : vector<32x16xbf16>, vector<16x128xbf16>, vector<32x128xf32> -> vector<32x128xf32>
    %7 = arith.addf %3, %6 : vector<32x128xf32>
    %c0_6 = arith.constant 0 : index
    %c0_7 = arith.constant 0 : index
    %8 = vector.load %arg8[%c0_6, %c0_7] : memref<32x128xf32, #tpu.memory_space<vmem>>, vector<32x128xf32>
    tpu.vector_store %arg8[%c0_6, %c0_7], %7 {strides = array<i32>} : memref<32x128xf32, #tpu.memory_space<vmem>>, vector<32x128xf32>,
    %c0_i32_8 = arith.constant 0 : i32
    %9 = arith.cmpi eq, %arg2, %c0_i32_8 : i32
    %10 = arith.extui %9 : i1 to i32
    %c0_i32_9 = arith.constant 0 : i32
    %11 = arith.cmpi ne, %10, %c0_i32_9 : i32
    scf.if %11 {
      %c0_10 = arith.constant 0 : index
      %c0_11 = arith.constant 0 : index
      %12 = vector.load %arg8[%c0_10, %c0_11] : memref<32x128xf32, #tpu.memory_space<vmem>>, vector<32x128xf32>
      %c0_12 = arith.constant 0 : index
      %c0_13 = arith.constant 0 : index
      %13 = vector.load %arg5[%c0_12, %c0_13] : memref<1x128xf32, #tpu.memory_space<vmem>>, vector<1x128xf32>
      %14 = vector.broadcast %13 : vector<1x128xf32> to vector<32x128xf32>
      %15 = arith.mulf %12, %14 : vector<32x128xf32>
      %c0_14 = arith.constant 0 : index
      %c0_15 = arith.constant 0 : index
      %16 = vector.load %arg6[%c0_14, %c0_15] : memref<1x128xf32, #tpu.memory_space<vmem>>, vector<1x128xf32>
      %17 = vector.broadcast %16 : vector<1x128xf32> to vector<32x128xf32>
      %18 = arith.addf %15, %17 : vector<32x128xf32>
      %c0_16 = arith.constant 0 : index
      %c0_17 = arith.constant 0 : index
      %19 = vector.load %arg7[%c0_16, %c0_17] : memref<32x128xf32, #tpu.memory_space<vmem>>, vector<32x128xf32>
      tpu.vector_store %arg7[%c0_16, %c0_17], %18 {strides = array<i32>} : memref<32x128xf32, #tpu.memory_space<vmem>>, vector<32x128xf32>,
    } else {
    }
    return
  }
  func.func @transform_0(%arg0: i32, %arg1: i32, %arg2: i32) -> (i32, i32) {
    %c0_i32 = arith.constant 0 : i32
    return %arg0, %arg2 : i32, i32
  }
  func.func @transform_1(%arg0: i32, %arg1: i32, %arg2: i32) -> (i32, i32) {
    %c0_i32 = arith.constant 0 : i32
    return %arg2, %arg1 : i32, i32
  }
  func.func @transform_2(%arg0: i32, %arg1: i32, %arg2: i32) -> (i32, i32) {
    %c0_i32 = arith.constant 0 : i32
    %c0_i32_0 = arith.constant 0 : i32
    return %c0_i32, %arg1 : i32, i32
  }
  func.func @transform_3(%arg0: i32, %arg1: i32, %arg2: i32) -> (i32, i32) {
    %c0_i32 = arith.constant 0 : i32
    %c0_i32_0 = arith.constant 0 : i32
    return %c0_i32, %arg1 : i32, i32
  }
  func.func @transform_4(%arg0: i32, %arg1: i32, %arg2: i32) -> (i32, i32) {
    %c0_i32 = arith.constant 0 : i32
    return %arg0, %arg1 : i32, i32
  }
}

module attributes {stable_mosaic.version = 11 : i64} {
  func.func @_depthwise_kernel(%arg0: i32, %arg1: memref<1x17x16xf32, #tpu.memory_space<vmem>>, %arg2: memref<3x16xf32, #tpu.memory_space<vmem>>, %arg3: memref<1x16xf32, #tpu.memory_space<vmem>>, %arg4: memref<1x15x16xf32, #tpu.memory_space<vmem>>) attributes {dimension_semantics = [#tpu.dimension_semantics<parallel>], iteration_bounds = array<i64: 2>, scalar_prefetch = 0 : i64, scratch_operands = 0 : i64, tpu.core_type = #tpu.core_type<tc>, window_params = [{transform_indices = @transform_0, window_bounds = array<i64: 1, 17, 16>}, {pipeline_mode = #tpu.pipeline_mode<synchronous>, transform_indices = @transform_1, window_bounds = array<i64: 3, 16>}, {pipeline_mode = #tpu.pipeline_mode<synchronous>, transform_indices = @transform_2, window_bounds = array<i64: 1, 16>}, {transform_indices = @transform_3, window_bounds = array<i64: 1, 15, 16>}]} {
    %c0 = arith.constant 0 : index
    %c0_0 = arith.constant 0 : index
    %c0_1 = arith.constant 0 : index
    %0 = vector.load %arg1[%c0, %c0_0, %c0_1] : memref<1x17x16xf32, #tpu.memory_space<vmem>>, vector<1x17x16xf32>
    %1 = vector.shape_cast %0 : vector<1x17x16xf32> to vector<17x16xf32>
    %cst = arith.constant 0.000000e+00 : f32
    %2 = vector.broadcast %cst : f32 to vector<15x16xf32>
    %3 = vector.extract_strided_slice %1 {offsets = [0, 0], sizes = [15, 16], strides = [1, 1]} : vector<17x16xf32> to vector<15x16xf32>
    %c0_2 = arith.constant 0 : index
    %c0_3 = arith.constant 0 : index
    %4 = vector.load %arg2[%c0_2, %c0_3] : memref<3x16xf32, #tpu.memory_space<vmem>>, vector<1x16xf32>
    %5 = vector.broadcast %4 : vector<1x16xf32> to vector<15x16xf32>
    %6 = arith.mulf %3, %5 : vector<15x16xf32>
    %7 = arith.addf %2, %6 : vector<15x16xf32>
    %8 = vector.extract_strided_slice %1 {offsets = [1, 0], sizes = [15, 16], strides = [1, 1]} : vector<17x16xf32> to vector<15x16xf32>
    %c1 = arith.constant 1 : index
    %c0_4 = arith.constant 0 : index
    %9 = vector.load %arg2[%c1, %c0_4] : memref<3x16xf32, #tpu.memory_space<vmem>>, vector<1x16xf32>
    %10 = vector.broadcast %9 : vector<1x16xf32> to vector<15x16xf32>
    %11 = arith.mulf %8, %10 : vector<15x16xf32>
    %12 = arith.addf %7, %11 : vector<15x16xf32>
    %13 = vector.extract_strided_slice %1 {offsets = [2, 0], sizes = [15, 16], strides = [1, 1]} : vector<17x16xf32> to vector<15x16xf32>
    %c2 = arith.constant 2 : index
    %c0_5 = arith.constant 0 : index
    %14 = vector.load %arg2[%c2, %c0_5] : memref<3x16xf32, #tpu.memory_space<vmem>>, vector<1x16xf32>
    %15 = vector.broadcast %14 : vector<1x16xf32> to vector<15x16xf32>
    %16 = arith.mulf %13, %15 : vector<15x16xf32>
    %17 = arith.addf %12, %16 : vector<15x16xf32>
    %c0_6 = arith.constant 0 : index
    %c0_7 = arith.constant 0 : index
    %18 = vector.load %arg3[%c0_6, %c0_7] : memref<1x16xf32, #tpu.memory_space<vmem>>, vector<1x16xf32>
    %19 = vector.broadcast %18 : vector<1x16xf32> to vector<15x16xf32>
    %20 = arith.addf %17, %19 : vector<15x16xf32>
    %c0_8 = arith.constant 0 : index
    %c0_9 = arith.constant 0 : index
    %c0_10 = arith.constant 0 : index
    %21 = vector.load %arg4[%c0_8, %c0_9, %c0_10] : memref<1x15x16xf32, #tpu.memory_space<vmem>>, vector<1x15x16xf32>
    %22 = vector.shape_cast %21 : vector<1x15x16xf32> to vector<15x16xf32>
    %23 = vector.shape_cast %20 : vector<15x16xf32> to vector<1x15x16xf32>
    tpu.vector_store %arg4[%c0_8, %c0_9, %c0_10], %23 {strides = array<i32>} : memref<1x15x16xf32, #tpu.memory_space<vmem>>, vector<1x15x16xf32>,
    return
  }
  func.func @transform_0(%arg0: i32) -> (i32, i32, i32) {
    %c0_i32 = arith.constant 0 : i32
    %c0_i32_0 = arith.constant 0 : i32
    %c0_i32_1 = arith.constant 0 : i32
    return %arg0, %c0_i32, %c0_i32_0 : i32, i32, i32
  }
  func.func @transform_1(%arg0: i32) -> (i32, i32) {
    %c0_i32 = arith.constant 0 : i32
    %c0_i32_0 = arith.constant 0 : i32
    %c0_i32_1 = arith.constant 0 : i32
    return %c0_i32, %c0_i32_0 : i32, i32
  }
  func.func @transform_2(%arg0: i32) -> (i32, i32) {
    %c0_i32 = arith.constant 0 : i32
    %c0_i32_0 = arith.constant 0 : i32
    %c0_i32_1 = arith.constant 0 : i32
    return %c0_i32, %c0_i32_0 : i32, i32
  }
  func.func @transform_3(%arg0: i32) -> (i32, i32, i32) {
    %c0_i32 = arith.constant 0 : i32
    %c0_i32_0 = arith.constant 0 : i32
    %c0_i32_1 = arith.constant 0 : i32
    return %arg0, %c0_i32, %c0_i32_0 : i32, i32, i32
  }
}

module attributes {stable_mosaic.version = 11 : i64} {
  func.func @_affine_split_gate_kernel(%arg0: i32, %arg1: memref<32x32xf32, #tpu.memory_space<vmem>>, %arg2: memref<1x32xf32, #tpu.memory_space<vmem>>, %arg3: memref<1x32xf32, #tpu.memory_space<vmem>>, %arg4: memref<32x16xf32, #tpu.memory_space<vmem>>) attributes {dimension_semantics = [#tpu.dimension_semantics<parallel>], iteration_bounds = array<i64: 1>, scalar_prefetch = 0 : i64, scratch_operands = 0 : i64, tpu.core_type = #tpu.core_type<tc>, window_params = [{transform_indices = @transform_0, window_bounds = array<i64: 32, 32>}, {pipeline_mode = #tpu.pipeline_mode<synchronous>, transform_indices = @transform_1, window_bounds = array<i64: 1, 32>}, {pipeline_mode = #tpu.pipeline_mode<synchronous>, transform_indices = @transform_2, window_bounds = array<i64: 1, 32>}, {transform_indices = @transform_3, window_bounds = array<i64: 32, 16>}]} {
    %c0 = arith.constant 0 : index
    %c0_0 = arith.constant 0 : index
    %0 = vector.load %arg1[%c0, %c0_0] : memref<32x32xf32, #tpu.memory_space<vmem>>, vector<32x32xf32>
    %c0_1 = arith.constant 0 : index
    %c0_2 = arith.constant 0 : index
    %1 = vector.load %arg2[%c0_1, %c0_2] : memref<1x32xf32, #tpu.memory_space<vmem>>, vector<1x32xf32>
    %2 = vector.broadcast %1 : vector<1x32xf32> to vector<32x32xf32>
    %3 = arith.mulf %0, %2 : vector<32x32xf32>
    %c0_3 = arith.constant 0 : index
    %c0_4 = arith.constant 0 : index
    %4 = vector.load %arg3[%c0_3, %c0_4] : memref<1x32xf32, #tpu.memory_space<vmem>>, vector<1x32xf32>
    %5 = vector.broadcast %4 : vector<1x32xf32> to vector<32x32xf32>
    %6 = arith.addf %3, %5 : vector<32x32xf32>
    %7 = vector.extract_strided_slice %6 {offsets = [0, 0], sizes = [32, 16], strides = [1, 1]} : vector<32x32xf32> to vector<32x16xf32>
    %8 = vector.extract_strided_slice %6 {offsets = [0, 16], sizes = [32, 16], strides = [1, 1]} : vector<32x32xf32> to vector<32x16xf32>
    %9 = arith.negf %8 : vector<32x16xf32>
    %10 = math.exp %9 : vector<32x16xf32>
    %cst = arith.constant 1.000000e+00 : f32
    %11 = vector.broadcast %cst : f32 to vector<32x16xf32>
    %12 = arith.addf %11, %10 : vector<32x16xf32>
    %13 = arith.divf %11, %12 : vector<32x16xf32>
    %14 = arith.mulf %7, %13 : vector<32x16xf32>
    %c0_5 = arith.constant 0 : index
    %c0_6 = arith.constant 0 : index
    %15 = vector.load %arg4[%c0_5, %c0_6] : memref<32x16xf32, #tpu.memory_space<vmem>>, vector<32x16xf32>
    tpu.vector_store %arg4[%c0_5, %c0_6], %14 {strides = array<i32>} : memref<32x16xf32, #tpu.memory_space<vmem>>, vector<32x16xf32>,
    return
  }
  func.func @transform_0(%arg0: i32) -> (i32, i32) {
    %c0_i32 = arith.constant 0 : i32
    %c0_i32_0 = arith.constant 0 : i32
    return %arg0, %c0_i32 : i32, i32
  }
  func.func @transform_1(%arg0: i32) -> (i32, i32) {
    %c0_i32 = arith.constant 0 : i32
    %c0_i32_0 = arith.constant 0 : i32
    %c0_i32_1 = arith.constant 0 : i32
    return %c0_i32, %c0_i32_0 : i32, i32
  }
  func.func @transform_2(%arg0: i32) -> (i32, i32) {
    %c0_i32 = arith.constant 0 : i32
    %c0_i32_0 = arith.constant 0 : i32
    %c0_i32_1 = arith.constant 0 : i32
    return %c0_i32, %c0_i32_0 : i32, i32
  }
  func.func @transform_3(%arg0: i32) -> (i32, i32) {
    %c0_i32 = arith.constant 0 : i32
    %c0_i32_0 = arith.constant 0 : i32
    return %arg0, %c0_i32 : i32, i32
  }
}

module attributes {stable_mosaic.version = 11 : i64} {
  func.func @_affine_act_kernel(%arg0: i32, %arg1: memref<32x16xf32, #tpu.memory_space<vmem>>, %arg2: memref<1x16xf32, #tpu.memory_space<vmem>>, %arg3: memref<1x16xf32, #tpu.memory_space<vmem>>, %arg4: memref<32x16xf32, #tpu.memory_space<vmem>>) attributes {dimension_semantics = [#tpu.dimension_semantics<parallel>], iteration_bounds = array<i64: 1>, scalar_prefetch = 0 : i64, scratch_operands = 0 : i64, tpu.core_type = #tpu.core_type<tc>, window_params = [{transform_indices = @transform_0, window_bounds = array<i64: 32, 16>}, {pipeline_mode = #tpu.pipeline_mode<synchronous>, transform_indices = @transform_1, window_bounds = array<i64: 1, 16>}, {pipeline_mode = #tpu.pipeline_mode<synchronous>, transform_indices = @transform_2, window_bounds = array<i64: 1, 16>}, {transform_indices = @transform_3, window_bounds = array<i64: 32, 16>}]} {
    %c0 = arith.constant 0 : index
    %c0_0 = arith.constant 0 : index
    %0 = vector.load %arg1[%c0, %c0_0] : memref<32x16xf32, #tpu.memory_space<vmem>>, vector<32x16xf32>
    %c0_1 = arith.constant 0 : index
    %c0_2 = arith.constant 0 : index
    %1 = vector.load %arg2[%c0_1, %c0_2] : memref<1x16xf32, #tpu.memory_space<vmem>>, vector<1x16xf32>
    %2 = vector.broadcast %1 : vector<1x16xf32> to vector<32x16xf32>
    %3 = arith.mulf %0, %2 : vector<32x16xf32>
    %c0_3 = arith.constant 0 : index
    %c0_4 = arith.constant 0 : index
    %4 = vector.load %arg3[%c0_3, %c0_4] : memref<1x16xf32, #tpu.memory_space<vmem>>, vector<1x16xf32>
    %5 = vector.broadcast %4 : vector<1x16xf32> to vector<32x16xf32>
    %6 = arith.addf %3, %5 : vector<32x16xf32>
    %7 = arith.negf %6 : vector<32x16xf32>
    %8 = math.exp %7 : vector<32x16xf32>
    %cst = arith.constant 1.000000e+00 : f32
    %9 = vector.broadcast %cst : f32 to vector<32x16xf32>
    %10 = arith.addf %9, %8 : vector<32x16xf32>
    %11 = arith.divf %9, %10 : vector<32x16xf32>
    %12 = arith.mulf %6, %11 : vector<32x16xf32>
    %c0_5 = arith.constant 0 : index
    %c0_6 = arith.constant 0 : index
    %13 = vector.load %arg4[%c0_5, %c0_6] : memref<32x16xf32, #tpu.memory_space<vmem>>, vector<32x16xf32>
    tpu.vector_store %arg4[%c0_5, %c0_6], %12 {strides = array<i32>} : memref<32x16xf32, #tpu.memory_space<vmem>>, vector<32x16xf32>,
    return
  }
  func.func @transform_0(%arg0: i32) -> (i32, i32) {
    %c0_i32 = arith.constant 0 : i32
    %c0_i32_0 = arith.constant 0 : i32
    return %arg0, %c0_i32 : i32, i32
  }
  func.func @transform_1(%arg0: i32) -> (i32, i32) {
    %c0_i32 = arith.constant 0 : i32
    %c0_i32_0 = arith.constant 0 : i32
    %c0_i32_1 = arith.constant 0 : i32
    return %c0_i32, %c0_i32_0 : i32, i32
  }
  func.func @transform_2(%arg0: i32) -> (i32, i32) {
    %c0_i32 = arith.constant 0 : i32
    %c0_i32_0 = arith.constant 0 : i32
    %c0_i32_1 = arith.constant 0 : i32
    return %c0_i32, %c0_i32_0 : i32, i32
  }
  func.func @transform_3(%arg0: i32) -> (i32, i32) {
    %c0_i32 = arith.constant 0 : i32
    %c0_i32_0 = arith.constant 0 : i32
    return %arg0, %c0_i32 : i32, i32
  }
}

module attributes {stable_mosaic.version = 11 : i64} {
  func.func @_matmul_epi_kernel(%arg0: i32, %arg1: i32, %arg2: i32, %arg3: memref<32x32xbf16, #tpu.memory_space<vmem>>, %arg4: memref<32x128xbf16, #tpu.memory_space<vmem>>, %arg5: memref<1x128xf32, #tpu.memory_space<vmem>>, %arg6: memref<1x128xf32, #tpu.memory_space<vmem>>, %arg7: memref<32x128xf32, #tpu.memory_space<vmem>>, %arg8: memref<32x128xf32, #tpu.memory_space<vmem>>) attributes {dimension_semantics = [#tpu.dimension_semantics<parallel>, #tpu.dimension_semantics<parallel>, #tpu.dimension_semantics<arbitrary>], iteration_bounds = array<i64: 1, 1, 1>, scalar_prefetch = 0 : i64, scratch_operands = 1 : i64, tpu.core_type = #tpu.core_type<tc>, window_params = [{transform_indices = @transform_0, window_bounds = array<i64: 32, 32>}, {transform_indices = @transform_1, window_bounds = array<i64: 32, 128>}, {transform_indices = @transform_2, window_bounds = array<i64: 1, 128>}, {transform_indices = @transform_3, window_bounds = array<i64: 1, 128>}, {transform_indices = @transform_4, window_bounds = array<i64: 32, 128>}]} {
    %c0_i32 = arith.constant 0 : i32
    %0 = arith.cmpi eq, %arg2, %c0_i32 : i32
    %1 = arith.extui %0 : i1 to i32
    %c0_i32_0 = arith.constant 0 : i32
    %2 = arith.cmpi ne, %1, %c0_i32_0 : i32
    scf.if %2 {
      %cst_10 = arith.constant 0.000000e+00 : f32
      %12 = vector.broadcast %cst_10 : f32 to vector<32x128xf32>
      %c0_11 = arith.constant 0 : index
      %c0_12 = arith.constant 0 : index
      %13 = vector.load %arg8[%c0_11, %c0_12] : memref<32x128xf32, #tpu.memory_space<vmem>>, vector<32x128xf32>
      tpu.vector_store %arg8[%c0_11, %c0_12], %12 {strides = array<i32>} : memref<32x128xf32, #tpu.memory_space<vmem>>, vector<32x128xf32>,
    } else {
    }
    %c0 = arith.constant 0 : index
    %c0_1 = arith.constant 0 : index
    %3 = vector.load %arg8[%c0, %c0_1] : memref<32x128xf32, #tpu.memory_space<vmem>>, vector<32x128xf32>
    %c0_2 = arith.constant 0 : index
    %c0_3 = arith.constant 0 : index
    %4 = vector.load %arg3[%c0_2, %c0_3] : memref<32x32xbf16, #tpu.memory_space<vmem>>, vector<32x32xbf16>
    %c0_4 = arith.constant 0 : index
    %c0_5 = arith.constant 0 : index
    %5 = vector.load %arg4[%c0_4, %c0_5] : memref<32x128xbf16, #tpu.memory_space<vmem>>, vector<32x128xbf16>
    %cst = arith.constant dense<0.000000e+00> : vector<32x128xf32>
    %6 = tpu.matmul %4, %5, %cst {dimension_numbers = #tpu.dot_dimension_numbers<[1], [0], [0], [1], [0, 0, 1, 1], [], []>} : vector<32x32xbf16>, vector<32x128xbf16>, vector<32x128xf32> -> vector<32x128xf32>
    %7 = arith.addf %3, %6 : vector<32x128xf32>
    %c0_6 = arith.constant 0 : index
    %c0_7 = arith.constant 0 : index
    %8 = vector.load %arg8[%c0_6, %c0_7] : memref<32x128xf32, #tpu.memory_space<vmem>>, vector<32x128xf32>
    tpu.vector_store %arg8[%c0_6, %c0_7], %7 {strides = array<i32>} : memref<32x128xf32, #tpu.memory_space<vmem>>, vector<32x128xf32>,
    %c0_i32_8 = arith.constant 0 : i32
    %9 = arith.cmpi eq, %arg2, %c0_i32_8 : i32
    %10 = arith.extui %9 : i1 to i32
    %c0_i32_9 = arith.constant 0 : i32
    %11 = arith.cmpi ne, %10, %c0_i32_9 : i32
    scf.if %11 {
      %c0_10 = arith.constant 0 : index
      %c0_11 = arith.constant 0 : index
      %12 = vector.load %arg8[%c0_10, %c0_11] : memref<32x128xf32, #tpu.memory_space<vmem>>, vector<32x128xf32>
      %c0_12 = arith.constant 0 : index
      %c0_13 = arith.constant 0 : index
      %13 = vector.load %arg5[%c0_12, %c0_13] : memref<1x128xf32, #tpu.memory_space<vmem>>, vector<1x128xf32>
      %14 = vector.broadcast %13 : vector<1x128xf32> to vector<32x128xf32>
      %15 = arith.mulf %12, %14 : vector<32x128xf32>
      %c0_14 = arith.constant 0 : index
      %c0_15 = arith.constant 0 : index
      %16 = vector.load %arg6[%c0_14, %c0_15] : memref<1x128xf32, #tpu.memory_space<vmem>>, vector<1x128xf32>
      %17 = vector.broadcast %16 : vector<1x128xf32> to vector<32x128xf32>
      %18 = arith.addf %15, %17 : vector<32x128xf32>
      %c0_16 = arith.constant 0 : index
      %c0_17 = arith.constant 0 : index
      %19 = vector.load %arg7[%c0_16, %c0_17] : memref<32x128xf32, #tpu.memory_space<vmem>>, vector<32x128xf32>
      tpu.vector_store %arg7[%c0_16, %c0_17], %18 {strides = array<i32>} : memref<32x128xf32, #tpu.memory_space<vmem>>, vector<32x128xf32>,
    } else {
    }
    return
  }
  func.func @transform_0(%arg0: i32, %arg1: i32, %arg2: i32) -> (i32, i32) {
    %c0_i32 = arith.constant 0 : i32
    return %arg0, %arg2 : i32, i32
  }
  func.func @transform_1(%arg0: i32, %arg1: i32, %arg2: i32) -> (i32, i32) {
    %c0_i32 = arith.constant 0 : i32
    return %arg2, %arg1 : i32, i32
  }
  func.func @transform_2(%arg0: i32, %arg1: i32, %arg2: i32) -> (i32, i32) {
    %c0_i32 = arith.constant 0 : i32
    %c0_i32_0 = arith.constant 0 : i32
    return %c0_i32, %arg1 : i32, i32
  }
  func.func @transform_3(%arg0: i32, %arg1: i32, %arg2: i32) -> (i32, i32) {
    %c0_i32 = arith.constant 0 : i32
    %c0_i32_0 = arith.constant 0 : i32
    return %c0_i32, %arg1 : i32, i32
  }
  func.func @transform_4(%arg0: i32, %arg1: i32, %arg2: i32) -> (i32, i32) {
    %c0_i32 = arith.constant 0 : i32
    return %arg0, %arg1 : i32, i32
  }
}

module attributes {stable_mosaic.version = 11 : i64} {
  func.func @_affine_act_kernel(%arg0: i32, %arg1: memref<32x32xf32, #tpu.memory_space<vmem>>, %arg2: memref<1x32xf32, #tpu.memory_space<vmem>>, %arg3: memref<1x32xf32, #tpu.memory_space<vmem>>, %arg4: memref<32x32xf32, #tpu.memory_space<vmem>>) attributes {dimension_semantics = [#tpu.dimension_semantics<parallel>], iteration_bounds = array<i64: 1>, scalar_prefetch = 0 : i64, scratch_operands = 0 : i64, tpu.core_type = #tpu.core_type<tc>, window_params = [{transform_indices = @transform_0, window_bounds = array<i64: 32, 32>}, {pipeline_mode = #tpu.pipeline_mode<synchronous>, transform_indices = @transform_1, window_bounds = array<i64: 1, 32>}, {pipeline_mode = #tpu.pipeline_mode<synchronous>, transform_indices = @transform_2, window_bounds = array<i64: 1, 32>}, {transform_indices = @transform_3, window_bounds = array<i64: 32, 32>}]} {
    %c0 = arith.constant 0 : index
    %c0_0 = arith.constant 0 : index
    %0 = vector.load %arg1[%c0, %c0_0] : memref<32x32xf32, #tpu.memory_space<vmem>>, vector<32x32xf32>
    %c0_1 = arith.constant 0 : index
    %c0_2 = arith.constant 0 : index
    %1 = vector.load %arg2[%c0_1, %c0_2] : memref<1x32xf32, #tpu.memory_space<vmem>>, vector<1x32xf32>
    %2 = vector.broadcast %1 : vector<1x32xf32> to vector<32x32xf32>
    %3 = arith.mulf %0, %2 : vector<32x32xf32>
    %c0_3 = arith.constant 0 : index
    %c0_4 = arith.constant 0 : index
    %4 = vector.load %arg3[%c0_3, %c0_4] : memref<1x32xf32, #tpu.memory_space<vmem>>, vector<1x32xf32>
    %5 = vector.broadcast %4 : vector<1x32xf32> to vector<32x32xf32>
    %6 = arith.addf %3, %5 : vector<32x32xf32>
    %cst = arith.constant 0.000000e+00 : f32
    %7 = vector.broadcast %cst : f32 to vector<32x32xf32>
    %8 = arith.maximumf %6, %7 : vector<32x32xf32>
    %c0_5 = arith.constant 0 : index
    %c0_6 = arith.constant 0 : index
    %9 = vector.load %arg4[%c0_5, %c0_6] : memref<32x32xf32, #tpu.memory_space<vmem>>, vector<32x32xf32>
    tpu.vector_store %arg4[%c0_5, %c0_6], %8 {strides = array<i32>} : memref<32x32xf32, #tpu.memory_space<vmem>>, vector<32x32xf32>,
    return
  }
  func.func @transform_0(%arg0: i32) -> (i32, i32) {
    %c0_i32 = arith.constant 0 : i32
    %c0_i32_0 = arith.constant 0 : i32
    return %arg0, %c0_i32 : i32, i32
  }
  func.func @transform_1(%arg0: i32) -> (i32, i32) {
    %c0_i32 = arith.constant 0 : i32
    %c0_i32_0 = arith.constant 0 : i32
    %c0_i32_1 = arith.constant 0 : i32
    return %c0_i32, %c0_i32_0 : i32, i32
  }
  func.func @transform_2(%arg0: i32) -> (i32, i32) {
    %c0_i32 = arith.constant 0 : i32
    %c0_i32_0 = arith.constant 0 : i32
    %c0_i32_1 = arith.constant 0 : i32
    return %c0_i32, %c0_i32_0 : i32, i32
  }
  func.func @transform_3(%arg0: i32) -> (i32, i32) {
    %c0_i32 = arith.constant 0 : i32
    %c0_i32_0 = arith.constant 0 : i32
    return %arg0, %c0_i32 : i32, i32
  }
}

module attributes {stable_mosaic.version = 11 : i64} {
  func.func @_attn_kernel(%arg0: i32, %arg1: memref<1x15x16xf32, #tpu.memory_space<vmem>>, %arg2: memref<1x15x16xf32, #tpu.memory_space<vmem>>, %arg3: memref<1x15x16xf32, #tpu.memory_space<vmem>>, %arg4: memref<1x15x16xf32, #tpu.memory_space<vmem>>) attributes {dimension_semantics = [#tpu.dimension_semantics<parallel>], iteration_bounds = array<i64: 4>, scalar_prefetch = 0 : i64, scratch_operands = 0 : i64, tpu.core_type = #tpu.core_type<tc>, window_params = [{transform_indices = @transform_0, window_bounds = array<i64: 1, 15, 16>}, {transform_indices = @transform_1, window_bounds = array<i64: 1, 15, 16>}, {transform_indices = @transform_2, window_bounds = array<i64: 1, 15, 16>}, {transform_indices = @transform_3, window_bounds = array<i64: 1, 15, 16>}]} {
    %c0 = arith.constant 0 : index
    %c0_0 = arith.constant 0 : index
    %c0_1 = arith.constant 0 : index
    %0 = vector.load %arg1[%c0, %c0_0, %c0_1] : memref<1x15x16xf32, #tpu.memory_space<vmem>>, vector<1x15x16xf32>
    %1 = vector.shape_cast %0 : vector<1x15x16xf32> to vector<15x16xf32>
    %c0_2 = arith.constant 0 : index
    %c0_3 = arith.constant 0 : index
    %c0_4 = arith.constant 0 : index
    %2 = vector.load %arg2[%c0_2, %c0_3, %c0_4] : memref<1x15x16xf32, #tpu.memory_space<vmem>>, vector<1x15x16xf32>
    %3 = vector.shape_cast %2 : vector<1x15x16xf32> to vector<15x16xf32>
    %c0_5 = arith.constant 0 : index
    %c0_6 = arith.constant 0 : index
    %c0_7 = arith.constant 0 : index
    %4 = vector.load %arg3[%c0_5, %c0_6, %c0_7] : memref<1x15x16xf32, #tpu.memory_space<vmem>>, vector<1x15x16xf32>
    %5 = vector.shape_cast %4 : vector<1x15x16xf32> to vector<15x16xf32>
    %cst = arith.constant dense<0.000000e+00> : vector<15x15xf32>
    %6 = tpu.matmul %1, %3, %cst {dimension_numbers = #tpu.dot_dimension_numbers<[1], [1], [0], [0], [0, 0, 1, 0], [], []>} : vector<15x16xf32>, vector<15x16xf32>, vector<15x15xf32> -> vector<15x15xf32>
    %cst_8 = arith.constant 2.500000e-01 : f32
    %7 = vector.broadcast %cst_8 : f32 to vector<15x15xf32>
    %8 = arith.mulf %6, %7 : vector<15x15xf32>
    %cst_9 = arith.constant dense<0xFF800000> : vector<15xf32>
    %9 = vector.multi_reduction <maximumf>, %8, %cst_9 [1] : vector<15x15xf32> to vector<15xf32>
    %10 = vector.shape_cast %9 : vector<15xf32> to vector<15x1xf32>
    %11 = vector.broadcast %10 : vector<15x1xf32> to vector<15x15xf32>
    %12 = arith.subf %8, %11 : vector<15x15xf32>
    %13 = math.exp %12 : vector<15x15xf32>
    %cst_10 = arith.constant dense<0.000000e+00> : vector<15xf32>
    %14 = vector.multi_reduction <add>, %13, %cst_10 [1] : vector<15x15xf32> to vector<15xf32>
    %15 = vector.shape_cast %14 : vector<15xf32> to vector<15x1xf32>
    %16 = tpu.reciprocal %15 {approx = true} : vector<15x1xf32> -> vector<15x1xf32>
    %17 = vector.broadcast %16 : vector<15x1xf32> to vector<15x15xf32>
    %18 = arith.mulf %13, %17 : vector<15x15xf32>
    %cst_11 = arith.constant dense<0.000000e+00> : vector<15x16xf32>
    %19 = tpu.matmul %18, %5, %cst_11 {dimension_numbers = #tpu.dot_dimension_numbers<[1], [0], [0], [1], [0, 0, 1, 1], [], []>} : vector<15x15xf32>, vector<15x16xf32>, vector<15x16xf32> -> vector<15x16xf32>
    %c0_12 = arith.constant 0 : index
    %c0_13 = arith.constant 0 : index
    %c0_14 = arith.constant 0 : index
    %20 = vector.load %arg4[%c0_12, %c0_13, %c0_14] : memref<1x15x16xf32, #tpu.memory_space<vmem>>, vector<1x15x16xf32>
    %21 = vector.shape_cast %20 : vector<1x15x16xf32> to vector<15x16xf32>
    %22 = vector.shape_cast %19 : vector<15x16xf32> to vector<1x15x16xf32>
    tpu.vector_store %arg4[%c0_12, %c0_13, %c0_14], %22 {strides = array<i32>} : memref<1x15x16xf32, #tpu.memory_space<vmem>>, vector<1x15x16xf32>,
    return
  }
  func.func @transform_0(%arg0: i32) -> (i32, i32, i32) {
    %c0_i32 = arith.constant 0 : i32
    %c0_i32_0 = arith.constant 0 : i32
    %c0_i32_1 = arith.constant 0 : i32
    return %arg0, %c0_i32, %c0_i32_0 : i32, i32, i32
  }
  func.func @transform_1(%arg0: i32) -> (i32, i32, i32) {
    %c0_i32 = arith.constant 0 : i32
    %c0_i32_0 = arith.constant 0 : i32
    %c0_i32_1 = arith.constant 0 : i32
    return %arg0, %c0_i32, %c0_i32_0 : i32, i32, i32
  }
  func.func @transform_2(%arg0: i32) -> (i32, i32, i32) {
    %c0_i32 = arith.constant 0 : i32
    %c0_i32_0 = arith.constant 0 : i32
    %c0_i32_1 = arith.constant 0 : i32
    return %arg0, %c0_i32, %c0_i32_0 : i32, i32, i32
  }
  func.func @transform_3(%arg0: i32) -> (i32, i32, i32) {
    %c0_i32 = arith.constant 0 : i32
    %c0_i32_0 = arith.constant 0 : i32
    %c0_i32_1 = arith.constant 0 : i32
    return %arg0, %c0_i32, %c0_i32_0 : i32, i32, i32
  }
}

module attributes {stable_mosaic.version = 11 : i64} {
  func.func @_matmul_epi_kernel(%arg0: i32, %arg1: i32, %arg2: i32, %arg3: memref<16x16xbf16, #tpu.memory_space<vmem>>, %arg4: memref<16x128xbf16, #tpu.memory_space<vmem>>, %arg5: memref<1x128xf32, #tpu.memory_space<vmem>>, %arg6: memref<1x128xf32, #tpu.memory_space<vmem>>, %arg7: memref<16x128xf32, #tpu.memory_space<vmem>>, %arg8: memref<16x128xf32, #tpu.memory_space<vmem>>) attributes {dimension_semantics = [#tpu.dimension_semantics<parallel>, #tpu.dimension_semantics<parallel>, #tpu.dimension_semantics<arbitrary>], iteration_bounds = array<i64: 1, 1, 1>, scalar_prefetch = 0 : i64, scratch_operands = 1 : i64, tpu.core_type = #tpu.core_type<tc>, window_params = [{transform_indices = @transform_0, window_bounds = array<i64: 16, 16>}, {transform_indices = @transform_1, window_bounds = array<i64: 16, 128>}, {transform_indices = @transform_2, window_bounds = array<i64: 1, 128>}, {transform_indices = @transform_3, window_bounds = array<i64: 1, 128>}, {transform_indices = @transform_4, window_bounds = array<i64: 16, 128>}]} {
    %c0_i32 = arith.constant 0 : i32
    %0 = arith.cmpi eq, %arg2, %c0_i32 : i32
    %1 = arith.extui %0 : i1 to i32
    %c0_i32_0 = arith.constant 0 : i32
    %2 = arith.cmpi ne, %1, %c0_i32_0 : i32
    scf.if %2 {
      %cst_10 = arith.constant 0.000000e+00 : f32
      %12 = vector.broadcast %cst_10 : f32 to vector<16x128xf32>
      %c0_11 = arith.constant 0 : index
      %c0_12 = arith.constant 0 : index
      %13 = vector.load %arg8[%c0_11, %c0_12] : memref<16x128xf32, #tpu.memory_space<vmem>>, vector<16x128xf32>
      tpu.vector_store %arg8[%c0_11, %c0_12], %12 {strides = array<i32>} : memref<16x128xf32, #tpu.memory_space<vmem>>, vector<16x128xf32>,
    } else {
    }
    %c0 = arith.constant 0 : index
    %c0_1 = arith.constant 0 : index
    %3 = vector.load %arg8[%c0, %c0_1] : memref<16x128xf32, #tpu.memory_space<vmem>>, vector<16x128xf32>
    %c0_2 = arith.constant 0 : index
    %c0_3 = arith.constant 0 : index
    %4 = vector.load %arg3[%c0_2, %c0_3] : memref<16x16xbf16, #tpu.memory_space<vmem>>, vector<16x16xbf16>
    %c0_4 = arith.constant 0 : index
    %c0_5 = arith.constant 0 : index
    %5 = vector.load %arg4[%c0_4, %c0_5] : memref<16x128xbf16, #tpu.memory_space<vmem>>, vector<16x128xbf16>
    %cst = arith.constant dense<0.000000e+00> : vector<16x128xf32>
    %6 = tpu.matmul %4, %5, %cst {dimension_numbers = #tpu.dot_dimension_numbers<[1], [0], [0], [1], [0, 0, 1, 1], [], []>} : vector<16x16xbf16>, vector<16x128xbf16>, vector<16x128xf32> -> vector<16x128xf32>
    %7 = arith.addf %3, %6 : vector<16x128xf32>
    %c0_6 = arith.constant 0 : index
    %c0_7 = arith.constant 0 : index
    %8 = vector.load %arg8[%c0_6, %c0_7] : memref<16x128xf32, #tpu.memory_space<vmem>>, vector<16x128xf32>
    tpu.vector_store %arg8[%c0_6, %c0_7], %7 {strides = array<i32>} : memref<16x128xf32, #tpu.memory_space<vmem>>, vector<16x128xf32>,
    %c0_i32_8 = arith.constant 0 : i32
    %9 = arith.cmpi eq, %arg2, %c0_i32_8 : i32
    %10 = arith.extui %9 : i1 to i32
    %c0_i32_9 = arith.constant 0 : i32
    %11 = arith.cmpi ne, %10, %c0_i32_9 : i32
    scf.if %11 {
      %c0_10 = arith.constant 0 : index
      %c0_11 = arith.constant 0 : index
      %12 = vector.load %arg8[%c0_10, %c0_11] : memref<16x128xf32, #tpu.memory_space<vmem>>, vector<16x128xf32>
      %c0_12 = arith.constant 0 : index
      %c0_13 = arith.constant 0 : index
      %13 = vector.load %arg5[%c0_12, %c0_13] : memref<1x128xf32, #tpu.memory_space<vmem>>, vector<1x128xf32>
      %14 = vector.broadcast %13 : vector<1x128xf32> to vector<16x128xf32>
      %15 = arith.mulf %12, %14 : vector<16x128xf32>
      %c0_14 = arith.constant 0 : index
      %c0_15 = arith.constant 0 : index
      %16 = vector.load %arg6[%c0_14, %c0_15] : memref<1x128xf32, #tpu.memory_space<vmem>>, vector<1x128xf32>
      %17 = vector.broadcast %16 : vector<1x128xf32> to vector<16x128xf32>
      %18 = arith.addf %15, %17 : vector<16x128xf32>
      %19 = arith.negf %18 : vector<16x128xf32>
      %20 = math.exp %19 : vector<16x128xf32>
      %cst_16 = arith.constant 1.000000e+00 : f32
      %21 = vector.broadcast %cst_16 : f32 to vector<16x128xf32>
      %22 = arith.addf %21, %20 : vector<16x128xf32>
      %23 = arith.divf %21, %22 : vector<16x128xf32>
      %c0_17 = arith.constant 0 : index
      %c0_18 = arith.constant 0 : index
      %24 = vector.load %arg7[%c0_17, %c0_18] : memref<16x128xf32, #tpu.memory_space<vmem>>, vector<16x128xf32>
      tpu.vector_store %arg7[%c0_17, %c0_18], %23 {strides = array<i32>} : memref<16x128xf32, #tpu.memory_space<vmem>>, vector<16x128xf32>,
    } else {
    }
    return
  }
  func.func @transform_0(%arg0: i32, %arg1: i32, %arg2: i32) -> (i32, i32) {
    %c0_i32 = arith.constant 0 : i32
    return %arg0, %arg2 : i32, i32
  }
  func.func @transform_1(%arg0: i32, %arg1: i32, %arg2: i32) -> (i32, i32) {
    %c0_i32 = arith.constant 0 : i32
    return %arg2, %arg1 : i32, i32
  }
  func.func @transform_2(%arg0: i32, %arg1: i32, %arg2: i32) -> (i32, i32) {
    %c0_i32 = arith.constant 0 : i32
    %c0_i32_0 = arith.constant 0 : i32
    return %c0_i32, %arg1 : i32, i32
  }
  func.func @transform_3(%arg0: i32, %arg1: i32, %arg2: i32) -> (i32, i32) {
    %c0_i32 = arith.constant 0 : i32
    %c0_i32_0 = arith.constant 0 : i32
    return %c0_i32, %arg1 : i32, i32
  }
  func.func @transform_4(%arg0: i32, %arg1: i32, %arg2: i32) -> (i32, i32) {
    %c0_i32 = arith.constant 0 : i32
    return %arg0, %arg1 : i32, i32
  }
}

module attributes {stable_mosaic.version = 11 : i64} {
  func.func @_matmul_epi_kernel(%arg0: i32, %arg1: i32, %arg2: i32, %arg3: memref<16x32xbf16, #tpu.memory_space<vmem>>, %arg4: memref<32x128xbf16, #tpu.memory_space<vmem>>, %arg5: memref<1x128xf32, #tpu.memory_space<vmem>>, %arg6: memref<1x128xf32, #tpu.memory_space<vmem>>, %arg7: memref<16x128xf32, #tpu.memory_space<vmem>>, %arg8: memref<16x128xf32, #tpu.memory_space<vmem>>) attributes {dimension_semantics = [#tpu.dimension_semantics<parallel>, #tpu.dimension_semantics<parallel>, #tpu.dimension_semantics<arbitrary>], iteration_bounds = array<i64: 1, 1, 1>, scalar_prefetch = 0 : i64, scratch_operands = 1 : i64, tpu.core_type = #tpu.core_type<tc>, window_params = [{transform_indices = @transform_0, window_bounds = array<i64: 16, 32>}, {transform_indices = @transform_1, window_bounds = array<i64: 32, 128>}, {transform_indices = @transform_2, window_bounds = array<i64: 1, 128>}, {transform_indices = @transform_3, window_bounds = array<i64: 1, 128>}, {transform_indices = @transform_4, window_bounds = array<i64: 16, 128>}]} {
    %c0_i32 = arith.constant 0 : i32
    %0 = arith.cmpi eq, %arg2, %c0_i32 : i32
    %1 = arith.extui %0 : i1 to i32
    %c0_i32_0 = arith.constant 0 : i32
    %2 = arith.cmpi ne, %1, %c0_i32_0 : i32
    scf.if %2 {
      %cst_10 = arith.constant 0.000000e+00 : f32
      %12 = vector.broadcast %cst_10 : f32 to vector<16x128xf32>
      %c0_11 = arith.constant 0 : index
      %c0_12 = arith.constant 0 : index
      %13 = vector.load %arg8[%c0_11, %c0_12] : memref<16x128xf32, #tpu.memory_space<vmem>>, vector<16x128xf32>
      tpu.vector_store %arg8[%c0_11, %c0_12], %12 {strides = array<i32>} : memref<16x128xf32, #tpu.memory_space<vmem>>, vector<16x128xf32>,
    } else {
    }
    %c0 = arith.constant 0 : index
    %c0_1 = arith.constant 0 : index
    %3 = vector.load %arg8[%c0, %c0_1] : memref<16x128xf32, #tpu.memory_space<vmem>>, vector<16x128xf32>
    %c0_2 = arith.constant 0 : index
    %c0_3 = arith.constant 0 : index
    %4 = vector.load %arg3[%c0_2, %c0_3] : memref<16x32xbf16, #tpu.memory_space<vmem>>, vector<16x32xbf16>
    %c0_4 = arith.constant 0 : index
    %c0_5 = arith.constant 0 : index
    %5 = vector.load %arg4[%c0_4, %c0_5] : memref<32x128xbf16, #tpu.memory_space<vmem>>, vector<32x128xbf16>
    %cst = arith.constant dense<0.000000e+00> : vector<16x128xf32>
    %6 = tpu.matmul %4, %5, %cst {dimension_numbers = #tpu.dot_dimension_numbers<[1], [0], [0], [1], [0, 0, 1, 1], [], []>} : vector<16x32xbf16>, vector<32x128xbf16>, vector<16x128xf32> -> vector<16x128xf32>
    %7 = arith.addf %3, %6 : vector<16x128xf32>
    %c0_6 = arith.constant 0 : index
    %c0_7 = arith.constant 0 : index
    %8 = vector.load %arg8[%c0_6, %c0_7] : memref<16x128xf32, #tpu.memory_space<vmem>>, vector<16x128xf32>
    tpu.vector_store %arg8[%c0_6, %c0_7], %7 {strides = array<i32>} : memref<16x128xf32, #tpu.memory_space<vmem>>, vector<16x128xf32>,
    %c0_i32_8 = arith.constant 0 : i32
    %9 = arith.cmpi eq, %arg2, %c0_i32_8 : i32
    %10 = arith.extui %9 : i1 to i32
    %c0_i32_9 = arith.constant 0 : i32
    %11 = arith.cmpi ne, %10, %c0_i32_9 : i32
    scf.if %11 {
      %c0_10 = arith.constant 0 : index
      %c0_11 = arith.constant 0 : index
      %12 = vector.load %arg8[%c0_10, %c0_11] : memref<16x128xf32, #tpu.memory_space<vmem>>, vector<16x128xf32>
      %c0_12 = arith.constant 0 : index
      %c0_13 = arith.constant 0 : index
      %13 = vector.load %arg5[%c0_12, %c0_13] : memref<1x128xf32, #tpu.memory_space<vmem>>, vector<1x128xf32>
      %14 = vector.broadcast %13 : vector<1x128xf32> to vector<16x128xf32>
      %15 = arith.mulf %12, %14 : vector<16x128xf32>
      %c0_14 = arith.constant 0 : index
      %c0_15 = arith.constant 0 : index
      %16 = vector.load %arg6[%c0_14, %c0_15] : memref<1x128xf32, #tpu.memory_space<vmem>>, vector<1x128xf32>
      %17 = vector.broadcast %16 : vector<1x128xf32> to vector<16x128xf32>
      %18 = arith.addf %15, %17 : vector<16x128xf32>
      %cst_16 = arith.constant 0.000000e+00 : f32
      %19 = vector.broadcast %cst_16 : f32 to vector<16x128xf32>
      %20 = arith.maximumf %18, %19 : vector<16x128xf32>
      %c0_17 = arith.constant 0 : index
      %c0_18 = arith.constant 0 : index
      %21 = vector.load %arg7[%c0_17, %c0_18] : memref<16x128xf32, #tpu.memory_space<vmem>>, vector<16x128xf32>
      tpu.vector_store %arg7[%c0_17, %c0_18], %20 {strides = array<i32>} : memref<16x128xf32, #tpu.memory_space<vmem>>, vector<16x128xf32>,
    } else {
    }
    return
  }
  func.func @transform_0(%arg0: i32, %arg1: i32, %arg2: i32) -> (i32, i32) {
    %c0_i32 = arith.constant 0 : i32
    return %arg0, %arg2 : i32, i32
  }
  func.func @transform_1(%arg0: i32, %arg1: i32, %arg2: i32) -> (i32, i32) {
    %c0_i32 = arith.constant 0 : i32
    return %arg2, %arg1 : i32, i32
  }
  func.func @transform_2(%arg0: i32, %arg1: i32, %arg2: i32) -> (i32, i32) {
    %c0_i32 = arith.constant 0 : i32
    %c0_i32_0 = arith.constant 0 : i32
    return %c0_i32, %arg1 : i32, i32
  }
  func.func @transform_3(%arg0: i32, %arg1: i32, %arg2: i32) -> (i32, i32) {
    %c0_i32 = arith.constant 0 : i32
    %c0_i32_0 = arith.constant 0 : i32
    return %c0_i32, %arg1 : i32, i32
  }
  func.func @transform_4(%arg0: i32, %arg1: i32, %arg2: i32) -> (i32, i32) {
    %c0_i32 = arith.constant 0 : i32
    return %arg0, %arg1 : i32, i32
  }
}

module attributes {stable_mosaic.version = 11 : i64} {
  func.func @_channel_gate_kernel(%arg0: i32, %arg1: memref<1x15x32xf32, #tpu.memory_space<vmem>>, %arg2: memref<1x1x32xf32, #tpu.memory_space<vmem>>, %arg3: memref<1x15x32xf32, #tpu.memory_space<vmem>>) attributes {dimension_semantics = [#tpu.dimension_semantics<parallel>], iteration_bounds = array<i64: 2>, scalar_prefetch = 0 : i64, scratch_operands = 0 : i64, tpu.core_type = #tpu.core_type<tc>, window_params = [{transform_indices = @transform_0, window_bounds = array<i64: 1, 15, 32>}, {transform_indices = @transform_1, window_bounds = array<i64: 1, 1, 32>}, {transform_indices = @transform_2, window_bounds = array<i64: 1, 15, 32>}]} {
    %c0 = arith.constant 0 : index
    %c0_0 = arith.constant 0 : index
    %c0_1 = arith.constant 0 : index
    %0 = vector.load %arg1[%c0, %c0_0, %c0_1] : memref<1x15x32xf32, #tpu.memory_space<vmem>>, vector<1x15x32xf32>
    %c0_2 = arith.constant 0 : index
    %c0_3 = arith.constant 0 : index
    %c0_4 = arith.constant 0 : index
    %1 = vector.load %arg2[%c0_2, %c0_3, %c0_4] : memref<1x1x32xf32, #tpu.memory_space<vmem>>, vector<1x1x32xf32>
    %2 = vector.broadcast %1 : vector<1x1x32xf32> to vector<1x15x32xf32>
    %3 = arith.mulf %0, %2 : vector<1x15x32xf32>
    %c0_5 = arith.constant 0 : index
    %c0_6 = arith.constant 0 : index
    %c0_7 = arith.constant 0 : index
    %4 = vector.load %arg3[%c0_5, %c0_6, %c0_7] : memref<1x15x32xf32, #tpu.memory_space<vmem>>, vector<1x15x32xf32>
    tpu.vector_store %arg3[%c0_5, %c0_6, %c0_7], %3 {strides = array<i32>} : memref<1x15x32xf32, #tpu.memory_space<vmem>>, vector<1x15x32xf32>,
    return
  }
  func.func @transform_0(%arg0: i32) -> (i32, i32, i32) {
    %c0_i32 = arith.constant 0 : i32
    %c0_i32_0 = arith.constant 0 : i32
    %c0_i32_1 = arith.constant 0 : i32
    return %arg0, %c0_i32, %c0_i32_0 : i32, i32, i32
  }
  func.func @transform_1(%arg0: i32) -> (i32, i32, i32) {
    %c0_i32 = arith.constant 0 : i32
    %c0_i32_0 = arith.constant 0 : i32
    %c0_i32_1 = arith.constant 0 : i32
    return %arg0, %c0_i32, %c0_i32_0 : i32, i32, i32
  }
  func.func @transform_2(%arg0: i32) -> (i32, i32, i32) {
    %c0_i32 = arith.constant 0 : i32
    %c0_i32_0 = arith.constant 0 : i32
    %c0_i32_1 = arith.constant 0 : i32
    return %arg0, %c0_i32, %c0_i32_0 : i32, i32, i32
  }
}

module attributes {stable_mosaic.version = 11 : i64} {
  func.func @_depthwise_kernel(%arg0: i32, %arg1: memref<1x22x32xf32, #tpu.memory_space<vmem>>, %arg2: memref<8x32xf32, #tpu.memory_space<vmem>>, %arg3: memref<1x32xf32, #tpu.memory_space<vmem>>, %arg4: memref<1x15x32xf32, #tpu.memory_space<vmem>>) attributes {dimension_semantics = [#tpu.dimension_semantics<parallel>], iteration_bounds = array<i64: 2>, scalar_prefetch = 0 : i64, scratch_operands = 0 : i64, tpu.core_type = #tpu.core_type<tc>, window_params = [{transform_indices = @transform_0, window_bounds = array<i64: 1, 22, 32>}, {pipeline_mode = #tpu.pipeline_mode<synchronous>, transform_indices = @transform_1, window_bounds = array<i64: 8, 32>}, {pipeline_mode = #tpu.pipeline_mode<synchronous>, transform_indices = @transform_2, window_bounds = array<i64: 1, 32>}, {transform_indices = @transform_3, window_bounds = array<i64: 1, 15, 32>}]} {
    %c0 = arith.constant 0 : index
    %c0_0 = arith.constant 0 : index
    %c0_1 = arith.constant 0 : index
    %0 = vector.load %arg1[%c0, %c0_0, %c0_1] : memref<1x22x32xf32, #tpu.memory_space<vmem>>, vector<1x22x32xf32>
    %1 = vector.shape_cast %0 : vector<1x22x32xf32> to vector<22x32xf32>
    %cst = arith.constant 0.000000e+00 : f32
    %2 = vector.broadcast %cst : f32 to vector<15x32xf32>
    %3 = vector.extract_strided_slice %1 {offsets = [0, 0], sizes = [15, 32], strides = [1, 1]} : vector<22x32xf32> to vector<15x32xf32>
    %c0_2 = arith.constant 0 : index
    %c0_3 = arith.constant 0 : index
    %4 = vector.load %arg2[%c0_2, %c0_3] : memref<8x32xf32, #tpu.memory_space<vmem>>, vector<1x32xf32>
    %5 = vector.broadcast %4 : vector<1x32xf32> to vector<15x32xf32>
    %6 = arith.mulf %3, %5 : vector<15x32xf32>
    %7 = arith.addf %2, %6 : vector<15x32xf32>
    %8 = vector.extract_strided_slice %1 {offsets = [1, 0], sizes = [15, 32], strides = [1, 1]} : vector<22x32xf32> to vector<15x32xf32>
    %c1 = arith.constant 1 : index
    %c0_4 = arith.constant 0 : index
    %9 = vector.load %arg2[%c1, %c0_4] : memref<8x32xf32, #tpu.memory_space<vmem>>, vector<1x32xf32>
    %10 = vector.broadcast %9 : vector<1x32xf32> to vector<15x32xf32>
    %11 = arith.mulf %8, %10 : vector<15x32xf32>
    %12 = arith.addf %7, %11 : vector<15x32xf32>
    %13 = vector.extract_strided_slice %1 {offsets = [2, 0], sizes = [15, 32], strides = [1, 1]} : vector<22x32xf32> to vector<15x32xf32>
    %c2 = arith.constant 2 : index
    %c0_5 = arith.constant 0 : index
    %14 = vector.load %arg2[%c2, %c0_5] : memref<8x32xf32, #tpu.memory_space<vmem>>, vector<1x32xf32>
    %15 = vector.broadcast %14 : vector<1x32xf32> to vector<15x32xf32>
    %16 = arith.mulf %13, %15 : vector<15x32xf32>
    %17 = arith.addf %12, %16 : vector<15x32xf32>
    %18 = vector.extract_strided_slice %1 {offsets = [3, 0], sizes = [15, 32], strides = [1, 1]} : vector<22x32xf32> to vector<15x32xf32>
    %c3 = arith.constant 3 : index
    %c0_6 = arith.constant 0 : index
    %19 = vector.load %arg2[%c3, %c0_6] : memref<8x32xf32, #tpu.memory_space<vmem>>, vector<1x32xf32>
    %20 = vector.broadcast %19 : vector<1x32xf32> to vector<15x32xf32>
    %21 = arith.mulf %18, %20 : vector<15x32xf32>
    %22 = arith.addf %17, %21 : vector<15x32xf32>
    %23 = vector.extract_strided_slice %1 {offsets = [4, 0], sizes = [15, 32], strides = [1, 1]} : vector<22x32xf32> to vector<15x32xf32>
    %c4 = arith.constant 4 : index
    %c0_7 = arith.constant 0 : index
    %24 = vector.load %arg2[%c4, %c0_7] : memref<8x32xf32, #tpu.memory_space<vmem>>, vector<1x32xf32>
    %25 = vector.broadcast %24 : vector<1x32xf32> to vector<15x32xf32>
    %26 = arith.mulf %23, %25 : vector<15x32xf32>
    %27 = arith.addf %22, %26 : vector<15x32xf32>
    %28 = vector.extract_strided_slice %1 {offsets = [5, 0], sizes = [15, 32], strides = [1, 1]} : vector<22x32xf32> to vector<15x32xf32>
    %c5 = arith.constant 5 : index
    %c0_8 = arith.constant 0 : index
    %29 = vector.load %arg2[%c5, %c0_8] : memref<8x32xf32, #tpu.memory_space<vmem>>, vector<1x32xf32>
    %30 = vector.broadcast %29 : vector<1x32xf32> to vector<15x32xf32>
    %31 = arith.mulf %28, %30 : vector<15x32xf32>
    %32 = arith.addf %27, %31 : vector<15x32xf32>
    %33 = vector.extract_strided_slice %1 {offsets = [6, 0], sizes = [15, 32], strides = [1, 1]} : vector<22x32xf32> to vector<15x32xf32>
    %c6 = arith.constant 6 : index
    %c0_9 = arith.constant 0 : index
    %34 = vector.load %arg2[%c6, %c0_9] : memref<8x32xf32, #tpu.memory_space<vmem>>, vector<1x32xf32>
    %35 = vector.broadcast %34 : vector<1x32xf32> to vector<15x32xf32>
    %36 = arith.mulf %33, %35 : vector<15x32xf32>
    %37 = arith.addf %32, %36 : vector<15x32xf32>
    %38 = vector.extract_strided_slice %1 {offsets = [7, 0], sizes = [15, 32], strides = [1, 1]} : vector<22x32xf32> to vector<15x32xf32>
    %c7 = arith.constant 7 : index
    %c0_10 = arith.constant 0 : index
    %39 = vector.load %arg2[%c7, %c0_10] : memref<8x32xf32, #tpu.memory_space<vmem>>, vector<1x32xf32>
    %40 = vector.broadcast %39 : vector<1x32xf32> to vector<15x32xf32>
    %41 = arith.mulf %38, %40 : vector<15x32xf32>
    %42 = arith.addf %37, %41 : vector<15x32xf32>
    %c0_11 = arith.constant 0 : index
    %c0_12 = arith.constant 0 : index
    %43 = vector.load %arg3[%c0_11, %c0_12] : memref<1x32xf32, #tpu.memory_space<vmem>>, vector<1x32xf32>
    %44 = vector.broadcast %43 : vector<1x32xf32> to vector<15x32xf32>
    %45 = arith.addf %42, %44 : vector<15x32xf32>
    %46 = vector.extract_strided_slice %1 {offsets = [3, 0], sizes = [15, 32], strides = [1, 1]} : vector<22x32xf32> to vector<15x32xf32>
    %47 = arith.negf %45 : vector<15x32xf32>
    %48 = math.exp %47 : vector<15x32xf32>
    %cst_13 = arith.constant 1.000000e+00 : f32
    %49 = vector.broadcast %cst_13 : f32 to vector<15x32xf32>
    %50 = arith.addf %49, %48 : vector<15x32xf32>
    %51 = arith.divf %49, %50 : vector<15x32xf32>
    %52 = arith.mulf %46, %51 : vector<15x32xf32>
    %c0_14 = arith.constant 0 : index
    %c0_15 = arith.constant 0 : index
    %c0_16 = arith.constant 0 : index
    %53 = vector.load %arg4[%c0_14, %c0_15, %c0_16] : memref<1x15x32xf32, #tpu.memory_space<vmem>>, vector<1x15x32xf32>
    %54 = vector.shape_cast %53 : vector<1x15x32xf32> to vector<15x32xf32>
    %55 = vector.shape_cast %52 : vector<15x32xf32> to vector<1x15x32xf32>
    tpu.vector_store %arg4[%c0_14, %c0_15, %c0_16], %55 {strides = array<i32>} : memref<1x15x32xf32, #tpu.memory_space<vmem>>, vector<1x15x32xf32>,
    return
  }
  func.func @transform_0(%arg0: i32) -> (i32, i32, i32) {
    %c0_i32 = arith.constant 0 : i32
    %c0_i32_0 = arith.constant 0 : i32
    %c0_i32_1 = arith.constant 0 : i32
    return %arg0, %c0_i32, %c0_i32_0 : i32, i32, i32
  }
  func.func @transform_1(%arg0: i32) -> (i32, i32) {
    %c0_i32 = arith.constant 0 : i32
    %c0_i32_0 = arith.constant 0 : i32
    %c0_i32_1 = arith.constant 0 : i32
    return %c0_i32, %c0_i32_0 : i32, i32
  }
  func.func @transform_2(%arg0: i32) -> (i32, i32) {
    %c0_i32 = arith.constant 0 : i32
    %c0_i32_0 = arith.constant 0 : i32
    %c0_i32_1 = arith.constant 0 : i32
    return %c0_i32, %c0_i32_0 : i32, i32
  }
  func.func @transform_3(%arg0: i32) -> (i32, i32, i32) {
    %c0_i32 = arith.constant 0 : i32
    %c0_i32_0 = arith.constant 0 : i32
    %c0_i32_1 = arith.constant 0 : i32
    return %arg0, %c0_i32, %c0_i32_0 : i32, i32, i32
  }
}

module attributes {stable_mosaic.version = 11 : i64} {
  func.func @_matmul_epi_kernel(%arg0: i32, %arg1: i32, %arg2: i32, %arg3: memref<32x32xbf16, #tpu.memory_space<vmem>>, %arg4: memref<32x128xbf16, #tpu.memory_space<vmem>>, %arg5: memref<1x128xf32, #tpu.memory_space<vmem>>, %arg6: memref<1x128xf32, #tpu.memory_space<vmem>>, %arg7: memref<32x128xf32, #tpu.memory_space<vmem>>, %arg8: memref<32x128xf32, #tpu.memory_space<vmem>>) attributes {dimension_semantics = [#tpu.dimension_semantics<parallel>, #tpu.dimension_semantics<parallel>, #tpu.dimension_semantics<arbitrary>], iteration_bounds = array<i64: 1, 1, 1>, scalar_prefetch = 0 : i64, scratch_operands = 1 : i64, tpu.core_type = #tpu.core_type<tc>, window_params = [{transform_indices = @transform_0, window_bounds = array<i64: 32, 32>}, {transform_indices = @transform_1, window_bounds = array<i64: 32, 128>}, {transform_indices = @transform_2, window_bounds = array<i64: 1, 128>}, {transform_indices = @transform_3, window_bounds = array<i64: 1, 128>}, {transform_indices = @transform_4, window_bounds = array<i64: 32, 128>}]} {
    %c0_i32 = arith.constant 0 : i32
    %0 = arith.cmpi eq, %arg2, %c0_i32 : i32
    %1 = arith.extui %0 : i1 to i32
    %c0_i32_0 = arith.constant 0 : i32
    %2 = arith.cmpi ne, %1, %c0_i32_0 : i32
    scf.if %2 {
      %cst_10 = arith.constant 0.000000e+00 : f32
      %12 = vector.broadcast %cst_10 : f32 to vector<32x128xf32>
      %c0_11 = arith.constant 0 : index
      %c0_12 = arith.constant 0 : index
      %13 = vector.load %arg8[%c0_11, %c0_12] : memref<32x128xf32, #tpu.memory_space<vmem>>, vector<32x128xf32>
      tpu.vector_store %arg8[%c0_11, %c0_12], %12 {strides = array<i32>} : memref<32x128xf32, #tpu.memory_space<vmem>>, vector<32x128xf32>,
    } else {
    }
    %c0 = arith.constant 0 : index
    %c0_1 = arith.constant 0 : index
    %3 = vector.load %arg8[%c0, %c0_1] : memref<32x128xf32, #tpu.memory_space<vmem>>, vector<32x128xf32>
    %c0_2 = arith.constant 0 : index
    %c0_3 = arith.constant 0 : index
    %4 = vector.load %arg3[%c0_2, %c0_3] : memref<32x32xbf16, #tpu.memory_space<vmem>>, vector<32x32xbf16>
    %c0_4 = arith.constant 0 : index
    %c0_5 = arith.constant 0 : index
    %5 = vector.load %arg4[%c0_4, %c0_5] : memref<32x128xbf16, #tpu.memory_space<vmem>>, vector<32x128xbf16>
    %cst = arith.constant dense<0.000000e+00> : vector<32x128xf32>
    %6 = tpu.matmul %4, %5, %cst {dimension_numbers = #tpu.dot_dimension_numbers<[1], [0], [0], [1], [0, 0, 1, 1], [], []>} : vector<32x32xbf16>, vector<32x128xbf16>, vector<32x128xf32> -> vector<32x128xf32>
    %7 = arith.addf %3, %6 : vector<32x128xf32>
    %c0_6 = arith.constant 0 : index
    %c0_7 = arith.constant 0 : index
    %8 = vector.load %arg8[%c0_6, %c0_7] : memref<32x128xf32, #tpu.memory_space<vmem>>, vector<32x128xf32>
    tpu.vector_store %arg8[%c0_6, %c0_7], %7 {strides = array<i32>} : memref<32x128xf32, #tpu.memory_space<vmem>>, vector<32x128xf32>,
    %c0_i32_8 = arith.constant 0 : i32
    %9 = arith.cmpi eq, %arg2, %c0_i32_8 : i32
    %10 = arith.extui %9 : i1 to i32
    %c0_i32_9 = arith.constant 0 : i32
    %11 = arith.cmpi ne, %10, %c0_i32_9 : i32
    scf.if %11 {
      %c0_10 = arith.constant 0 : index
      %c0_11 = arith.constant 0 : index
      %12 = vector.load %arg8[%c0_10, %c0_11] : memref<32x128xf32, #tpu.memory_space<vmem>>, vector<32x128xf32>
      %c0_12 = arith.constant 0 : index
      %c0_13 = arith.constant 0 : index
      %13 = vector.load %arg5[%c0_12, %c0_13] : memref<1x128xf32, #tpu.memory_space<vmem>>, vector<1x128xf32>
      %14 = vector.broadcast %13 : vector<1x128xf32> to vector<32x128xf32>
      %15 = arith.mulf %12, %14 : vector<32x128xf32>
      %c0_14 = arith.constant 0 : index
      %c0_15 = arith.constant 0 : index
      %16 = vector.load %arg6[%c0_14, %c0_15] : memref<1x128xf32, #tpu.memory_space<vmem>>, vector<1x128xf32>
      %17 = vector.broadcast %16 : vector<1x128xf32> to vector<32x128xf32>
      %18 = arith.addf %15, %17 : vector<32x128xf32>
      %cst_16 = arith.constant 0.000000e+00 : f32
      %19 = vector.broadcast %cst_16 : f32 to vector<32x128xf32>
      %20 = arith.maximumf %18, %19 : vector<32x128xf32>
      %c0_17 = arith.constant 0 : index
      %c0_18 = arith.constant 0 : index
      %21 = vector.load %arg7[%c0_17, %c0_18] : memref<32x128xf32, #tpu.memory_space<vmem>>, vector<32x128xf32>
      tpu.vector_store %arg7[%c0_17, %c0_18], %20 {strides = array<i32>} : memref<32x128xf32, #tpu.memory_space<vmem>>, vector<32x128xf32>,
    } else {
    }
    return
  }
  func.func @transform_0(%arg0: i32, %arg1: i32, %arg2: i32) -> (i32, i32) {
    %c0_i32 = arith.constant 0 : i32
    return %arg0, %arg2 : i32, i32
  }
  func.func @transform_1(%arg0: i32, %arg1: i32, %arg2: i32) -> (i32, i32) {
    %c0_i32 = arith.constant 0 : i32
    return %arg2, %arg1 : i32, i32
  }
  func.func @transform_2(%arg0: i32, %arg1: i32, %arg2: i32) -> (i32, i32) {
    %c0_i32 = arith.constant 0 : i32
    %c0_i32_0 = arith.constant 0 : i32
    return %c0_i32, %arg1 : i32, i32
  }
  func.func @transform_3(%arg0: i32, %arg1: i32, %arg2: i32) -> (i32, i32) {
    %c0_i32 = arith.constant 0 : i32
    %c0_i32_0 = arith.constant 0 : i32
    return %c0_i32, %arg1 : i32, i32
  }
  func.func @transform_4(%arg0: i32, %arg1: i32, %arg2: i32) -> (i32, i32) {
    %c0_i32 = arith.constant 0 : i32
    return %arg0, %arg1 : i32, i32
  }
}

module attributes {stable_mosaic.version = 11 : i64} {
  func.func @_affine_split_gate_kernel(%arg0: i32, %arg1: memref<32x64xf32, #tpu.memory_space<vmem>>, %arg2: memref<1x64xf32, #tpu.memory_space<vmem>>, %arg3: memref<1x64xf32, #tpu.memory_space<vmem>>, %arg4: memref<32x32xf32, #tpu.memory_space<vmem>>) attributes {dimension_semantics = [#tpu.dimension_semantics<parallel>], iteration_bounds = array<i64: 1>, scalar_prefetch = 0 : i64, scratch_operands = 0 : i64, tpu.core_type = #tpu.core_type<tc>, window_params = [{transform_indices = @transform_0, window_bounds = array<i64: 32, 64>}, {pipeline_mode = #tpu.pipeline_mode<synchronous>, transform_indices = @transform_1, window_bounds = array<i64: 1, 64>}, {pipeline_mode = #tpu.pipeline_mode<synchronous>, transform_indices = @transform_2, window_bounds = array<i64: 1, 64>}, {transform_indices = @transform_3, window_bounds = array<i64: 32, 32>}]} {
    %c0 = arith.constant 0 : index
    %c0_0 = arith.constant 0 : index
    %0 = vector.load %arg1[%c0, %c0_0] : memref<32x64xf32, #tpu.memory_space<vmem>>, vector<32x64xf32>
    %c0_1 = arith.constant 0 : index
    %c0_2 = arith.constant 0 : index
    %1 = vector.load %arg2[%c0_1, %c0_2] : memref<1x64xf32, #tpu.memory_space<vmem>>, vector<1x64xf32>
    %2 = vector.broadcast %1 : vector<1x64xf32> to vector<32x64xf32>
    %3 = arith.mulf %0, %2 : vector<32x64xf32>
    %c0_3 = arith.constant 0 : index
    %c0_4 = arith.constant 0 : index
    %4 = vector.load %arg3[%c0_3, %c0_4] : memref<1x64xf32, #tpu.memory_space<vmem>>, vector<1x64xf32>
    %5 = vector.broadcast %4 : vector<1x64xf32> to vector<32x64xf32>
    %6 = arith.addf %3, %5 : vector<32x64xf32>
    %7 = vector.extract_strided_slice %6 {offsets = [0, 0], sizes = [32, 32], strides = [1, 1]} : vector<32x64xf32> to vector<32x32xf32>
    %8 = vector.extract_strided_slice %6 {offsets = [0, 32], sizes = [32, 32], strides = [1, 1]} : vector<32x64xf32> to vector<32x32xf32>
    %9 = arith.negf %8 : vector<32x32xf32>
    %10 = math.exp %9 : vector<32x32xf32>
    %cst = arith.constant 1.000000e+00 : f32
    %11 = vector.broadcast %cst : f32 to vector<32x32xf32>
    %12 = arith.addf %11, %10 : vector<32x32xf32>
    %13 = arith.divf %11, %12 : vector<32x32xf32>
    %14 = arith.mulf %7, %13 : vector<32x32xf32>
    %c0_5 = arith.constant 0 : index
    %c0_6 = arith.constant 0 : index
    %15 = vector.load %arg4[%c0_5, %c0_6] : memref<32x32xf32, #tpu.memory_space<vmem>>, vector<32x32xf32>
    tpu.vector_store %arg4[%c0_5, %c0_6], %14 {strides = array<i32>} : memref<32x32xf32, #tpu.memory_space<vmem>>, vector<32x32xf32>,
    return
  }
  func.func @transform_0(%arg0: i32) -> (i32, i32) {
    %c0_i32 = arith.constant 0 : i32
    %c0_i32_0 = arith.constant 0 : i32
    return %arg0, %c0_i32 : i32, i32
  }
  func.func @transform_1(%arg0: i32) -> (i32, i32) {
    %c0_i32 = arith.constant 0 : i32
    %c0_i32_0 = arith.constant 0 : i32
    %c0_i32_1 = arith.constant 0 : i32
    return %c0_i32, %c0_i32_0 : i32, i32
  }
  func.func @transform_2(%arg0: i32) -> (i32, i32) {
    %c0_i32 = arith.constant 0 : i32
    %c0_i32_0 = arith.constant 0 : i32
    %c0_i32_1 = arith.constant 0 : i32
    return %c0_i32, %c0_i32_0 : i32, i32
  }
  func.func @transform_3(%arg0: i32) -> (i32, i32) {
    %c0_i32 = arith.constant 0 : i32
    %c0_i32_0 = arith.constant 0 : i32
    return %arg0, %c0_i32 : i32, i32
  }
}

module attributes {stable_mosaic.version = 11 : i64} {
  func.func @_depthwise_kernel(%arg0: i32, %arg1: memref<1x17x32xf32, #tpu.memory_space<vmem>>, %arg2: memref<3x32xf32, #tpu.memory_space<vmem>>, %arg3: memref<1x32xf32, #tpu.memory_space<vmem>>, %arg4: memref<1x15x32xf32, #tpu.memory_space<vmem>>) attributes {dimension_semantics = [#tpu.dimension_semantics<parallel>], iteration_bounds = array<i64: 2>, scalar_prefetch = 0 : i64, scratch_operands = 0 : i64, tpu.core_type = #tpu.core_type<tc>, window_params = [{transform_indices = @transform_0, window_bounds = array<i64: 1, 17, 32>}, {pipeline_mode = #tpu.pipeline_mode<synchronous>, transform_indices = @transform_1, window_bounds = array<i64: 3, 32>}, {pipeline_mode = #tpu.pipeline_mode<synchronous>, transform_indices = @transform_2, window_bounds = array<i64: 1, 32>}, {transform_indices = @transform_3, window_bounds = array<i64: 1, 15, 32>}]} {
    %c0 = arith.constant 0 : index
    %c0_0 = arith.constant 0 : index
    %c0_1 = arith.constant 0 : index
    %0 = vector.load %arg1[%c0, %c0_0, %c0_1] : memref<1x17x32xf32, #tpu.memory_space<vmem>>, vector<1x17x32xf32>
    %1 = vector.shape_cast %0 : vector<1x17x32xf32> to vector<17x32xf32>
    %cst = arith.constant 0.000000e+00 : f32
    %2 = vector.broadcast %cst : f32 to vector<15x32xf32>
    %3 = vector.extract_strided_slice %1 {offsets = [0, 0], sizes = [15, 32], strides = [1, 1]} : vector<17x32xf32> to vector<15x32xf32>
    %c0_2 = arith.constant 0 : index
    %c0_3 = arith.constant 0 : index
    %4 = vector.load %arg2[%c0_2, %c0_3] : memref<3x32xf32, #tpu.memory_space<vmem>>, vector<1x32xf32>
    %5 = vector.broadcast %4 : vector<1x32xf32> to vector<15x32xf32>
    %6 = arith.mulf %3, %5 : vector<15x32xf32>
    %7 = arith.addf %2, %6 : vector<15x32xf32>
    %8 = vector.extract_strided_slice %1 {offsets = [1, 0], sizes = [15, 32], strides = [1, 1]} : vector<17x32xf32> to vector<15x32xf32>
    %c1 = arith.constant 1 : index
    %c0_4 = arith.constant 0 : index
    %9 = vector.load %arg2[%c1, %c0_4] : memref<3x32xf32, #tpu.memory_space<vmem>>, vector<1x32xf32>
    %10 = vector.broadcast %9 : vector<1x32xf32> to vector<15x32xf32>
    %11 = arith.mulf %8, %10 : vector<15x32xf32>
    %12 = arith.addf %7, %11 : vector<15x32xf32>
    %13 = vector.extract_strided_slice %1 {offsets = [2, 0], sizes = [15, 32], strides = [1, 1]} : vector<17x32xf32> to vector<15x32xf32>
    %c2 = arith.constant 2 : index
    %c0_5 = arith.constant 0 : index
    %14 = vector.load %arg2[%c2, %c0_5] : memref<3x32xf32, #tpu.memory_space<vmem>>, vector<1x32xf32>
    %15 = vector.broadcast %14 : vector<1x32xf32> to vector<15x32xf32>
    %16 = arith.mulf %13, %15 : vector<15x32xf32>
    %17 = arith.addf %12, %16 : vector<15x32xf32>
    %c0_6 = arith.constant 0 : index
    %c0_7 = arith.constant 0 : index
    %18 = vector.load %arg3[%c0_6, %c0_7] : memref<1x32xf32, #tpu.memory_space<vmem>>, vector<1x32xf32>
    %19 = vector.broadcast %18 : vector<1x32xf32> to vector<15x32xf32>
    %20 = arith.addf %17, %19 : vector<15x32xf32>
    %c0_8 = arith.constant 0 : index
    %c0_9 = arith.constant 0 : index
    %c0_10 = arith.constant 0 : index
    %21 = vector.load %arg4[%c0_8, %c0_9, %c0_10] : memref<1x15x32xf32, #tpu.memory_space<vmem>>, vector<1x15x32xf32>
    %22 = vector.shape_cast %21 : vector<1x15x32xf32> to vector<15x32xf32>
    %23 = vector.shape_cast %20 : vector<15x32xf32> to vector<1x15x32xf32>
    tpu.vector_store %arg4[%c0_8, %c0_9, %c0_10], %23 {strides = array<i32>} : memref<1x15x32xf32, #tpu.memory_space<vmem>>, vector<1x15x32xf32>,
    return
  }
  func.func @transform_0(%arg0: i32) -> (i32, i32, i32) {
    %c0_i32 = arith.constant 0 : i32
    %c0_i32_0 = arith.constant 0 : i32
    %c0_i32_1 = arith.constant 0 : i32
    return %arg0, %c0_i32, %c0_i32_0 : i32, i32, i32
  }
  func.func @transform_1(%arg0: i32) -> (i32, i32) {
    %c0_i32 = arith.constant 0 : i32
    %c0_i32_0 = arith.constant 0 : i32
    %c0_i32_1 = arith.constant 0 : i32
    return %c0_i32, %c0_i32_0 : i32, i32
  }
  func.func @transform_2(%arg0: i32) -> (i32, i32) {
    %c0_i32 = arith.constant 0 : i32
    %c0_i32_0 = arith.constant 0 : i32
    %c0_i32_1 = arith.constant 0 : i32
    return %c0_i32, %c0_i32_0 : i32, i32
  }
  func.func @transform_3(%arg0: i32) -> (i32, i32, i32) {
    %c0_i32 = arith.constant 0 : i32
    %c0_i32_0 = arith.constant 0 : i32
    %c0_i32_1 = arith.constant 0 : i32
    return %arg0, %c0_i32, %c0_i32_0 : i32, i32, i32
  }
}

module attributes {stable_mosaic.version = 11 : i64} {
  func.func @_affine_act_kernel(%arg0: i32, %arg1: memref<32x32xf32, #tpu.memory_space<vmem>>, %arg2: memref<1x32xf32, #tpu.memory_space<vmem>>, %arg3: memref<1x32xf32, #tpu.memory_space<vmem>>, %arg4: memref<32x32xf32, #tpu.memory_space<vmem>>) attributes {dimension_semantics = [#tpu.dimension_semantics<parallel>], iteration_bounds = array<i64: 1>, scalar_prefetch = 0 : i64, scratch_operands = 0 : i64, tpu.core_type = #tpu.core_type<tc>, window_params = [{transform_indices = @transform_0, window_bounds = array<i64: 32, 32>}, {pipeline_mode = #tpu.pipeline_mode<synchronous>, transform_indices = @transform_1, window_bounds = array<i64: 1, 32>}, {pipeline_mode = #tpu.pipeline_mode<synchronous>, transform_indices = @transform_2, window_bounds = array<i64: 1, 32>}, {transform_indices = @transform_3, window_bounds = array<i64: 32, 32>}]} {
    %c0 = arith.constant 0 : index
    %c0_0 = arith.constant 0 : index
    %0 = vector.load %arg1[%c0, %c0_0] : memref<32x32xf32, #tpu.memory_space<vmem>>, vector<32x32xf32>
    %c0_1 = arith.constant 0 : index
    %c0_2 = arith.constant 0 : index
    %1 = vector.load %arg2[%c0_1, %c0_2] : memref<1x32xf32, #tpu.memory_space<vmem>>, vector<1x32xf32>
    %2 = vector.broadcast %1 : vector<1x32xf32> to vector<32x32xf32>
    %3 = arith.mulf %0, %2 : vector<32x32xf32>
    %c0_3 = arith.constant 0 : index
    %c0_4 = arith.constant 0 : index
    %4 = vector.load %arg3[%c0_3, %c0_4] : memref<1x32xf32, #tpu.memory_space<vmem>>, vector<1x32xf32>
    %5 = vector.broadcast %4 : vector<1x32xf32> to vector<32x32xf32>
    %6 = arith.addf %3, %5 : vector<32x32xf32>
    %7 = arith.negf %6 : vector<32x32xf32>
    %8 = math.exp %7 : vector<32x32xf32>
    %cst = arith.constant 1.000000e+00 : f32
    %9 = vector.broadcast %cst : f32 to vector<32x32xf32>
    %10 = arith.addf %9, %8 : vector<32x32xf32>
    %11 = arith.divf %9, %10 : vector<32x32xf32>
    %12 = arith.mulf %6, %11 : vector<32x32xf32>
    %c0_5 = arith.constant 0 : index
    %c0_6 = arith.constant 0 : index
    %13 = vector.load %arg4[%c0_5, %c0_6] : memref<32x32xf32, #tpu.memory_space<vmem>>, vector<32x32xf32>
    tpu.vector_store %arg4[%c0_5, %c0_6], %12 {strides = array<i32>} : memref<32x32xf32, #tpu.memory_space<vmem>>, vector<32x32xf32>,
    return
  }
  func.func @transform_0(%arg0: i32) -> (i32, i32) {
    %c0_i32 = arith.constant 0 : i32
    %c0_i32_0 = arith.constant 0 : i32
    return %arg0, %c0_i32 : i32, i32
  }
  func.func @transform_1(%arg0: i32) -> (i32, i32) {
    %c0_i32 = arith.constant 0 : i32
    %c0_i32_0 = arith.constant 0 : i32
    %c0_i32_1 = arith.constant 0 : i32
    return %c0_i32, %c0_i32_0 : i32, i32
  }
  func.func @transform_2(%arg0: i32) -> (i32, i32) {
    %c0_i32 = arith.constant 0 : i32
    %c0_i32_0 = arith.constant 0 : i32
    %c0_i32_1 = arith.constant 0 : i32
    return %c0_i32, %c0_i32_0 : i32, i32
  }
  func.func @transform_3(%arg0: i32) -> (i32, i32) {
    %c0_i32 = arith.constant 0 : i32
    %c0_i32_0 = arith.constant 0 : i32
    return %arg0, %c0_i32 : i32, i32
  }
}

module attributes {stable_mosaic.version = 11 : i64} {
  func.func @_attn_kernel(%arg0: i32, %arg1: memref<1x32x8xf32, #tpu.memory_space<vmem>>, %arg2: memref<1x32x8xf32, #tpu.memory_space<vmem>>, %arg3: memref<1x32x8xf32, #tpu.memory_space<vmem>>, %arg4: memref<1x32x8xf32, #tpu.memory_space<vmem>>) attributes {dimension_semantics = [#tpu.dimension_semantics<parallel>], iteration_bounds = array<i64: 4>, scalar_prefetch = 0 : i64, scratch_operands = 0 : i64, tpu.core_type = #tpu.core_type<tc>, window_params = [{transform_indices = @transform_0, window_bounds = array<i64: 1, 32, 8>}, {transform_indices = @transform_1, window_bounds = array<i64: 1, 32, 8>}, {transform_indices = @transform_2, window_bounds = array<i64: 1, 32, 8>}, {transform_indices = @transform_3, window_bounds = array<i64: 1, 32, 8>}]} {
    %c0 = arith.constant 0 : index
    %c0_0 = arith.constant 0 : index
    %c0_1 = arith.constant 0 : index
    %0 = vector.load %arg1[%c0, %c0_0, %c0_1] : memref<1x32x8xf32, #tpu.memory_space<vmem>>, vector<1x32x8xf32>
    %1 = vector.shape_cast %0 : vector<1x32x8xf32> to vector<32x8xf32>
    %c0_2 = arith.constant 0 : index
    %c0_3 = arith.constant 0 : index
    %c0_4 = arith.constant 0 : index
    %2 = vector.load %arg2[%c0_2, %c0_3, %c0_4] : memref<1x32x8xf32, #tpu.memory_space<vmem>>, vector<1x32x8xf32>
    %3 = vector.shape_cast %2 : vector<1x32x8xf32> to vector<32x8xf32>
    %c0_5 = arith.constant 0 : index
    %c0_6 = arith.constant 0 : index
    %c0_7 = arith.constant 0 : index
    %4 = vector.load %arg3[%c0_5, %c0_6, %c0_7] : memref<1x32x8xf32, #tpu.memory_space<vmem>>, vector<1x32x8xf32>
    %5 = vector.shape_cast %4 : vector<1x32x8xf32> to vector<32x8xf32>
    %cst = arith.constant dense<0.000000e+00> : vector<32x32xf32>
    %6 = tpu.matmul %1, %3, %cst {dimension_numbers = #tpu.dot_dimension_numbers<[1], [1], [0], [0], [0, 0, 1, 0], [], []>} : vector<32x8xf32>, vector<32x8xf32>, vector<32x32xf32> -> vector<32x32xf32>
    %cst_8 = arith.constant 0.353553385 : f32
    %7 = vector.broadcast %cst_8 : f32 to vector<32x32xf32>
    %8 = arith.mulf %6, %7 : vector<32x32xf32>
    %cst_9 = arith.constant dense<0xFF800000> : vector<32xf32>
    %9 = vector.multi_reduction <maximumf>, %8, %cst_9 [1] : vector<32x32xf32> to vector<32xf32>
    %10 = vector.shape_cast %9 : vector<32xf32> to vector<32x1xf32>
    %11 = vector.broadcast %10 : vector<32x1xf32> to vector<32x32xf32>
    %12 = arith.subf %8, %11 : vector<32x32xf32>
    %13 = math.exp %12 : vector<32x32xf32>
    %cst_10 = arith.constant dense<0.000000e+00> : vector<32xf32>
    %14 = vector.multi_reduction <add>, %13, %cst_10 [1] : vector<32x32xf32> to vector<32xf32>
    %15 = vector.shape_cast %14 : vector<32xf32> to vector<32x1xf32>
    %16 = tpu.reciprocal %15 {approx = true} : vector<32x1xf32> -> vector<32x1xf32>
    %17 = vector.broadcast %16 : vector<32x1xf32> to vector<32x32xf32>
    %18 = arith.mulf %13, %17 : vector<32x32xf32>
    %cst_11 = arith.constant dense<0.000000e+00> : vector<32x8xf32>
    %19 = tpu.matmul %18, %5, %cst_11 {dimension_numbers = #tpu.dot_dimension_numbers<[1], [0], [0], [1], [0, 0, 1, 1], [], []>} : vector<32x32xf32>, vector<32x8xf32>, vector<32x8xf32> -> vector<32x8xf32>
    %c0_12 = arith.constant 0 : index
    %c0_13 = arith.constant 0 : index
    %c0_14 = arith.constant 0 : index
    %20 = vector.load %arg4[%c0_12, %c0_13, %c0_14] : memref<1x32x8xf32, #tpu.memory_space<vmem>>, vector<1x32x8xf32>
    %21 = vector.shape_cast %20 : vector<1x32x8xf32> to vector<32x8xf32>
    %22 = vector.shape_cast %19 : vector<32x8xf32> to vector<1x32x8xf32>
    tpu.vector_store %arg4[%c0_12, %c0_13, %c0_14], %22 {strides = array<i32>} : memref<1x32x8xf32, #tpu.memory_space<vmem>>, vector<1x32x8xf32>,
    return
  }
  func.func @transform_0(%arg0: i32) -> (i32, i32, i32) {
    %c0_i32 = arith.constant 0 : i32
    %c0_i32_0 = arith.constant 0 : i32
    %c0_i32_1 = arith.constant 0 : i32
    return %arg0, %c0_i32, %c0_i32_0 : i32, i32, i32
  }
  func.func @transform_1(%arg0: i32) -> (i32, i32, i32) {
    %c0_i32 = arith.constant 0 : i32
    %c0_i32_0 = arith.constant 0 : i32
    %c0_i32_1 = arith.constant 0 : i32
    return %arg0, %c0_i32, %c0_i32_0 : i32, i32, i32
  }
  func.func @transform_2(%arg0: i32) -> (i32, i32, i32) {
    %c0_i32 = arith.constant 0 : i32
    %c0_i32_0 = arith.constant 0 : i32
    %c0_i32_1 = arith.constant 0 : i32
    return %arg0, %c0_i32, %c0_i32_0 : i32, i32, i32
  }
  func.func @transform_3(%arg0: i32) -> (i32, i32, i32) {
    %c0_i32 = arith.constant 0 : i32
    %c0_i32_0 = arith.constant 0 : i32
    %c0_i32_1 = arith.constant 0 : i32
    return %arg0, %c0_i32, %c0_i32_0 : i32, i32, i32
  }
}

module attributes {stable_mosaic.version = 11 : i64} {
  func.func @_channel_gate_kernel(%arg0: i32, %arg1: memref<1x32x16xf32, #tpu.memory_space<vmem>>, %arg2: memref<1x1x16xf32, #tpu.memory_space<vmem>>, %arg3: memref<1x32x16xf32, #tpu.memory_space<vmem>>) attributes {dimension_semantics = [#tpu.dimension_semantics<parallel>], iteration_bounds = array<i64: 2>, scalar_prefetch = 0 : i64, scratch_operands = 0 : i64, tpu.core_type = #tpu.core_type<tc>, window_params = [{transform_indices = @transform_0, window_bounds = array<i64: 1, 32, 16>}, {transform_indices = @transform_1, window_bounds = array<i64: 1, 1, 16>}, {transform_indices = @transform_2, window_bounds = array<i64: 1, 32, 16>}]} {
    %c0 = arith.constant 0 : index
    %c0_0 = arith.constant 0 : index
    %c0_1 = arith.constant 0 : index
    %0 = vector.load %arg1[%c0, %c0_0, %c0_1] : memref<1x32x16xf32, #tpu.memory_space<vmem>>, vector<1x32x16xf32>
    %c0_2 = arith.constant 0 : index
    %c0_3 = arith.constant 0 : index
    %c0_4 = arith.constant 0 : index
    %1 = vector.load %arg2[%c0_2, %c0_3, %c0_4] : memref<1x1x16xf32, #tpu.memory_space<vmem>>, vector<1x1x16xf32>
    %2 = vector.broadcast %1 : vector<1x1x16xf32> to vector<1x32x16xf32>
    %3 = arith.mulf %0, %2 : vector<1x32x16xf32>
    %c0_5 = arith.constant 0 : index
    %c0_6 = arith.constant 0 : index
    %c0_7 = arith.constant 0 : index
    %4 = vector.load %arg3[%c0_5, %c0_6, %c0_7] : memref<1x32x16xf32, #tpu.memory_space<vmem>>, vector<1x32x16xf32>
    tpu.vector_store %arg3[%c0_5, %c0_6, %c0_7], %3 {strides = array<i32>} : memref<1x32x16xf32, #tpu.memory_space<vmem>>, vector<1x32x16xf32>,
    return
  }
  func.func @transform_0(%arg0: i32) -> (i32, i32, i32) {
    %c0_i32 = arith.constant 0 : i32
    %c0_i32_0 = arith.constant 0 : i32
    %c0_i32_1 = arith.constant 0 : i32
    return %arg0, %c0_i32, %c0_i32_0 : i32, i32, i32
  }
  func.func @transform_1(%arg0: i32) -> (i32, i32, i32) {
    %c0_i32 = arith.constant 0 : i32
    %c0_i32_0 = arith.constant 0 : i32
    %c0_i32_1 = arith.constant 0 : i32
    return %arg0, %c0_i32, %c0_i32_0 : i32, i32, i32
  }
  func.func @transform_2(%arg0: i32) -> (i32, i32, i32) {
    %c0_i32 = arith.constant 0 : i32
    %c0_i32_0 = arith.constant 0 : i32
    %c0_i32_1 = arith.constant 0 : i32
    return %arg0, %c0_i32, %c0_i32_0 : i32, i32, i32
  }
}

module attributes {stable_mosaic.version = 11 : i64} {
  func.func @_depthwise_kernel(%arg0: i32, %arg1: memref<1x39x16xf32, #tpu.memory_space<vmem>>, %arg2: memref<8x16xf32, #tpu.memory_space<vmem>>, %arg3: memref<1x16xf32, #tpu.memory_space<vmem>>, %arg4: memref<1x32x16xf32, #tpu.memory_space<vmem>>) attributes {dimension_semantics = [#tpu.dimension_semantics<parallel>], iteration_bounds = array<i64: 2>, scalar_prefetch = 0 : i64, scratch_operands = 0 : i64, tpu.core_type = #tpu.core_type<tc>, window_params = [{transform_indices = @transform_0, window_bounds = array<i64: 1, 39, 16>}, {pipeline_mode = #tpu.pipeline_mode<synchronous>, transform_indices = @transform_1, window_bounds = array<i64: 8, 16>}, {pipeline_mode = #tpu.pipeline_mode<synchronous>, transform_indices = @transform_2, window_bounds = array<i64: 1, 16>}, {transform_indices = @transform_3, window_bounds = array<i64: 1, 32, 16>}]} {
    %c0 = arith.constant 0 : index
    %c0_0 = arith.constant 0 : index
    %c0_1 = arith.constant 0 : index
    %0 = vector.load %arg1[%c0, %c0_0, %c0_1] : memref<1x39x16xf32, #tpu.memory_space<vmem>>, vector<1x39x16xf32>
    %1 = vector.shape_cast %0 : vector<1x39x16xf32> to vector<39x16xf32>
    %cst = arith.constant 0.000000e+00 : f32
    %2 = vector.broadcast %cst : f32 to vector<32x16xf32>
    %3 = vector.extract_strided_slice %1 {offsets = [0, 0], sizes = [32, 16], strides = [1, 1]} : vector<39x16xf32> to vector<32x16xf32>
    %c0_2 = arith.constant 0 : index
    %c0_3 = arith.constant 0 : index
    %4 = vector.load %arg2[%c0_2, %c0_3] : memref<8x16xf32, #tpu.memory_space<vmem>>, vector<1x16xf32>
    %5 = vector.broadcast %4 : vector<1x16xf32> to vector<32x16xf32>
    %6 = arith.mulf %3, %5 : vector<32x16xf32>
    %7 = arith.addf %2, %6 : vector<32x16xf32>
    %8 = vector.extract_strided_slice %1 {offsets = [1, 0], sizes = [32, 16], strides = [1, 1]} : vector<39x16xf32> to vector<32x16xf32>
    %c1 = arith.constant 1 : index
    %c0_4 = arith.constant 0 : index
    %9 = vector.load %arg2[%c1, %c0_4] : memref<8x16xf32, #tpu.memory_space<vmem>>, vector<1x16xf32>
    %10 = vector.broadcast %9 : vector<1x16xf32> to vector<32x16xf32>
    %11 = arith.mulf %8, %10 : vector<32x16xf32>
    %12 = arith.addf %7, %11 : vector<32x16xf32>
    %13 = vector.extract_strided_slice %1 {offsets = [2, 0], sizes = [32, 16], strides = [1, 1]} : vector<39x16xf32> to vector<32x16xf32>
    %c2 = arith.constant 2 : index
    %c0_5 = arith.constant 0 : index
    %14 = vector.load %arg2[%c2, %c0_5] : memref<8x16xf32, #tpu.memory_space<vmem>>, vector<1x16xf32>
    %15 = vector.broadcast %14 : vector<1x16xf32> to vector<32x16xf32>
    %16 = arith.mulf %13, %15 : vector<32x16xf32>
    %17 = arith.addf %12, %16 : vector<32x16xf32>
    %18 = vector.extract_strided_slice %1 {offsets = [3, 0], sizes = [32, 16], strides = [1, 1]} : vector<39x16xf32> to vector<32x16xf32>
    %c3 = arith.constant 3 : index
    %c0_6 = arith.constant 0 : index
    %19 = vector.load %arg2[%c3, %c0_6] : memref<8x16xf32, #tpu.memory_space<vmem>>, vector<1x16xf32>
    %20 = vector.broadcast %19 : vector<1x16xf32> to vector<32x16xf32>
    %21 = arith.mulf %18, %20 : vector<32x16xf32>
    %22 = arith.addf %17, %21 : vector<32x16xf32>
    %23 = vector.extract_strided_slice %1 {offsets = [4, 0], sizes = [32, 16], strides = [1, 1]} : vector<39x16xf32> to vector<32x16xf32>
    %c4 = arith.constant 4 : index
    %c0_7 = arith.constant 0 : index
    %24 = vector.load %arg2[%c4, %c0_7] : memref<8x16xf32, #tpu.memory_space<vmem>>, vector<1x16xf32>
    %25 = vector.broadcast %24 : vector<1x16xf32> to vector<32x16xf32>
    %26 = arith.mulf %23, %25 : vector<32x16xf32>
    %27 = arith.addf %22, %26 : vector<32x16xf32>
    %28 = vector.extract_strided_slice %1 {offsets = [5, 0], sizes = [32, 16], strides = [1, 1]} : vector<39x16xf32> to vector<32x16xf32>
    %c5 = arith.constant 5 : index
    %c0_8 = arith.constant 0 : index
    %29 = vector.load %arg2[%c5, %c0_8] : memref<8x16xf32, #tpu.memory_space<vmem>>, vector<1x16xf32>
    %30 = vector.broadcast %29 : vector<1x16xf32> to vector<32x16xf32>
    %31 = arith.mulf %28, %30 : vector<32x16xf32>
    %32 = arith.addf %27, %31 : vector<32x16xf32>
    %33 = vector.extract_strided_slice %1 {offsets = [6, 0], sizes = [32, 16], strides = [1, 1]} : vector<39x16xf32> to vector<32x16xf32>
    %c6 = arith.constant 6 : index
    %c0_9 = arith.constant 0 : index
    %34 = vector.load %arg2[%c6, %c0_9] : memref<8x16xf32, #tpu.memory_space<vmem>>, vector<1x16xf32>
    %35 = vector.broadcast %34 : vector<1x16xf32> to vector<32x16xf32>
    %36 = arith.mulf %33, %35 : vector<32x16xf32>
    %37 = arith.addf %32, %36 : vector<32x16xf32>
    %38 = vector.extract_strided_slice %1 {offsets = [7, 0], sizes = [32, 16], strides = [1, 1]} : vector<39x16xf32> to vector<32x16xf32>
    %c7 = arith.constant 7 : index
    %c0_10 = arith.constant 0 : index
    %39 = vector.load %arg2[%c7, %c0_10] : memref<8x16xf32, #tpu.memory_space<vmem>>, vector<1x16xf32>
    %40 = vector.broadcast %39 : vector<1x16xf32> to vector<32x16xf32>
    %41 = arith.mulf %38, %40 : vector<32x16xf32>
    %42 = arith.addf %37, %41 : vector<32x16xf32>
    %c0_11 = arith.constant 0 : index
    %c0_12 = arith.constant 0 : index
    %43 = vector.load %arg3[%c0_11, %c0_12] : memref<1x16xf32, #tpu.memory_space<vmem>>, vector<1x16xf32>
    %44 = vector.broadcast %43 : vector<1x16xf32> to vector<32x16xf32>
    %45 = arith.addf %42, %44 : vector<32x16xf32>
    %46 = vector.extract_strided_slice %1 {offsets = [3, 0], sizes = [32, 16], strides = [1, 1]} : vector<39x16xf32> to vector<32x16xf32>
    %47 = arith.negf %45 : vector<32x16xf32>
    %48 = math.exp %47 : vector<32x16xf32>
    %cst_13 = arith.constant 1.000000e+00 : f32
    %49 = vector.broadcast %cst_13 : f32 to vector<32x16xf32>
    %50 = arith.addf %49, %48 : vector<32x16xf32>
    %51 = arith.divf %49, %50 : vector<32x16xf32>
    %52 = arith.mulf %46, %51 : vector<32x16xf32>
    %c0_14 = arith.constant 0 : index
    %c0_15 = arith.constant 0 : index
    %c0_16 = arith.constant 0 : index
    %53 = vector.load %arg4[%c0_14, %c0_15, %c0_16] : memref<1x32x16xf32, #tpu.memory_space<vmem>>, vector<1x32x16xf32>
    %54 = vector.shape_cast %53 : vector<1x32x16xf32> to vector<32x16xf32>
    %55 = vector.shape_cast %52 : vector<32x16xf32> to vector<1x32x16xf32>
    tpu.vector_store %arg4[%c0_14, %c0_15, %c0_16], %55 {strides = array<i32>} : memref<1x32x16xf32, #tpu.memory_space<vmem>>, vector<1x32x16xf32>,
    return
  }
  func.func @transform_0(%arg0: i32) -> (i32, i32, i32) {
    %c0_i32 = arith.constant 0 : i32
    %c0_i32_0 = arith.constant 0 : i32
    %c0_i32_1 = arith.constant 0 : i32
    return %arg0, %c0_i32, %c0_i32_0 : i32, i32, i32
  }
  func.func @transform_1(%arg0: i32) -> (i32, i32) {
    %c0_i32 = arith.constant 0 : i32
    %c0_i32_0 = arith.constant 0 : i32
    %c0_i32_1 = arith.constant 0 : i32
    return %c0_i32, %c0_i32_0 : i32, i32
  }
  func.func @transform_2(%arg0: i32) -> (i32, i32) {
    %c0_i32 = arith.constant 0 : i32
    %c0_i32_0 = arith.constant 0 : i32
    %c0_i32_1 = arith.constant 0 : i32
    return %c0_i32, %c0_i32_0 : i32, i32
  }
  func.func @transform_3(%arg0: i32) -> (i32, i32, i32) {
    %c0_i32 = arith.constant 0 : i32
    %c0_i32_0 = arith.constant 0 : i32
    %c0_i32_1 = arith.constant 0 : i32
    return %arg0, %c0_i32, %c0_i32_0 : i32, i32, i32
  }
}

module attributes {stable_mosaic.version = 11 : i64} {
  func.func @_matmul_epi_kernel(%arg0: i32, %arg1: i32, %arg2: i32, %arg3: memref<16x16xbf16, #tpu.memory_space<vmem>>, %arg4: memref<16x128xbf16, #tpu.memory_space<vmem>>, %arg5: memref<1x128xf32, #tpu.memory_space<vmem>>, %arg6: memref<1x128xf32, #tpu.memory_space<vmem>>, %arg7: memref<16x128xf32, #tpu.memory_space<vmem>>, %arg8: memref<16x128xf32, #tpu.memory_space<vmem>>) attributes {dimension_semantics = [#tpu.dimension_semantics<parallel>, #tpu.dimension_semantics<parallel>, #tpu.dimension_semantics<arbitrary>], iteration_bounds = array<i64: 1, 1, 1>, scalar_prefetch = 0 : i64, scratch_operands = 1 : i64, tpu.core_type = #tpu.core_type<tc>, window_params = [{transform_indices = @transform_0, window_bounds = array<i64: 16, 16>}, {transform_indices = @transform_1, window_bounds = array<i64: 16, 128>}, {transform_indices = @transform_2, window_bounds = array<i64: 1, 128>}, {transform_indices = @transform_3, window_bounds = array<i64: 1, 128>}, {transform_indices = @transform_4, window_bounds = array<i64: 16, 128>}]} {
    %c0_i32 = arith.constant 0 : i32
    %0 = arith.cmpi eq, %arg2, %c0_i32 : i32
    %1 = arith.extui %0 : i1 to i32
    %c0_i32_0 = arith.constant 0 : i32
    %2 = arith.cmpi ne, %1, %c0_i32_0 : i32
    scf.if %2 {
      %cst_10 = arith.constant 0.000000e+00 : f32
      %12 = vector.broadcast %cst_10 : f32 to vector<16x128xf32>
      %c0_11 = arith.constant 0 : index
      %c0_12 = arith.constant 0 : index
      %13 = vector.load %arg8[%c0_11, %c0_12] : memref<16x128xf32, #tpu.memory_space<vmem>>, vector<16x128xf32>
      tpu.vector_store %arg8[%c0_11, %c0_12], %12 {strides = array<i32>} : memref<16x128xf32, #tpu.memory_space<vmem>>, vector<16x128xf32>,
    } else {
    }
    %c0 = arith.constant 0 : index
    %c0_1 = arith.constant 0 : index
    %3 = vector.load %arg8[%c0, %c0_1] : memref<16x128xf32, #tpu.memory_space<vmem>>, vector<16x128xf32>
    %c0_2 = arith.constant 0 : index
    %c0_3 = arith.constant 0 : index
    %4 = vector.load %arg3[%c0_2, %c0_3] : memref<16x16xbf16, #tpu.memory_space<vmem>>, vector<16x16xbf16>
    %c0_4 = arith.constant 0 : index
    %c0_5 = arith.constant 0 : index
    %5 = vector.load %arg4[%c0_4, %c0_5] : memref<16x128xbf16, #tpu.memory_space<vmem>>, vector<16x128xbf16>
    %cst = arith.constant dense<0.000000e+00> : vector<16x128xf32>
    %6 = tpu.matmul %4, %5, %cst {dimension_numbers = #tpu.dot_dimension_numbers<[1], [0], [0], [1], [0, 0, 1, 1], [], []>} : vector<16x16xbf16>, vector<16x128xbf16>, vector<16x128xf32> -> vector<16x128xf32>
    %7 = arith.addf %3, %6 : vector<16x128xf32>
    %c0_6 = arith.constant 0 : index
    %c0_7 = arith.constant 0 : index
    %8 = vector.load %arg8[%c0_6, %c0_7] : memref<16x128xf32, #tpu.memory_space<vmem>>, vector<16x128xf32>
    tpu.vector_store %arg8[%c0_6, %c0_7], %7 {strides = array<i32>} : memref<16x128xf32, #tpu.memory_space<vmem>>, vector<16x128xf32>,
    %c0_i32_8 = arith.constant 0 : i32
    %9 = arith.cmpi eq, %arg2, %c0_i32_8 : i32
    %10 = arith.extui %9 : i1 to i32
    %c0_i32_9 = arith.constant 0 : i32
    %11 = arith.cmpi ne, %10, %c0_i32_9 : i32
    scf.if %11 {
      %c0_10 = arith.constant 0 : index
      %c0_11 = arith.constant 0 : index
      %12 = vector.load %arg8[%c0_10, %c0_11] : memref<16x128xf32, #tpu.memory_space<vmem>>, vector<16x128xf32>
      %c0_12 = arith.constant 0 : index
      %c0_13 = arith.constant 0 : index
      %13 = vector.load %arg5[%c0_12, %c0_13] : memref<1x128xf32, #tpu.memory_space<vmem>>, vector<1x128xf32>
      %14 = vector.broadcast %13 : vector<1x128xf32> to vector<16x128xf32>
      %15 = arith.mulf %12, %14 : vector<16x128xf32>
      %c0_14 = arith.constant 0 : index
      %c0_15 = arith.constant 0 : index
      %16 = vector.load %arg6[%c0_14, %c0_15] : memref<1x128xf32, #tpu.memory_space<vmem>>, vector<1x128xf32>
      %17 = vector.broadcast %16 : vector<1x128xf32> to vector<16x128xf32>
      %18 = arith.addf %15, %17 : vector<16x128xf32>
      %cst_16 = arith.constant 0.000000e+00 : f32
      %19 = vector.broadcast %cst_16 : f32 to vector<16x128xf32>
      %20 = arith.maximumf %18, %19 : vector<16x128xf32>
      %c0_17 = arith.constant 0 : index
      %c0_18 = arith.constant 0 : index
      %21 = vector.load %arg7[%c0_17, %c0_18] : memref<16x128xf32, #tpu.memory_space<vmem>>, vector<16x128xf32>
      tpu.vector_store %arg7[%c0_17, %c0_18], %20 {strides = array<i32>} : memref<16x128xf32, #tpu.memory_space<vmem>>, vector<16x128xf32>,
    } else {
    }
    return
  }
  func.func @transform_0(%arg0: i32, %arg1: i32, %arg2: i32) -> (i32, i32) {
    %c0_i32 = arith.constant 0 : i32
    return %arg0, %arg2 : i32, i32
  }
  func.func @transform_1(%arg0: i32, %arg1: i32, %arg2: i32) -> (i32, i32) {
    %c0_i32 = arith.constant 0 : i32
    return %arg2, %arg1 : i32, i32
  }
  func.func @transform_2(%arg0: i32, %arg1: i32, %arg2: i32) -> (i32, i32) {
    %c0_i32 = arith.constant 0 : i32
    %c0_i32_0 = arith.constant 0 : i32
    return %c0_i32, %arg1 : i32, i32
  }
  func.func @transform_3(%arg0: i32, %arg1: i32, %arg2: i32) -> (i32, i32) {
    %c0_i32 = arith.constant 0 : i32
    %c0_i32_0 = arith.constant 0 : i32
    return %c0_i32, %arg1 : i32, i32
  }
  func.func @transform_4(%arg0: i32, %arg1: i32, %arg2: i32) -> (i32, i32) {
    %c0_i32 = arith.constant 0 : i32
    return %arg0, %arg1 : i32, i32
  }
}

module attributes {stable_mosaic.version = 11 : i64} {
  func.func @_depthwise_kernel(%arg0: i32, %arg1: memref<1x34x16xf32, #tpu.memory_space<vmem>>, %arg2: memref<3x16xf32, #tpu.memory_space<vmem>>, %arg3: memref<1x16xf32, #tpu.memory_space<vmem>>, %arg4: memref<1x32x16xf32, #tpu.memory_space<vmem>>) attributes {dimension_semantics = [#tpu.dimension_semantics<parallel>], iteration_bounds = array<i64: 2>, scalar_prefetch = 0 : i64, scratch_operands = 0 : i64, tpu.core_type = #tpu.core_type<tc>, window_params = [{transform_indices = @transform_0, window_bounds = array<i64: 1, 34, 16>}, {pipeline_mode = #tpu.pipeline_mode<synchronous>, transform_indices = @transform_1, window_bounds = array<i64: 3, 16>}, {pipeline_mode = #tpu.pipeline_mode<synchronous>, transform_indices = @transform_2, window_bounds = array<i64: 1, 16>}, {transform_indices = @transform_3, window_bounds = array<i64: 1, 32, 16>}]} {
    %c0 = arith.constant 0 : index
    %c0_0 = arith.constant 0 : index
    %c0_1 = arith.constant 0 : index
    %0 = vector.load %arg1[%c0, %c0_0, %c0_1] : memref<1x34x16xf32, #tpu.memory_space<vmem>>, vector<1x34x16xf32>
    %1 = vector.shape_cast %0 : vector<1x34x16xf32> to vector<34x16xf32>
    %cst = arith.constant 0.000000e+00 : f32
    %2 = vector.broadcast %cst : f32 to vector<32x16xf32>
    %3 = vector.extract_strided_slice %1 {offsets = [0, 0], sizes = [32, 16], strides = [1, 1]} : vector<34x16xf32> to vector<32x16xf32>
    %c0_2 = arith.constant 0 : index
    %c0_3 = arith.constant 0 : index
    %4 = vector.load %arg2[%c0_2, %c0_3] : memref<3x16xf32, #tpu.memory_space<vmem>>, vector<1x16xf32>
    %5 = vector.broadcast %4 : vector<1x16xf32> to vector<32x16xf32>
    %6 = arith.mulf %3, %5 : vector<32x16xf32>
    %7 = arith.addf %2, %6 : vector<32x16xf32>
    %8 = vector.extract_strided_slice %1 {offsets = [1, 0], sizes = [32, 16], strides = [1, 1]} : vector<34x16xf32> to vector<32x16xf32>
    %c1 = arith.constant 1 : index
    %c0_4 = arith.constant 0 : index
    %9 = vector.load %arg2[%c1, %c0_4] : memref<3x16xf32, #tpu.memory_space<vmem>>, vector<1x16xf32>
    %10 = vector.broadcast %9 : vector<1x16xf32> to vector<32x16xf32>
    %11 = arith.mulf %8, %10 : vector<32x16xf32>
    %12 = arith.addf %7, %11 : vector<32x16xf32>
    %13 = vector.extract_strided_slice %1 {offsets = [2, 0], sizes = [32, 16], strides = [1, 1]} : vector<34x16xf32> to vector<32x16xf32>
    %c2 = arith.constant 2 : index
    %c0_5 = arith.constant 0 : index
    %14 = vector.load %arg2[%c2, %c0_5] : memref<3x16xf32, #tpu.memory_space<vmem>>, vector<1x16xf32>
    %15 = vector.broadcast %14 : vector<1x16xf32> to vector<32x16xf32>
    %16 = arith.mulf %13, %15 : vector<32x16xf32>
    %17 = arith.addf %12, %16 : vector<32x16xf32>
    %c0_6 = arith.constant 0 : index
    %c0_7 = arith.constant 0 : index
    %18 = vector.load %arg3[%c0_6, %c0_7] : memref<1x16xf32, #tpu.memory_space<vmem>>, vector<1x16xf32>
    %19 = vector.broadcast %18 : vector<1x16xf32> to vector<32x16xf32>
    %20 = arith.addf %17, %19 : vector<32x16xf32>
    %c0_8 = arith.constant 0 : index
    %c0_9 = arith.constant 0 : index
    %c0_10 = arith.constant 0 : index
    %21 = vector.load %arg4[%c0_8, %c0_9, %c0_10] : memref<1x32x16xf32, #tpu.memory_space<vmem>>, vector<1x32x16xf32>
    %22 = vector.shape_cast %21 : vector<1x32x16xf32> to vector<32x16xf32>
    %23 = vector.shape_cast %20 : vector<32x16xf32> to vector<1x32x16xf32>
    tpu.vector_store %arg4[%c0_8, %c0_9, %c0_10], %23 {strides = array<i32>} : memref<1x32x16xf32, #tpu.memory_space<vmem>>, vector<1x32x16xf32>,
    return
  }
  func.func @transform_0(%arg0: i32) -> (i32, i32, i32) {
    %c0_i32 = arith.constant 0 : i32
    %c0_i32_0 = arith.constant 0 : i32
    %c0_i32_1 = arith.constant 0 : i32
    return %arg0, %c0_i32, %c0_i32_0 : i32, i32, i32
  }
  func.func @transform_1(%arg0: i32) -> (i32, i32) {
    %c0_i32 = arith.constant 0 : i32
    %c0_i32_0 = arith.constant 0 : i32
    %c0_i32_1 = arith.constant 0 : i32
    return %c0_i32, %c0_i32_0 : i32, i32
  }
  func.func @transform_2(%arg0: i32) -> (i32, i32) {
    %c0_i32 = arith.constant 0 : i32
    %c0_i32_0 = arith.constant 0 : i32
    %c0_i32_1 = arith.constant 0 : i32
    return %c0_i32, %c0_i32_0 : i32, i32
  }
  func.func @transform_3(%arg0: i32) -> (i32, i32, i32) {
    %c0_i32 = arith.constant 0 : i32
    %c0_i32_0 = arith.constant 0 : i32
    %c0_i32_1 = arith.constant 0 : i32
    return %arg0, %c0_i32, %c0_i32_0 : i32, i32, i32
  }
}

module attributes {stable_mosaic.version = 11 : i64} {
  func.func @_affine_split_gate_kernel(%arg0: i32, %arg1: memref<64x32xf32, #tpu.memory_space<vmem>>, %arg2: memref<1x32xf32, #tpu.memory_space<vmem>>, %arg3: memref<1x32xf32, #tpu.memory_space<vmem>>, %arg4: memref<64x16xf32, #tpu.memory_space<vmem>>) attributes {dimension_semantics = [#tpu.dimension_semantics<parallel>], iteration_bounds = array<i64: 1>, scalar_prefetch = 0 : i64, scratch_operands = 0 : i64, tpu.core_type = #tpu.core_type<tc>, window_params = [{transform_indices = @transform_0, window_bounds = array<i64: 64, 32>}, {pipeline_mode = #tpu.pipeline_mode<synchronous>, transform_indices = @transform_1, window_bounds = array<i64: 1, 32>}, {pipeline_mode = #tpu.pipeline_mode<synchronous>, transform_indices = @transform_2, window_bounds = array<i64: 1, 32>}, {transform_indices = @transform_3, window_bounds = array<i64: 64, 16>}]} {
    %c0 = arith.constant 0 : index
    %c0_0 = arith.constant 0 : index
    %0 = vector.load %arg1[%c0, %c0_0] : memref<64x32xf32, #tpu.memory_space<vmem>>, vector<64x32xf32>
    %c0_1 = arith.constant 0 : index
    %c0_2 = arith.constant 0 : index
    %1 = vector.load %arg2[%c0_1, %c0_2] : memref<1x32xf32, #tpu.memory_space<vmem>>, vector<1x32xf32>
    %2 = vector.broadcast %1 : vector<1x32xf32> to vector<64x32xf32>
    %3 = arith.mulf %0, %2 : vector<64x32xf32>
    %c0_3 = arith.constant 0 : index
    %c0_4 = arith.constant 0 : index
    %4 = vector.load %arg3[%c0_3, %c0_4] : memref<1x32xf32, #tpu.memory_space<vmem>>, vector<1x32xf32>
    %5 = vector.broadcast %4 : vector<1x32xf32> to vector<64x32xf32>
    %6 = arith.addf %3, %5 : vector<64x32xf32>
    %7 = vector.extract_strided_slice %6 {offsets = [0, 0], sizes = [64, 16], strides = [1, 1]} : vector<64x32xf32> to vector<64x16xf32>
    %8 = vector.extract_strided_slice %6 {offsets = [0, 16], sizes = [64, 16], strides = [1, 1]} : vector<64x32xf32> to vector<64x16xf32>
    %9 = arith.negf %8 : vector<64x16xf32>
    %10 = math.exp %9 : vector<64x16xf32>
    %cst = arith.constant 1.000000e+00 : f32
    %11 = vector.broadcast %cst : f32 to vector<64x16xf32>
    %12 = arith.addf %11, %10 : vector<64x16xf32>
    %13 = arith.divf %11, %12 : vector<64x16xf32>
    %14 = arith.mulf %7, %13 : vector<64x16xf32>
    %c0_5 = arith.constant 0 : index
    %c0_6 = arith.constant 0 : index
    %15 = vector.load %arg4[%c0_5, %c0_6] : memref<64x16xf32, #tpu.memory_space<vmem>>, vector<64x16xf32>
    tpu.vector_store %arg4[%c0_5, %c0_6], %14 {strides = array<i32>} : memref<64x16xf32, #tpu.memory_space<vmem>>, vector<64x16xf32>,
    return
  }
  func.func @transform_0(%arg0: i32) -> (i32, i32) {
    %c0_i32 = arith.constant 0 : i32
    %c0_i32_0 = arith.constant 0 : i32
    return %arg0, %c0_i32 : i32, i32
  }
  func.func @transform_1(%arg0: i32) -> (i32, i32) {
    %c0_i32 = arith.constant 0 : i32
    %c0_i32_0 = arith.constant 0 : i32
    %c0_i32_1 = arith.constant 0 : i32
    return %c0_i32, %c0_i32_0 : i32, i32
  }
  func.func @transform_2(%arg0: i32) -> (i32, i32) {
    %c0_i32 = arith.constant 0 : i32
    %c0_i32_0 = arith.constant 0 : i32
    %c0_i32_1 = arith.constant 0 : i32
    return %c0_i32, %c0_i32_0 : i32, i32
  }
  func.func @transform_3(%arg0: i32) -> (i32, i32) {
    %c0_i32 = arith.constant 0 : i32
    %c0_i32_0 = arith.constant 0 : i32
    return %arg0, %c0_i32 : i32, i32
  }
}

module attributes {stable_mosaic.version = 11 : i64} {
  func.func @_affine_act_kernel(%arg0: i32, %arg1: memref<64x16xf32, #tpu.memory_space<vmem>>, %arg2: memref<1x16xf32, #tpu.memory_space<vmem>>, %arg3: memref<1x16xf32, #tpu.memory_space<vmem>>, %arg4: memref<64x16xf32, #tpu.memory_space<vmem>>) attributes {dimension_semantics = [#tpu.dimension_semantics<parallel>], iteration_bounds = array<i64: 1>, scalar_prefetch = 0 : i64, scratch_operands = 0 : i64, tpu.core_type = #tpu.core_type<tc>, window_params = [{transform_indices = @transform_0, window_bounds = array<i64: 64, 16>}, {pipeline_mode = #tpu.pipeline_mode<synchronous>, transform_indices = @transform_1, window_bounds = array<i64: 1, 16>}, {pipeline_mode = #tpu.pipeline_mode<synchronous>, transform_indices = @transform_2, window_bounds = array<i64: 1, 16>}, {transform_indices = @transform_3, window_bounds = array<i64: 64, 16>}]} {
    %c0 = arith.constant 0 : index
    %c0_0 = arith.constant 0 : index
    %0 = vector.load %arg1[%c0, %c0_0] : memref<64x16xf32, #tpu.memory_space<vmem>>, vector<64x16xf32>
    %c0_1 = arith.constant 0 : index
    %c0_2 = arith.constant 0 : index
    %1 = vector.load %arg2[%c0_1, %c0_2] : memref<1x16xf32, #tpu.memory_space<vmem>>, vector<1x16xf32>
    %2 = vector.broadcast %1 : vector<1x16xf32> to vector<64x16xf32>
    %3 = arith.mulf %0, %2 : vector<64x16xf32>
    %c0_3 = arith.constant 0 : index
    %c0_4 = arith.constant 0 : index
    %4 = vector.load %arg3[%c0_3, %c0_4] : memref<1x16xf32, #tpu.memory_space<vmem>>, vector<1x16xf32>
    %5 = vector.broadcast %4 : vector<1x16xf32> to vector<64x16xf32>
    %6 = arith.addf %3, %5 : vector<64x16xf32>
    %7 = arith.negf %6 : vector<64x16xf32>
    %8 = math.exp %7 : vector<64x16xf32>
    %cst = arith.constant 1.000000e+00 : f32
    %9 = vector.broadcast %cst : f32 to vector<64x16xf32>
    %10 = arith.addf %9, %8 : vector<64x16xf32>
    %11 = arith.divf %9, %10 : vector<64x16xf32>
    %12 = arith.mulf %6, %11 : vector<64x16xf32>
    %c0_5 = arith.constant 0 : index
    %c0_6 = arith.constant 0 : index
    %13 = vector.load %arg4[%c0_5, %c0_6] : memref<64x16xf32, #tpu.memory_space<vmem>>, vector<64x16xf32>
    tpu.vector_store %arg4[%c0_5, %c0_6], %12 {strides = array<i32>} : memref<64x16xf32, #tpu.memory_space<vmem>>, vector<64x16xf32>,
    return
  }
  func.func @transform_0(%arg0: i32) -> (i32, i32) {
    %c0_i32 = arith.constant 0 : i32
    %c0_i32_0 = arith.constant 0 : i32
    return %arg0, %c0_i32 : i32, i32
  }
  func.func @transform_1(%arg0: i32) -> (i32, i32) {
    %c0_i32 = arith.constant 0 : i32
    %c0_i32_0 = arith.constant 0 : i32
    %c0_i32_1 = arith.constant 0 : i32
    return %c0_i32, %c0_i32_0 : i32, i32
  }
  func.func @transform_2(%arg0: i32) -> (i32, i32) {
    %c0_i32 = arith.constant 0 : i32
    %c0_i32_0 = arith.constant 0 : i32
    %c0_i32_1 = arith.constant 0 : i32
    return %c0_i32, %c0_i32_0 : i32, i32
  }
  func.func @transform_3(%arg0: i32) -> (i32, i32) {
    %c0_i32 = arith.constant 0 : i32
    %c0_i32_0 = arith.constant 0 : i32
    return %arg0, %c0_i32 : i32, i32
  }
}

module attributes {stable_mosaic.version = 11 : i64} {
  func.func @_mul_act_kernel(%arg0: i32, %arg1: memref<136x8xf32, #tpu.memory_space<vmem>>, %arg2: memref<136x8xf32, #tpu.memory_space<vmem>>, %arg3: memref<136x8xf32, #tpu.memory_space<vmem>>) attributes {dimension_semantics = [#tpu.dimension_semantics<parallel>], iteration_bounds = array<i64: 1>, scalar_prefetch = 0 : i64, scratch_operands = 0 : i64, tpu.core_type = #tpu.core_type<tc>, window_params = [{transform_indices = @transform_0, window_bounds = array<i64: 136, 8>}, {transform_indices = @transform_1, window_bounds = array<i64: 136, 8>}, {transform_indices = @transform_2, window_bounds = array<i64: 136, 8>}]} {
    %c0 = arith.constant 0 : index
    %c0_0 = arith.constant 0 : index
    %0 = vector.load %arg1[%c0, %c0_0] : memref<136x8xf32, #tpu.memory_space<vmem>>, vector<136x8xf32>
    %c0_1 = arith.constant 0 : index
    %c0_2 = arith.constant 0 : index
    %1 = vector.load %arg2[%c0_1, %c0_2] : memref<136x8xf32, #tpu.memory_space<vmem>>, vector<136x8xf32>
    %2 = arith.mulf %0, %1 : vector<136x8xf32>
    %c0_3 = arith.constant 0 : index
    %c0_4 = arith.constant 0 : index
    %3 = vector.load %arg3[%c0_3, %c0_4] : memref<136x8xf32, #tpu.memory_space<vmem>>, vector<136x8xf32>
    tpu.vector_store %arg3[%c0_3, %c0_4], %2 {strides = array<i32>} : memref<136x8xf32, #tpu.memory_space<vmem>>, vector<136x8xf32>,
    return
  }
  func.func @transform_0(%arg0: i32) -> (i32, i32) {
    %c0_i32 = arith.constant 0 : i32
    %c0_i32_0 = arith.constant 0 : i32
    return %arg0, %c0_i32 : i32, i32
  }
  func.func @transform_1(%arg0: i32) -> (i32, i32) {
    %c0_i32 = arith.constant 0 : i32
    %c0_i32_0 = arith.constant 0 : i32
    return %arg0, %c0_i32 : i32, i32
  }
  func.func @transform_2(%arg0: i32) -> (i32, i32) {
    %c0_i32 = arith.constant 0 : i32
    %c0_i32_0 = arith.constant 0 : i32
    return %arg0, %c0_i32 : i32, i32
  }
}

module attributes {stable_mosaic.version = 11 : i64} {
  func.func @_affine_split_gate_kernel(%arg0: i32, %arg1: memref<136x16xf32, #tpu.memory_space<vmem>>, %arg2: memref<1x16xf32, #tpu.memory_space<vmem>>, %arg3: memref<1x16xf32, #tpu.memory_space<vmem>>, %arg4: memref<136x8xf32, #tpu.memory_space<vmem>>) attributes {dimension_semantics = [#tpu.dimension_semantics<parallel>], iteration_bounds = array<i64: 1>, scalar_prefetch = 0 : i64, scratch_operands = 0 : i64, tpu.core_type = #tpu.core_type<tc>, window_params = [{transform_indices = @transform_0, window_bounds = array<i64: 136, 16>}, {pipeline_mode = #tpu.pipeline_mode<synchronous>, transform_indices = @transform_1, window_bounds = array<i64: 1, 16>}, {pipeline_mode = #tpu.pipeline_mode<synchronous>, transform_indices = @transform_2, window_bounds = array<i64: 1, 16>}, {transform_indices = @transform_3, window_bounds = array<i64: 136, 8>}]} {
    %c0 = arith.constant 0 : index
    %c0_0 = arith.constant 0 : index
    %0 = vector.load %arg1[%c0, %c0_0] : memref<136x16xf32, #tpu.memory_space<vmem>>, vector<136x16xf32>
    %c0_1 = arith.constant 0 : index
    %c0_2 = arith.constant 0 : index
    %1 = vector.load %arg2[%c0_1, %c0_2] : memref<1x16xf32, #tpu.memory_space<vmem>>, vector<1x16xf32>
    %2 = vector.broadcast %1 : vector<1x16xf32> to vector<136x16xf32>
    %3 = arith.mulf %0, %2 : vector<136x16xf32>
    %c0_3 = arith.constant 0 : index
    %c0_4 = arith.constant 0 : index
    %4 = vector.load %arg3[%c0_3, %c0_4] : memref<1x16xf32, #tpu.memory_space<vmem>>, vector<1x16xf32>
    %5 = vector.broadcast %4 : vector<1x16xf32> to vector<136x16xf32>
    %6 = arith.addf %3, %5 : vector<136x16xf32>
    %7 = vector.extract_strided_slice %6 {offsets = [0, 0], sizes = [136, 8], strides = [1, 1]} : vector<136x16xf32> to vector<136x8xf32>
    %8 = math.tanh %7 : vector<136x8xf32>
    %9 = vector.extract_strided_slice %6 {offsets = [0, 8], sizes = [136, 8], strides = [1, 1]} : vector<136x16xf32> to vector<136x8xf32>
    %10 = arith.negf %9 : vector<136x8xf32>
    %11 = math.exp %10 : vector<136x8xf32>
    %cst = arith.constant 1.000000e+00 : f32
    %12 = vector.broadcast %cst : f32 to vector<136x8xf32>
    %13 = arith.addf %12, %11 : vector<136x8xf32>
    %14 = arith.divf %12, %13 : vector<136x8xf32>
    %15 = arith.mulf %8, %14 : vector<136x8xf32>
    %c0_5 = arith.constant 0 : index
    %c0_6 = arith.constant 0 : index
    %16 = vector.load %arg4[%c0_5, %c0_6] : memref<136x8xf32, #tpu.memory_space<vmem>>, vector<136x8xf32>
    tpu.vector_store %arg4[%c0_5, %c0_6], %15 {strides = array<i32>} : memref<136x8xf32, #tpu.memory_space<vmem>>, vector<136x8xf32>,
    return
  }
  func.func @transform_0(%arg0: i32) -> (i32, i32) {
    %c0_i32 = arith.constant 0 : i32
    %c0_i32_0 = arith.constant 0 : i32
    return %arg0, %c0_i32 : i32, i32
  }
  func.func @transform_1(%arg0: i32) -> (i32, i32) {
    %c0_i32 = arith.constant 0 : i32
    %c0_i32_0 = arith.constant 0 : i32
    %c0_i32_1 = arith.constant 0 : i32
    return %c0_i32, %c0_i32_0 : i32, i32
  }
  func.func @transform_2(%arg0: i32) -> (i32, i32) {
    %c0_i32 = arith.constant 0 : i32
    %c0_i32_0 = arith.constant 0 : i32
    %c0_i32_1 = arith.constant 0 : i32
    return %c0_i32, %c0_i32_0 : i32, i32
  }
  func.func @transform_3(%arg0: i32) -> (i32, i32) {
    %c0_i32 = arith.constant 0 : i32
    %c0_i32_0 = arith.constant 0 : i32
    return %arg0, %c0_i32 : i32, i32
  }
}

module attributes {stable_mosaic.version = 11 : i64} {
  func.func @_matmul_epi_kernel(%arg0: i32, %arg1: i32, %arg2: i32, %arg3: memref<144x16xbf16, #tpu.memory_space<vmem>>, %arg4: memref<16x128xbf16, #tpu.memory_space<vmem>>, %arg5: memref<1x128xf32, #tpu.memory_space<vmem>>, %arg6: memref<1x128xf32, #tpu.memory_space<vmem>>, %arg7: memref<144x128xf32, #tpu.memory_space<vmem>>, %arg8: memref<144x128xf32, #tpu.memory_space<vmem>>) attributes {dimension_semantics = [#tpu.dimension_semantics<parallel>, #tpu.dimension_semantics<parallel>, #tpu.dimension_semantics<arbitrary>], iteration_bounds = array<i64: 1, 1, 1>, scalar_prefetch = 0 : i64, scratch_operands = 1 : i64, tpu.core_type = #tpu.core_type<tc>, window_params = [{transform_indices = @transform_0, window_bounds = array<i64: 144, 16>}, {transform_indices = @transform_1, window_bounds = array<i64: 16, 128>}, {transform_indices = @transform_2, window_bounds = array<i64: 1, 128>}, {transform_indices = @transform_3, window_bounds = array<i64: 1, 128>}, {transform_indices = @transform_4, window_bounds = array<i64: 144, 128>}]} {
    %c0_i32 = arith.constant 0 : i32
    %0 = arith.cmpi eq, %arg2, %c0_i32 : i32
    %1 = arith.extui %0 : i1 to i32
    %c0_i32_0 = arith.constant 0 : i32
    %2 = arith.cmpi ne, %1, %c0_i32_0 : i32
    scf.if %2 {
      %cst_10 = arith.constant 0.000000e+00 : f32
      %12 = vector.broadcast %cst_10 : f32 to vector<144x128xf32>
      %c0_11 = arith.constant 0 : index
      %c0_12 = arith.constant 0 : index
      %13 = vector.load %arg8[%c0_11, %c0_12] : memref<144x128xf32, #tpu.memory_space<vmem>>, vector<144x128xf32>
      tpu.vector_store %arg8[%c0_11, %c0_12], %12 {strides = array<i32>} : memref<144x128xf32, #tpu.memory_space<vmem>>, vector<144x128xf32>,
    } else {
    }
    %c0 = arith.constant 0 : index
    %c0_1 = arith.constant 0 : index
    %3 = vector.load %arg8[%c0, %c0_1] : memref<144x128xf32, #tpu.memory_space<vmem>>, vector<144x128xf32>
    %c0_2 = arith.constant 0 : index
    %c0_3 = arith.constant 0 : index
    %4 = vector.load %arg3[%c0_2, %c0_3] : memref<144x16xbf16, #tpu.memory_space<vmem>>, vector<144x16xbf16>
    %c0_4 = arith.constant 0 : index
    %c0_5 = arith.constant 0 : index
    %5 = vector.load %arg4[%c0_4, %c0_5] : memref<16x128xbf16, #tpu.memory_space<vmem>>, vector<16x128xbf16>
    %cst = arith.constant dense<0.000000e+00> : vector<144x128xf32>
    %6 = tpu.matmul %4, %5, %cst {dimension_numbers = #tpu.dot_dimension_numbers<[1], [0], [0], [1], [0, 0, 1, 1], [], []>} : vector<144x16xbf16>, vector<16x128xbf16>, vector<144x128xf32> -> vector<144x128xf32>
    %7 = arith.addf %3, %6 : vector<144x128xf32>
    %c0_6 = arith.constant 0 : index
    %c0_7 = arith.constant 0 : index
    %8 = vector.load %arg8[%c0_6, %c0_7] : memref<144x128xf32, #tpu.memory_space<vmem>>, vector<144x128xf32>
    tpu.vector_store %arg8[%c0_6, %c0_7], %7 {strides = array<i32>} : memref<144x128xf32, #tpu.memory_space<vmem>>, vector<144x128xf32>,
    %c0_i32_8 = arith.constant 0 : i32
    %9 = arith.cmpi eq, %arg2, %c0_i32_8 : i32
    %10 = arith.extui %9 : i1 to i32
    %c0_i32_9 = arith.constant 0 : i32
    %11 = arith.cmpi ne, %10, %c0_i32_9 : i32
    scf.if %11 {
      %c0_10 = arith.constant 0 : index
      %c0_11 = arith.constant 0 : index
      %12 = vector.load %arg8[%c0_10, %c0_11] : memref<144x128xf32, #tpu.memory_space<vmem>>, vector<144x128xf32>
      %c0_12 = arith.constant 0 : index
      %c0_13 = arith.constant 0 : index
      %13 = vector.load %arg5[%c0_12, %c0_13] : memref<1x128xf32, #tpu.memory_space<vmem>>, vector<1x128xf32>
      %14 = vector.broadcast %13 : vector<1x128xf32> to vector<144x128xf32>
      %15 = arith.mulf %12, %14 : vector<144x128xf32>
      %c0_14 = arith.constant 0 : index
      %c0_15 = arith.constant 0 : index
      %16 = vector.load %arg6[%c0_14, %c0_15] : memref<1x128xf32, #tpu.memory_space<vmem>>, vector<1x128xf32>
      %17 = vector.broadcast %16 : vector<1x128xf32> to vector<144x128xf32>
      %18 = arith.addf %15, %17 : vector<144x128xf32>
      %cst_16 = arith.constant 0.000000e+00 : f32
      %19 = vector.broadcast %cst_16 : f32 to vector<144x128xf32>
      %20 = arith.maximumf %18, %19 : vector<144x128xf32>
      %c0_17 = arith.constant 0 : index
      %c0_18 = arith.constant 0 : index
      %21 = vector.load %arg7[%c0_17, %c0_18] : memref<144x128xf32, #tpu.memory_space<vmem>>, vector<144x128xf32>
      tpu.vector_store %arg7[%c0_17, %c0_18], %20 {strides = array<i32>} : memref<144x128xf32, #tpu.memory_space<vmem>>, vector<144x128xf32>,
    } else {
    }
    return
  }
  func.func @transform_0(%arg0: i32, %arg1: i32, %arg2: i32) -> (i32, i32) {
    %c0_i32 = arith.constant 0 : i32
    return %arg0, %arg2 : i32, i32
  }
  func.func @transform_1(%arg0: i32, %arg1: i32, %arg2: i32) -> (i32, i32) {
    %c0_i32 = arith.constant 0 : i32
    return %arg2, %arg1 : i32, i32
  }
  func.func @transform_2(%arg0: i32, %arg1: i32, %arg2: i32) -> (i32, i32) {
    %c0_i32 = arith.constant 0 : i32
    %c0_i32_0 = arith.constant 0 : i32
    return %c0_i32, %arg1 : i32, i32
  }
  func.func @transform_3(%arg0: i32, %arg1: i32, %arg2: i32) -> (i32, i32) {
    %c0_i32 = arith.constant 0 : i32
    %c0_i32_0 = arith.constant 0 : i32
    return %c0_i32, %arg1 : i32, i32
  }
  func.func @transform_4(%arg0: i32, %arg1: i32, %arg2: i32) -> (i32, i32) {
    %c0_i32 = arith.constant 0 : i32
    return %arg0, %arg1 : i32, i32
  }
}

module attributes {stable_mosaic.version = 11 : i64} {
  func.func @_matmul_epi_kernel(%arg0: i32, %arg1: i32, %arg2: i32, %arg3: memref<144x32xbf16, #tpu.memory_space<vmem>>, %arg4: memref<32x128xbf16, #tpu.memory_space<vmem>>, %arg5: memref<1x128xf32, #tpu.memory_space<vmem>>, %arg6: memref<1x128xf32, #tpu.memory_space<vmem>>, %arg7: memref<144x128xf32, #tpu.memory_space<vmem>>, %arg8: memref<144x128xf32, #tpu.memory_space<vmem>>) attributes {dimension_semantics = [#tpu.dimension_semantics<parallel>, #tpu.dimension_semantics<parallel>, #tpu.dimension_semantics<arbitrary>], iteration_bounds = array<i64: 1, 1, 1>, scalar_prefetch = 0 : i64, scratch_operands = 1 : i64, tpu.core_type = #tpu.core_type<tc>, window_params = [{transform_indices = @transform_0, window_bounds = array<i64: 144, 32>}, {transform_indices = @transform_1, window_bounds = array<i64: 32, 128>}, {transform_indices = @transform_2, window_bounds = array<i64: 1, 128>}, {transform_indices = @transform_3, window_bounds = array<i64: 1, 128>}, {transform_indices = @transform_4, window_bounds = array<i64: 144, 128>}]} {
    %c0_i32 = arith.constant 0 : i32
    %0 = arith.cmpi eq, %arg2, %c0_i32 : i32
    %1 = arith.extui %0 : i1 to i32
    %c0_i32_0 = arith.constant 0 : i32
    %2 = arith.cmpi ne, %1, %c0_i32_0 : i32
    scf.if %2 {
      %cst_10 = arith.constant 0.000000e+00 : f32
      %12 = vector.broadcast %cst_10 : f32 to vector<144x128xf32>
      %c0_11 = arith.constant 0 : index
      %c0_12 = arith.constant 0 : index
      %13 = vector.load %arg8[%c0_11, %c0_12] : memref<144x128xf32, #tpu.memory_space<vmem>>, vector<144x128xf32>
      tpu.vector_store %arg8[%c0_11, %c0_12], %12 {strides = array<i32>} : memref<144x128xf32, #tpu.memory_space<vmem>>, vector<144x128xf32>,
    } else {
    }
    %c0 = arith.constant 0 : index
    %c0_1 = arith.constant 0 : index
    %3 = vector.load %arg8[%c0, %c0_1] : memref<144x128xf32, #tpu.memory_space<vmem>>, vector<144x128xf32>
    %c0_2 = arith.constant 0 : index
    %c0_3 = arith.constant 0 : index
    %4 = vector.load %arg3[%c0_2, %c0_3] : memref<144x32xbf16, #tpu.memory_space<vmem>>, vector<144x32xbf16>
    %c0_4 = arith.constant 0 : index
    %c0_5 = arith.constant 0 : index
    %5 = vector.load %arg4[%c0_4, %c0_5] : memref<32x128xbf16, #tpu.memory_space<vmem>>, vector<32x128xbf16>
    %cst = arith.constant dense<0.000000e+00> : vector<144x128xf32>
    %6 = tpu.matmul %4, %5, %cst {dimension_numbers = #tpu.dot_dimension_numbers<[1], [0], [0], [1], [0, 0, 1, 1], [], []>} : vector<144x32xbf16>, vector<32x128xbf16>, vector<144x128xf32> -> vector<144x128xf32>
    %7 = arith.addf %3, %6 : vector<144x128xf32>
    %c0_6 = arith.constant 0 : index
    %c0_7 = arith.constant 0 : index
    %8 = vector.load %arg8[%c0_6, %c0_7] : memref<144x128xf32, #tpu.memory_space<vmem>>, vector<144x128xf32>
    tpu.vector_store %arg8[%c0_6, %c0_7], %7 {strides = array<i32>} : memref<144x128xf32, #tpu.memory_space<vmem>>, vector<144x128xf32>,
    %c0_i32_8 = arith.constant 0 : i32
    %9 = arith.cmpi eq, %arg2, %c0_i32_8 : i32
    %10 = arith.extui %9 : i1 to i32
    %c0_i32_9 = arith.constant 0 : i32
    %11 = arith.cmpi ne, %10, %c0_i32_9 : i32
    scf.if %11 {
      %c0_10 = arith.constant 0 : index
      %c0_11 = arith.constant 0 : index
      %12 = vector.load %arg8[%c0_10, %c0_11] : memref<144x128xf32, #tpu.memory_space<vmem>>, vector<144x128xf32>
      %c0_12 = arith.constant 0 : index
      %c0_13 = arith.constant 0 : index
      %13 = vector.load %arg5[%c0_12, %c0_13] : memref<1x128xf32, #tpu.memory_space<vmem>>, vector<1x128xf32>
      %14 = vector.broadcast %13 : vector<1x128xf32> to vector<144x128xf32>
      %15 = arith.mulf %12, %14 : vector<144x128xf32>
      %c0_14 = arith.constant 0 : index
      %c0_15 = arith.constant 0 : index
      %16 = vector.load %arg6[%c0_14, %c0_15] : memref<1x128xf32, #tpu.memory_space<vmem>>, vector<1x128xf32>
      %17 = vector.broadcast %16 : vector<1x128xf32> to vector<144x128xf32>
      %18 = arith.addf %15, %17 : vector<144x128xf32>
      %c0_16 = arith.constant 0 : index
      %c0_17 = arith.constant 0 : index
      %19 = vector.load %arg7[%c0_16, %c0_17] : memref<144x128xf32, #tpu.memory_space<vmem>>, vector<144x128xf32>
      tpu.vector_store %arg7[%c0_16, %c0_17], %18 {strides = array<i32>} : memref<144x128xf32, #tpu.memory_space<vmem>>, vector<144x128xf32>,
    } else {
    }
    return
  }
  func.func @transform_0(%arg0: i32, %arg1: i32, %arg2: i32) -> (i32, i32) {
    %c0_i32 = arith.constant 0 : i32
    return %arg0, %arg2 : i32, i32
  }
  func.func @transform_1(%arg0: i32, %arg1: i32, %arg2: i32) -> (i32, i32) {
    %c0_i32 = arith.constant 0 : i32
    return %arg2, %arg1 : i32, i32
  }
  func.func @transform_2(%arg0: i32, %arg1: i32, %arg2: i32) -> (i32, i32) {
    %c0_i32 = arith.constant 0 : i32
    %c0_i32_0 = arith.constant 0 : i32
    return %c0_i32, %arg1 : i32, i32
  }
  func.func @transform_3(%arg0: i32, %arg1: i32, %arg2: i32) -> (i32, i32) {
    %c0_i32 = arith.constant 0 : i32
    %c0_i32_0 = arith.constant 0 : i32
    return %c0_i32, %arg1 : i32, i32
  }
  func.func @transform_4(%arg0: i32, %arg1: i32, %arg2: i32) -> (i32, i32) {
    %c0_i32 = arith.constant 0 : i32
    return %arg0, %arg1 : i32, i32
  }
}

</mosaic_0001>

<bundles_post_ra>
// kernel: manner_forward.61
= control target key start
LH: loop header
LB: loop body
LE: loop exit
PB: predicated region body
PF: predicated region fallthrough
CT: control target
= control target key end

     0   :  { %vm96_vm0 = vcmask 64512   ;;  %s303_s0 = inlined_call_operand.vmem [shape: f32[136,8], index: 0, kind: input, shape index: {}]   ;;  %s304_s1 = inlined_call_operand.vmem [shape: f32[1,8], index: 1, kind: input, shape index: {}]   ;;  %s305_s2 = inlined_call_operand.vmem [shape: f32[1,8], index: 2, kind: input, shape index: {}]   ;;  %s306_s3 = inlined_call_operand.vmem [shape: f32[136,8], index: 3, kind: output, shape index: {}]  }
   0x1   :  { %v14_v0 = vld [vmem:[%s303_s0] sm:$0xff]  ;;  %v15_v4 = vld [vmem:[%s303_s0 + $0x8] sm:$0xff]  ;;  %v16_v5 = vld [vmem:[%s303_s0 + $0x10] sm:$0xff] }
   0x2   :  { %v146_v1 = vld [vmem:[%s304_s1] ss:$0 sm:$0xff]  ;;  %v17_v6 = vld [vmem:[%s303_s0 + $0x18] sm:$0xff]  ;;  %v19_v11 = vld [vmem:[%s303_s0 + $0x28] sm:$0xff] }
   0x3   :  { %v151_v2 = vld [vmem:[%s305_s2] ss:$0 sm:$0xff]  ;;  %v38_v3 = vmul.f32 %v146_v1, %v14_v0  ;;  %v39_v7 = vmul.f32 %v146_v1, %v15_v4  ;;  %v40_v8 = vmul.f32 %v146_v1, %v16_v5  ;;  %v41_v9 = vmul.f32 %v146_v1, %v17_v6  ;;  %v20_v12 = vld [vmem:[%s303_s0 + $0x30] sm:$0xff]  ;;  %v21_v17 = vld [vmem:[%s303_s0 + $0x38] sm:$0xff] }
   0x4   :  { %v18_v10 = vld [vmem:[%s303_s0 + $0x20] sm:$0xff]  ;;  %v43_v15 = vmul.f32 %v146_v1, %v19_v11  ;;  %v44_v16 = vmul.f32 %v146_v1, %v20_v12  ;;  %v45_v21 = vmul.f32 %v146_v1, %v21_v17  ;;  %v23_v27 = vld [vmem:[%s303_s0 + $0x48] sm:$0xff]  ;;  %v24_v28 = vld [vmem:[%s303_s0 + $0x50] sm:$0xff] }
   0x5   :  { %v62_v13 = vadd.f32 %v151_v2, %v38_v3  ;;  %v42_v14 = vmul.f32 %v146_v1, %v18_v10  ;;  %v63_v18 = vadd.f32 %v151_v2, %v39_v7  ;;  %v64_v19 = vadd.f32 %v151_v2, %v40_v8  ;;  %v22_v22 = vld [vmem:[%s303_s0 + $0x40] sm:$0xff]  ;;  %v25_v29 = vld [vmem:[%s303_s0 + $0x58] sm:$0xff]  ;;  %v27_v35 = vld [vmem:[%s303_s0 + $0x68] sm:$0xff] }
   0x6   :  { %v65_v20 = vadd.f32 %v151_v2, %v41_v9  ;;  %v67_v25 = vadd.f32 %v151_v2, %v43_v15  ;;  %v68_v26 = vadd.f32 %v151_v2, %v44_v16  ;;  %v69_v33 = vadd.f32 %v151_v2, %v45_v21  ;;  %v26_v34 = vld [vmem:[%s303_s0 + $0x60] sm:$0xff]  ;;  %v28_v36 = vld [vmem:[%s303_s0 + $0x70] sm:$0xff]  ;;  %v29_v41 = vld [vmem:[%s303_s0 + $0x78] sm:$0xff] }
   0x7   :  { %v79_v23 = vmax.f32 %v62_v13, 0.0  ;;  %v66_v24 = vadd.f32 %v151_v2, %v42_v14  ;;  %v80_v30 = vmax.f32 %v63_v18, 0.0  ;;  %v81_v31 = vmax.f32 %v64_v19, 0.0  ;;  %v30_v54 = vld [vmem:[%s303_s0 + $0x80] sm:$0xff] }
   0x8   :  { %v82_v32 = vmax.f32 %v65_v20, 0.0  ;;  %v84_v38 = vmax.f32 %v67_v25, 0.0  ;;  %v85_v39 = vmax.f32 %v68_v26, 0.0  ;;  %v46_v40 = vmul.f32 %v146_v1, %v22_v22 }
   0x9   :  { %97 = vst.msk [vmem:[%s306_s3] sm:$0xff] %vm96_vm0, %v79_v23  ;;  %v83_v37 = vmax.f32 %v66_v24, 0.0  ;;  %98 = vst.msk [vmem:[%s306_s3 + $0x8] sm:$0xff] %vm96_vm0, %v80_v30  ;;  %v86_v42 = vmax.f32 %v69_v33, 0.0  ;;  %v47_v43 = vmul.f32 %v146_v1, %v23_v27  ;;  %v48_v44 = vmul.f32 %v146_v1, %v24_v28 }
   0xa   :  { %99 = vst.msk [vmem:[%s306_s3 + $0x10] sm:$0xff] %vm96_vm0, %v81_v31  ;;  %100 = vst.msk [vmem:[%s306_s3 + $0x18] sm:$0xff] %vm96_vm0, %v82_v32  ;;  %v49_v45 = vmul.f32 %v146_v1, %v25_v29  ;;  %v70_v46 = vadd.f32 %v151_v2, %v46_v40  ;;  %v50_v47 = vmul.f32 %v146_v1, %v26_v34 }
   0xb   :  { %101 = vst.msk [vmem:[%s306_s3 + $0x20] sm:$0xff] %vm96_vm0, %v83_v37  ;;  %102 = vst.msk [vmem:[%s306_s3 + $0x28] sm:$0xff] %vm96_vm0, %v84_v38  ;;  %v51_v48 = vmul.f32 %v146_v1, %v27_v35  ;;  %v52_v49 = vmul.f32 %v146_v1, %v28_v36  ;;  %v71_v50 = vadd.f32 %v151_v2, %v47_v43 }
   0xc   :  { %103 = vst.msk [vmem:[%s306_s3 + $0x30] sm:$0xff] %vm96_vm0, %v85_v39  ;;  %104 = vst.msk [vmem:[%s306_s3 + $0x38] sm:$0xff] %vm96_vm0, %v86_v42  ;;  %v72_v51 = vadd.f32 %v151_v2, %v48_v44  ;;  %v73_v52 = vadd.f32 %v151_v2, %v49_v45  ;;  %v53_v53 = vmul.f32 %v146_v1, %v29_v41  ;;  %v87_v55 = vmax.f32 %v70_v46, 0.0 }
   0xd   :  { %v74_v56 = vadd.f32 %v151_v2, %v50_v47  ;;  %v75_v57 = vadd.f32 %v151_v2, %v51_v48  ;;  %v76_v58 = vadd.f32 %v151_v2, %v52_v49  ;;  %v88_v59 = vmax.f32 %v71_v50, 0.0 }
   0xe   :  { %v89_v60 = vmax.f32 %v72_v51, 0.0  ;;  %v90_v61 = vmax.f32 %v73_v52, 0.0  ;;  %v77_v62 = vadd.f32 %v151_v2, %v53_v53  ;;  %105 = vst.msk [vmem:[%s306_s3 + $0x40] sm:$0xff] %vm96_vm0, %v87_v55  ;;  %v54_v4 = vmul.f32 %v146_v1, %v30_v54 }
   0xf   :  { %v91_v63 = vmax.f32 %v74_v56, 0.0  ;;  %v92_v0 = vmax.f32 %v75_v57, 0.0  ;;  %v93_v3 = vmax.f32 %v76_v58, 0.0  ;;  %106 = vst.msk [vmem:[%s306_s3 + $0x48] sm:$0xff] %vm96_vm0, %v88_v59 }
  0x10   :  { %107 = vst.msk [vmem:[%s306_s3 + $0x50] sm:$0xff] %vm96_vm0, %v89_v60  ;;  %108 = vst.msk [vmem:[%s306_s3 + $0x58] sm:$0xff] %vm96_vm0, %v90_v61  ;;  %v94_v5 = vmax.f32 %v77_v62, 0.0  ;;  %v78_v1 = vadd.f32 %v151_v2, %v54_v4 }
  0x11   :  { %109 = vst.msk [vmem:[%s306_s3 + $0x60] sm:$0xff] %vm96_vm0, %v91_v63  ;;  %110 = vst.msk [vmem:[%s306_s3 + $0x68] sm:$0xff] %vm96_vm0, %v92_v0 }
  0x12   :  { %111 = vst.msk [vmem:[%s306_s3 + $0x70] sm:$0xff] %vm96_vm0, %v93_v3  ;;  %112 = vst.msk [vmem:[%s306_s3 + $0x78] sm:$0xff] %vm96_vm0, %v94_v5  ;;  %v95_v6 = vmax.f32 %v78_v1, 0.0 }
  0x14   :  { %113 = vst.msk [vmem:[%s306_s3 + $0x80] sm:$0xff] %vm96_vm0, %v95_v6 }

// kernel: manner_forward.60
= control target key start
LH: loop header
LB: loop body
LE: loop exit
PB: predicated region body
PF: predicated region fallthrough
CT: control target
= control target key end

     0   :  { %v474_v0 = vmov 0.0   ;;  %vm475_vm0 = vmmov 0   ;;  %vm129_vm1 = vcmask 130048   ;;  %s649_s1 = inlined_call_operand.vmem [shape: bf16[16,128], index: 1, kind: input, shape index: {}]   ;;  %s650_s0 = inlined_call_operand.vmem [shape: bf16[144,16], index: 0, kind: input, shape index: {}]   ;;  %s651_s2 = inlined_call_operand.vmem [shape: f32[1,128], index: 2, kind: input, shape index: {}]   ;;  %s652_s3 = inlined_call_operand.vmem [shape: f32[1,128], index: 3, kind: input, shape index: {}]   ;;  %s653_s4 = inlined_call_operand.vmem [shape: f32[144,128], index: 4, kind: output, shape index: {}]  }
   0x1   :  { %422 = vmatprep.subr.bf16.mxu0 %v474_v0  ;;  %v464_v1 = vld [vmem:[%s649_s1] sm:$0xff]   ;;  %424 = vmatprep.mubr.msk.bf16.mxu0 %vm475_vm0, %v474_v0  ;;  %v466_v3 = vld [vmem:[%s650_s0 + $0x28] sm:$0xff]   ;;  %v468_v5 = vld [vmem:[%s650_s0 + $0x30] sm:$0xff]  }
   0x2   :  { %v465_v2 = vld [vmem:[%s650_s0] sm:$0xff]   ;;  %460 = vmatprep.subr.bf16.mxu1 %v474_v0  ;;  %444 = vmatprep.mubr.msk.bf16.mxu1 %vm475_vm0, %v474_v0  ;;  %v467_v4 = vld [vmem:[%s650_s0 + $0x8] sm:$0xff]   ;;  %v469_v6 = vld [vmem:[%s650_s0 + $0x10] sm:$0xff]  }
   0x3   :  { %423 = vmatpush3.bf16.msra.mxu0 %v464_v1  ;;  %461 = vmatpush3.bf16.msra.mxu1 %v464_v1  ;;  %v470_v7 = vld [vmem:[%s650_s0 + $0x38] sm:$0xff]   ;;  %v472_v9 = vld [vmem:[%s650_s0 + $0x40] sm:$0xff]  }
   0x4   :  { %v471_v8 = vld [vmem:[%s650_s0 + $0x18] sm:$0xff]   ;;  %v473_v10 = vld [vmem:[%s650_s0 + $0x20] sm:$0xff]  }
   0x5   :  { %v552_v11 = vld [vmem:[%s651_s2] ss:$0 sm:$0xff] }
   0x6   :  { %425 = vmatmul.mubr.msk.bf16.vlgmr.msra.gmra.mrb[0].mxu0 %vm129_vm1, %v465_v2  ;;  %445 = vmatmul.mubr.msk.bf16.vlgmr.msra.gmra.mrb[0].mxu1 %vm129_vm1, %v466_v3  ;;  %v557_v13 = vld [vmem:[%s652_s3] ss:$0 sm:$0xff] }
   0x7   :  { %428 = vmatprep.mubr.msk.bf16.mxu0 %vm475_vm0, %v474_v0  ;;  %448 = vmatprep.mubr.msk.bf16.mxu1 %vm475_vm0, %v474_v0 }
   0xe   :  { %429 = vmatmul.mubr.msk.bf16.gmra.mrb[4].mxu0 %vm129_vm1, %v467_v4  ;;  %449 = vmatmul.mubr.msk.bf16.gmra.mrb[4].mxu1 %vm129_vm1, %v468_v5 }
   0xf   :  { %432 = vmatprep.mubr.msk.bf16.mxu0 %vm475_vm0, %v474_v0  ;;  %452 = vmatprep.mubr.msk.bf16.mxu1 %vm475_vm0, %v474_v0 }
  0x16   :  { %433 = vmatmul.mubr.msk.bf16.gmra.mrb[8].mxu0 %vm129_vm1, %v469_v6  ;;  %453 = vmatmul.mubr.msk.bf16.gmra.mrb[8].mxu1 %vm129_vm1, %v470_v7 }
  0x17   :  { %436 = vmatprep.mubr.msk.bf16.mxu0 %vm475_vm0, %v474_v0  ;;  %456 = vmatprep.mubr.msk.bf16.mxu1 %vm475_vm0, %v474_v0 }
  0x1e   :  { %437 = vmatmul.mubr.msk.bf16.gmra.mrb[12].mxu0 %vm129_vm1, %v471_v8  ;;  %457 = vmatmul.mubr.msk.bf16.gmra.mrb[12].mxu1 %vm129_vm1, %v472_v9 }
  0x1f   :  { %440 = vmatprep.mubr.msk.bf16.mxu0 %vm475_vm0, %v474_v0 }
  0x26   :  { %441 = vmatmul.mubr.msk.bf16.gmra.mrb[16].mxu0 %vm129_vm1, %v473_v10 }
  0xd9   :  { %v191_v12 = vpop.f32.mrb[0].mxu0  ;;  %v231_v14 = vpop.f32.mrb[0].mxu1 }
  0xda   :  { %v326_v15 = vmul.f32 %v552_v11, %v191_v12  ;;  %v426_v16 = vpop.f32.mrb[1].mxu0  ;;  %v336_v17 = vmul.f32 %v552_v11, %v231_v14  ;;  %v446_v18 = vpop.f32.mrb[1].mxu1 }
  0xdb   :  { %v194_v19 = vpop.f32.mrb[2].mxu0  ;;  %v234_v20 = vpop.f32.mrb[2].mxu1 }
  0xdc   :  { %v351_v21 = vadd.f32 %v557_v13, %v326_v15  ;;  %v327_v22 = vmul.f32 %v552_v11, %v194_v19  ;;  %v427_v23 = vpop.f32.mrb[3].mxu0  ;;  %v361_v24 = vadd.f32 %v557_v13, %v336_v17  ;;  %v337_v25 = vmul.f32 %v552_v11, %v234_v20  ;;  %v447_v26 = vpop.f32.mrb[3].mxu1 }
  0xde   :  { %369 = vst [vmem:[%s653_s4] sm:$0xff] %v351_v21  ;;  %v352_v27 = vadd.f32 %v557_v13, %v327_v22  ;;  %379 = vst [vmem:[%s653_s4 + $0x50] sm:$0xff] %v361_v24  ;;  %v362_v28 = vadd.f32 %v557_v13, %v337_v25 }
  0xe0   :  { %370 = vst [vmem:[%s653_s4 + $0x8] sm:$0xff] %v352_v27  ;;  %380 = vst [vmem:[%s653_s4 + $0x58] sm:$0xff] %v362_v28 }
  0xe1   :  { %v199_v29 = vpop.f32.mrb[4].mxu0  ;;  %v239_v30 = vpop.f32.mrb[4].mxu1 }
  0xe2   :  { %v328_v31 = vmul.f32 %v552_v11, %v199_v29  ;;  %v430_v32 = vpop.f32.mrb[5].mxu0  ;;  %v338_v33 = vmul.f32 %v552_v11, %v239_v30  ;;  %v450_v34 = vpop.f32.mrb[5].mxu1 }
  0xe3   :  { %v202_v35 = vpop.f32.mrb[6].mxu0  ;;  %v242_v36 = vpop.f32.mrb[6].mxu1 }
  0xe4   :  { %v353_v37 = vadd.f32 %v557_v13, %v328_v31  ;;  %v329_v38 = vmul.f32 %v552_v11, %v202_v35  ;;  %v431_v39 = vpop.f32.mrb[7].mxu0  ;;  %v363_v40 = vadd.f32 %v557_v13, %v338_v33  ;;  %v339_v41 = vmul.f32 %v552_v11, %v242_v36  ;;  %v451_v42 = vpop.f32.mrb[7].mxu1 }
  0xe6   :  { %371 = vst [vmem:[%s653_s4 + $0x10] sm:$0xff] %v353_v37  ;;  %v354_v43 = vadd.f32 %v557_v13, %v329_v38  ;;  %381 = vst [vmem:[%s653_s4 + $0x60] sm:$0xff] %v363_v40  ;;  %v364_v44 = vadd.f32 %v557_v13, %v339_v41 }
  0xe8   :  { %372 = vst [vmem:[%s653_s4 + $0x18] sm:$0xff] %v354_v43  ;;  %382 = vst [vmem:[%s653_s4 + $0x68] sm:$0xff] %v364_v44 }
  0xe9   :  { %v207_v45 = vpop.f32.mrb[8].mxu0  ;;  %v247_v46 = vpop.f32.mrb[8].mxu1 }
  0xea   :  { %v330_v47 = vmul.f32 %v552_v11, %v207_v45  ;;  %v434_v48 = vpop.f32.mrb[9].mxu0  ;;  %v340_v49 = vmul.f32 %v552_v11, %v247_v46  ;;  %v454_v50 = vpop.f32.mrb[9].mxu1 }
  0xeb   :  { %v210_v51 = vpop.f32.mrb[10].mxu0  ;;  %v250_v52 = vpop.f32.mrb[10].mxu1 }
  0xec   :  { %v355_v53 = vadd.f32 %v557_v13, %v330_v47  ;;  %v331_v54 = vmul.f32 %v552_v11, %v210_v51  ;;  %v435_v55 = vpop.f32.mrb[11].mxu0  ;;  %v365_v56 = vadd.f32 %v557_v13, %v340_v49  ;;  %v341_v57 = vmul.f32 %v552_v11, %v250_v52  ;;  %v455_v58 = vpop.f32.mrb[11].mxu1 }
  0xee   :  { %373 = vst [vmem:[%s653_s4 + $0x20] sm:$0xff] %v355_v53  ;;  %v356_v59 = vadd.f32 %v557_v13, %v331_v54  ;;  %383 = vst [vmem:[%s653_s4 + $0x70] sm:$0xff] %v365_v56  ;;  %v366_v60 = vadd.f32 %v557_v13, %v341_v57 }
  0xf0   :  { %374 = vst [vmem:[%s653_s4 + $0x28] sm:$0xff] %v356_v59  ;;  %384 = vst [vmem:[%s653_s4 + $0x78] sm:$0xff] %v366_v60 }
  0xf1   :  { %v215_v61 = vpop.f32.mrb[12].mxu0  ;;  %v255_v62 = vpop.f32.mrb[12].mxu1 }
  0xf2   :  { %v332_v63 = vmul.f32 %v552_v11, %v215_v61  ;;  %v438_v0 = vpop.f32.mrb[13].mxu0  ;;  %v342_v1 = vmul.f32 %v552_v11, %v255_v62  ;;  %v458_v2 = vpop.f32.mrb[13].mxu1 }
  0xf3   :  { %v218_v3 = vpop.f32.mrb[14].mxu0  ;;  %v258_v4 = vpop.f32.mrb[14].mxu1 }
  0xf4   :  { %v357_v5 = vadd.f32 %v557_v13, %v332_v63  ;;  %v333_v6 = vmul.f32 %v552_v11, %v218_v3  ;;  %v439_v7 = vpop.f32.mrb[15].mxu0  ;;  %v367_v8 = vadd.f32 %v557_v13, %v342_v1  ;;  %v343_v9 = vmul.f32 %v552_v11, %v258_v4  ;;  %v459_v10 = vpop.f32.mrb[15].mxu1 }
  0xf6   :  { %375 = vst [vmem:[%s653_s4 + $0x30] sm:$0xff] %v357_v5  ;;  %v358_v12 = vadd.f32 %v557_v13, %v333_v6  ;;  %385 = vst [vmem:[%s653_s4 + $0x80] sm:$0xff] %v367_v8  ;;  %v368_v14 = vadd.f32 %v557_v13, %v343_v9 }
  0xf8   :  { %376 = vst [vmem:[%s653_s4 + $0x38] sm:$0xff] %v358_v12  ;;  %386 = vst [vmem:[%s653_s4 + $0x88] sm:$0xff] %v368_v14 }
  0xf9   :  { %v223_v15 = vpop.f32.mrb[16].mxu0 }
  0xfa   :  { %v334_v16 = vmul.f32 %v552_v11, %v223_v15  ;;  %v442_v17 = vpop.f32.mrb[17].mxu0 }
  0xfb   :  { %v226_v18 = vpop.f32.mrb[18].mxu0 }
  0xfc   :  { %v359_v19 = vadd.f32 %v557_v13, %v334_v16  ;;  %v335_v20 = vmul.f32 %v552_v11, %v226_v18  ;;  %v443_v21 = vpop.f32.mrb[19].mxu0 }
  0xfe   :  { %377 = vst [vmem:[%s653_s4 + $0x40] sm:$0xff] %v359_v19  ;;  %v360_v22 = vadd.f32 %v557_v13, %v335_v20 }
 0x100   :  { %378 = vst [vmem:[%s653_s4 + $0x48] sm:$0xff] %v360_v22 }

// kernel: manner_forward.63
= control target key start
LH: loop header
LB: loop body
LE: loop exit
PB: predicated region body
PF: predicated region fallthrough
CT: control target
= control target key end

     0   :  { %vm60_vm0 = vcmask 64512   ;;  %s157_s0 = inlined_call_operand.vmem [shape: f32[64,8], index: 0, kind: input, shape index: {}]   ;;  %s158_s1 = inlined_call_operand.vmem [shape: f32[1,8], index: 1, kind: input, shape index: {}]   ;;  %s159_s2 = inlined_call_operand.vmem [shape: f32[1,8], index: 2, kind: input, shape index: {}]   ;;  %s160_s3 = inlined_call_operand.vmem [shape: f32[64,8], index: 3, kind: output, shape index: {}]  }
   0x1   :  { %v14_v0 = vld [vmem:[%s157_s0] sm:$0xff]  ;;  %v15_v4 = vld [vmem:[%s157_s0 + $0x8] sm:$0xff]  ;;  %v16_v5 = vld [vmem:[%s157_s0 + $0x10] sm:$0xff] }
   0x2   :  { %v73_v1 = vld [vmem:[%s158_s1] ss:$0 sm:$0xff]  ;;  %v17_v6 = vld [vmem:[%s157_s0 + $0x18] sm:$0xff]  ;;  %v19_v11 = vld [vmem:[%s157_s0 + $0x28] sm:$0xff] }
   0x3   :  { %v74_v2 = vld [vmem:[%s159_s2] ss:$0 sm:$0xff]  ;;  %v29_v3 = vmul.f32 %v73_v1, %v14_v0  ;;  %v30_v7 = vmul.f32 %v73_v1, %v15_v4  ;;  %v31_v8 = vmul.f32 %v73_v1, %v16_v5  ;;  %v32_v9 = vmul.f32 %v73_v1, %v17_v6  ;;  %v20_v12 = vld [vmem:[%s157_s0 + $0x30] sm:$0xff]  ;;  %v21_v17 = vld [vmem:[%s157_s0 + $0x38] sm:$0xff] }
   0x4   :  { %v18_v10 = vld [vmem:[%s157_s0 + $0x20] sm:$0xff]  ;;  %v34_v15 = vmul.f32 %v73_v1, %v19_v11  ;;  %v35_v16 = vmul.f32 %v73_v1, %v20_v12  ;;  %v36_v21 = vmul.f32 %v73_v1, %v21_v17 }
   0x5   :  { %v44_v13 = vadd.f32 %v74_v2, %v29_v3  ;;  %v33_v14 = vmul.f32 %v73_v1, %v18_v10  ;;  %v45_v18 = vadd.f32 %v74_v2, %v30_v7  ;;  %v46_v19 = vadd.f32 %v74_v2, %v31_v8 }
   0x6   :  { %v47_v20 = vadd.f32 %v74_v2, %v32_v9  ;;  %v49_v24 = vadd.f32 %v74_v2, %v34_v15  ;;  %v50_v25 = vadd.f32 %v74_v2, %v35_v16  ;;  %v51_v29 = vadd.f32 %v74_v2, %v36_v21 }
   0x7   :  { %v52_v22 = vmax.f32 %v44_v13, 0.0  ;;  %v48_v23 = vadd.f32 %v74_v2, %v33_v14  ;;  %v53_v26 = vmax.f32 %v45_v18, 0.0  ;;  %v54_v27 = vmax.f32 %v46_v19, 0.0 }
   0x8   :  { %v55_v28 = vmax.f32 %v47_v20, 0.0  ;;  %v57_v31 = vmax.f32 %v49_v24, 0.0  ;;  %v58_v32 = vmax.f32 %v50_v25, 0.0  ;;  %v59_v33 = vmax.f32 %v51_v29, 0.0 }
   0x9   :  { %61 = vst.msk [vmem:[%s160_s3] sm:$0xff] %vm60_vm0, %v52_v22  ;;  %v56_v30 = vmax.f32 %v48_v23, 0.0  ;;  %62 = vst.msk [vmem:[%s160_s3 + $0x8] sm:$0xff] %vm60_vm0, %v53_v26 }
   0xa   :  { %63 = vst.msk [vmem:[%s160_s3 + $0x10] sm:$0xff] %vm60_vm0, %v54_v27  ;;  %64 = vst.msk [vmem:[%s160_s3 + $0x18] sm:$0xff] %vm60_vm0, %v55_v28 }
   0xb   :  { %65 = vst.msk [vmem:[%s160_s3 + $0x20] sm:$0xff] %vm60_vm0, %v56_v30  ;;  %66 = vst.msk [vmem:[%s160_s3 + $0x28] sm:$0xff] %vm60_vm0, %v57_v31 }
   0xc   :  { %67 = vst.msk [vmem:[%s160_s3 + $0x30] sm:$0xff] %vm60_vm0, %v58_v32  ;;  %68 = vst.msk [vmem:[%s160_s3 + $0x38] sm:$0xff] %vm60_vm0, %v59_v33 }

// kernel: manner_forward.62
= control target key start
LH: loop header
LB: loop body
LE: loop exit
PB: predicated region body
PF: predicated region fallthrough
CT: control target
= control target key end

     0   :  { %vm82_vm0 = vcmask 261120   ;;  %s342_s1 = inlined_call_operand.vmem [shape: bf16[32,128], index: 1, kind: input, shape index: {}]   ;;  %s343_s0 = inlined_call_operand.vmem [shape: bf16[64,32], index: 0, kind: input, shape index: {}]   ;;  %s344_s2 = inlined_call_operand.vmem [shape: f32[1,128], index: 2, kind: input, shape index: {}]   ;;  %s345_s3 = inlined_call_operand.vmem [shape: f32[1,128], index: 3, kind: input, shape index: {}]   ;;  %s346_s4 = inlined_call_operand.vmem [shape: f32[64,128], index: 4, kind: output, shape index: {}]  }
   0x1   :  { %v263_v0 = vld [vmem:[%s342_s1] sm:$0xff]   ;;  %v264_v1 = vld [vmem:[%s342_s1 + $0x8] sm:$0xff]   ;;  %v266_v3 = vld [vmem:[%s343_s0 + $0x10] sm:$0xff]  }
   0x2   :  { %247 = vmatprep.subr.bf16.mxu0 %v263_v0  ;;  %259 = vmatprep.subr.bf16.mxu1 %v263_v0  ;;  %v265_v2 = vld [vmem:[%s343_s0] sm:$0xff]   ;;  %v267_v4 = vld [vmem:[%s343_s0 + $0x8] sm:$0xff]   ;;  %v268_v5 = vld [vmem:[%s343_s0 + $0x18] sm:$0xff]  }
   0x3   :  { %248 = vmatpush3.bf16.msra.mxu0 %v263_v0  ;;  %261 = vmatpush3.bf16.msra.mxu1 %v263_v0  ;;  %v239_v6 = vld [vmem:[%s344_s2] ss:$0 sm:$0xff] }
   0x4   :  { %249 = vmatprep.subr.bf16.mxu0 %v264_v1  ;;  %260 = vmatprep.subr.bf16.mxu1 %v264_v1  ;;  %v240_v8 = vld [vmem:[%s345_s3] ss:$0 sm:$0xff] }
   0x5   :  { %251 = vmatprep.mubr.msk.bf16.mxu0 %vm82_vm0, %v265_v2  ;;  %255 = vmatprep.mubr.msk.bf16.mxu1 %vm82_vm0, %v266_v3 }
   0x7   :  { %250 = vmatpush3.bf16.msra.mxu0 %v264_v1  ;;  %262 = vmatpush3.bf16.msra.mxu1 %v264_v1 }
   0xa   :  { %252 = vmatmul.mubr.msk.bf16.vlgmr.msra.gmra.mrb[0].mxu0 %vm82_vm0, %v267_v4  ;;  %256 = vmatmul.mubr.msk.bf16.vlgmr.msra.gmra.mrb[0].mxu1 %vm82_vm0, %v268_v5 }
  0xdd   :  { %v253_v7 = vpop.f32.mrb[0].mxu0  ;;  %v257_v9 = vpop.f32.mrb[0].mxu1 }
  0xde   :  { %v196_v10 = vmul.f32 %v253_v7, %v239_v6  ;;  %v200_v11 = vmul.f32 %v257_v9, %v239_v6  ;;  %v129_v12 = vpop.f32.mrb[1].mxu0  ;;  %v145_v13 = vpop.f32.mrb[1].mxu1 }
  0xdf   :  { %v194_v14 = vmul.f32 %v239_v6, %v129_v12  ;;  %v198_v15 = vmul.f32 %v239_v6, %v145_v13  ;;  %v254_v16 = vpop.f32.mrb[2].mxu0  ;;  %v258_v17 = vpop.f32.mrb[2].mxu1 }
  0xe0   :  { %v211_v18 = vadd.f32 %v240_v8, %v196_v10  ;;  %v215_v19 = vadd.f32 %v240_v8, %v200_v11  ;;  %v197_v20 = vmul.f32 %v254_v16, %v239_v6  ;;  %v201_v21 = vmul.f32 %v258_v17, %v239_v6  ;;  %v132_v22 = vpop.f32.mrb[3].mxu0  ;;  %v148_v23 = vpop.f32.mrb[3].mxu1 }
  0xe1   :  { %v209_v24 = vadd.f32 %v240_v8, %v194_v14  ;;  %v213_v25 = vadd.f32 %v240_v8, %v198_v15  ;;  %v195_v26 = vmul.f32 %v239_v6, %v132_v22  ;;  %v199_v27 = vmul.f32 %v239_v6, %v148_v23 }
  0xe2   :  { %219 = vst [vmem:[%s346_s4 + $0x10] sm:$0xff] %v211_v18  ;;  %223 = vst [vmem:[%s346_s4 + $0x30] sm:$0xff] %v215_v19  ;;  %v212_v28 = vadd.f32 %v240_v8, %v197_v20  ;;  %v216_v29 = vadd.f32 %v240_v8, %v201_v21 }
  0xe3   :  { %217 = vst [vmem:[%s346_s4] sm:$0xff] %v209_v24  ;;  %221 = vst [vmem:[%s346_s4 + $0x20] sm:$0xff] %v213_v25  ;;  %v210_v30 = vadd.f32 %v240_v8, %v195_v26  ;;  %v214_v31 = vadd.f32 %v240_v8, %v199_v27 }
  0xe4   :  { %220 = vst [vmem:[%s346_s4 + $0x18] sm:$0xff] %v212_v28  ;;  %224 = vst [vmem:[%s346_s4 + $0x38] sm:$0xff] %v216_v29 }
  0xe5   :  { %218 = vst [vmem:[%s346_s4 + $0x8] sm:$0xff] %v210_v30  ;;  %222 = vst [vmem:[%s346_s4 + $0x28] sm:$0xff] %v214_v31 }

// kernel: manner_forward.66
= control target key start
LH: loop header
LB: loop body
LE: loop exit
PB: predicated region body
PF: predicated region fallthrough
CT: control target
= control target key end

     0   :  { %s378_s12 = smov 0   ;;  %s423_s0 = inlined_call_operand.vmem [shape: f32[2,34,8], index: 0, kind: input, shape index: {}]   ;;  %s424_s1 = inlined_call_operand.vmem [shape: f32[3,8], index: 1, kind: input, shape index: {}]   ;;  %s425_s2 = inlined_call_operand.vmem [shape: f32[1,8], index: 2, kind: input, shape index: {}]   ;;  %s426_s3 = inlined_call_operand.vmem [shape: f32[2,32,8], index: 3, kind: output, shape index: {}]  }
   0x1 LB: > { %s326_s13 = sadd.s32 4294967295, %s356_s12   ;;  %p330_p0 = scmp.ge.s32.totalorder %s356_s12, 1  ;;  %s356_s12 = sphi %s378_s12, %s13_s12  }
   0x2   : > { %p137_p1 = scmp.lt.s32.totalorder %s356_s12, 3 }
   0x4   : > { %p138_p2 = pnand %p330_p0, %p137_p1 }
   0x5   : > { %p161_p3 = scmp.lt.s32.totalorder (!%p138_p2), %s326_s13, 1  ;;  %v334_v0 = vld [vmem:[%s424_s1] ss:$0 sm:$0xff] (!%p138_p2)  ;;  %v335_v1 = vld [vmem:[%s424_s1 + $0x1] ss:$0 sm:$0xff] (!%p138_p2)  ;;  %vm204_vm0 = vcmask (!%p138_p2), 1046528  }
   0x6   : > { %141 = sbr.rel (%p138_p2) target bundleno = 35 (0x23), region = 32  ;;  %v336_v2 = vld [vmem:[%s424_s1 + $0x2] ss:$0 sm:$0xff] (!%p138_p2)  ;;  %vm237_vm1 = vcmask (!%p138_p2), 1045504   ;;  %v337_v32 = vld [vmem:[%s425_s2] ss:$0 sm:$0xff] (!%p138_p2) }
   0x7   : > { %vm266_vm2 = vcmask (!%p138_p2), 64512  }
   0xd   : > { %s428_s13 = smov (!%p161_p3, %s326_s13), 1 }
   0xe   : > { %s341_s14 = smul.u32 40, %s428_s13  ;;  %s340_s24 = sshll.u32 %s428_s13, 5 }
   0xf   : > { %s170_s29 = scalar_lea.vmem %s426_s3, %s340_s24 }
  0x10   : > { %s165_s23 = scalar_lea.vmem %s423_s0, %s341_s14 }
  0x11   : > { %v171_v3 = vld [vmem:[%s165_s23] sm:$0xff]  ;;  %v172_v4 = vld [vmem:[%s165_s23 + $0x8] sm:$0xff]  ;;  %v173_v5 = vld [vmem:[%s165_s23 + $0x10] sm:$0xff] }
  0x12   : > { %v181_v6 = vmul.f32 %v334_v0, %v171_v3  ;;  %v194_v7 = vmul.f32 %v335_v1, %v171_v3  ;;  %v195_v8 = vmul.f32 %v335_v1, %v172_v4  ;;  %v227_v9 = vmul.f32 %v336_v2, %v171_v3  ;;  %v174_v10 = vld [vmem:[%s165_s23 + $0x18] sm:$0xff]  ;;  %v175_v15 = vld [vmem:[%s165_s23 + $0x20] sm:$0x3] }
  0x13   : > { %v228_v11 = vmul.f32 %v336_v2, %v172_v4  ;;  %v182_v12 = vmul.f32 %v334_v0, %v172_v4  ;;  %v196_v13 = vmul.f32 %v335_v1, %v173_v5  ;;  %v229_v14 = vmul.f32 %v336_v2, %v173_v5 }
  0x14   : > { %v205_v16 = vrot.slane %v194_v7, 1  ;;  %v206_v17 = vrot.slane %v195_v8, 1  ;;  %v238_v18 = vrot.slane %v227_v9, 2  ;;  %v183_v19 = vmul.f32 %v334_v0, %v173_v5 }
  0x15   : > { %v239_v20 = vrot.slane %v228_v11, 2  ;;  %v208_v21 = vrot.slane %v196_v13, 1  ;;  %v241_v22 = vrot.slane %v229_v14, 2  ;;  %v197_v23 = vmul.f32 %v335_v1, %v174_v10 }
  0x16   : > { %v207_v24 = vsel %vm204_vm0, %v205_v16, %v206_v17  ;;  %v230_v25 = vmul.f32 %v336_v2, %v174_v10  ;;  %v184_v26 = vmul.f32 %v334_v0, %v174_v10  ;;  %v198_v27 = vmul.f32 %v335_v1, %v175_v15 }
  0x17   : > { %v218_v28 = vadd.f32 %v207_v24, %v181_v6  ;;  %v240_v29 = vsel %vm237_vm1, %v238_v18, %v239_v20  ;;  %v209_v30 = vsel %vm204_vm0, %v206_v17, %v208_v21  ;;  %v242_v31 = vsel %vm237_vm1, %v239_v20, %v241_v22 }
  0x18   : > { %v219_v33 = vadd.f32 %v209_v30, %v182_v12  ;;  %v210_v34 = vrot.slane %v197_v23, 1  ;;  %v243_v35 = vrot.slane %v230_v25, 2  ;;  %v212_v36 = vrot.slane %v198_v27, 1 }
  0x19   : > { %v251_v37 = vadd.f32 %v240_v29, %v218_v28  ;;  %v231_v38 = vmul.f32 %v336_v2, %v175_v15 }
  0x1a   : > { %v252_v39 = vadd.f32 %v242_v31, %v219_v33  ;;  %v211_v40 = vsel %vm204_vm0, %v208_v21, %v210_v34  ;;  %v244_v41 = vsel %vm237_vm1, %v241_v22, %v243_v35  ;;  %v213_v42 = vsel %vm204_vm0, %v210_v34, %v212_v36 }
  0x1b   : > { %v262_v43 = vadd.f32 %v337_v32, %v251_v37  ;;  %v220_v44 = vadd.f32 %v211_v40, %v183_v19  ;;  %v221_v45 = vadd.f32 %v213_v42, %v184_v26  ;;  %v245_v46 = vrot.slane %v231_v38, 2 }
  0x1c   : > { %v263_v47 = vadd.f32 %v337_v32, %v252_v39 }
  0x1d   : > { %267 = vst.msk [vmem:[%s170_s29] sm:$0xff] %vm266_vm2, %v262_v43  ;;  %v253_v48 = vadd.f32 %v244_v41, %v220_v44  ;;  %v246_v49 = vsel %vm237_vm1, %v243_v35, %v245_v46 }
  0x1e   : > { %268 = vst.msk [vmem:[%s170_s29 + $0x8] sm:$0xff] %vm266_vm2, %v263_v47  ;;  %v254_v50 = vadd.f32 %v246_v49, %v221_v45 }
  0x1f   : > { %v264_v51 = vadd.f32 %v337_v32, %v253_v48 }
  0x20   : > { %v265_v52 = vadd.f32 %v337_v32, %v254_v50 }
  0x21   : > { %269 = vst.msk [vmem:[%s170_s29 + $0x10] sm:$0xff] %vm266_vm2, %v264_v51 }
  0x22   : > { %270 = vst.msk [vmem:[%s170_s29 + $0x18] sm:$0xff] %vm266_vm2, %v265_v52 }
  0x23 PF: > { %s13_s12 = sadd.s32 1, %s356_s12  }
  0x24   : > { %p10_p4 = scmp.ge.s32.totalorder %s13_s12, 4  }
  0x26   :  { %12 = sbr.rel (!%p10_p4) target bundleno = 1 (0x1), region = 62 }

// kernel: manner_forward.64
= control target key start
LH: loop header
LB: loop body
LE: loop exit
PB: predicated region body
PF: predicated region fallthrough
CT: control target
= control target key end

     0   :  { %vm74_vm0 = vcmask 130048   ;;  %s324_s1 = inlined_call_operand.vmem [shape: bf16[16,128], index: 1, kind: input, shape index: {}]   ;;  %s325_s0 = inlined_call_operand.vmem [shape: bf16[64,16], index: 0, kind: input, shape index: {}]   ;;  %s326_s2 = inlined_call_operand.vmem [shape: f32[1,128], index: 2, kind: input, shape index: {}]   ;;  %s327_s3 = inlined_call_operand.vmem [shape: f32[1,128], index: 3, kind: input, shape index: {}]   ;;  %s328_s4 = inlined_call_operand.vmem [shape: f32[64,128], index: 4, kind: output, shape index: {}]  }
   0x1   :  { %v249_v0 = vld [vmem:[%s324_s1] sm:$0xff]   ;;  %v251_v2 = vld [vmem:[%s325_s0 + $0x10] sm:$0xff]   ;;  %v252_v3 = vld [vmem:[%s325_s0 + $0x8] sm:$0xff]  }
   0x2   :  { %v250_v1 = vld [vmem:[%s325_s0] sm:$0xff]   ;;  %237 = vmatprep.subr.bf16.mxu0 %v249_v0  ;;  %247 = vmatprep.subr.bf16.mxu1 %v249_v0  ;;  %v253_v4 = vld [vmem:[%s325_s0 + $0x18] sm:$0xff]  }
   0x3   :  { %238 = vmatpush3.bf16.msra.mxu0 %v249_v0  ;;  %248 = vmatpush3.bf16.msra.mxu1 %v249_v0  ;;  %v230_v5 = vld [vmem:[%s326_s2] ss:$0 sm:$0xff] }
   0x4   :  { %239 = vmatprep.mubr.msk.bf16.mxu0 %vm74_vm0, %v250_v1  ;;  %243 = vmatprep.mubr.msk.bf16.mxu1 %vm74_vm0, %v251_v2  ;;  %v231_v7 = vld [vmem:[%s327_s3] ss:$0 sm:$0xff] }
   0x6   :  { %240 = vmatmul.mubr.msk.bf16.vlgmr.msra.gmra.mrb[0].mxu0 %vm74_vm0, %v252_v3  ;;  %244 = vmatmul.mubr.msk.bf16.vlgmr.msra.gmra.mrb[0].mxu1 %vm74_vm0, %v253_v4 }
  0xd9   :  { %v241_v6 = vpop.f32.mrb[0].mxu0  ;;  %v245_v8 = vpop.f32.mrb[0].mxu1 }
  0xda   :  { %v188_v9 = vmul.f32 %v241_v6, %v230_v5  ;;  %v192_v10 = vmul.f32 %v245_v8, %v230_v5  ;;  %v121_v11 = vpop.f32.mrb[1].mxu0  ;;  %v137_v12 = vpop.f32.mrb[1].mxu1 }
  0xdb   :  { %v186_v13 = vmul.f32 %v230_v5, %v121_v11  ;;  %v190_v14 = vmul.f32 %v230_v5, %v137_v12  ;;  %v242_v15 = vpop.f32.mrb[2].mxu0  ;;  %v246_v16 = vpop.f32.mrb[2].mxu1 }
  0xdc   :  { %v203_v17 = vadd.f32 %v231_v7, %v188_v9  ;;  %v207_v18 = vadd.f32 %v231_v7, %v192_v10  ;;  %v189_v19 = vmul.f32 %v242_v15, %v230_v5  ;;  %v193_v20 = vmul.f32 %v246_v16, %v230_v5  ;;  %v124_v21 = vpop.f32.mrb[3].mxu0  ;;  %v140_v22 = vpop.f32.mrb[3].mxu1 }
  0xdd   :  { %v201_v23 = vadd.f32 %v231_v7, %v186_v13  ;;  %v205_v24 = vadd.f32 %v231_v7, %v190_v14  ;;  %v187_v25 = vmul.f32 %v230_v5, %v124_v21  ;;  %v191_v26 = vmul.f32 %v230_v5, %v140_v22 }
  0xde   :  { %211 = vst [vmem:[%s328_s4 + $0x10] sm:$0xff] %v203_v17  ;;  %215 = vst [vmem:[%s328_s4 + $0x30] sm:$0xff] %v207_v18  ;;  %v204_v27 = vadd.f32 %v231_v7, %v189_v19  ;;  %v208_v28 = vadd.f32 %v231_v7, %v193_v20 }
  0xdf   :  { %209 = vst [vmem:[%s328_s4] sm:$0xff] %v201_v23  ;;  %213 = vst [vmem:[%s328_s4 + $0x20] sm:$0xff] %v205_v24  ;;  %v202_v29 = vadd.f32 %v231_v7, %v187_v25  ;;  %v206_v30 = vadd.f32 %v231_v7, %v191_v26 }
  0xe0   :  { %212 = vst [vmem:[%s328_s4 + $0x18] sm:$0xff] %v204_v27  ;;  %216 = vst [vmem:[%s328_s4 + $0x38] sm:$0xff] %v208_v28 }
  0xe1   :  { %210 = vst [vmem:[%s328_s4 + $0x8] sm:$0xff] %v202_v29  ;;  %214 = vst [vmem:[%s328_s4 + $0x28] sm:$0xff] %v206_v30 }

// kernel: manner_forward.65
= control target key start
LH: loop header
LB: loop body
LE: loop exit
PB: predicated region body
PF: predicated region fallthrough
CT: control target
= control target key end

     0   :  { %vm140_vm0 = vcmask 64512   ;;  %s311_s0 = inlined_call_operand.vmem [shape: f32[64,16], index: 0, kind: input, shape index: {}]   ;;  %s312_s1 = inlined_call_operand.vmem [shape: f32[1,16], index: 1, kind: input, shape index: {}]   ;;  %s313_s2 = inlined_call_operand.vmem [shape: f32[1,16], index: 2, kind: input, shape index: {}]   ;;  %s314_s3 = inlined_call_operand.vmem [shape: f32[64,8], index: 3, kind: output, shape index: {}]  }
   0x1   :  { %v16_v0 = vld [vmem:[%s311_s0 + $0x10] sm:$0xff]  ;;  %v153_v1 = vld [vmem:[%s312_s1] ss:$0 sm:$0xff]  ;;  %v17_v5 = vld [vmem:[%s311_s0 + $0x18] sm:$0xff] }
   0x2   :  { %v154_v2 = vld [vmem:[%s313_s2] ss:$0 sm:$0xff]  ;;  %v31_v3 = vmul.f32 %v153_v1, %v16_v0  ;;  %v15_v6 = vld [vmem:[%s311_s0 + $0x8] sm:$0xff]  ;;  %v32_v8 = vmul.f32 %v153_v1, %v17_v5  ;;  %v21_v12 = vld [vmem:[%s311_s0 + $0x38] sm:$0xff] }
   0x3   :  { %v14_v4 = vld [vmem:[%s311_s0] sm:$0xff]  ;;  %v30_v9 = vmul.f32 %v153_v1, %v15_v6  ;;  %v19_v10 = vld [vmem:[%s311_s0 + $0x28] sm:$0xff]  ;;  %v36_v16 = vmul.f32 %v153_v1, %v21_v12  ;;  %v20_v17 = vld [vmem:[%s311_s0 + $0x30] sm:$0xff] }
   0x4   :  { %v29_v7 = vmul.f32 %v153_v1, %v14_v4  ;;  %v18_v11 = vld [vmem:[%s311_s0 + $0x20] sm:$0xff]  ;;  %v244_v13 = vadd.f32 %v154_v2, %v31_v3  ;;  %v34_v14 = vmul.f32 %v153_v1, %v19_v10  ;;  %v251_v19 = vadd.f32 %v154_v2, %v32_v8  ;;  %s196_s0 = smov 120  }
   0x5   :  { %v33_v15 = vmul.f32 %v153_v1, %v18_v11  ;;  %v253_v20 = vadd.f32 %v154_v2, %v30_v9  ;;  %v35_v21 = vmul.f32 %v153_v1, %v20_v17  ;;  %v260_v25 = vadd.f32 %v154_v2, %v36_v16 }
   0x6   :  { %v249_v18 = vadd.f32 %v154_v2, %v29_v7  ;;  %v157_v22 = vmul.f32 -1.442695, %v244_v13  ;;  %v256_v23 = vadd.f32 %v154_v2, %v34_v14  ;;  %v158_v27 = vmul.f32 -1.442695, %v251_v19 }
   0x7   :  { %v258_v24 = vadd.f32 %v154_v2, %v33_v15  ;;  %v156_v28 = vmul.f32 -1.442695, %v253_v20  ;;  %v265_v29 = vadd.f32 %v154_v2, %v35_v21  ;;  %v162_v32 = vmul.f32 -1.442695, %v260_v25 }
   0x8   :  { %v155_v26 = vmul.f32 -1.442695, %v249_v18  ;;  %164 = vpow2.f32 %v157_v22  ;;  %v160_v30 = vmul.f32 -1.442695, %v256_v23 }
   0x9   :  { %v159_v31 = vmul.f32 -1.442695, %v258_v24  ;;  %v161_v33 = vmul.f32 -1.442695, %v265_v29 }
   0xa   :  { %166 = vpow2.f32 %v155_v26 }
   0xb   :  { %168 = vpow2.f32 %v158_v27 }
   0xc   :  { %170 = vpow2.f32 %v156_v28 }
   0xd   :  { %172 = vpow2.f32 %v160_v30 }
   0xe   :  { %174 = vpow2.f32 %v159_v31 }
   0xf   :  { %176 = vpow2.f32 %v162_v32 }
  0x10   :  { %178 = vpow2.f32 %v161_v33 }
  0x12   :  { %v165_v34 = vpop.eup %164 }
  0x13   :  { %v78_v36 = vadd.f32 1.0, %v165_v34 }
  0x14   :  { %v167_v35 = vpop.eup %166 }
  0x15   :  { %v169_v37 = vpop.eup %168  ;;  %v76_v38 = vadd.f32 1.0, %v167_v35  ;;  %180 = vrcp.f32 %v78_v36 }
  0x16   :  { %v171_v39 = vpop.eup %170  ;;  %v79_v40 = vadd.f32 1.0, %v169_v37 }
  0x17   :  { %v173_v41 = vpop.eup %172  ;;  %182 = vrcp.f32 %v76_v38  ;;  %v77_v42 = vadd.f32 1.0, %v171_v39 }
  0x18   :  { %v175_v43 = vpop.eup %174  ;;  %184 = vrcp.f32 %v79_v40  ;;  %v81_v44 = vadd.f32 1.0, %v173_v41 }
  0x19   :  { %v177_v45 = vpop.eup %176  ;;  %186 = vrcp.f32 %v77_v42  ;;  %v80_v46 = vadd.f32 1.0, %v175_v43 }
  0x1a   :  { %v179_v47 = vpop.eup %178  ;;  %188 = vrcp.f32 %v81_v44  ;;  %v83_v48 = vadd.f32 1.0, %v177_v45 }
  0x1b   :  { %190 = vrcp.f32 %v80_v46  ;;  %v82_v49 = vadd.f32 1.0, %v179_v47 }
  0x1c   :  { %192 = vrcp.f32 %v83_v48 }
  0x1d   :  { %194 = vrcp.f32 %v82_v49 }
  0x1f   :  { %v181_v50 = vpop.eup %180 }
  0x20   :  { %112 = vrot.lane.b32.xlu1 %v181_v50, %s196_s0 }
  0x21   :  { %v183_v51 = vpop.eup %182 }
  0x22   :  { %v185_v52 = vpop.eup %184  ;;  %108 = vrot.lane.b32.xlu0 %v183_v51, %s196_s0 }
  0x23   :  { %v187_v53 = vpop.eup %186 }
  0x24   :  { %114 = vrot.lane.b32.xlu1 %v185_v52, %s196_s0  ;;  %v189_v54 = vpop.eup %188 }
  0x25   :  { %v191_v55 = vpop.eup %190 }
  0x26   :  { %110 = vrot.lane.b32.xlu0 %v187_v53, %s196_s0  ;;  %v193_v56 = vpop.eup %192 }
  0x27   :  { %v195_v57 = vpop.eup %194 }
  0x28   :  { %118 = vrot.lane.b32.xlu1 %v189_v54, %s196_s0 }
  0x2a   :  { %116 = vrot.lane.b32.xlu0 %v191_v55, %s196_s0 }
  0x2c   :  { %122 = vrot.lane.b32.xlu1 %v193_v56, %s196_s0 }
  0x2e   :  { %120 = vrot.lane.b32.xlu0 %v195_v57, %s196_s0 }
  0x92   :  { %v113_v58 = vpop.permute.xlu1 %112 }
  0x93   :  { %v134_v59 = vmul.f32 %v113_v58, %v244_v13 }
  0x94   :  { %v109_v60 = vpop.permute.xlu0 %108 }
  0x95   :  { %v132_v61 = vmul.f32 %v109_v60, %v249_v18  ;;  %143 = vst.msk [vmem:[%s314_s3 + $0x10] sm:$0xff] %vm140_vm0, %v134_v59 }
  0x96   :  { %v115_v62 = vpop.permute.xlu1 %114 }
  0x97   :  { %141 = vst.msk [vmem:[%s314_s3] sm:$0xff] %vm140_vm0, %v132_v61  ;;  %v135_v63 = vmul.f32 %v115_v62, %v251_v19 }
  0x98   :  { %v111_v0 = vpop.permute.xlu0 %110 }
  0x99   :  { %v133_v1 = vmul.f32 %v111_v0, %v253_v20  ;;  %144 = vst.msk [vmem:[%s314_s3 + $0x18] sm:$0xff] %vm140_vm0, %v135_v63 }
  0x9a   :  { %v119_v2 = vpop.permute.xlu1 %118 }
  0x9b   :  { %142 = vst.msk [vmem:[%s314_s3 + $0x8] sm:$0xff] %vm140_vm0, %v133_v1  ;;  %v137_v3 = vmul.f32 %v119_v2, %v256_v23 }
  0x9c   :  { %v117_v4 = vpop.permute.xlu0 %116 }
  0x9d   :  { %v136_v5 = vmul.f32 %v117_v4, %v258_v24  ;;  %146 = vst.msk [vmem:[%s314_s3 + $0x28] sm:$0xff] %vm140_vm0, %v137_v3 }
  0x9e   :  { %v123_v6 = vpop.permute.xlu1 %122 }
  0x9f   :  { %145 = vst.msk [vmem:[%s314_s3 + $0x20] sm:$0xff] %vm140_vm0, %v136_v5  ;;  %v139_v7 = vmul.f32 %v123_v6, %v260_v25 }
  0xa0   :  { %v121_v8 = vpop.permute.xlu0 %120 }
  0xa1   :  { %v138_v9 = vmul.f32 %v121_v8, %v265_v29  ;;  %148 = vst.msk [vmem:[%s314_s3 + $0x38] sm:$0xff] %vm140_vm0, %v139_v7 }
  0xa3   :  { %147 = vst.msk [vmem:[%s314_s3 + $0x30] sm:$0xff] %vm140_vm0, %v138_v9 }

// kernel: manner_forward.67
= control target key start
LH: loop header
LB: loop body
LE: loop exit
PB: predicated region body
PF: predicated region fallthrough
CT: control target
= control target key end

     0   :  { %vm108_vm0 = vcmask 64512   ;;  %s245_s0 = inlined_call_operand.vmem [shape: f32[64,8], index: 0, kind: input, shape index: {}]   ;;  %s246_s1 = inlined_call_operand.vmem [shape: f32[1,8], index: 1, kind: input, shape index: {}]   ;;  %s247_s2 = inlined_call_operand.vmem [shape: f32[1,8], index: 2, kind: input, shape index: {}]   ;;  %s248_s3 = inlined_call_operand.vmem [shape: f32[64,8], index: 3, kind: output, shape index: {}]  }
   0x1   :  { %v14_v0 = vld [vmem:[%s245_s0] sm:$0xff]  ;;  %v15_v4 = vld [vmem:[%s245_s0 + $0x8] sm:$0xff]  ;;  %v16_v5 = vld [vmem:[%s245_s0 + $0x10] sm:$0xff] }
   0x2   :  { %v121_v1 = vld [vmem:[%s246_s1] ss:$0 sm:$0xff]  ;;  %v17_v6 = vld [vmem:[%s245_s0 + $0x18] sm:$0xff]  ;;  %v19_v11 = vld [vmem:[%s245_s0 + $0x28] sm:$0xff] }
   0x3   :  { %v122_v2 = vld [vmem:[%s247_s2] ss:$0 sm:$0xff]  ;;  %v29_v3 = vmul.f32 %v121_v1, %v14_v0  ;;  %v30_v7 = vmul.f32 %v121_v1, %v15_v4  ;;  %v31_v8 = vmul.f32 %v121_v1, %v16_v5  ;;  %v32_v9 = vmul.f32 %v121_v1, %v17_v6  ;;  %v20_v12 = vld [vmem:[%s245_s0 + $0x30] sm:$0xff]  ;;  %v21_v17 = vld [vmem:[%s245_s0 + $0x38] sm:$0xff] }
   0x4   :  { %v18_v10 = vld [vmem:[%s245_s0 + $0x20] sm:$0xff]  ;;  %v34_v15 = vmul.f32 %v121_v1, %v19_v11  ;;  %v35_v16 = vmul.f32 %v121_v1, %v20_v12  ;;  %v36_v21 = vmul.f32 %v121_v1, %v21_v17 }
   0x5   :  { %v44_v13 = vadd.f32 %v122_v2, %v29_v3  ;;  %v33_v14 = vmul.f32 %v121_v1, %v18_v10  ;;  %v45_v18 = vadd.f32 %v122_v2, %v30_v7  ;;  %v46_v19 = vadd.f32 %v122_v2, %v31_v8 }
   0x6   :  { %v47_v20 = vadd.f32 %v122_v2, %v32_v9  ;;  %v49_v24 = vadd.f32 %v122_v2, %v34_v15  ;;  %v50_v25 = vadd.f32 %v122_v2, %v35_v16  ;;  %v51_v29 = vadd.f32 %v122_v2, %v36_v21 }
   0x7   :  { %v123_v22 = vmul.f32 -1.442695, %v44_v13  ;;  %v48_v23 = vadd.f32 %v122_v2, %v33_v14  ;;  %v124_v26 = vmul.f32 -1.442695, %v45_v18  ;;  %v125_v27 = vmul.f32 -1.442695, %v46_v19 }
   0x8   :  { %v126_v28 = vmul.f32 -1.442695, %v47_v20  ;;  %v128_v31 = vmul.f32 -1.442695, %v49_v24  ;;  %v129_v32 = vmul.f32 -1.442695, %v50_v25 }
   0x9   :  { %131 = vpow2.f32 %v123_v22  ;;  %v127_v30 = vmul.f32 -1.442695, %v48_v23  ;;  %v130_v33 = vmul.f32 -1.442695, %v51_v29 }
   0xa   :  { %133 = vpow2.f32 %v124_v26 }
   0xb   :  { %135 = vpow2.f32 %v125_v27 }
   0xc   :  { %137 = vpow2.f32 %v126_v28 }
   0xd   :  { %139 = vpow2.f32 %v127_v30 }
   0xe   :  { %141 = vpow2.f32 %v128_v31 }
   0xf   :  { %143 = vpow2.f32 %v129_v32 }
  0x10   :  { %145 = vpow2.f32 %v130_v33 }
  0x13   :  { %v132_v34 = vpop.eup %131 }
  0x14   :  { %v134_v35 = vpop.eup %133  ;;  %v76_v36 = vadd.f32 1.0, %v132_v34 }
  0x15   :  { %v136_v37 = vpop.eup %135  ;;  %v77_v38 = vadd.f32 1.0, %v134_v35 }
  0x16   :  { %v138_v39 = vpop.eup %137  ;;  %147 = vrcp.f32 %v76_v36  ;;  %v78_v40 = vadd.f32 1.0, %v136_v37 }
  0x17   :  { %v140_v41 = vpop.eup %139  ;;  %149 = vrcp.f32 %v77_v38  ;;  %v79_v42 = vadd.f32 1.0, %v138_v39 }
  0x18   :  { %v142_v43 = vpop.eup %141  ;;  %151 = vrcp.f32 %v78_v40  ;;  %v80_v44 = vadd.f32 1.0, %v140_v41 }
  0x19   :  { %v144_v45 = vpop.eup %143  ;;  %153 = vrcp.f32 %v79_v42  ;;  %v81_v46 = vadd.f32 1.0, %v142_v43 }
  0x1a   :  { %v146_v47 = vpop.eup %145  ;;  %155 = vrcp.f32 %v80_v44  ;;  %v82_v48 = vadd.f32 1.0, %v144_v45 }
  0x1b   :  { %157 = vrcp.f32 %v81_v46  ;;  %v83_v49 = vadd.f32 1.0, %v146_v47 }
  0x1c   :  { %159 = vrcp.f32 %v82_v48 }
  0x1d   :  { %161 = vrcp.f32 %v83_v49 }
  0x20   :  { %v148_v50 = vpop.eup %147 }
  0x21   :  { %v150_v51 = vpop.eup %149  ;;  %v100_v52 = vmul.f32 %v148_v50, %v44_v13 }
  0x22   :  { %v152_v53 = vpop.eup %151  ;;  %v101_v54 = vmul.f32 %v150_v51, %v45_v18 }
  0x23   :  { %v154_v55 = vpop.eup %153  ;;  %109 = vst.msk [vmem:[%s248_s3] sm:$0xff] %vm108_vm0, %v100_v52  ;;  %v102_v56 = vmul.f32 %v152_v53, %v46_v19 }
  0x24   :  { %v156_v57 = vpop.eup %155  ;;  %110 = vst.msk [vmem:[%s248_s3 + $0x8] sm:$0xff] %vm108_vm0, %v101_v54  ;;  %v103_v58 = vmul.f32 %v154_v55, %v47_v20 }
  0x25   :  { %v158_v59 = vpop.eup %157  ;;  %111 = vst.msk [vmem:[%s248_s3 + $0x10] sm:$0xff] %vm108_vm0, %v102_v56  ;;  %v104_v60 = vmul.f32 %v156_v57, %v48_v23 }
  0x26   :  { %v160_v61 = vpop.eup %159  ;;  %112 = vst.msk [vmem:[%s248_s3 + $0x18] sm:$0xff] %vm108_vm0, %v103_v58  ;;  %v105_v62 = vmul.f32 %v158_v59, %v49_v24 }
  0x27   :  { %v162_v63 = vpop.eup %161  ;;  %113 = vst.msk [vmem:[%s248_s3 + $0x20] sm:$0xff] %vm108_vm0, %v104_v60  ;;  %v106_v0 = vmul.f32 %v160_v61, %v50_v25 }
  0x28   :  { %114 = vst.msk [vmem:[%s248_s3 + $0x28] sm:$0xff] %vm108_vm0, %v105_v62  ;;  %v107_v1 = vmul.f32 %v162_v63, %v51_v29 }
  0x29   :  { %115 = vst.msk [vmem:[%s248_s3 + $0x30] sm:$0xff] %vm108_vm0, %v106_v0 }
  0x2a   :  { %116 = vst.msk [vmem:[%s248_s3 + $0x38] sm:$0xff] %vm108_vm0, %v107_v1 }

// kernel: manner_forward.69
= control target key start
LH: loop header
LB: loop body
LE: loop exit
PB: predicated region body
PF: predicated region fallthrough
CT: control target
= control target key end

     0   :  { %vm60_vm0 = vcmask 130048   ;;  %s157_s0 = inlined_call_operand.vmem [shape: f32[64,16], index: 0, kind: input, shape index: {}]   ;;  %s158_s1 = inlined_call_operand.vmem [shape: f32[1,16], index: 1, kind: input, shape index: {}]   ;;  %s159_s2 = inlined_call_operand.vmem [shape: f32[1,16], index: 2, kind: input, shape index: {}]   ;;  %s160_s3 = inlined_call_operand.vmem [shape: f32[64,16], index: 3, kind: output, shape index: {}]  }
   0x1   :  { %v14_v0 = vld [vmem:[%s157_s0] sm:$0xff]  ;;  %v15_v4 = vld [vmem:[%s157_s0 + $0x8] sm:$0xff]  ;;  %v16_v5 = vld [vmem:[%s157_s0 + $0x10] sm:$0xff] }
   0x2   :  { %v73_v1 = vld [vmem:[%s158_s1] ss:$0 sm:$0xff]  ;;  %v17_v6 = vld [vmem:[%s157_s0 + $0x18] sm:$0xff]  ;;  %v19_v11 = vld [vmem:[%s157_s0 + $0x28] sm:$0xff] }
   0x3   :  { %v74_v2 = vld [vmem:[%s159_s2] ss:$0 sm:$0xff]  ;;  %v29_v3 = vmul.f32 %v73_v1, %v14_v0  ;;  %v30_v7 = vmul.f32 %v73_v1, %v15_v4  ;;  %v31_v8 = vmul.f32 %v73_v1, %v16_v5  ;;  %v32_v9 = vmul.f32 %v73_v1, %v17_v6  ;;  %v20_v12 = vld [vmem:[%s157_s0 + $0x30] sm:$0xff]  ;;  %v21_v17 = vld [vmem:[%s157_s0 + $0x38] sm:$0xff] }
   0x4   :  { %v18_v10 = vld [vmem:[%s157_s0 + $0x20] sm:$0xff]  ;;  %v34_v15 = vmul.f32 %v73_v1, %v19_v11  ;;  %v35_v16 = vmul.f32 %v73_v1, %v20_v12  ;;  %v36_v21 = vmul.f32 %v73_v1, %v21_v17 }
   0x5   :  { %v44_v13 = vadd.f32 %v74_v2, %v29_v3  ;;  %v33_v14 = vmul.f32 %v73_v1, %v18_v10  ;;  %v45_v18 = vadd.f32 %v74_v2, %v30_v7  ;;  %v46_v19 = vadd.f32 %v74_v2, %v31_v8 }
   0x6   :  { %v47_v20 = vadd.f32 %v74_v2, %v32_v9  ;;  %v49_v24 = vadd.f32 %v74_v2, %v34_v15  ;;  %v50_v25 = vadd.f32 %v74_v2, %v35_v16  ;;  %v51_v29 = vadd.f32 %v74_v2, %v36_v21 }
   0x7   :  { %v52_v22 = vmax.f32 %v44_v13, 0.0  ;;  %v48_v23 = vadd.f32 %v74_v2, %v33_v14  ;;  %v53_v26 = vmax.f32 %v45_v18, 0.0  ;;  %v54_v27 = vmax.f32 %v46_v19, 0.0 }
   0x8   :  { %v55_v28 = vmax.f32 %v47_v20, 0.0  ;;  %v57_v31 = vmax.f32 %v49_v24, 0.0  ;;  %v58_v32 = vmax.f32 %v50_v25, 0.0  ;;  %v59_v33 = vmax.f32 %v51_v29, 0.0 }
   0x9   :  { %61 = vst.msk [vmem:[%s160_s3] sm:$0xff] %vm60_vm0, %v52_v22  ;;  %v56_v30 = vmax.f32 %v48_v23, 0.0  ;;  %62 = vst.msk [vmem:[%s160_s3 + $0x8] sm:$0xff] %vm60_vm0, %v53_v26 }
   0xa   :  { %63 = vst.msk [vmem:[%s160_s3 + $0x10] sm:$0xff] %vm60_vm0, %v54_v27  ;;  %64 = vst.msk [vmem:[%s160_s3 + $0x18] sm:$0xff] %vm60_vm0, %v55_v28 }
   0xb   :  { %65 = vst.msk [vmem:[%s160_s3 + $0x20] sm:$0xff] %vm60_vm0, %v56_v30  ;;  %66 = vst.msk [vmem:[%s160_s3 + $0x28] sm:$0xff] %vm60_vm0, %v57_v31 }
   0xc   :  { %67 = vst.msk [vmem:[%s160_s3 + $0x30] sm:$0xff] %vm60_vm0, %v58_v32  ;;  %68 = vst.msk [vmem:[%s160_s3 + $0x38] sm:$0xff] %vm60_vm0, %v59_v33 }

// kernel: manner_forward.72
= control target key start
LH: loop header
LB: loop body
LE: loop exit
PB: predicated region body
PF: predicated region fallthrough
CT: control target
= control target key end

     0   :  { %vm44_vm0 = vcmask 130048   ;;  %s105_s0 = inlined_call_operand.vmem [shape: f32[32,16], index: 0, kind: input, shape index: {}]   ;;  %s106_s1 = inlined_call_operand.vmem [shape: f32[1,16], index: 1, kind: input, shape index: {}]   ;;  %s107_s2 = inlined_call_operand.vmem [shape: f32[1,16], index: 2, kind: input, shape index: {}]   ;;  %s108_s3 = inlined_call_operand.vmem [shape: f32[32,16], index: 3, kind: output, shape index: {}]  }
   0x1   :  { %v14_v0 = vld [vmem:[%s105_s0] sm:$0xff]  ;;  %v15_v4 = vld [vmem:[%s105_s0 + $0x8] sm:$0xff]  ;;  %v16_v5 = vld [vmem:[%s105_s0 + $0x10] sm:$0xff] }
   0x2   :  { %v53_v1 = vld [vmem:[%s106_s1] ss:$0 sm:$0xff]  ;;  %v17_v6 = vld [vmem:[%s105_s0 + $0x18] sm:$0xff] }
   0x3   :  { %v54_v2 = vld [vmem:[%s107_s2] ss:$0 sm:$0xff]  ;;  %v25_v3 = vmul.f32 %v53_v1, %v14_v0  ;;  %v26_v7 = vmul.f32 %v53_v1, %v15_v4  ;;  %v27_v8 = vmul.f32 %v53_v1, %v16_v5  ;;  %v28_v9 = vmul.f32 %v53_v1, %v17_v6 }
   0x5   :  { %v36_v10 = vadd.f32 %v54_v2, %v25_v3  ;;  %v37_v11 = vadd.f32 %v54_v2, %v26_v7  ;;  %v38_v12 = vadd.f32 %v54_v2, %v27_v8  ;;  %v39_v13 = vadd.f32 %v54_v2, %v28_v9 }
   0x7   :  { %v40_v14 = vmax.f32 %v36_v10, 0.0  ;;  %v41_v15 = vmax.f32 %v37_v11, 0.0  ;;  %v42_v16 = vmax.f32 %v38_v12, 0.0  ;;  %v43_v17 = vmax.f32 %v39_v13, 0.0 }
   0x9   :  { %45 = vst.msk [vmem:[%s108_s3] sm:$0xff] %vm44_vm0, %v40_v14  ;;  %46 = vst.msk [vmem:[%s108_s3 + $0x8] sm:$0xff] %vm44_vm0, %v41_v15 }
   0xa   :  { %47 = vst.msk [vmem:[%s108_s3 + $0x10] sm:$0xff] %vm44_vm0, %v42_v16  ;;  %48 = vst.msk [vmem:[%s108_s3 + $0x18] sm:$0xff] %vm44_vm0, %v43_v17 }

// kernel: manner_forward.71
= control target key start
LH: loop header
LB: loop body
LE: loop exit
PB: predicated region body
PF: predicated region fallthrough
CT: control target
= control target key end

     0   :  { %vm76_vm0 = vcmask 523264   ;;  %s272_s1 = inlined_call_operand.vmem [shape: bf16[64,128], index: 1, kind: input, shape index: {}]   ;;  %s273_s0 = inlined_call_operand.vmem [shape: bf16[32,64], index: 0, kind: input, shape index: {}]   ;;  %s274_s2 = inlined_call_operand.vmem [shape: f32[1,128], index: 2, kind: input, shape index: {}]   ;;  %s275_s3 = inlined_call_operand.vmem [shape: f32[1,128], index: 3, kind: input, shape index: {}]   ;;  %s276_s4 = inlined_call_operand.vmem [shape: f32[32,128], index: 4, kind: output, shape index: {}]  }
   0x1   :  { %v205_v0 = vld [vmem:[%s272_s1] sm:$0xff]   ;;  %v206_v1 = vld [vmem:[%s272_s1 + $0x8] sm:$0xff]   ;;  %v207_v2 = vld [vmem:[%s272_s1 + $0x10] sm:$0xff]  }
   0x2   :  { %193 = vmatprep.subr.bf16.mxu0 %v205_v0  ;;  %v209_v3 = vld [vmem:[%s273_s0] sm:$0xff]   ;;  %v208_v4 = vld [vmem:[%s272_s1 + $0x18] sm:$0xff]   ;;  %v210_v5 = vld [vmem:[%s273_s0 + $0x8] sm:$0xff]  }
   0x3   :  { %194 = vmatpush3.bf16.msra.mxu0 %v205_v0  ;;  %201 = vmatprep.mubr.msk.bf16.mxu0 %vm76_vm0, %v209_v3  ;;  %v185_v6 = vld [vmem:[%s274_s2] ss:$0 sm:$0xff] }
   0x4   :  { %195 = vmatprep.subr.bf16.mxu0 %v206_v1  ;;  %v186_v8 = vld [vmem:[%s275_s3] ss:$0 sm:$0xff] }
   0x7   :  { %196 = vmatpush3.bf16.msra.mxu0 %v206_v1 }
   0x8   :  { %197 = vmatprep.subr.bf16.mxu0 %v207_v2 }
   0xb   :  { %198 = vmatpush3.bf16.msra.mxu0 %v207_v2 }
   0xc   :  { %199 = vmatprep.subr.bf16.mxu0 %v208_v4 }
   0xf   :  { %200 = vmatpush3.bf16.msra.mxu0 %v208_v4 }
  0x12   :  { %202 = vmatmul.mubr.msk.bf16.vlgmr.msra.gmra.mrb[0].mxu0 %vm76_vm0, %v210_v5 }
  0xe5   :  { %v203_v7 = vpop.f32.mrb[0].mxu0 }
  0xe6   :  { %v156_v9 = vmul.f32 %v203_v7, %v185_v6  ;;  %v117_v10 = vpop.f32.mrb[1].mxu0 }
  0xe7   :  { %v154_v11 = vmul.f32 %v185_v6, %v117_v10  ;;  %v204_v12 = vpop.f32.mrb[2].mxu0 }
  0xe8   :  { %v167_v13 = vadd.f32 %v186_v8, %v156_v9  ;;  %v157_v14 = vmul.f32 %v204_v12, %v185_v6  ;;  %v120_v15 = vpop.f32.mrb[3].mxu0 }
  0xe9   :  { %v165_v16 = vadd.f32 %v186_v8, %v154_v11  ;;  %v155_v17 = vmul.f32 %v185_v6, %v120_v15 }
  0xea   :  { %171 = vst [vmem:[%s276_s4 + $0x10] sm:$0xff] %v167_v13  ;;  %v168_v18 = vadd.f32 %v186_v8, %v157_v14 }
  0xeb   :  { %169 = vst [vmem:[%s276_s4] sm:$0xff] %v165_v16  ;;  %v166_v19 = vadd.f32 %v186_v8, %v155_v17 }
  0xec   :  { %172 = vst [vmem:[%s276_s4 + $0x18] sm:$0xff] %v168_v18 }
  0xed   :  { %170 = vst [vmem:[%s276_s4 + $0x8] sm:$0xff] %v166_v19 }

// kernel: manner_forward.73
= control target key start
LH: loop header
LB: loop body
LE: loop exit
PB: predicated region body
PF: predicated region fallthrough
CT: control target
= control target key end

     0   :  { %vm52_vm0 = vcmask 130048   ;;  %s224_s1 = inlined_call_operand.vmem [shape: bf16[16,128], index: 1, kind: input, shape index: {}]   ;;  %s225_s0 = inlined_call_operand.vmem [shape: bf16[32,16], index: 0, kind: input, shape index: {}]   ;;  %s226_s2 = inlined_call_operand.vmem [shape: f32[1,128], index: 2, kind: input, shape index: {}]   ;;  %s227_s3 = inlined_call_operand.vmem [shape: f32[1,128], index: 3, kind: input, shape index: {}]   ;;  %s228_s4 = inlined_call_operand.vmem [shape: f32[32,128], index: 4, kind: output, shape index: {}]  }
   0x1   :  { %v169_v0 = vld [vmem:[%s224_s1] sm:$0xff]   ;;  %v171_v2 = vld [vmem:[%s225_s0 + $0x8] sm:$0xff]  }
   0x2   :  { %v170_v1 = vld [vmem:[%s225_s0] sm:$0xff]   ;;  %163 = vmatprep.subr.bf16.mxu0 %v169_v0 }
   0x3   :  { %164 = vmatpush3.bf16.msra.mxu0 %v169_v0  ;;  %165 = vmatprep.mubr.msk.bf16.mxu0 %vm52_vm0, %v170_v1  ;;  %v158_v3 = vld [vmem:[%s226_s2] ss:$0 sm:$0xff] }
   0x4   :  { %v159_v5 = vld [vmem:[%s227_s3] ss:$0 sm:$0xff] }
   0x6   :  { %166 = vmatmul.mubr.msk.bf16.vlgmr.msra.gmra.mrb[0].mxu0 %vm52_vm0, %v171_v2 }
  0xd9   :  { %v167_v4 = vpop.f32.mrb[0].mxu0 }
  0xda   :  { %v132_v6 = vmul.f32 %v167_v4, %v158_v3  ;;  %v93_v7 = vpop.f32.mrb[1].mxu0 }
  0xdb   :  { %v130_v8 = vmul.f32 %v158_v3, %v93_v7  ;;  %v168_v9 = vpop.f32.mrb[2].mxu0 }
  0xdc   :  { %v143_v10 = vadd.f32 %v159_v5, %v132_v6  ;;  %v133_v11 = vmul.f32 %v168_v9, %v158_v3  ;;  %v96_v12 = vpop.f32.mrb[3].mxu0 }
  0xdd   :  { %v141_v13 = vadd.f32 %v159_v5, %v130_v8  ;;  %v131_v14 = vmul.f32 %v158_v3, %v96_v12 }
  0xde   :  { %147 = vst [vmem:[%s228_s4 + $0x10] sm:$0xff] %v143_v10  ;;  %v144_v15 = vadd.f32 %v159_v5, %v133_v11 }
  0xdf   :  { %145 = vst [vmem:[%s228_s4] sm:$0xff] %v141_v13  ;;  %v142_v16 = vadd.f32 %v159_v5, %v131_v14 }
  0xe0   :  { %148 = vst [vmem:[%s228_s4 + $0x18] sm:$0xff] %v144_v15 }
  0xe1   :  { %146 = vst [vmem:[%s228_s4 + $0x8] sm:$0xff] %v142_v16 }

// kernel: manner_forward.75
= control target key start
LH: loop header
LB: loop body
LE: loop exit
PB: predicated region body
PF: predicated region fallthrough
CT: control target
= control target key end

     0   :  { %s341_s12 = smov 0   ;;  %s374_s0 = inlined_call_operand.vmem [shape: f32[2,17,16], index: 0, kind: input, shape index: {}]   ;;  %s375_s1 = inlined_call_operand.vmem [shape: f32[3,16], index: 1, kind: input, shape index: {}]   ;;  %s376_s2 = inlined_call_operand.vmem [shape: f32[1,16], index: 2, kind: input, shape index: {}]   ;;  %s377_s3 = inlined_call_operand.vmem [shape: f32[2,15,16], index: 3, kind: output, shape index: {}]  }
   0x1 LB: > { %s289_s13 = sadd.s32 4294967295, %s319_s12   ;;  %p293_p0 = scmp.ge.s32.totalorder %s319_s12, 1  ;;  %s319_s12 = sphi %s341_s12, %s13_s12  }
   0x2   : > { %p137_p1 = scmp.lt.s32.totalorder %s319_s12, 3 }
   0x4   : > { %p138_p2 = pnand %p293_p0, %p137_p1 }
   0x5   : > { %p161_p3 = scmp.lt.s32.totalorder (!%p138_p2), %s289_s13, 1  ;;  %v298_v0 = vld [vmem:[%s375_s1 + $0x1] ss:$0 sm:$0xff] (!%p138_p2)  ;;  %v299_v1 = vld [vmem:[%s375_s1 + $0x2] ss:$0 sm:$0xff] (!%p138_p2)  ;;  %vm192_vm0 = vcmask (!%p138_p2), 1046528  }
   0x6   : > { %141 = sbr.rel (%p138_p2) target bundleno = 30 (0x1e), region = 32  ;;  %v297_v2 = vld [vmem:[%s375_s1] ss:$0 sm:$0xff] (!%p138_p2)  ;;  %vm211_vm1 = vcmask (!%p138_p2), 1045504   ;;  %vm232_vm2 = vcmask (!%p138_p2), 129024   ;;  %vm230_vm3 = vcmask (!%p138_p2), 130048  }
   0x7   : > { %v300_v22 = vld [vmem:[%s376_s2] ss:$0 sm:$0xff] (!%p138_p2) }
   0xd   : > { %s379_s13 = smov (!%p161_p3, %s289_s13), 1 }
   0xe   : > { %s304_s14 = smul.u32 24, %s379_s13  ;;  %s303_s24 = sshll.u32 %s379_s13, 4 }
   0xf   : > { %s170_s29 = scalar_lea.vmem %s377_s3, %s303_s24 }
  0x10   : > { %s165_s21 = scalar_lea.vmem %s374_s0, %s304_s14 }
  0x11   : > { %v171_v3 = vld [vmem:[%s165_s21] sm:$0xff]  ;;  %v172_v4 = vld [vmem:[%s165_s21 + $0x8] sm:$0xff]  ;;  %v173_v5 = vld [vmem:[%s165_s21 + $0x10] sm:$0x1] }
  0x12   : > { %v188_v6 = vmul.f32 %v298_v0, %v171_v3  ;;  %v189_v7 = vmul.f32 %v298_v0, %v172_v4  ;;  %v205_v8 = vmul.f32 %v299_v1, %v171_v3  ;;  %v179_v9 = vmul.f32 %v297_v2, %v171_v3 }
  0x13   : > { %v206_v10 = vmul.f32 %v299_v1, %v172_v4  ;;  %v207_v11 = vmul.f32 %v299_v1, %v173_v5  ;;  %v180_v12 = vmul.f32 %v297_v2, %v172_v4 }
  0x14   : > { %v193_v13 = vrot.slane %v188_v6, 1  ;;  %v194_v14 = vrot.slane %v189_v7, 1  ;;  %v212_v15 = vrot.slane %v205_v8, 2 }
  0x15   : > { %v213_v16 = vrot.slane %v206_v10, 2  ;;  %v215_v17 = vrot.slane %v207_v11, 2 }
  0x16   : > { %v195_v18 = vsel %vm192_vm0, %v193_v13, %v194_v14  ;;  %v199_v19 = vadd.f32 %v194_v14, %v180_v12 }
  0x17   : > { %v198_v20 = vadd.f32 %v195_v18, %v179_v9  ;;  %v214_v21 = vsel %vm211_vm1, %v212_v15, %v213_v16  ;;  %v216_v23 = vsel %vm211_vm1, %v213_v16, %v215_v17 }
  0x18   : > { %v220_v24 = vadd.f32 %v216_v23, %v199_v19 }
  0x19   : > { %v219_v25 = vadd.f32 %v214_v21, %v198_v20 }
  0x1a   : > { %v229_v26 = vadd.f32 %v300_v22, %v220_v24 }
  0x1b   : > { %v228_v27 = vadd.f32 %v300_v22, %v219_v25 }
  0x1c   : > { %233 = vst.msk [vmem:[%s170_s29 + $0x8] sm:$0x7f] %vm232_vm2, %v229_v26 }
  0x1d   : > { %231 = vst.msk [vmem:[%s170_s29] sm:$0xff] %vm230_vm3, %v228_v27 }
  0x1e PF: > { %s13_s12 = sadd.s32 1, %s319_s12  }
  0x1f   : > { %p10_p4 = scmp.ge.s32.totalorder %s13_s12, 4  }
  0x21   :  { %12 = sbr.rel (!%p10_p4) target bundleno = 1 (0x1), region = 62 }

// kernel: manner_forward.74
= control target key start
LH: loop header
LB: loop body
LE: loop exit
PB: predicated region body
PF: predicated region fallthrough
CT: control target
= control target key end

     0   :  { %vm84_vm0 = vcmask 130048   ;;  %s167_s0 = inlined_call_operand.vmem [shape: f32[32,32], index: 0, kind: input, shape index: {}]   ;;  %s168_s1 = inlined_call_operand.vmem [shape: f32[1,32], index: 1, kind: input, shape index: {}]   ;;  %s169_s2 = inlined_call_operand.vmem [shape: f32[1,32], index: 2, kind: input, shape index: {}]   ;;  %s170_s3 = inlined_call_operand.vmem [shape: f32[32,16], index: 3, kind: output, shape index: {}]  }
   0x1   :  { %v16_v0 = vld [vmem:[%s167_s0 + $0x10] sm:$0xff]  ;;  %v17_v1 = vld [vmem:[%s167_s0 + $0x18] sm:$0xff]  ;;  %v93_v2 = vld [vmem:[%s168_s1] ss:$0 sm:$0xff] }
   0x2   :  { %v27_v3 = vmul.f32 %v93_v2, %v16_v0  ;;  %v28_v4 = vmul.f32 %v93_v2, %v17_v1  ;;  %v94_v5 = vld [vmem:[%s169_s2] ss:$0 sm:$0xff]  ;;  %v15_v6 = vld [vmem:[%s167_s0 + $0x8] sm:$0xff] }
   0x3   :  { %v14_v7 = vld [vmem:[%s167_s0] sm:$0xff]  ;;  %v26_v8 = vmul.f32 %v93_v2, %v15_v6  ;;  %s116_s0 = smov 112  }
   0x4   :  { %v25_v9 = vmul.f32 %v93_v2, %v14_v7  ;;  %v38_v10 = vadd.f32 %v94_v5, %v27_v3  ;;  %v39_v11 = vadd.f32 %v94_v5, %v28_v4 }
   0x5   :  { %v37_v12 = vadd.f32 %v94_v5, %v26_v8 }
   0x6   :  { %v36_v13 = vadd.f32 %v94_v5, %v25_v9  ;;  %v97_v14 = vmul.f32 -1.442695, %v38_v10  ;;  %v98_v15 = vmul.f32 -1.442695, %v39_v11 }
   0x7   :  { %v96_v16 = vmul.f32 -1.442695, %v37_v12 }
   0x8   :  { %v95_v17 = vmul.f32 -1.442695, %v36_v13  ;;  %100 = vpow2.f32 %v97_v14 }
   0x9   :  { %102 = vpow2.f32 %v98_v15 }
   0xa   :  { %104 = vpow2.f32 %v96_v16 }
   0xb   :  { %106 = vpow2.f32 %v95_v17 }
  0x12   :  { %v101_v18 = vpop.eup %100 }
  0x13   :  { %v103_v19 = vpop.eup %102  ;;  %v54_v20 = vadd.f32 1.0, %v101_v18 }
  0x14   :  { %v105_v21 = vpop.eup %104  ;;  %v55_v22 = vadd.f32 1.0, %v103_v19 }
  0x15   :  { %v107_v23 = vpop.eup %106  ;;  %108 = vrcp.f32 %v54_v20  ;;  %v53_v25 = vadd.f32 1.0, %v105_v21 }
  0x16   :  { %v52_v24 = vadd.f32 1.0, %v107_v23  ;;  %110 = vrcp.f32 %v55_v22 }
  0x18   :  { %112 = vrcp.f32 %v52_v24 }
  0x19   :  { %114 = vrcp.f32 %v53_v25 }
  0x1f   :  { %v109_v26 = vpop.eup %108 }
  0x20   :  { %72 = vrot.lane.b32.xlu1 %v109_v26, %s116_s0  ;;  %v111_v27 = vpop.eup %110 }
  0x22   :  { %v113_v28 = vpop.eup %112 }
  0x23   :  { %68 = vrot.lane.b32.xlu0 %v113_v28, %s116_s0  ;;  %v115_v29 = vpop.eup %114 }
  0x24   :  { %74 = vrot.lane.b32.xlu1 %v111_v27, %s116_s0 }
  0x27   :  { %70 = vrot.lane.b32.xlu0 %v115_v29, %s116_s0 }
  0x92   :  { %v73_v30 = vpop.permute.xlu1 %72 }
  0x93   :  { %v82_v31 = vmul.f32 %v73_v30, %v38_v10 }
  0x95   :  { %87 = vst.msk [vmem:[%s170_s3 + $0x10] sm:$0xff] %vm84_vm0, %v82_v31  ;;  %v69_v32 = vpop.permute.xlu0 %68 }
  0x96   :  { %v80_v33 = vmul.f32 %v69_v32, %v36_v13  ;;  %v75_v34 = vpop.permute.xlu1 %74 }
  0x97   :  { %v83_v35 = vmul.f32 %v75_v34, %v39_v11 }
  0x98   :  { %85 = vst.msk [vmem:[%s170_s3] sm:$0xff] %vm84_vm0, %v80_v33 }
  0x99   :  { %88 = vst.msk [vmem:[%s170_s3 + $0x18] sm:$0xff] %vm84_vm0, %v83_v35  ;;  %v71_v36 = vpop.permute.xlu0 %70 }
  0x9a   :  { %v81_v37 = vmul.f32 %v71_v36, %v37_v12 }
  0x9c   :  { %86 = vst.msk [vmem:[%s170_s3 + $0x8] sm:$0xff] %vm84_vm0, %v81_v37 }

// kernel: manner_forward.76
= control target key start
LH: loop header
LB: loop body
LE: loop exit
PB: predicated region body
PF: predicated region fallthrough
CT: control target
= control target key end

     0   :  { %vm68_vm0 = vcmask 130048   ;;  %s149_s0 = inlined_call_operand.vmem [shape: f32[32,16], index: 0, kind: input, shape index: {}]   ;;  %s150_s1 = inlined_call_operand.vmem [shape: f32[1,16], index: 1, kind: input, shape index: {}]   ;;  %s151_s2 = inlined_call_operand.vmem [shape: f32[1,16], index: 2, kind: input, shape index: {}]   ;;  %s152_s3 = inlined_call_operand.vmem [shape: f32[32,16], index: 3, kind: output, shape index: {}]  }
   0x1   :  { %v14_v0 = vld [vmem:[%s149_s0] sm:$0xff]  ;;  %v15_v4 = vld [vmem:[%s149_s0 + $0x8] sm:$0xff]  ;;  %v16_v5 = vld [vmem:[%s149_s0 + $0x10] sm:$0xff] }
   0x2   :  { %v77_v1 = vld [vmem:[%s150_s1] ss:$0 sm:$0xff]  ;;  %v17_v6 = vld [vmem:[%s149_s0 + $0x18] sm:$0xff] }
   0x3   :  { %v78_v2 = vld [vmem:[%s151_s2] ss:$0 sm:$0xff]  ;;  %v25_v3 = vmul.f32 %v77_v1, %v14_v0  ;;  %v26_v7 = vmul.f32 %v77_v1, %v15_v4  ;;  %v27_v8 = vmul.f32 %v77_v1, %v16_v5  ;;  %v28_v9 = vmul.f32 %v77_v1, %v17_v6 }
   0x5   :  { %v36_v10 = vadd.f32 %v78_v2, %v25_v3  ;;  %v37_v11 = vadd.f32 %v78_v2, %v26_v7  ;;  %v38_v12 = vadd.f32 %v78_v2, %v27_v8  ;;  %v39_v13 = vadd.f32 %v78_v2, %v28_v9 }
   0x7   :  { %v79_v14 = vmul.f32 -1.442695, %v36_v10  ;;  %v80_v15 = vmul.f32 -1.442695, %v37_v11  ;;  %v81_v16 = vmul.f32 -1.442695, %v38_v12 }
   0x8   :  { %v82_v17 = vmul.f32 -1.442695, %v39_v13 }
   0x9   :  { %83 = vpow2.f32 %v79_v14 }
   0xa   :  { %85 = vpow2.f32 %v80_v15 }
   0xb   :  { %87 = vpow2.f32 %v81_v16 }
   0xc   :  { %89 = vpow2.f32 %v82_v17 }
  0x13   :  { %v84_v18 = vpop.eup %83 }
  0x14   :  { %v86_v19 = vpop.eup %85  ;;  %v52_v20 = vadd.f32 1.0, %v84_v18 }
  0x15   :  { %v88_v21 = vpop.eup %87  ;;  %v53_v22 = vadd.f32 1.0, %v86_v19 }
  0x16   :  { %v90_v23 = vpop.eup %89  ;;  %91 = vrcp.f32 %v52_v20  ;;  %v54_v24 = vadd.f32 1.0, %v88_v21 }
  0x17   :  { %93 = vrcp.f32 %v53_v22  ;;  %v55_v25 = vadd.f32 1.0, %v90_v23 }
  0x18   :  { %95 = vrcp.f32 %v54_v24 }
  0x19   :  { %97 = vrcp.f32 %v55_v25 }
  0x20   :  { %v92_v26 = vpop.eup %91 }
  0x21   :  { %v94_v27 = vpop.eup %93  ;;  %v64_v28 = vmul.f32 %v92_v26, %v36_v10 }
  0x22   :  { %v96_v29 = vpop.eup %95  ;;  %v65_v30 = vmul.f32 %v94_v27, %v37_v11 }
  0x23   :  { %v98_v31 = vpop.eup %97  ;;  %69 = vst.msk [vmem:[%s152_s3] sm:$0xff] %vm68_vm0, %v64_v28  ;;  %v66_v32 = vmul.f32 %v96_v29, %v38_v12 }
  0x24   :  { %70 = vst.msk [vmem:[%s152_s3 + $0x8] sm:$0xff] %vm68_vm0, %v65_v30  ;;  %v67_v33 = vmul.f32 %v98_v31, %v39_v13 }
  0x25   :  { %71 = vst.msk [vmem:[%s152_s3 + $0x10] sm:$0xff] %vm68_vm0, %v66_v32 }
  0x26   :  { %72 = vst.msk [vmem:[%s152_s3 + $0x18] sm:$0xff] %vm68_vm0, %v67_v33 }

// kernel: manner_forward.78
= control target key start
LH: loop header
LB: loop body
LE: loop exit
PB: predicated region body
PF: predicated region fallthrough
CT: control target
= control target key end

     0   :  { %vm44_vm0 = vcmask 261120   ;;  %s105_s0 = inlined_call_operand.vmem [shape: f32[32,32], index: 0, kind: input, shape index: {}]   ;;  %s106_s1 = inlined_call_operand.vmem [shape: f32[1,32], index: 1, kind: input, shape index: {}]   ;;  %s107_s2 = inlined_call_operand.vmem [shape: f32[1,32], index: 2, kind: input, shape index: {}]   ;;  %s108_s3 = inlined_call_operand.vmem [shape: f32[32,32], index: 3, kind: output, shape index: {}]  }
   0x1   :  { %v14_v0 = vld [vmem:[%s105_s0] sm:$0xff]  ;;  %v15_v4 = vld [vmem:[%s105_s0 + $0x8] sm:$0xff]  ;;  %v16_v5 = vld [vmem:[%s105_s0 + $0x10] sm:$0xff] }
   0x2   :  { %v53_v1 = vld [vmem:[%s106_s1] ss:$0 sm:$0xff]  ;;  %v17_v6 = vld [vmem:[%s105_s0 + $0x18] sm:$0xff] }
   0x3   :  { %v54_v2 = vld [vmem:[%s107_s2] ss:$0 sm:$0xff]  ;;  %v25_v3 = vmul.f32 %v53_v1, %v14_v0  ;;  %v26_v7 = vmul.f32 %v53_v1, %v15_v4  ;;  %v27_v8 = vmul.f32 %v53_v1, %v16_v5  ;;  %v28_v9 = vmul.f32 %v53_v1, %v17_v6 }
   0x5   :  { %v36_v10 = vadd.f32 %v54_v2, %v25_v3  ;;  %v37_v11 = vadd.f32 %v54_v2, %v26_v7  ;;  %v38_v12 = vadd.f32 %v54_v2, %v27_v8  ;;  %v39_v13 = vadd.f32 %v54_v2, %v28_v9 }
   0x7   :  { %v40_v14 = vmax.f32 %v36_v10, 0.0  ;;  %v41_v15 = vmax.f32 %v37_v11, 0.0  ;;  %v42_v16 = vmax.f32 %v38_v12, 0.0  ;;  %v43_v17 = vmax.f32 %v39_v13, 0.0 }
   0x9   :  { %45 = vst.msk [vmem:[%s108_s3] sm:$0xff] %vm44_vm0, %v40_v14  ;;  %46 = vst.msk [vmem:[%s108_s3 + $0x8] sm:$0xff] %vm44_vm0, %v41_v15 }
   0xa   :  { %47 = vst.msk [vmem:[%s108_s3 + $0x10] sm:$0xff] %vm44_vm0, %v42_v16  ;;  %48 = vst.msk [vmem:[%s108_s3 + $0x18] sm:$0xff] %vm44_vm0, %v43_v17 }

// kernel: manner_forward.80
= control target key start
LH: loop header
LB: loop body
LE: loop exit
PB: predicated region body
PF: predicated region fallthrough
CT: control target
= control target key end

     0   :  { %vm60_vm0 = vcmask 261120   ;;  %s240_s1 = inlined_call_operand.vmem [shape: bf16[32,128], index: 1, kind: input, shape index: {}]   ;;  %s241_s0 = inlined_call_operand.vmem [shape: bf16[32,32], index: 0, kind: input, shape index: {}]   ;;  %s242_s2 = inlined_call_operand.vmem [shape: f32[1,128], index: 2, kind: input, shape index: {}]   ;;  %s243_s3 = inlined_call_operand.vmem [shape: f32[1,128], index: 3, kind: input, shape index: {}]   ;;  %s244_s4 = inlined_call_operand.vmem [shape: f32[32,128], index: 4, kind: output, shape index: {}]  }
   0x1   :  { %v181_v0 = vld [vmem:[%s240_s1] sm:$0xff]   ;;  %v182_v1 = vld [vmem:[%s240_s1 + $0x8] sm:$0xff]  }
   0x2   :  { %173 = vmatprep.subr.bf16.mxu0 %v181_v0  ;;  %v183_v2 = vld [vmem:[%s241_s0] sm:$0xff]   ;;  %v184_v3 = vld [vmem:[%s241_s0 + $0x8] sm:$0xff]  }
   0x3   :  { %174 = vmatpush3.bf16.msra.mxu0 %v181_v0  ;;  %177 = vmatprep.mubr.msk.bf16.mxu0 %vm60_vm0, %v183_v2  ;;  %v167_v4 = vld [vmem:[%s242_s2] ss:$0 sm:$0xff] }
   0x4   :  { %175 = vmatprep.subr.bf16.mxu0 %v182_v1  ;;  %v168_v6 = vld [vmem:[%s243_s3] ss:$0 sm:$0xff] }
   0x7   :  { %176 = vmatpush3.bf16.msra.mxu0 %v182_v1 }
   0xa   :  { %178 = vmatmul.mubr.msk.bf16.vlgmr.msra.gmra.mrb[0].mxu0 %vm60_vm0, %v184_v3 }
  0xdd   :  { %v179_v5 = vpop.f32.mrb[0].mxu0 }
  0xde   :  { %v140_v7 = vmul.f32 %v179_v5, %v167_v4  ;;  %v101_v8 = vpop.f32.mrb[1].mxu0 }
  0xdf   :  { %v138_v9 = vmul.f32 %v167_v4, %v101_v8  ;;  %v180_v10 = vpop.f32.mrb[2].mxu0 }
  0xe0   :  { %v151_v11 = vadd.f32 %v168_v6, %v140_v7  ;;  %v141_v12 = vmul.f32 %v180_v10, %v167_v4  ;;  %v104_v13 = vpop.f32.mrb[3].mxu0 }
  0xe1   :  { %v149_v14 = vadd.f32 %v168_v6, %v138_v9  ;;  %v139_v15 = vmul.f32 %v167_v4, %v104_v13 }
  0xe2   :  { %155 = vst [vmem:[%s244_s4 + $0x10] sm:$0xff] %v151_v11  ;;  %v152_v16 = vadd.f32 %v168_v6, %v141_v12 }
  0xe3   :  { %153 = vst [vmem:[%s244_s4] sm:$0xff] %v149_v14  ;;  %v150_v17 = vadd.f32 %v168_v6, %v139_v15 }
  0xe4   :  { %156 = vst [vmem:[%s244_s4 + $0x18] sm:$0xff] %v152_v16 }
  0xe5   :  { %154 = vst [vmem:[%s244_s4 + $0x8] sm:$0xff] %v150_v17 }

// kernel: manner_forward.85
= control target key start
LH: loop header
LB: loop body
LE: loop exit
PB: predicated region body
PF: predicated region fallthrough
CT: control target
= control target key end

     0   :  { %v158_v0 = vmov 0.0   ;;  %vm159_vm0 = vmmov 0   ;;  %vm41_vm1 = vcmask 130048   ;;  %s203_s1 = inlined_call_operand.vmem [shape: bf16[16,128], index: 1, kind: input, shape index: {}]   ;;  %s204_s0 = inlined_call_operand.vmem [shape: bf16[16,16], index: 0, kind: input, shape index: {}]   ;;  %s205_s2 = inlined_call_operand.vmem [shape: f32[1,128], index: 2, kind: input, shape index: {}]   ;;  %s206_s3 = inlined_call_operand.vmem [shape: f32[1,128], index: 3, kind: input, shape index: {}]   ;;  %s207_s4 = inlined_call_operand.vmem [shape: f32[16,128], index: 4, kind: output, shape index: {}]  }
   0x1   :  { %140 = vmatprep.subr.bf16.mxu0 %v158_v0  ;;  %v148_v1 = vld [vmem:[%s203_s1] sm:$0xff]   ;;  %142 = vmatprep.mubr.msk.bf16.mxu0 %vm159_vm0, %v158_v0 }
   0x2   :  { %v149_v2 = vld [vmem:[%s204_s0] sm:$0xff]   ;;  %141 = vmatpush3.bf16.msra.mxu0 %v148_v1 }
   0x3   :  { %v134_v3 = vld [vmem:[%s205_s2] ss:$0 sm:$0xff] }
   0x4   :  { %v135_v5 = vld [vmem:[%s206_s3] ss:$0 sm:$0xff] }
   0x5   :  { %143 = vmatmul.mubr.msk.bf16.vlgmr.msra.gmra.mrb[0].mxu0 %vm41_vm1, %v149_v2 }
  0xd8   :  { %v79_v4 = vpop.f32.mrb[0].mxu0 }
  0xd9   :  { %v102_v6 = vmul.f32 %v134_v3, %v79_v4  ;;  %v144_v7 = vpop.f32.mrb[1].mxu0 }
  0xda   :  { %v82_v8 = vpop.f32.mrb[2].mxu0 }
  0xdb   :  { %v111_v9 = vadd.f32 %v135_v5, %v102_v6  ;;  %v103_v10 = vmul.f32 %v134_v3, %v82_v8  ;;  %v145_v11 = vpop.f32.mrb[3].mxu0 }
  0xdd   :  { %v136_v12 = vmul.f32 -1.442695, %v111_v9  ;;  %v112_v13 = vadd.f32 %v135_v5, %v103_v10 }
  0xdf   :  { %150 = vpow2.f32 %v136_v12  ;;  %v137_v14 = vmul.f32 -1.442695, %v112_v13 }
  0xe1   :  { %152 = vpow2.f32 %v137_v14 }
  0xe9   :  { %v151_v15 = vpop.eup %150 }
  0xea   :  { %v119_v16 = vadd.f32 1.0, %v151_v15 }
  0xeb   :  { %v153_v17 = vpop.eup %152 }
  0xec   :  { %154 = vrcp.f32 %v119_v16  ;;  %v120_v18 = vadd.f32 1.0, %v153_v17 }
  0xee   :  { %156 = vrcp.f32 %v120_v18 }
  0xf6   :  { %v155_v19 = vpop.eup %154 }
  0xf7   :  { %125 = vst [vmem:[%s207_s4] sm:$0xff] %v155_v19 }
  0xf8   :  { %v157_v20 = vpop.eup %156 }
  0xf9   :  { %126 = vst [vmem:[%s207_s4 + $0x8] sm:$0xff] %v157_v20 }

// kernel: manner_forward.81
= control target key start
LH: loop header
LB: loop body
LE: loop exit
PB: predicated region body
PF: predicated region fallthrough
CT: control target
= control target key end

     0   :  { %s604_s12 = smov 0   ;;  %s642_s0 = inlined_call_operand.vmem [shape: f32[4,15,16], index: 0, kind: input, shape index: {}]   ;;  %s643_s1 = inlined_call_operand.vmem [shape: f32[4,15,16], index: 1, kind: input, shape index: {}]   ;;  %s644_s2 = inlined_call_operand.vmem [shape: f32[4,15,16], index: 2, kind: input, shape index: {}]   ;;  %s645_s3 = inlined_call_operand.vmem [shape: f32[4,15,16], index: 3, kind: output, shape index: {}]  }
   0x1 LB: > { %s498_s13 = sadd.s32 4294967295, %s581_s12   ;;  %p502_p0 = scmp.ge.s32.totalorder %s581_s12, 1  ;;  %s581_s12 = sphi %s604_s12, %s13_s12  }
   0x2   : > { %p157_p1 = scmp.lt.s32.totalorder %s581_s12, 5 }
   0x4   : > { %p158_p2 = pnand %p502_p0, %p157_p1 }
   0x5   : > { %p191_p3 = scmp.lt.s32.totalorder (!%p158_p2), %s498_s13, 3  ;;  %vm217_vm0 = vcmask (!%p158_p2), 130048   ;;  %vm307_vm2 = vcmask (!%p158_p2), 121856   ;;  %vm311_vm3 = vcmask (!%p158_p2), 120832   ;;  %vm337_vm4 = vcmask (!%p158_p2), 1046528  }
   0x6   : > { %161 = sbr.rel (%p158_p2) target bundleno = 774 (0x306), region = 32  ;;  %vm547_vm1 = vmpackc.low (!%p158_p2), %vm217_vm0, %vm217_vm0  ;;  %vm583_vm5 = vmmov (!%p158_p2), 1   ;;  %vm417_vm7 = vcmask (!%p158_p2), 129024  }
   0x7   : > { %vm553_vm6 = vmpackc.low (!%p158_p2), %vm337_vm4, %vm583_vm5 }
   0xd   : > { %s647_s13 = smov (!%p191_p3, %s498_s13), 3 }
   0xe   : > { %s612_s14 = sshll.u32 %s647_s13, 4 }
   0xf   : > { %s200_s17 = scalar_lea.vmem %s643_s1, %s612_s14  ;;  %s195_s20 = scalar_lea.vmem %s642_s0, %s612_s14 }
  0x10   : > { %v213_v0 = vld [vmem:[%s200_s17] sm:$0xff]  ;;  %v214_v1 = vld [vmem:[%s200_s17 + $0x8] sm:$0x7f]  ;;  %s205_s23 = scalar_lea.vmem %s644_s2, %s612_s14  ;;  %s210_s26 = scalar_lea.vmem %s645_s3, %s612_s14 }
  0x11   : > { %v211_v2 = vld [vmem:[%s195_s20] sm:$0xff]  ;;  %v546_v3 = vpack.c.bf16 %v214_v1, %v213_v0  ;;  %v212_v4 = vld [vmem:[%s195_s20 + $0x8] sm:$0x7f] }
  0x12   : > { %536 = vmatprep.mubr.msk.f32.mxu0 %vm217_vm0, %v211_v2  ;;  %v215_v21 = vld [vmem:[%s205_s23] sm:$0xff]  ;;  %v216_v22 = vld [vmem:[%s205_s23 + $0x8] sm:$0x7f] }
  0x13   : > { %548 = vmatprep.subr.msk.bf16.mxu0 %vm547_vm1, %v546_v3  ;;  %v552_v23 = vpack.c.bf16 %v216_v22, %v215_v21 }
  0x14   : > { %551 = vmatpush3.bf16.xpose.msk.msra.mxu0 %vm547_vm1, %v546_v3 }
  0x15   : > { %554 = vmatprep.subr.msk.bf16.mxu1 %vm553_vm6, %v552_v23 }
  0x16   : > { %557 = vmatpush3.bf16.msk.msra.mxu1 %vm553_vm6, %v552_v23 }
  0x1b   : > { %537 = vmatmul.mubr.msk.f32.vlgmr.msra.gmra.mrb[0].mxu0 %vm217_vm0, %v212_v4 }
  0xee   : > { %v538_v5 = vpop.f32.mrb[0].mxu0 }
  0xef   : > { %v296_v6 = vpop.f32.mrb[1].mxu0  ;;  %v306_v8 = vmul.f32 0.25, %v538_v5 }
  0xf0   : > { %v305_v7 = vmul.f32 0.25, %v296_v6 }
  0xf1   : > { %v312_v10 = vsel %vm311_vm3, %v306_v8, -inf }
  0xf2   : > { %v308_v9 = vsel %vm307_vm2, %v305_v7, -inf }
  0xf3   : > { %309 = vmax.xlane.f32.xlu0 %v308_v9 }
  0xf7   : > { %313 = vmax.xlane.f32.xlu0 %v312_v10 }
 0x180   : > { %v310_v11 = vpop.xlane.xlu0 %309 }
 0x181   : > { %v315_v12 = vsub.f32 %v305_v7, %v310_v11 }
 0x183   : > { %v317_v13 = vmul.f32 1.442695, %v315_v12 }
 0x184   : > { %v314_v14 = vpop.xlane.xlu0 %313 }
 0x185   : > { %567 = vpow2.f32 %v317_v13  ;;  %v316_v15 = vsub.f32 %v306_v8, %v314_v14 }
 0x187   : > { %v319_v16 = vmul.f32 1.442695, %v316_v15 }
 0x189   : > { %569 = vpow2.f32 %v319_v16 }
 0x18f   : > { %v568_v17 = vpop.eup %567 }
 0x190   : > { %v321_v18 = vsel %vm307_vm2, %v568_v17, 0.0 }
 0x191   : > { %322 = vadd.xlane.f32.xlu1 %v321_v18 }
 0x193   : > { %v570_v19 = vpop.eup %569 }
 0x194   : > { %v324_v20 = vsel %vm311_vm3, %v570_v19, 0.0 }
 0x195   : > { %325 = vadd.xlane.f32.xlu1 %v324_v20 }
 0x21e   : > { %v323_v24 = vpop.xlane.xlu1 %322 }
 0x21f   : > { %571 = vrcp.f32 %v323_v24 }
 0x222   : > { %v326_v25 = vpop.xlane.xlu1 %325 }
 0x223   : > { %573 = vrcp.f32 %v326_v25 }
 0x229   : > { %v572_v26 = vpop.eup %571 }
 0x22a   : > { %v329_v27 = vmul.f32 %v572_v26, %v568_v17 }
 0x22c   : > { %543 = vmatprep.mubr.msk.f32.mxu1 %vm307_vm2, %v329_v27 }
 0x22d   : > { %v574_v28 = vpop.eup %573 }
 0x22e   : > { %v330_v29 = vmul.f32 %v574_v28, %v570_v19 }
 0x230   : > { %544 = vmatmul.mubr.msk.f32.vlgmr.msra.gmra.mrb[0].mxu1 %vm307_vm2, %v330_v29 }
 0x303   : > { %v545_v30 = vpop.f32.mrb[0].mxu1 }
 0x304   : > { %418 = vst.msk [vmem:[%s210_s26 + $0x8] sm:$0x7f] %vm417_vm7, %v545_v30  ;;  %v407_v31 = vpop.f32.mrb[1].mxu1 }
 0x305   : > { %416 = vst.msk [vmem:[%s210_s26] sm:$0xff] %vm217_vm0, %v407_v31 }
 0x306 PF: > { %s13_s12 = sadd.s32 1, %s581_s12  }
 0x307   : > { %p10_p4 = scmp.ge.s32.totalorder %s13_s12, 6  }
 0x309   :  { %12 = sbr.rel (!%p10_p4) target bundleno = 1 (0x1), region = 68 }

// kernel: manner_forward.86
= control target key start
LH: loop header
LB: loop body
LE: loop exit
PB: predicated region body
PF: predicated region fallthrough
CT: control target
= control target key end

     0   :  { %s263_s9 = smov 0   ;;  %s291_s0 = inlined_call_operand.vmem [shape: f32[2,15,32], index: 0, kind: input, shape index: {}]   ;;  %s292_s1 = inlined_call_operand.vmem [shape: f32[2,1,32], index: 1, kind: input, shape index: {}]   ;;  %s293_s2 = inlined_call_operand.vmem [shape: f32[2,15,32], index: 2, kind: output, shape index: {}]  }
   0x1 LB: > { %s237_s10 = sadd.s32 4294967295, %s265_s9   ;;  %p241_p0 = scmp.ge.s32.totalorder %s265_s9, 1  ;;  %s265_s9 = sphi %s263_s9, %s12_s9  }
   0x2   : > { %p120_p1 = scmp.lt.s32.totalorder %s265_s9, 3 }
   0x4   : > { %p121_p2 = pnand %p241_p0, %p120_p1 }
   0x5   : > { %p145_p3 = scmp.lt.s32.totalorder (!%p121_p2), %s237_s10, 1  ;;  %vm169_vm0 = vcmask (!%p121_p2), 261120   ;;  %vm171_vm1 = vcmask (!%p121_p2), 260096  }
   0x6   : > { %124 = sbr.rel (%p121_p2) target bundleno = 21 (0x15), region = 28 }
   0xd   : > { %s295_s10 = smov (!%p145_p3, %s237_s10), 1 }
   0xe   : > { %s249_s11 = sshll.u32 %s295_s10, 4  ;;  %s152_s14 = scalar_lea.vmem %s292_s1, %s295_s10 }
   0xf   : > { %s149_s17 = scalar_lea.vmem %s291_s0, %s249_s11  ;;  %v246_v0 = vld [vmem:[%s152_s14] ss:$0 sm:$0xff]  ;;  %s157_s20 = scalar_lea.vmem %s293_s2, %s249_s11 }
  0x10   : > { %v158_v1 = vld [vmem:[%s149_s17] sm:$0xff]  ;;  %v159_v2 = vld [vmem:[%s149_s17 + $0x8] sm:$0x7f] }
  0x11   : > { %v167_v3 = vmul.f32 %v246_v0, %v158_v1  ;;  %v168_v4 = vmul.f32 %v246_v0, %v159_v2 }
  0x13   : > { %170 = vst.msk [vmem:[%s157_s20] sm:$0xff] %vm169_vm0, %v167_v3 }
  0x14   : > { %172 = vst.msk [vmem:[%s157_s20 + $0x8] sm:$0x7f] %vm171_vm1, %v168_v4 }
  0x15 PF: > { %s12_s9 = sadd.s32 1, %s265_s9  }
  0x16   : > { %p9_p4 = scmp.ge.s32.totalorder %s12_s9, 4  }
  0x18   :  { %11 = sbr.rel (!%p9_p4) target bundleno = 1 (0x1), region = 61 }

// kernel: manner_forward.84
= control target key start
LH: loop header
LB: loop body
LE: loop exit
PB: predicated region body
PF: predicated region fallthrough
CT: control target
= control target key end

     0   :  { %v151_v0 = vmov 0.0   ;;  %vm152_vm0 = vmmov 0   ;;  %vm49_vm1 = vcmask 261120   ;;  %s199_s1 = inlined_call_operand.vmem [shape: bf16[32,128], index: 1, kind: input, shape index: {}]   ;;  %s200_s0 = inlined_call_operand.vmem [shape: bf16[16,32], index: 0, kind: input, shape index: {}]   ;;  %s201_s2 = inlined_call_operand.vmem [shape: f32[1,128], index: 2, kind: input, shape index: {}]   ;;  %s202_s3 = inlined_call_operand.vmem [shape: f32[1,128], index: 3, kind: input, shape index: {}]   ;;  %s203_s4 = inlined_call_operand.vmem [shape: f32[16,128], index: 4, kind: output, shape index: {}]  }
   0x1   :  { %138 = vmatprep.subr.bf16.mxu0 %v151_v0  ;;  %v148_v1 = vld [vmem:[%s199_s1] sm:$0xff]   ;;  %142 = vmatprep.mubr.msk.bf16.mxu0 %vm152_vm0, %v151_v0  ;;  %v149_v2 = vld [vmem:[%s199_s1 + $0x8] sm:$0xff]  }
   0x2   :  { %139 = vmatpush3.bf16.msra.mxu0 %v148_v1  ;;  %v150_v3 = vld [vmem:[%s200_s0] sm:$0xff]  }
   0x3   :  { %140 = vmatprep.subr.bf16.mxu0 %v151_v0  ;;  %v133_v4 = vld [vmem:[%s201_s2] ss:$0 sm:$0xff] }
   0x4   :  { %v134_v6 = vld [vmem:[%s202_s3] ss:$0 sm:$0xff] }
   0x6   :  { %141 = vmatpush3.bf16.msra.mxu0 %v149_v2 }
   0x9   :  { %143 = vmatmul.mubr.msk.bf16.vlgmr.msra.gmra.mrb[0].mxu0 %vm49_vm1, %v150_v3 }
  0xdc   :  { %v87_v5 = vpop.f32.mrb[0].mxu0 }
  0xdd   :  { %v110_v7 = vmul.f32 %v133_v4, %v87_v5  ;;  %v144_v8 = vpop.f32.mrb[1].mxu0 }
  0xde   :  { %v90_v9 = vpop.f32.mrb[2].mxu0 }
  0xdf   :  { %v119_v10 = vadd.f32 %v134_v6, %v110_v7  ;;  %v111_v11 = vmul.f32 %v133_v4, %v90_v9  ;;  %v145_v12 = vpop.f32.mrb[3].mxu0 }
  0xe1   :  { %v121_v13 = vmax.f32 %v119_v10, 0.0  ;;  %v120_v14 = vadd.f32 %v134_v6, %v111_v11 }
  0xe3   :  { %123 = vst [vmem:[%s203_s4] sm:$0xff] %v121_v13  ;;  %v122_v15 = vmax.f32 %v120_v14, 0.0 }
  0xe5   :  { %124 = vst [vmem:[%s203_s4 + $0x8] sm:$0xff] %v122_v15 }

// kernel: manner_forward.83
= control target key start
LH: loop header
LB: loop body
LE: loop exit
PB: predicated region body
PF: predicated region fallthrough
CT: control target
= control target key end

     0   :  { %s486_s12 = smov 0   ;;  %s577_s0 = inlined_call_operand.vmem [shape: f32[2,22,32], index: 0, kind: input, shape index: {}]   ;;  %s578_s1 = inlined_call_operand.vmem [shape: f32[8,32], index: 1, kind: input, shape index: {}]   ;;  %s579_s2 = inlined_call_operand.vmem [shape: f32[1,32], index: 2, kind: input, shape index: {}]   ;;  %s580_s3 = inlined_call_operand.vmem [shape: f32[2,15,32], index: 3, kind: output, shape index: {}]  }
   0x1 LB: > { %s419_s13 = sadd.s32 4294967295, %s464_s12   ;;  %p423_p0 = scmp.ge.s32.totalorder %s464_s12, 1  ;;  %s464_s12 = sphi %s486_s12, %s13_s12  }
   0x2   : > { %p137_p1 = scmp.lt.s32.totalorder %s464_s12, 3 }
   0x4   : > { %p138_p2 = pnand %p423_p0, %p137_p1 }
   0x5   : > { %p161_p3 = scmp.lt.s32.totalorder (!%p138_p2), %s419_s13, 1  ;;  %v427_v0 = vld [vmem:[%s578_s1] ss:$0 sm:$0xff] (!%p138_p2)  ;;  %v428_v1 = vld [vmem:[%s578_s1 + $0x1] ss:$0 sm:$0xff] (!%p138_p2)  ;;  %vm192_vm0 = vcmask (!%p138_p2), 1046528  }
   0x6   : > { %141 = sbr.rel (%p138_p2) target bundleno = 73 (0x49), region = 32  ;;  %v429_v2 = vld [vmem:[%s578_s1 + $0x2] ss:$0 sm:$0xff] (!%p138_p2)  ;;  %vm211_vm1 = vcmask (!%p138_p2), 1045504   ;;  %v430_v3 = vld [vmem:[%s578_s1 + $0x3] ss:$0 sm:$0xff] (!%p138_p2) }
   0x7   : > { %vm232_vm2 = vcmask (!%p138_p2), 1044480   ;;  %vm253_vm3 = vcmask (!%p138_p2), 1043456   ;;  %vm274_vm4 = vcmask (!%p138_p2), 1042432   ;;  %v431_v19 = vld [vmem:[%s578_s1 + $0x4] ss:$0 sm:$0xff] (!%p138_p2)  ;;  %vm295_vm5 = vcmask (!%p138_p2), 1041408  }
   0x8   : > { %v432_v28 = vld [vmem:[%s578_s1 + $0x5] ss:$0 sm:$0xff] (!%p138_p2)  ;;  %v433_v37 = vld [vmem:[%s578_s1 + $0x6] ss:$0 sm:$0xff] (!%p138_p2)  ;;  %v434_v54 = vld [vmem:[%s578_s1 + $0x7] ss:$0 sm:$0xff] (!%p138_p2) }
   0x9   : > { %vm316_vm6 = vcmask (!%p138_p2), 1040384   ;;  %vm358_vm7 = vcmask (!%p138_p2), 261123   ;;  %vm362_vm8 = vcmask (!%p138_p2), 254976   ;;  %vm360_vm9 = vcmask (!%p138_p2), 261120  }
   0xd   : > { %s582_s13 = smov (!%p161_p3, %s419_s13), 1 }
   0xe   : > { %s441_s14 = smul.u32 24, %s582_s13  ;;  %s440_s9 = sshll.u32 %s582_s13, 4 }
  0x10   : > { %s165_s21 = scalar_lea.vmem %s577_s0, %s441_s14  ;;  %s170_s14 = scalar_lea.vmem %s580_s3, %s440_s9 }
  0x11   : > { %v512_v4 = vld [vmem:[%s165_s21] sm:$0xff]  ;;  %v514_v5 = vld [vmem:[%s165_s21 + $0x8] sm:$0xff]  ;;  %v516_v6 = vld [vmem:[%s165_s21 + $0x10] sm:$0x3f] }
  0x12   : > { %v179_v7 = vmul.f32 %v427_v0, %v512_v4  ;;  %v180_v8 = vmul.f32 %v427_v0, %v514_v5  ;;  %v188_v9 = vmul.f32 %v428_v1, %v512_v4  ;;  %v189_v10 = vmul.f32 %v428_v1, %v514_v5 }
  0x13   : > { %v205_v11 = vmul.f32 %v429_v2, %v512_v4  ;;  %v206_v12 = vmul.f32 %v429_v2, %v514_v5  ;;  %v207_v13 = vmul.f32 %v429_v2, %v516_v6  ;;  %v226_v14 = vmul.f32 %v430_v3, %v512_v4 }
  0x14   : > { %v193_v15 = vrot.slane %v188_v9, 1  ;;  %v194_v16 = vrot.slane %v189_v10, 1  ;;  %v227_v17 = vmul.f32 %v430_v3, %v514_v5  ;;  %v228_v18 = vmul.f32 %v430_v3, %v516_v6 }
  0x15   : > { %v212_v20 = vrot.slane %v205_v11, 2  ;;  %v213_v21 = vrot.slane %v206_v12, 2  ;;  %v215_v22 = vrot.slane %v207_v13, 2  ;;  %v233_v23 = vrot.slane %v226_v14, 3 }
  0x16   : > { %v195_v24 = vsel %vm192_vm0, %v193_v15, %v194_v16  ;;  %v199_v25 = vadd.f32 %v194_v16, %v180_v8  ;;  %v234_v26 = vrot.slane %v227_v17, 3  ;;  %v236_v27 = vrot.slane %v228_v18, 3  ;;  %v435_v16 = vld [vmem:[%s579_s2] ss:$0 sm:$0xff] }
  0x17   : > { %v198_v29 = vadd.f32 %v195_v24, %v179_v7  ;;  %v214_v30 = vsel %vm211_vm1, %v212_v20, %v213_v21  ;;  %v216_v31 = vsel %vm211_vm1, %v213_v21, %v215_v22  ;;  %v247_v32 = vmul.f32 %v431_v19, %v512_v4 }
  0x18   : > { %v220_v33 = vadd.f32 %v216_v31, %v199_v25  ;;  %v235_v34 = vsel %vm232_vm2, %v233_v23, %v234_v26  ;;  %v237_v35 = vsel %vm232_vm2, %v234_v26, %v236_v27  ;;  %v248_v36 = vmul.f32 %v431_v19, %v514_v5 }
  0x19   : > { %v219_v38 = vadd.f32 %v214_v30, %v198_v29  ;;  %v249_v39 = vmul.f32 %v431_v19, %v516_v6  ;;  %v254_v40 = vrot.slane %v247_v32, 4  ;;  %v268_v41 = vmul.f32 %v432_v28, %v512_v4 }
  0x1a   : > { %v241_v42 = vadd.f32 %v237_v35, %v220_v33  ;;  %v255_v43 = vrot.slane %v248_v36, 4  ;;  %v269_v44 = vmul.f32 %v432_v28, %v514_v5  ;;  %v270_v45 = vmul.f32 %v432_v28, %v516_v6 }
  0x1b   : > { %v240_v46 = vadd.f32 %v235_v34, %v219_v38  ;;  %v257_v47 = vrot.slane %v249_v39, 4  ;;  %v275_v48 = vrot.slane %v268_v41, 5  ;;  %v289_v49 = vmul.f32 %v433_v37, %v512_v4 }
  0x1c   : > { %v256_v50 = vsel %vm253_vm3, %v254_v40, %v255_v43  ;;  %v276_v51 = vrot.slane %v269_v44, 5  ;;  %v278_v52 = vrot.slane %v270_v45, 5  ;;  %v290_v53 = vmul.f32 %v433_v37, %v514_v5 }
  0x1d   : > { %v258_v55 = vsel %vm253_vm3, %v255_v43, %v257_v47  ;;  %v261_v56 = vadd.f32 %v256_v50, %v240_v46  ;;  %v291_v57 = vmul.f32 %v433_v37, %v516_v6  ;;  %v296_v58 = vrot.slane %v289_v49, 6 }
  0x1e   : > { %v262_v59 = vadd.f32 %v258_v55, %v241_v42  ;;  %v277_v60 = vsel %vm274_vm4, %v275_v48, %v276_v51  ;;  %v279_v61 = vsel %vm274_vm4, %v276_v51, %v278_v52  ;;  %v297_v62 = vrot.slane %v290_v53, 6 }
  0x1f   : > { %v282_v63 = vadd.f32 %v277_v60, %v261_v56  ;;  %v299_v0 = vrot.slane %v291_v57, 6  ;;  %v310_v1 = vmul.f32 %v434_v54, %v512_v4  ;;  %v311_v2 = vmul.f32 %v434_v54, %v514_v5 }
  0x20   : > { %v283_v3 = vadd.f32 %v279_v61, %v262_v59  ;;  %v298_v7 = vsel %vm295_vm5, %v296_v58, %v297_v62  ;;  %v312_v8 = vmul.f32 %v434_v54, %v516_v6 }
  0x21   : > { %v300_v9 = vsel %vm295_vm5, %v297_v62, %v299_v0  ;;  %v303_v10 = vadd.f32 %v298_v7, %v282_v63  ;;  %v317_v11 = vrot.slane %v310_v1, 7  ;;  %v318_v12 = vrot.slane %v311_v2, 7 }
  0x22   : > { %v304_v13 = vadd.f32 %v300_v9, %v283_v3  ;;  %v320_v14 = vrot.slane %v312_v8, 7 }
  0x23   : > { %v319_v15 = vsel %vm316_vm6, %v317_v11, %v318_v12 }
  0x24   : > { %v321_v17 = vsel %vm316_vm6, %v318_v12, %v320_v14  ;;  %v324_v18 = vadd.f32 %v319_v15, %v303_v10 }
  0x25   : > { %v325_v19 = vadd.f32 %v321_v17, %v304_v13 }
  0x26   : > { %v333_v20 = vadd.f32 %v435_v16, %v324_v18 }
  0x27   : > { %v334_v21 = vadd.f32 %v435_v16, %v325_v19 }
  0x28   : > { %v436_v22 = vmul.f32 -1.442695, %v333_v20 }
  0x29   : > { %v437_v23 = vmul.f32 -1.442695, %v334_v21 }
  0x2a   : > { %450 = vpow2.f32 %v436_v22 }
  0x2b   : > { %452 = vpow2.f32 %v437_v23 }
  0x34   : > { %v451_v24 = vpop.eup %450 }
  0x35   : > { %v453_v25 = vpop.eup %452  ;;  %v341_v26 = vadd.f32 1.0, %v451_v24 }
  0x36   : > { %v342_v27 = vadd.f32 1.0, %v453_v25 }
  0x37   : > { %454 = vrcp.f32 %v341_v26 }
  0x38   : > { %456 = vrcp.f32 %v342_v27 }
  0x41   : > { %v455_v28 = vpop.eup %454 }
  0x42   : > { %v457_v29 = vpop.eup %456  ;;  %v349_v30 = vrot.slane %v455_v28, 5 }
  0x43   : > { %v350_v31 = vrot.slane %v457_v29, 5 }
  0x44   : > { %v355_v32 = vmul.f32 %v349_v30, %v512_v4 }
  0x45   : > { %v351_v33 = vsel %vm274_vm4, %v349_v30, %v350_v31  ;;  %v357_v34 = vmul.f32 %v350_v31, %v516_v6 }
  0x46   : > { %359 = vst.msk [vmem:[%s170_s14 - $0x3] sm:$0xf8] %vm358_vm7, %v355_v32  ;;  %v356_v35 = vmul.f32 %v351_v33, %v514_v5 }
  0x47   : > { %363 = vst.msk [vmem:[%s170_s14 + $0xd] sm:$0x3] %vm362_vm8, %v357_v34 }
  0x48   : > { %361 = vst.msk [vmem:[%s170_s14 + $0x5] sm:$0xff] %vm360_vm9, %v356_v35 }
  0x49 PF: > { %s13_s12 = sadd.s32 1, %s464_s12  }
  0x4a   : > { %p10_p4 = scmp.ge.s32.totalorder %s13_s12, 4  }
  0x4c   :  { %12 = sbr.rel (!%p10_p4) target bundleno = 1 (0x1), region = 62 }

// kernel: manner_forward.88
= control target key start
LH: loop header
LB: loop body
LE: loop exit
PB: predicated region body
PF: predicated region fallthrough
CT: control target
= control target key end

     0   :  { %vm60_vm0 = vcmask 261120   ;;  %s244_s1 = inlined_call_operand.vmem [shape: bf16[32,128], index: 1, kind: input, shape index: {}]   ;;  %s245_s0 = inlined_call_operand.vmem [shape: bf16[32,32], index: 0, kind: input, shape index: {}]   ;;  %s246_s2 = inlined_call_operand.vmem [shape: f32[1,128], index: 2, kind: input, shape index: {}]   ;;  %s247_s3 = inlined_call_operand.vmem [shape: f32[1,128], index: 3, kind: input, shape index: {}]   ;;  %s248_s4 = inlined_call_operand.vmem [shape: f32[32,128], index: 4, kind: output, shape index: {}]  }
   0x1   :  { %v185_v0 = vld [vmem:[%s244_s1] sm:$0xff]   ;;  %v186_v1 = vld [vmem:[%s244_s1 + $0x8] sm:$0xff]  }
   0x2   :  { %177 = vmatprep.subr.bf16.mxu0 %v185_v0  ;;  %v187_v2 = vld [vmem:[%s245_s0] sm:$0xff]   ;;  %v188_v3 = vld [vmem:[%s245_s0 + $0x8] sm:$0xff]  }
   0x3   :  { %178 = vmatpush3.bf16.msra.mxu0 %v185_v0  ;;  %181 = vmatprep.mubr.msk.bf16.mxu0 %vm60_vm0, %v187_v2  ;;  %v171_v4 = vld [vmem:[%s246_s2] ss:$0 sm:$0xff] }
   0x4   :  { %179 = vmatprep.subr.bf16.mxu0 %v186_v1  ;;  %v172_v6 = vld [vmem:[%s247_s3] ss:$0 sm:$0xff] }
   0x7   :  { %180 = vmatpush3.bf16.msra.mxu0 %v186_v1 }
   0xa   :  { %182 = vmatmul.mubr.msk.bf16.vlgmr.msra.gmra.mrb[0].mxu0 %vm60_vm0, %v188_v3 }
  0xdd   :  { %v183_v5 = vpop.f32.mrb[0].mxu0 }
  0xde   :  { %v140_v7 = vmul.f32 %v183_v5, %v171_v4  ;;  %v101_v8 = vpop.f32.mrb[1].mxu0 }
  0xdf   :  { %v138_v9 = vmul.f32 %v171_v4, %v101_v8  ;;  %v184_v10 = vpop.f32.mrb[2].mxu0 }
  0xe0   :  { %v151_v11 = vadd.f32 %v172_v6, %v140_v7  ;;  %v141_v12 = vmul.f32 %v184_v10, %v171_v4  ;;  %v104_v13 = vpop.f32.mrb[3].mxu0 }
  0xe1   :  { %v149_v14 = vadd.f32 %v172_v6, %v138_v9  ;;  %v139_v15 = vmul.f32 %v171_v4, %v104_v13 }
  0xe2   :  { %v155_v16 = vmax.f32 %v151_v11, 0.0  ;;  %v152_v17 = vadd.f32 %v172_v6, %v141_v12 }
  0xe3   :  { %v153_v18 = vmax.f32 %v149_v14, 0.0  ;;  %v150_v19 = vadd.f32 %v172_v6, %v139_v15 }
  0xe4   :  { %159 = vst [vmem:[%s248_s4 + $0x10] sm:$0xff] %v155_v16  ;;  %v156_v20 = vmax.f32 %v152_v17, 0.0 }
  0xe5   :  { %157 = vst [vmem:[%s248_s4] sm:$0xff] %v153_v18  ;;  %v154_v21 = vmax.f32 %v150_v19, 0.0 }
  0xe6   :  { %160 = vst [vmem:[%s248_s4 + $0x18] sm:$0xff] %v156_v20 }
  0xe7   :  { %158 = vst [vmem:[%s248_s4 + $0x8] sm:$0xff] %v154_v21 }

// kernel: manner_forward.90
= control target key start
LH: loop header
LB: loop body
LE: loop exit
PB: predicated region body
PF: predicated region fallthrough
CT: control target
= control target key end

     0   :  { %vm84_vm0 = vcmask 261120   ;;  %s167_s0 = inlined_call_operand.vmem [shape: f32[32,64], index: 0, kind: input, shape index: {}]   ;;  %s168_s1 = inlined_call_operand.vmem [shape: f32[1,64], index: 1, kind: input, shape index: {}]   ;;  %s169_s2 = inlined_call_operand.vmem [shape: f32[1,64], index: 2, kind: input, shape index: {}]   ;;  %s170_s3 = inlined_call_operand.vmem [shape: f32[32,32], index: 3, kind: output, shape index: {}]  }
   0x1   :  { %v16_v0 = vld [vmem:[%s167_s0 + $0x10] sm:$0xff]  ;;  %v17_v1 = vld [vmem:[%s167_s0 + $0x18] sm:$0xff]  ;;  %v93_v2 = vld [vmem:[%s168_s1] ss:$0 sm:$0xff] }
   0x2   :  { %v27_v3 = vmul.f32 %v93_v2, %v16_v0  ;;  %v28_v4 = vmul.f32 %v93_v2, %v17_v1  ;;  %v94_v5 = vld [vmem:[%s169_s2] ss:$0 sm:$0xff]  ;;  %v15_v6 = vld [vmem:[%s167_s0 + $0x8] sm:$0xff] }
   0x3   :  { %v14_v7 = vld [vmem:[%s167_s0] sm:$0xff]  ;;  %v26_v8 = vmul.f32 %v93_v2, %v15_v6  ;;  %s116_s0 = smov 96  }
   0x4   :  { %v25_v9 = vmul.f32 %v93_v2, %v14_v7  ;;  %v38_v10 = vadd.f32 %v94_v5, %v27_v3  ;;  %v39_v11 = vadd.f32 %v94_v5, %v28_v4 }
   0x5   :  { %v37_v12 = vadd.f32 %v94_v5, %v26_v8 }
   0x6   :  { %v36_v13 = vadd.f32 %v94_v5, %v25_v9  ;;  %v97_v14 = vmul.f32 -1.442695, %v38_v10  ;;  %v98_v15 = vmul.f32 -1.442695, %v39_v11 }
   0x7   :  { %v96_v16 = vmul.f32 -1.442695, %v37_v12 }
   0x8   :  { %v95_v17 = vmul.f32 -1.442695, %v36_v13  ;;  %100 = vpow2.f32 %v97_v14 }
   0x9   :  { %102 = vpow2.f32 %v98_v15 }
   0xa   :  { %104 = vpow2.f32 %v96_v16 }
   0xb   :  { %106 = vpow2.f32 %v95_v17 }
  0x12   :  { %v101_v18 = vpop.eup %100 }
  0x13   :  { %v103_v19 = vpop.eup %102  ;;  %v54_v20 = vadd.f32 1.0, %v101_v18 }
  0x14   :  { %v105_v21 = vpop.eup %104  ;;  %v55_v22 = vadd.f32 1.0, %v103_v19 }
  0x15   :  { %v107_v23 = vpop.eup %106  ;;  %108 = vrcp.f32 %v54_v20  ;;  %v53_v25 = vadd.f32 1.0, %v105_v21 }
  0x16   :  { %v52_v24 = vadd.f32 1.0, %v107_v23  ;;  %110 = vrcp.f32 %v55_v22 }
  0x18   :  { %112 = vrcp.f32 %v52_v24 }
  0x19   :  { %114 = vrcp.f32 %v53_v25 }
  0x1f   :  { %v109_v26 = vpop.eup %108 }
  0x20   :  { %72 = vrot.lane.b32.xlu1 %v109_v26, %s116_s0  ;;  %v111_v27 = vpop.eup %110 }
  0x22   :  { %v113_v28 = vpop.eup %112 }
  0x23   :  { %68 = vrot.lane.b32.xlu0 %v113_v28, %s116_s0  ;;  %v115_v29 = vpop.eup %114 }
  0x24   :  { %74 = vrot.lane.b32.xlu1 %v111_v27, %s116_s0 }
  0x27   :  { %70 = vrot.lane.b32.xlu0 %v115_v29, %s116_s0 }
  0x92   :  { %v73_v30 = vpop.permute.xlu1 %72 }
  0x93   :  { %v82_v31 = vmul.f32 %v73_v30, %v38_v10 }
  0x95   :  { %87 = vst.msk [vmem:[%s170_s3 + $0x10] sm:$0xff] %vm84_vm0, %v82_v31  ;;  %v69_v32 = vpop.permute.xlu0 %68 }
  0x96   :  { %v80_v33 = vmul.f32 %v69_v32, %v36_v13  ;;  %v75_v34 = vpop.permute.xlu1 %74 }
  0x97   :  { %v83_v35 = vmul.f32 %v75_v34, %v39_v11 }
  0x98   :  { %85 = vst.msk [vmem:[%s170_s3] sm:$0xff] %vm84_vm0, %v80_v33 }
  0x99   :  { %88 = vst.msk [vmem:[%s170_s3 + $0x18] sm:$0xff] %vm84_vm0, %v83_v35  ;;  %v71_v36 = vpop.permute.xlu0 %70 }
  0x9a   :  { %v81_v37 = vmul.f32 %v71_v36, %v37_v12 }
  0x9c   :  { %86 = vst.msk [vmem:[%s170_s3 + $0x8] sm:$0xff] %vm84_vm0, %v81_v37 }

// kernel: manner_forward.92
= control target key start
LH: loop header
LB: loop body
LE: loop exit
PB: predicated region body
PF: predicated region fallthrough
CT: control target
= control target key end

     0   :  { %vm68_vm0 = vcmask 261120   ;;  %s149_s0 = inlined_call_operand.vmem [shape: f32[32,32], index: 0, kind: input, shape index: {}]   ;;  %s150_s1 = inlined_call_operand.vmem [shape: f32[1,32], index: 1, kind: input, shape index: {}]   ;;  %s151_s2 = inlined_call_operand.vmem [shape: f32[1,32], index: 2, kind: input, shape index: {}]   ;;  %s152_s3 = inlined_call_operand.vmem [shape: f32[32,32], index: 3, kind: output, shape index: {}]  }
   0x1   :  { %v14_v0 = vld [vmem:[%s149_s0] sm:$0xff]  ;;  %v15_v4 = vld [vmem:[%s149_s0 + $0x8] sm:$0xff]  ;;  %v16_v5 = vld [vmem:[%s149_s0 + $0x10] sm:$0xff] }
   0x2   :  { %v77_v1 = vld [vmem:[%s150_s1] ss:$0 sm:$0xff]  ;;  %v17_v6 = vld [vmem:[%s149_s0 + $0x18] sm:$0xff] }
   0x3   :  { %v78_v2 = vld [vmem:[%s151_s2] ss:$0 sm:$0xff]  ;;  %v25_v3 = vmul.f32 %v77_v1, %v14_v0  ;;  %v26_v7 = vmul.f32 %v77_v1, %v15_v4  ;;  %v27_v8 = vmul.f32 %v77_v1, %v16_v5  ;;  %v28_v9 = vmul.f32 %v77_v1, %v17_v6 }
   0x5   :  { %v36_v10 = vadd.f32 %v78_v2, %v25_v3  ;;  %v37_v11 = vadd.f32 %v78_v2, %v26_v7  ;;  %v38_v12 = vadd.f32 %v78_v2, %v27_v8  ;;  %v39_v13 = vadd.f32 %v78_v2, %v28_v9 }
   0x7   :  { %v79_v14 = vmul.f32 -1.442695, %v36_v10  ;;  %v80_v15 = vmul.f32 -1.442695, %v37_v11  ;;  %v81_v16 = vmul.f32 -1.442695, %v38_v12 }
   0x8   :  { %v82_v17 = vmul.f32 -1.442695, %v39_v13 }
   0x9   :  { %83 = vpow2.f32 %v79_v14 }
   0xa   :  { %85 = vpow2.f32 %v80_v15 }
   0xb   :  { %87 = vpow2.f32 %v81_v16 }
   0xc   :  { %89 = vpow2.f32 %v82_v17 }
  0x13   :  { %v84_v18 = vpop.eup %83 }
  0x14   :  { %v86_v19 = vpop.eup %85  ;;  %v52_v20 = vadd.f32 1.0, %v84_v18 }
  0x15   :  { %v88_v21 = vpop.eup %87  ;;  %v53_v22 = vadd.f32 1.0, %v86_v19 }
  0x16   :  { %v90_v23 = vpop.eup %89  ;;  %91 = vrcp.f32 %v52_v20  ;;  %v54_v24 = vadd.f32 1.0, %v88_v21 }
  0x17   :  { %93 = vrcp.f32 %v53_v22  ;;  %v55_v25 = vadd.f32 1.0, %v90_v23 }
  0x18   :  { %95 = vrcp.f32 %v54_v24 }
  0x19   :  { %97 = vrcp.f32 %v55_v25 }
  0x20   :  { %v92_v26 = vpop.eup %91 }
  0x21   :  { %v94_v27 = vpop.eup %93  ;;  %v64_v28 = vmul.f32 %v92_v26, %v36_v10 }
  0x22   :  { %v96_v29 = vpop.eup %95  ;;  %v65_v30 = vmul.f32 %v94_v27, %v37_v11 }
  0x23   :  { %v98_v31 = vpop.eup %97  ;;  %69 = vst.msk [vmem:[%s152_s3] sm:$0xff] %vm68_vm0, %v64_v28  ;;  %v66_v32 = vmul.f32 %v96_v29, %v38_v12 }
  0x24   :  { %70 = vst.msk [vmem:[%s152_s3 + $0x8] sm:$0xff] %vm68_vm0, %v65_v30  ;;  %v67_v33 = vmul.f32 %v98_v31, %v39_v13 }
  0x25   :  { %71 = vst.msk [vmem:[%s152_s3 + $0x10] sm:$0xff] %vm68_vm0, %v66_v32 }
  0x26   :  { %72 = vst.msk [vmem:[%s152_s3 + $0x18] sm:$0xff] %vm68_vm0, %v67_v33 }

// kernel: manner_forward.91
= control target key start
LH: loop header
LB: loop body
LE: loop exit
PB: predicated region body
PF: predicated region fallthrough
CT: control target
= control target key end

     0   :  { %s341_s12 = smov 0   ;;  %s374_s0 = inlined_call_operand.vmem [shape: f32[2,17,32], index: 0, kind: input, shape index: {}]   ;;  %s375_s1 = inlined_call_operand.vmem [shape: f32[3,32], index: 1, kind: input, shape index: {}]   ;;  %s376_s2 = inlined_call_operand.vmem [shape: f32[1,32], index: 2, kind: input, shape index: {}]   ;;  %s377_s3 = inlined_call_operand.vmem [shape: f32[2,15,32], index: 3, kind: output, shape index: {}]  }
   0x1 LB: > { %s289_s13 = sadd.s32 4294967295, %s319_s12   ;;  %p293_p0 = scmp.ge.s32.totalorder %s319_s12, 1  ;;  %s319_s12 = sphi %s341_s12, %s13_s12  }
   0x2   : > { %p137_p1 = scmp.lt.s32.totalorder %s319_s12, 3 }
   0x4   : > { %p138_p2 = pnand %p293_p0, %p137_p1 }
   0x5   : > { %p161_p3 = scmp.lt.s32.totalorder (!%p138_p2), %s289_s13, 1  ;;  %v298_v0 = vld [vmem:[%s375_s1 + $0x1] ss:$0 sm:$0xff] (!%p138_p2)  ;;  %v299_v1 = vld [vmem:[%s375_s1 + $0x2] ss:$0 sm:$0xff] (!%p138_p2)  ;;  %vm192_vm0 = vcmask (!%p138_p2), 1046528  }
   0x6   : > { %141 = sbr.rel (%p138_p2) target bundleno = 30 (0x1e), region = 32  ;;  %v297_v2 = vld [vmem:[%s375_s1] ss:$0 sm:$0xff] (!%p138_p2)  ;;  %vm211_vm1 = vcmask (!%p138_p2), 1045504   ;;  %vm232_vm2 = vcmask (!%p138_p2), 260096   ;;  %vm230_vm3 = vcmask (!%p138_p2), 261120  }
   0x7   : > { %v300_v22 = vld [vmem:[%s376_s2] ss:$0 sm:$0xff] (!%p138_p2) }
   0xd   : > { %s379_s13 = smov (!%p161_p3, %s289_s13), 1 }
   0xe   : > { %s304_s14 = smul.u32 24, %s379_s13  ;;  %s303_s24 = sshll.u32 %s379_s13, 4 }
   0xf   : > { %s170_s29 = scalar_lea.vmem %s377_s3, %s303_s24 }
  0x10   : > { %s165_s21 = scalar_lea.vmem %s374_s0, %s304_s14 }
  0x11   : > { %v171_v3 = vld [vmem:[%s165_s21] sm:$0xff]  ;;  %v172_v4 = vld [vmem:[%s165_s21 + $0x8] sm:$0xff]  ;;  %v173_v5 = vld [vmem:[%s165_s21 + $0x10] sm:$0x1] }
  0x12   : > { %v188_v6 = vmul.f32 %v298_v0, %v171_v3  ;;  %v189_v7 = vmul.f32 %v298_v0, %v172_v4  ;;  %v205_v8 = vmul.f32 %v299_v1, %v171_v3  ;;  %v179_v9 = vmul.f32 %v297_v2, %v171_v3 }
  0x13   : > { %v206_v10 = vmul.f32 %v299_v1, %v172_v4  ;;  %v207_v11 = vmul.f32 %v299_v1, %v173_v5  ;;  %v180_v12 = vmul.f32 %v297_v2, %v172_v4 }
  0x14   : > { %v193_v13 = vrot.slane %v188_v6, 1  ;;  %v194_v14 = vrot.slane %v189_v7, 1  ;;  %v212_v15 = vrot.slane %v205_v8, 2 }
  0x15   : > { %v213_v16 = vrot.slane %v206_v10, 2  ;;  %v215_v17 = vrot.slane %v207_v11, 2 }
  0x16   : > { %v195_v18 = vsel %vm192_vm0, %v193_v13, %v194_v14  ;;  %v199_v19 = vadd.f32 %v194_v14, %v180_v12 }
  0x17   : > { %v198_v20 = vadd.f32 %v195_v18, %v179_v9  ;;  %v214_v21 = vsel %vm211_vm1, %v212_v15, %v213_v16  ;;  %v216_v23 = vsel %vm211_vm1, %v213_v16, %v215_v17 }
  0x18   : > { %v220_v24 = vadd.f32 %v216_v23, %v199_v19 }
  0x19   : > { %v219_v25 = vadd.f32 %v214_v21, %v198_v20 }
  0x1a   : > { %v229_v26 = vadd.f32 %v300_v22, %v220_v24 }
  0x1b   : > { %v228_v27 = vadd.f32 %v300_v22, %v219_v25 }
  0x1c   : > { %233 = vst.msk [vmem:[%s170_s29 + $0x8] sm:$0x7f] %vm232_vm2, %v229_v26 }
  0x1d   : > { %231 = vst.msk [vmem:[%s170_s29] sm:$0xff] %vm230_vm3, %v228_v27 }
  0x1e PF: > { %s13_s12 = sadd.s32 1, %s319_s12  }
  0x1f   : > { %p10_p4 = scmp.ge.s32.totalorder %s13_s12, 4  }
  0x21   :  { %12 = sbr.rel (!%p10_p4) target bundleno = 1 (0x1), region = 62 }

// kernel: manner_forward.99
= control target key start
LH: loop header
LB: loop body
LE: loop exit
PB: predicated region body
PF: predicated region fallthrough
CT: control target
= control target key end

     0   :  { %s709_s12 = smov 0   ;;  %s760_s0 = inlined_call_operand.vmem [shape: f32[4,32,8], index: 0, kind: input, shape index: {}]   ;;  %s761_s1 = inlined_call_operand.vmem [shape: f32[4,32,8], index: 1, kind: input, shape index: {}]   ;;  %s762_s2 = inlined_call_operand.vmem [shape: f32[4,32,8], index: 2, kind: input, shape index: {}]   ;;  %s763_s3 = inlined_call_operand.vmem [shape: f32[4,32,8], index: 3, kind: output, shape index: {}]  }
   0x1 LB: > { %s562_s13 = sadd.s32 4294967295, %s687_s12   ;;  %p566_p0 = scmp.ge.s32.totalorder %s687_s12, 1  ;;  %s687_s12 = sphi %s709_s12, %s13_s12  }
   0x2   : > { %p157_p1 = scmp.lt.s32.totalorder %s687_s12, 5 }
   0x4   : > { %p158_p2 = pnand %p566_p0, %p157_p1 }
   0x5   : > { %p191_p3 = scmp.lt.s32.totalorder (!%p158_p2), %s562_s13, 3  ;;  %vm223_vm0 = vcmask (!%p158_p2), 64512   ;;  %vm337_vm2 = vcmask (!%p158_p2), 261120  }
   0x6   : > { %161 = sbr.rel (%p158_p2) target bundleno = 786 (0x312), region = 32  ;;  %vm638_vm1 = vmpackc.low (!%p158_p2), %vm223_vm0, %vm223_vm0 }
   0xd   : > { %s765_s13 = smov (!%p191_p3, %s562_s13), 3 }
   0xe   : > { %s717_s14 = sshll.u32 %s765_s13, 5 }
   0xf   : > { %s200_s17 = scalar_lea.vmem %s761_s1, %s717_s14  ;;  %s195_s20 = scalar_lea.vmem %s760_s0, %s717_s14 }
  0x10   : > { %v215_v0 = vld [vmem:[%s200_s17] sm:$0xff]  ;;  %v216_v1 = vld [vmem:[%s200_s17 + $0x8] sm:$0xff]  ;;  %v217_v2 = vld [vmem:[%s200_s17 + $0x10] sm:$0xff]  ;;  %s205_s23 = scalar_lea.vmem %s762_s2, %s717_s14  ;;  %s210_s26 = scalar_lea.vmem %s763_s3, %s717_s14 }
  0x11   : > { %v637_v3 = vpack.c.bf16 %v216_v1, %v215_v0  ;;  %v218_v4 = vld [vmem:[%s200_s17 + $0x18] sm:$0xff]  ;;  %v211_v5 = vld [vmem:[%s195_s20] sm:$0xff]  ;;  %v212_v7 = vld [vmem:[%s195_s20 + $0x8] sm:$0xff] }
  0x12   : > { %v643_v6 = vpack.c.bf16 %v218_v4, %v217_v2  ;;  %617 = vmatprep.mubr.msk.f32.mxu0 %vm223_vm0, %v211_v5  ;;  %v213_v8 = vld [vmem:[%s195_s20 + $0x10] sm:$0xff]  ;;  %v214_v9 = vld [vmem:[%s195_s20 + $0x18] sm:$0xff]  ;;  %v219_v42 = vld [vmem:[%s205_s23] sm:$0xff] }
  0x13   : > { %639 = vmatprep.subr.msk.bf16.mxu0 %vm638_vm1, %v637_v3  ;;  %v220_v43 = vld [vmem:[%s205_s23 + $0x8] sm:$0xff]  ;;  %v221_v45 = vld [vmem:[%s205_s23 + $0x10] sm:$0xff]  ;;  %v222_v46 = vld [vmem:[%s205_s23 + $0x18] sm:$0xff] }
  0x14   : > { %642 = vmatpush3.bf16.xpose.msk.msra.mxu0 %vm638_vm1, %v637_v3  ;;  %v649_v44 = vpack.c.bf16 %v220_v43, %v219_v42  ;;  %v653_v47 = vpack.c.bf16 %v222_v46, %v221_v45 }
  0x15   : > { %645 = vmatprep.subr.msk.bf16.mxu0 %vm638_vm1, %v643_v6 }
  0x16   : > { %650 = vmatprep.subr.bf16.mxu1 %v649_v44 }
  0x17   : > { %652 = vmatpush3.bf16.msra.mxu1 %v649_v44 }
  0x18   : > { %654 = vmatprep.subr.bf16.mxu1 %v653_v47 }
  0x1b   : > { %656 = vmatpush3.bf16.msra.mxu1 %v653_v47 }
  0x1c   : > { %648 = vmatpush3.bf16.xpose.msk.msra.mxu0 %vm638_vm1, %v643_v6 }
  0x23   : > { %618 = vmatmul.mubr.msk.f32.vlgmr.msra.gmra.mrb[0].mxu0 %vm223_vm0, %v212_v7 }
  0x24   : > { %620 = vmatprep.mubr.msk.f32.mxu0 %vm223_vm0, %v213_v8 }
  0x27   : > { %621 = vmatmul.mubr.msk.f32.gmra.mrb[2].mxu0 %vm223_vm0, %v214_v9 }
  0xf6   : > { %v619_v10 = vpop.f32.mrb[0].mxu0 }
  0xf7   : > { %v314_v11 = vpop.f32.mrb[1].mxu0  ;;  %v334_v13 = vmul.f32 0.35355338, %v619_v10 }
  0xf8   : > { %v333_v12 = vmul.f32 0.35355338, %v314_v11 }
  0xf9   : > { %v341_v19 = vsel %vm337_vm2, %v334_v13, -inf }
  0xfa   : > { %v622_v14 = vpop.f32.mrb[2].mxu0  ;;  %v338_v15 = vsel %vm337_vm2, %v333_v12, -inf }
  0xfb   : > { %339 = vmax.xlane.f32.xlu0 %v338_v15  ;;  %v324_v16 = vpop.f32.mrb[3].mxu0  ;;  %v336_v18 = vmul.f32 0.35355338, %v622_v14 }
  0xfc   : > { %v335_v17 = vmul.f32 0.35355338, %v324_v16 }
  0xfd   : > { %v347_v21 = vsel %vm337_vm2, %v336_v18, -inf }
  0xfe   : > { %v344_v20 = vsel %vm337_vm2, %v335_v17, -inf }
  0xff   : > { %342 = vmax.xlane.f32.xlu0 %v341_v19  ;;  %345 = vmax.xlane.f32.xlu1 %v344_v20 }
 0x103   : > { %348 = vmax.xlane.f32.xlu1 %v347_v21 }
 0x188   : > { %v340_v22 = vpop.xlane.xlu0 %339 }
 0x189   : > { %v350_v23 = vsub.f32 %v333_v12, %v340_v22 }
 0x18b   : > { %v354_v24 = vmul.f32 1.442695, %v350_v23 }
 0x18c   : > { %v343_v25 = vpop.xlane.xlu0 %342  ;;  %v346_v26 = vpop.xlane.xlu1 %345 }
 0x18d   : > { %665 = vpow2.f32 %v354_v24  ;;  %v351_v27 = vsub.f32 %v334_v13, %v343_v25  ;;  %v352_v28 = vsub.f32 %v335_v17, %v346_v26 }
 0x18f   : > { %v356_v29 = vmul.f32 1.442695, %v351_v27  ;;  %v358_v30 = vmul.f32 1.442695, %v352_v28 }
 0x190   : > { %v349_v31 = vpop.xlane.xlu1 %348 }
 0x191   : > { %667 = vpow2.f32 %v356_v29  ;;  %v353_v32 = vsub.f32 %v336_v18, %v349_v31 }
 0x192   : > { %669 = vpow2.f32 %v358_v30 }
 0x193   : > { %v360_v33 = vmul.f32 1.442695, %v353_v32 }
 0x195   : > { %671 = vpow2.f32 %v360_v33 }
 0x197   : > { %v666_v34 = vpop.eup %665 }
 0x198   : > { %v362_v35 = vsel %vm337_vm2, %v666_v34, 0.0 }
 0x199   : > { %363 = vadd.xlane.f32.xlu0 %v362_v35 }
 0x19b   : > { %v668_v36 = vpop.eup %667 }
 0x19c   : > { %v670_v37 = vpop.eup %669  ;;  %v365_v38 = vsel %vm337_vm2, %v668_v36, 0.0 }
 0x19d   : > { %366 = vadd.xlane.f32.xlu1 %v365_v38  ;;  %v368_v39 = vsel %vm337_vm2, %v670_v37, 0.0 }
 0x19e   : > { %369 = vadd.xlane.f32.xlu0 %v368_v39 }
 0x19f   : > { %v672_v40 = vpop.eup %671 }
 0x1a0   : > { %v371_v41 = vsel %vm337_vm2, %v672_v40, 0.0 }
 0x1a1   : > { %372 = vadd.xlane.f32.xlu1 %v371_v41 }
 0x226   : > { %v364_v48 = vpop.xlane.xlu0 %363 }
 0x227   : > { %673 = vrcp.f32 %v364_v48 }
 0x22a   : > { %v367_v49 = vpop.xlane.xlu1 %366 }
 0x22b   : > { %v370_v50 = vpop.xlane.xlu0 %369  ;;  %675 = vrcp.f32 %v367_v49 }
 0x22c   : > { %677 = vrcp.f32 %v370_v50 }
 0x22e   : > { %v373_v51 = vpop.xlane.xlu1 %372 }
 0x22f   : > { %679 = vrcp.f32 %v373_v51 }
 0x231   : > { %v674_v52 = vpop.eup %673 }
 0x232   : > { %v378_v53 = vmul.f32 %v674_v52, %v666_v34 }
 0x234   : > { %631 = vmatprep.mubr.msk.f32.mxu1 %vm337_vm2, %v378_v53 }
 0x235   : > { %v676_v54 = vpop.eup %675 }
 0x236   : > { %v678_v55 = vpop.eup %677  ;;  %v379_v56 = vmul.f32 %v676_v54, %v668_v36 }
 0x237   : > { %v380_v57 = vmul.f32 %v678_v55, %v670_v37 }
 0x238   : > { %632 = vmatmul.mubr.msk.f32.vlgmr.msra.gmra.mrb[0].mxu1 %vm337_vm2, %v379_v56 }
 0x239   : > { %v680_v58 = vpop.eup %679  ;;  %634 = vmatprep.mubr.msk.f32.mxu1 %vm337_vm2, %v380_v57 }
 0x23a   : > { %v381_v59 = vmul.f32 %v680_v58, %v672_v40 }
 0x23c   : > { %635 = vmatmul.mubr.msk.f32.gmra.mrb[2].mxu1 %vm337_vm2, %v381_v59 }
 0x30b   : > { %v633_v60 = vpop.f32.mrb[0].mxu1 }
 0x30c   : > { %480 = vst.msk [vmem:[%s210_s26 + $0x8] sm:$0xff] %vm223_vm0, %v633_v60  ;;  %v460_v61 = vpop.f32.mrb[1].mxu1 }
 0x30d   : > { %479 = vst.msk [vmem:[%s210_s26] sm:$0xff] %vm223_vm0, %v460_v61 }
 0x30f   : > { %v636_v62 = vpop.f32.mrb[2].mxu1 }
 0x310   : > { %482 = vst.msk [vmem:[%s210_s26 + $0x18] sm:$0xff] %vm223_vm0, %v636_v62  ;;  %v470_v63 = vpop.f32.mrb[3].mxu1 }
 0x311   : > { %481 = vst.msk [vmem:[%s210_s26 + $0x10] sm:$0xff] %vm223_vm0, %v470_v63 }
 0x312 PF: > { %s13_s12 = sadd.s32 1, %s687_s12  }
 0x313   : > { %p10_p4 = scmp.ge.s32.totalorder %s13_s12, 6  }
 0x315   :  { %12 = sbr.rel (!%p10_p4) target bundleno = 1 (0x1), region = 68 }

// kernel: manner_forward.104
= control target key start
LH: loop header
LB: loop body
LE: loop exit
PB: predicated region body
PF: predicated region fallthrough
CT: control target
= control target key end

     0   :  { %s287_s9 = smov 0   ;;  %s307_s0 = inlined_call_operand.vmem [shape: f32[2,32,16], index: 0, kind: input, shape index: {}]   ;;  %s308_s1 = inlined_call_operand.vmem [shape: f32[2,1,16], index: 1, kind: input, shape index: {}]   ;;  %s309_s2 = inlined_call_operand.vmem [shape: f32[2,32,16], index: 2, kind: output, shape index: {}]  }
   0x1 LB: > { %s242_s10 = sadd.s32 4294967295, %s270_s9   ;;  %p246_p0 = scmp.ge.s32.totalorder %s270_s9, 1  ;;  %s270_s9 = sphi %s287_s9, %s12_s9  }
   0x2   : > { %p120_p1 = scmp.lt.s32.totalorder %s270_s9, 3 }
   0x4   : > { %p121_p2 = pnand %p246_p0, %p120_p1 }
   0x5   : > { %p145_p3 = scmp.lt.s32.totalorder (!%p121_p2), %s242_s10, 1  ;;  %vm173_vm0 = vcmask (!%p121_p2), 130048  }
   0x6   : > { %124 = sbr.rel (%p121_p2) target bundleno = 21 (0x15), region = 28 }
   0xd   : > { %s311_s10 = smov (!%p145_p3, %s242_s10), 1 }
   0xe   : > { %s254_s11 = sshll.u32 %s311_s10, 5  ;;  %s152_s14 = scalar_lea.vmem %s308_s1, %s311_s10 }
   0xf   : > { %s149_s17 = scalar_lea.vmem %s307_s0, %s254_s11  ;;  %v251_v0 = vld [vmem:[%s152_s14] ss:$0 sm:$0xff]  ;;  %s157_s20 = scalar_lea.vmem %s309_s2, %s254_s11 }
  0x10   : > { %v158_v1 = vld [vmem:[%s149_s17] sm:$0xff]  ;;  %v159_v2 = vld [vmem:[%s149_s17 + $0x8] sm:$0xff]  ;;  %v160_v3 = vld [vmem:[%s149_s17 + $0x10] sm:$0xff] }
  0x11   : > { %v169_v4 = vmul.f32 %v251_v0, %v158_v1  ;;  %v170_v5 = vmul.f32 %v251_v0, %v159_v2  ;;  %v171_v6 = vmul.f32 %v251_v0, %v160_v3  ;;  %v161_v7 = vld [vmem:[%s149_s17 + $0x18] sm:$0xff] }
  0x12   : > { %v172_v8 = vmul.f32 %v251_v0, %v161_v7 }
  0x13   : > { %174 = vst.msk [vmem:[%s157_s20] sm:$0xff] %vm173_vm0, %v169_v4  ;;  %175 = vst.msk [vmem:[%s157_s20 + $0x8] sm:$0xff] %vm173_vm0, %v170_v5 }
  0x14   : > { %176 = vst.msk [vmem:[%s157_s20 + $0x10] sm:$0xff] %vm173_vm0, %v171_v6  ;;  %177 = vst.msk [vmem:[%s157_s20 + $0x18] sm:$0xff] %vm173_vm0, %v172_v8 }
  0x15 PF: > { %s12_s9 = sadd.s32 1, %s270_s9  }
  0x16   : > { %p9_p4 = scmp.ge.s32.totalorder %s12_s9, 4  }
  0x18   :  { %11 = sbr.rel (!%p9_p4) target bundleno = 1 (0x1), region = 61 }

// kernel: manner_forward.101
= control target key start
LH: loop header
LB: loop body
LE: loop exit
PB: predicated region body
PF: predicated region fallthrough
CT: control target
= control target key end

     0   :  { %s616_s12 = smov 0   ;;  %s832_s0 = inlined_call_operand.vmem [shape: f32[2,39,16], index: 0, kind: input, shape index: {}]   ;;  %s833_s1 = inlined_call_operand.vmem [shape: f32[8,16], index: 1, kind: input, shape index: {}]   ;;  %s834_s2 = inlined_call_operand.vmem [shape: f32[1,16], index: 2, kind: input, shape index: {}]   ;;  %s835_s3 = inlined_call_operand.vmem [shape: f32[2,32,16], index: 3, kind: output, shape index: {}]  }
   0x1 LB: > { %s539_s13 = sadd.s32 4294967295, %s594_s12   ;;  %p543_p0 = scmp.ge.s32.totalorder %s594_s12, 1  ;;  %s594_s12 = sphi %s616_s12, %s13_s12  }
   0x2   : > { %p137_p1 = scmp.lt.s32.totalorder %s594_s12, 3 }
   0x4   : > { %p138_p2 = pnand %p543_p0, %p137_p1 }
   0x5   : > { %p161_p3 = scmp.lt.s32.totalorder (!%p138_p2), %s539_s13, 1  ;;  %v630_v0 = vld [vmem:[%s833_s1 + $0x1] ss:$0 sm:$0xff] (!%p138_p2)  ;;  %v635_v1 = vld [vmem:[%s833_s1 + $0x2] ss:$0 sm:$0xff] (!%p138_p2)  ;;  %vm204_vm0 = vcmask (!%p138_p2), 1046528  }
   0x6   : > { %141 = sbr.rel (%p138_p2) target bundleno = 92 (0x5c), region = 32  ;;  %v645_v2 = vld [vmem:[%s833_s1] ss:$0 sm:$0xff] (!%p138_p2)  ;;  %v650_v3 = vld [vmem:[%s833_s1 + $0x3] ss:$0 sm:$0xff] (!%p138_p2)  ;;  %vm237_vm1 = vcmask (!%p138_p2), 1045504  }
   0x7   : > { %vm270_vm2 = vcmask (!%p138_p2), 1044480   ;;  %vm303_vm3 = vcmask (!%p138_p2), 1043456   ;;  %vm336_vm4 = vcmask (!%p138_p2), 1042432   ;;  %vm369_vm5 = vcmask (!%p138_p2), 1041408   ;;  %v678_v13 = vld [vmem:[%s833_s1 + $0x4] ss:$0 sm:$0xff] (!%p138_p2) }
   0x8   : > { %vm402_vm6 = vcmask (!%p138_p2), 1040384   ;;  %v686_v18 = vld [vmem:[%s833_s1 + $0x5] ss:$0 sm:$0xff] (!%p138_p2)  ;;  %v699_v23 = vld [vmem:[%s833_s1 + $0x6] ss:$0 sm:$0xff] (!%p138_p2)  ;;  %vm476_vm7 = vcmask (!%p138_p2), 130051  }
   0x9   : > { %v714_v32 = vld [vmem:[%s833_s1 + $0x7] ss:$0 sm:$0xff] (!%p138_p2)  ;;  %vm478_vm8 = vcmask (!%p138_p2), 130048   ;;  %vm482_vm9 = vcmask (!%p138_p2), 124928  }
   0xd   : > { %s837_s13 = smov (!%p161_p3, %s539_s13), 1 }
   0xe   : > { %s563_s14 = smul.u32 40, %s837_s13  ;;  %s562_s9 = sshll.u32 %s837_s13, 5 }
  0x10   : > { %s640_s21 = scalar_lea.vmem %s832_s0, %s563_s14  ;;  %s170_s14 = scalar_lea.vmem %s835_s3, %s562_s9 }
  0x11   : > { %v653_v4 = vld [vmem:[%s640_s21] sm:$0xff]  ;;  %v656_v5 = vld [vmem:[%s640_s21 + $0x8] sm:$0xff]  ;;  %v720_v37 = vld [vmem:[%s640_s21 + $0x10] sm:$0xff] }
  0x12   : > { %v659_v6 = vld [vmem:[%s640_s21 + $0x20] sm:$0x7f]  ;;  %v194_v7 = vmul.f32 %v630_v0, %v653_v4  ;;  %v665_v8 = vmul.f32 %v630_v0, %v656_v5  ;;  %v227_v9 = vmul.f32 %v635_v1, %v653_v4  ;;  %v181_v10 = vmul.f32 %v645_v2, %v653_v4 }
  0x13   : > { %v228_v11 = vmul.f32 %v635_v1, %v656_v5  ;;  %v260_v12 = vmul.f32 %v650_v3, %v653_v4  ;;  %v261_v17 = vmul.f32 %v650_v3, %v656_v5  ;;  %v690_v19 = vmul.f32 %v630_v0, %v659_v6 }
  0x14   : > { %v205_v14 = vrot.slane %v194_v7, 1  ;;  %v206_v15 = vrot.slane %v665_v8, 1  ;;  %v238_v16 = vrot.slane %v227_v9, 2  ;;  %v694_v20 = vmul.f32 %v635_v1, %v659_v6  ;;  %v749_v9 = vld [vmem:[%s640_s21 + $0x18] sm:$0xff] }
  0x15   : > { %v239_v21 = vrot.slane %v228_v11, 2  ;;  %v271_v22 = vrot.slane %v260_v12, 3  ;;  %v272_v25 = vrot.slane %v261_v17, 3  ;;  %v293_v26 = vmul.f32 %v678_v13, %v653_v4 }
  0x16   : > { %v207_v24 = vsel %vm204_vm0, %v205_v14, %v206_v15  ;;  %v294_v27 = vmul.f32 %v678_v13, %v656_v5  ;;  %v326_v30 = vmul.f32 %v686_v18, %v653_v4  ;;  %v327_v31 = vmul.f32 %v686_v18, %v656_v5 }
  0x17   : > { %v218_v28 = vadd.f32 %v207_v24, %v181_v10  ;;  %v240_v29 = vsel %vm237_vm1, %v238_v16, %v239_v21  ;;  %v273_v33 = vsel %vm270_vm2, %v271_v22, %v272_v25  ;;  %v304_v34 = vrot.slane %v293_v26, 4  ;;  %v762_v26 = vld [vmem:[%s834_s2] ss:$0 sm:$0xff] }
  0x18   : > { %v305_v35 = vrot.slane %v294_v27, 4  ;;  %v359_v36 = vmul.f32 %v699_v23, %v653_v4  ;;  %v337_v39 = vrot.slane %v326_v30, 5  ;;  %v338_v40 = vrot.slane %v327_v31, 5 }
  0x19   : > { %v251_v38 = vadd.f32 %v240_v29, %v218_v28  ;;  %v360_v41 = vmul.f32 %v699_v23, %v656_v5  ;;  %v392_v44 = vmul.f32 %v714_v32, %v653_v4  ;;  %v393_v45 = vmul.f32 %v714_v32, %v656_v5 }
  0x1a   : > { %v306_v42 = vsel %vm303_vm3, %v304_v34, %v305_v35  ;;  %v370_v43 = vrot.slane %v359_v36, 6  ;;  %v339_v47 = vsel %vm336_vm4, %v337_v39, %v338_v40  ;;  %v182_v49 = vmul.f32 %v645_v2, %v656_v5 }
  0x1b   : > { %v284_v46 = vadd.f32 %v273_v33, %v251_v38  ;;  %v371_v48 = vrot.slane %v360_v41, 6  ;;  %v403_v50 = vrot.slane %v392_v44, 7  ;;  %v404_v51 = vrot.slane %v393_v45, 7 }
  0x1c   : > { %v196_v52 = vmul.f32 %v630_v0, %v720_v37  ;;  %v229_v53 = vmul.f32 %v635_v1, %v720_v37  ;;  %v262_v56 = vmul.f32 %v650_v3, %v720_v37  ;;  %v295_v57 = vmul.f32 %v678_v13, %v720_v37 }
  0x1d   : > { %v317_v54 = vadd.f32 %v306_v42, %v284_v46  ;;  %v372_v55 = vsel %vm369_vm5, %v370_v43, %v371_v48  ;;  %v405_v58 = vsel %vm402_vm6, %v403_v50, %v404_v51  ;;  %v328_v61 = vmul.f32 %v686_v18, %v720_v37 }
  0x1e   : > { %v208_v59 = vrot.slane %v196_v52, 1  ;;  %v241_v60 = vrot.slane %v229_v53, 2  ;;  %v274_v63 = vrot.slane %v262_v56, 3  ;;  %v307_v7 = vrot.slane %v295_v57, 4 }
  0x1f   : > { %v350_v62 = vadd.f32 %v339_v47, %v317_v54  ;;  %v746_v8 = vmul.f32 %v699_v23, %v720_v37  ;;  %v340_v12 = vrot.slane %v328_v61, 5  ;;  %v755_v14 = vmul.f32 %v714_v32, %v720_v37 }
  0x20   : > { %v209_v10 = vsel %vm204_vm0, %v206_v15, %v208_v59  ;;  %v242_v11 = vsel %vm237_vm1, %v239_v21, %v241_v60  ;;  %v212_v16 = vrot.slane %v690_v19, 1  ;;  %v245_v17 = vrot.slane %v694_v20, 2 }
  0x21   : > { %v383_v22 = vadd.f32 %v372_v55, %v350_v62  ;;  %v219_v24 = vadd.f32 %v209_v10, %v182_v49  ;;  %v275_v15 = vsel %vm270_vm2, %v272_v25, %v274_v63  ;;  %v308_v21 = vsel %vm303_vm3, %v305_v35, %v307_v7 }
  0x22   : > { %v341_v27 = vsel %vm336_vm4, %v338_v40, %v340_v12  ;;  %v373_v28 = vrot.slane %v746_v8, 6  ;;  %v197_v19 = vmul.f32 %v630_v0, %v749_v9  ;;  %v230_v20 = vmul.f32 %v635_v1, %v749_v9 }
  0x23   : > { %v416_v29 = vadd.f32 %v405_v58, %v383_v22  ;;  %v252_v30 = vadd.f32 %v242_v11, %v219_v24  ;;  %v406_v31 = vrot.slane %v755_v14, 7  ;;  %v183_v33 = vmul.f32 %v645_v2, %v720_v37 }
  0x24   : > { %v263_v25 = vmul.f32 %v650_v3, %v749_v9  ;;  %v296_v34 = vmul.f32 %v678_v13, %v749_v9  ;;  %v210_v38 = vrot.slane %v197_v19, 1  ;;  %v243_v39 = vrot.slane %v230_v20, 2 }
  0x25   : > { %v427_v35 = vadd.f32 %v762_v26, %v416_v29  ;;  %v285_v36 = vadd.f32 %v275_v15, %v252_v30  ;;  %v329_v1 = vmul.f32 %v686_v18, %v749_v9  ;;  %v362_v41 = vmul.f32 %v699_v23, %v749_v9 }
  0x26   : > { %v276_v0 = vrot.slane %v263_v25, 3  ;;  %v309_v40 = vrot.slane %v296_v34, 4  ;;  %v211_v44 = vsel %vm204_vm0, %v208_v59, %v210_v38  ;;  %v244_v45 = vsel %vm237_vm1, %v241_v60, %v243_v39 }
  0x27   : > { %v556_v42 = vmul.f32 -1.442695, %v427_v35  ;;  %v318_v43 = vadd.f32 %v308_v21, %v285_v36  ;;  %v374_v46 = vsel %vm369_vm5, %v371_v48, %v373_v28  ;;  %v407_v47 = vsel %vm402_vm6, %v404_v51, %v406_v31 }
  0x28   : > { %v220_v49 = vadd.f32 %v211_v44, %v183_v33  ;;  %v342_v50 = vrot.slane %v329_v1, 5  ;;  %v277_v53 = vsel %vm270_vm2, %v274_v63, %v276_v0  ;;  %v395_v54 = vmul.f32 %v714_v32, %v749_v9 }
  0x29   : > { %572 = vpow2.f32 %v556_v42  ;;  %v351_v52 = vadd.f32 %v341_v27, %v318_v43  ;;  %v310_v56 = vsel %vm303_vm3, %v307_v7, %v309_v40  ;;  %v184_v57 = vmul.f32 %v645_v2, %v749_v9 }
  0x2a   : > { %v253_v55 = vadd.f32 %v244_v45, %v220_v49  ;;  %v213_v58 = vsel %vm204_vm0, %v210_v38, %v212_v16  ;;  %v343_v51 = vsel %vm336_vm4, %v340_v12, %v342_v50  ;;  %v375_v59 = vrot.slane %v362_v41, 6 }
  0x2b   : > { %v384_v48 = vadd.f32 %v374_v46, %v351_v52  ;;  %v246_v60 = vsel %vm237_vm1, %v243_v39, %v245_v17  ;;  %v221_v62 = vadd.f32 %v213_v58, %v184_v57  ;;  %v264_v63 = vmul.f32 %v650_v3, %v659_v6 }
  0x2c   : > { %v286_v61 = vadd.f32 %v277_v53, %v253_v55  ;;  %v297_v8 = vmul.f32 %v678_v13, %v659_v6  ;;  %v408_v10 = vrot.slane %v395_v54, 7  ;;  %v330_v2 = vmul.f32 %v686_v18, %v659_v6 }
  0x2d   : > { %v417_v7 = vadd.f32 %v407_v47, %v384_v48  ;;  %v363_v11 = vmul.f32 %v699_v23, %v659_v6  ;;  %v254_v14 = vadd.f32 %v246_v60, %v221_v62  ;;  %v278_v16 = vrot.slane %v264_v63, 3 }
  0x2e   : > { %v319_v12 = vadd.f32 %v310_v56, %v286_v61  ;;  %v311_v17 = vrot.slane %v297_v8, 4  ;;  %v376_v24 = vsel %vm369_vm5, %v373_v28, %v375_v59  ;;  %v344_v3 = vrot.slane %v330_v2, 5 }
  0x2f   : > { %v428_v22 = vadd.f32 %v762_v26, %v417_v7  ;;  %v396_v13 = vmul.f32 %v714_v32, %v659_v6  ;;  %v279_v21 = vsel %vm270_vm2, %v276_v0, %v278_v16  ;;  %v377_v27 = vrot.slane %v363_v11, 6 }
  0x30   : > { %v352_v15 = vadd.f32 %v343_v51, %v319_v12  ;;  %v312_v18 = vsel %vm303_vm3, %v309_v40, %v311_v17  ;;  %v409_v23 = vsel %vm402_vm6, %v406_v31, %v408_v10  ;;  %v287_v30 = vadd.f32 %v279_v21, %v254_v14 }
  0x31   : > { %v557_v29 = vmul.f32 -1.442695, %v428_v22  ;;  %v345_v20 = vsel %vm336_vm4, %v342_v50, %v344_v3  ;;  %v410_v33 = vrot.slane %v396_v13, 7  ;;  %v378_v35 = vsel %vm369_vm5, %v375_v59, %v377_v27 }
  0x32   : > { %v385_v19 = vadd.f32 %v376_v24, %v352_v15  ;;  %v320_v28 = vadd.f32 %v312_v18, %v287_v30 }
  0x33   : > { %v573_v25 = vpop.eup %572  ;;  %574 = vpow2.f32 %v557_v29  ;;  %v411_v39 = vsel %vm402_vm6, %v408_v10, %v410_v33 }
  0x34   : > { %v443_v34 = vadd.f32 1.0, %v573_v25  ;;  %v418_v32 = vadd.f32 %v409_v23, %v385_v19  ;;  %v353_v36 = vadd.f32 %v345_v20, %v320_v28 }
  0x36   : > { %576 = vrcp.f32 %v443_v34  ;;  %v429_v38 = vadd.f32 %v762_v26, %v418_v32  ;;  %v386_v31 = vadd.f32 %v378_v35, %v353_v36 }
  0x38   : > { %v558_v0 = vmul.f32 -1.442695, %v429_v38  ;;  %v419_v40 = vadd.f32 %v411_v39, %v386_v31 }
  0x3a   : > { %578 = vpow2.f32 %v558_v0  ;;  %v430_v1 = vadd.f32 %v762_v26, %v419_v40 }
  0x3c   : > { %v559_v42 = vmul.f32 -1.442695, %v430_v1 }
  0x3d   : > { %v575_v41 = vpop.eup %574 }
  0x3e   : > { %v444_v43 = vadd.f32 1.0, %v575_v41  ;;  %580 = vpow2.f32 %v559_v42 }
  0x40   : > { %v577_v44 = vpop.eup %576  ;;  %582 = vrcp.f32 %v444_v43 }
  0x41   : > { %v459_v45 = vrot.slane %v577_v44, 5 }
  0x43   : > { %v471_v46 = vmul.f32 %v459_v45, %v653_v4 }
  0x44   : > { %v579_v47 = vpop.eup %578 }
  0x45   : > { %477 = vst.msk [vmem:[%s170_s14 - $0x3] sm:$0xf8] %vm476_vm7, %v471_v46  ;;  %v445_v49 = vadd.f32 1.0, %v579_v47 }
  0x47   : > { %584 = vrcp.f32 %v445_v49 }
  0x48   : > { %v581_v26 = vpop.eup %580 }
  0x49   : > { %v446_v52 = vadd.f32 1.0, %v581_v26 }
  0x4a   : > { %v583_v50 = vpop.eup %582 }
  0x4b   : > { %v460_v53 = vrot.slane %v583_v50, 5  ;;  %586 = vrcp.f32 %v446_v52 }
  0x4d   : > { %v461_v54 = vsel %vm336_vm4, %v459_v45, %v460_v53 }
  0x4e   : > { %v472_v55 = vmul.f32 %v461_v54, %v656_v5 }
  0x50   : > { %479 = vst.msk [vmem:[%s170_s14 + $0x5] sm:$0xff] %vm478_vm8, %v472_v55 }
  0x51   : > { %v585_v56 = vpop.eup %584 }
  0x52   : > { %v462_v57 = vrot.slane %v585_v56, 5 }
  0x54   : > { %v463_v58 = vsel %vm336_vm4, %v460_v53, %v462_v57 }
  0x55   : > { %v473_v4 = vmul.f32 %v463_v58, %v720_v37  ;;  %v587_v48 = vpop.eup %586 }
  0x56   : > { %v464_v51 = vrot.slane %v587_v48, 5 }
  0x57   : > { %480 = vst.msk [vmem:[%s170_s14 + $0xd] sm:$0xff] %vm478_vm8, %v473_v4 }
  0x58   : > { %v465_v59 = vsel %vm336_vm4, %v462_v57, %v464_v51  ;;  %v475_v60 = vmul.f32 %v464_v51, %v659_v6 }
  0x59   : > { %v474_v61 = vmul.f32 %v465_v59, %v749_v9 }
  0x5a   : > { %483 = vst.msk [vmem:[%s170_s14 + $0x1d] sm:$0x7] %vm482_vm9, %v475_v60 }
  0x5b   : > { %481 = vst.msk [vmem:[%s170_s14 + $0x15] sm:$0xff] %vm478_vm8, %v474_v61 }
  0x5c PF: > { %s13_s12 = sadd.s32 1, %s594_s12  }
  0x5d   : > { %p10_p4 = scmp.ge.s32.totalorder %s13_s12, 4  }
  0x5f   :  { %12 = sbr.rel (!%p10_p4) target bundleno = 1 (0x1), region = 62 }

// kernel: manner_forward.102
= control target key start
LH: loop header
LB: loop body
LE: loop exit
PB: predicated region body
PF: predicated region fallthrough
CT: control target
= control target key end

     0   :  { %v138_v0 = vmov 0.0   ;;  %vm139_vm0 = vmmov 0   ;;  %vm41_vm1 = vcmask 130048   ;;  %s183_s1 = inlined_call_operand.vmem [shape: bf16[16,128], index: 1, kind: input, shape index: {}]   ;;  %s184_s0 = inlined_call_operand.vmem [shape: bf16[16,16], index: 0, kind: input, shape index: {}]   ;;  %s185_s2 = inlined_call_operand.vmem [shape: f32[1,128], index: 2, kind: input, shape index: {}]   ;;  %s186_s3 = inlined_call_operand.vmem [shape: f32[1,128], index: 3, kind: input, shape index: {}]   ;;  %s187_s4 = inlined_call_operand.vmem [shape: f32[16,128], index: 4, kind: output, shape index: {}]  }
   0x1   :  { %128 = vmatprep.subr.bf16.mxu0 %v138_v0  ;;  %v136_v1 = vld [vmem:[%s183_s1] sm:$0xff]   ;;  %130 = vmatprep.mubr.msk.bf16.mxu0 %vm139_vm0, %v138_v0 }
   0x2   :  { %v137_v2 = vld [vmem:[%s184_s0] sm:$0xff]   ;;  %129 = vmatpush3.bf16.msra.mxu0 %v136_v1 }
   0x3   :  { %v124_v3 = vld [vmem:[%s185_s2] ss:$0 sm:$0xff] }
   0x4   :  { %v125_v5 = vld [vmem:[%s186_s3] ss:$0 sm:$0xff] }
   0x5   :  { %131 = vmatmul.mubr.msk.bf16.vlgmr.msra.gmra.mrb[0].mxu0 %vm41_vm1, %v137_v2 }
  0xd8   :  { %v79_v4 = vpop.f32.mrb[0].mxu0 }
  0xd9   :  { %v102_v6 = vmul.f32 %v124_v3, %v79_v4  ;;  %v132_v7 = vpop.f32.mrb[1].mxu0 }
  0xda   :  { %v82_v8 = vpop.f32.mrb[2].mxu0 }
  0xdb   :  { %v111_v9 = vadd.f32 %v125_v5, %v102_v6  ;;  %v103_v10 = vmul.f32 %v124_v3, %v82_v8  ;;  %v133_v11 = vpop.f32.mrb[3].mxu0 }
  0xdd   :  { %v113_v12 = vmax.f32 %v111_v9, 0.0  ;;  %v112_v13 = vadd.f32 %v125_v5, %v103_v10 }
  0xdf   :  { %115 = vst [vmem:[%s187_s4] sm:$0xff] %v113_v12  ;;  %v114_v14 = vmax.f32 %v112_v13, 0.0 }
  0xe1   :  { %116 = vst [vmem:[%s187_s4 + $0x8] sm:$0xff] %v114_v14 }

// kernel: manner_forward.108
= control target key start
LH: loop header
LB: loop body
LE: loop exit
PB: predicated region body
PF: predicated region fallthrough
CT: control target
= control target key end

     0   :  { %s378_s12 = smov 0   ;;  %s423_s0 = inlined_call_operand.vmem [shape: f32[2,34,16], index: 0, kind: input, shape index: {}]   ;;  %s424_s1 = inlined_call_operand.vmem [shape: f32[3,16], index: 1, kind: input, shape index: {}]   ;;  %s425_s2 = inlined_call_operand.vmem [shape: f32[1,16], index: 2, kind: input, shape index: {}]   ;;  %s426_s3 = inlined_call_operand.vmem [shape: f32[2,32,16], index: 3, kind: output, shape index: {}]  }
   0x1 LB: > { %s326_s13 = sadd.s32 4294967295, %s356_s12   ;;  %p330_p0 = scmp.ge.s32.totalorder %s356_s12, 1  ;;  %s356_s12 = sphi %s378_s12, %s13_s12  }
   0x2   : > { %p137_p1 = scmp.lt.s32.totalorder %s356_s12, 3 }
   0x4   : > { %p138_p2 = pnand %p330_p0, %p137_p1 }
   0x5   : > { %p161_p3 = scmp.lt.s32.totalorder (!%p138_p2), %s326_s13, 1  ;;  %v334_v0 = vld [vmem:[%s424_s1] ss:$0 sm:$0xff] (!%p138_p2)  ;;  %v335_v1 = vld [vmem:[%s424_s1 + $0x1] ss:$0 sm:$0xff] (!%p138_p2)  ;;  %vm204_vm0 = vcmask (!%p138_p2), 1046528  }
   0x6   : > { %141 = sbr.rel (%p138_p2) target bundleno = 35 (0x23), region = 32  ;;  %v336_v2 = vld [vmem:[%s424_s1 + $0x2] ss:$0 sm:$0xff] (!%p138_p2)  ;;  %vm237_vm1 = vcmask (!%p138_p2), 1045504   ;;  %v337_v32 = vld [vmem:[%s425_s2] ss:$0 sm:$0xff] (!%p138_p2) }
   0x7   : > { %vm266_vm2 = vcmask (!%p138_p2), 130048  }
   0xd   : > { %s428_s13 = smov (!%p161_p3, %s326_s13), 1 }
   0xe   : > { %s341_s14 = smul.u32 40, %s428_s13  ;;  %s340_s24 = sshll.u32 %s428_s13, 5 }
   0xf   : > { %s170_s29 = scalar_lea.vmem %s426_s3, %s340_s24 }
  0x10   : > { %s165_s23 = scalar_lea.vmem %s423_s0, %s341_s14 }
  0x11   : > { %v171_v3 = vld [vmem:[%s165_s23] sm:$0xff]  ;;  %v172_v4 = vld [vmem:[%s165_s23 + $0x8] sm:$0xff]  ;;  %v173_v5 = vld [vmem:[%s165_s23 + $0x10] sm:$0xff] }
  0x12   : > { %v181_v6 = vmul.f32 %v334_v0, %v171_v3  ;;  %v194_v7 = vmul.f32 %v335_v1, %v171_v3  ;;  %v195_v8 = vmul.f32 %v335_v1, %v172_v4  ;;  %v227_v9 = vmul.f32 %v336_v2, %v171_v3  ;;  %v174_v10 = vld [vmem:[%s165_s23 + $0x18] sm:$0xff]  ;;  %v175_v15 = vld [vmem:[%s165_s23 + $0x20] sm:$0x3] }
  0x13   : > { %v228_v11 = vmul.f32 %v336_v2, %v172_v4  ;;  %v182_v12 = vmul.f32 %v334_v0, %v172_v4  ;;  %v196_v13 = vmul.f32 %v335_v1, %v173_v5  ;;  %v229_v14 = vmul.f32 %v336_v2, %v173_v5 }
  0x14   : > { %v205_v16 = vrot.slane %v194_v7, 1  ;;  %v206_v17 = vrot.slane %v195_v8, 1  ;;  %v238_v18 = vrot.slane %v227_v9, 2  ;;  %v183_v19 = vmul.f32 %v334_v0, %v173_v5 }
  0x15   : > { %v239_v20 = vrot.slane %v228_v11, 2  ;;  %v208_v21 = vrot.slane %v196_v13, 1  ;;  %v241_v22 = vrot.slane %v229_v14, 2  ;;  %v197_v23 = vmul.f32 %v335_v1, %v174_v10 }
  0x16   : > { %v207_v24 = vsel %vm204_vm0, %v205_v16, %v206_v17  ;;  %v230_v25 = vmul.f32 %v336_v2, %v174_v10  ;;  %v184_v26 = vmul.f32 %v334_v0, %v174_v10  ;;  %v198_v27 = vmul.f32 %v335_v1, %v175_v15 }
  0x17   : > { %v218_v28 = vadd.f32 %v207_v24, %v181_v6  ;;  %v240_v29 = vsel %vm237_vm1, %v238_v18, %v239_v20  ;;  %v209_v30 = vsel %vm204_vm0, %v206_v17, %v208_v21  ;;  %v242_v31 = vsel %vm237_vm1, %v239_v20, %v241_v22 }
  0x18   : > { %v219_v33 = vadd.f32 %v209_v30, %v182_v12  ;;  %v210_v34 = vrot.slane %v197_v23, 1  ;;  %v243_v35 = vrot.slane %v230_v25, 2  ;;  %v212_v36 = vrot.slane %v198_v27, 1 }
  0x19   : > { %v251_v37 = vadd.f32 %v240_v29, %v218_v28  ;;  %v231_v38 = vmul.f32 %v336_v2, %v175_v15 }
  0x1a   : > { %v252_v39 = vadd.f32 %v242_v31, %v219_v33  ;;  %v211_v40 = vsel %vm204_vm0, %v208_v21, %v210_v34  ;;  %v244_v41 = vsel %vm237_vm1, %v241_v22, %v243_v35  ;;  %v213_v42 = vsel %vm204_vm0, %v210_v34, %v212_v36 }
  0x1b   : > { %v262_v43 = vadd.f32 %v337_v32, %v251_v37  ;;  %v220_v44 = vadd.f32 %v211_v40, %v183_v19  ;;  %v221_v45 = vadd.f32 %v213_v42, %v184_v26  ;;  %v245_v46 = vrot.slane %v231_v38, 2 }
  0x1c   : > { %v263_v47 = vadd.f32 %v337_v32, %v252_v39 }
  0x1d   : > { %267 = vst.msk [vmem:[%s170_s29] sm:$0xff] %vm266_vm2, %v262_v43  ;;  %v253_v48 = vadd.f32 %v244_v41, %v220_v44  ;;  %v246_v49 = vsel %vm237_vm1, %v243_v35, %v245_v46 }
  0x1e   : > { %268 = vst.msk [vmem:[%s170_s29 + $0x8] sm:$0xff] %vm266_vm2, %v263_v47  ;;  %v254_v50 = vadd.f32 %v246_v49, %v221_v45 }
  0x1f   : > { %v264_v51 = vadd.f32 %v337_v32, %v253_v48 }
  0x20   : > { %v265_v52 = vadd.f32 %v337_v32, %v254_v50 }
  0x21   : > { %269 = vst.msk [vmem:[%s170_s29 + $0x10] sm:$0xff] %vm266_vm2, %v264_v51 }
  0x22   : > { %270 = vst.msk [vmem:[%s170_s29 + $0x18] sm:$0xff] %vm266_vm2, %v265_v52 }
  0x23 PF: > { %s13_s12 = sadd.s32 1, %s356_s12  }
  0x24   : > { %p10_p4 = scmp.ge.s32.totalorder %s13_s12, 4  }
  0x26   :  { %12 = sbr.rel (!%p10_p4) target bundleno = 1 (0x1), region = 62 }

// kernel: manner_forward.107
= control target key start
LH: loop header
LB: loop body
LE: loop exit
PB: predicated region body
PF: predicated region fallthrough
CT: control target
= control target key end

     0   :  { %vm140_vm0 = vcmask 130048   ;;  %s311_s0 = inlined_call_operand.vmem [shape: f32[64,32], index: 0, kind: input, shape index: {}]   ;;  %s312_s1 = inlined_call_operand.vmem [shape: f32[1,32], index: 1, kind: input, shape index: {}]   ;;  %s313_s2 = inlined_call_operand.vmem [shape: f32[1,32], index: 2, kind: input, shape index: {}]   ;;  %s314_s3 = inlined_call_operand.vmem [shape: f32[64,16], index: 3, kind: output, shape index: {}]  }
   0x1   :  { %v16_v0 = vld [vmem:[%s311_s0 + $0x10] sm:$0xff]  ;;  %v153_v1 = vld [vmem:[%s312_s1] ss:$0 sm:$0xff]  ;;  %v17_v5 = vld [vmem:[%s311_s0 + $0x18] sm:$0xff] }
   0x2   :  { %v154_v2 = vld [vmem:[%s313_s2] ss:$0 sm:$0xff]  ;;  %v31_v3 = vmul.f32 %v153_v1, %v16_v0  ;;  %v15_v6 = vld [vmem:[%s311_s0 + $0x8] sm:$0xff]  ;;  %v32_v8 = vmul.f32 %v153_v1, %v17_v5  ;;  %v21_v12 = vld [vmem:[%s311_s0 + $0x38] sm:$0xff] }
   0x3   :  { %v14_v4 = vld [vmem:[%s311_s0] sm:$0xff]  ;;  %v30_v9 = vmul.f32 %v153_v1, %v15_v6  ;;  %v19_v10 = vld [vmem:[%s311_s0 + $0x28] sm:$0xff]  ;;  %v36_v16 = vmul.f32 %v153_v1, %v21_v12  ;;  %v20_v17 = vld [vmem:[%s311_s0 + $0x30] sm:$0xff] }
   0x4   :  { %v29_v7 = vmul.f32 %v153_v1, %v14_v4  ;;  %v18_v11 = vld [vmem:[%s311_s0 + $0x20] sm:$0xff]  ;;  %v244_v13 = vadd.f32 %v154_v2, %v31_v3  ;;  %v34_v14 = vmul.f32 %v153_v1, %v19_v10  ;;  %v251_v19 = vadd.f32 %v154_v2, %v32_v8  ;;  %s196_s0 = smov 112  }
   0x5   :  { %v33_v15 = vmul.f32 %v153_v1, %v18_v11  ;;  %v253_v20 = vadd.f32 %v154_v2, %v30_v9  ;;  %v35_v21 = vmul.f32 %v153_v1, %v20_v17  ;;  %v260_v25 = vadd.f32 %v154_v2, %v36_v16 }
   0x6   :  { %v249_v18 = vadd.f32 %v154_v2, %v29_v7  ;;  %v157_v22 = vmul.f32 -1.442695, %v244_v13  ;;  %v256_v23 = vadd.f32 %v154_v2, %v34_v14  ;;  %v158_v27 = vmul.f32 -1.442695, %v251_v19 }
   0x7   :  { %v258_v24 = vadd.f32 %v154_v2, %v33_v15  ;;  %v156_v28 = vmul.f32 -1.442695, %v253_v20  ;;  %v265_v29 = vadd.f32 %v154_v2, %v35_v21  ;;  %v162_v32 = vmul.f32 -1.442695, %v260_v25 }
   0x8   :  { %v155_v26 = vmul.f32 -1.442695, %v249_v18  ;;  %164 = vpow2.f32 %v157_v22  ;;  %v160_v30 = vmul.f32 -1.442695, %v256_v23 }
   0x9   :  { %v159_v31 = vmul.f32 -1.442695, %v258_v24  ;;  %v161_v33 = vmul.f32 -1.442695, %v265_v29 }
   0xa   :  { %166 = vpow2.f32 %v155_v26 }
   0xb   :  { %168 = vpow2.f32 %v158_v27 }
   0xc   :  { %170 = vpow2.f32 %v156_v28 }
   0xd   :  { %172 = vpow2.f32 %v160_v30 }
   0xe   :  { %174 = vpow2.f32 %v159_v31 }
   0xf   :  { %176 = vpow2.f32 %v162_v32 }
  0x10   :  { %178 = vpow2.f32 %v161_v33 }
  0x12   :  { %v165_v34 = vpop.eup %164 }
  0x13   :  { %v78_v36 = vadd.f32 1.0, %v165_v34 }
  0x14   :  { %v167_v35 = vpop.eup %166 }
  0x15   :  { %v169_v37 = vpop.eup %168  ;;  %v76_v38 = vadd.f32 1.0, %v167_v35  ;;  %180 = vrcp.f32 %v78_v36 }
  0x16   :  { %v171_v39 = vpop.eup %170  ;;  %v79_v40 = vadd.f32 1.0, %v169_v37 }
  0x17   :  { %v173_v41 = vpop.eup %172  ;;  %182 = vrcp.f32 %v76_v38  ;;  %v77_v42 = vadd.f32 1.0, %v171_v39 }
  0x18   :  { %v175_v43 = vpop.eup %174  ;;  %184 = vrcp.f32 %v79_v40  ;;  %v81_v44 = vadd.f32 1.0, %v173_v41 }
  0x19   :  { %v177_v45 = vpop.eup %176  ;;  %186 = vrcp.f32 %v77_v42  ;;  %v80_v46 = vadd.f32 1.0, %v175_v43 }
  0x1a   :  { %v179_v47 = vpop.eup %178  ;;  %188 = vrcp.f32 %v81_v44  ;;  %v83_v48 = vadd.f32 1.0, %v177_v45 }
  0x1b   :  { %190 = vrcp.f32 %v80_v46  ;;  %v82_v49 = vadd.f32 1.0, %v179_v47 }
  0x1c   :  { %192 = vrcp.f32 %v83_v48 }
  0x1d   :  { %194 = vrcp.f32 %v82_v49 }
  0x1f   :  { %v181_v50 = vpop.eup %180 }
  0x20   :  { %112 = vrot.lane.b32.xlu1 %v181_v50, %s196_s0 }
  0x21   :  { %v183_v51 = vpop.eup %182 }
  0x22   :  { %v185_v52 = vpop.eup %184  ;;  %108 = vrot.lane.b32.xlu0 %v183_v51, %s196_s0 }
  0x23   :  { %v187_v53 = vpop.eup %186 }
  0x24   :  { %114 = vrot.lane.b32.xlu1 %v185_v52, %s196_s0  ;;  %v189_v54 = vpop.eup %188 }
  0x25   :  { %v191_v55 = vpop.eup %190 }
  0x26   :  { %110 = vrot.lane.b32.xlu0 %v187_v53, %s196_s0  ;;  %v193_v56 = vpop.eup %192 }
  0x27   :  { %v195_v57 = vpop.eup %194 }
  0x28   :  { %118 = vrot.lane.b32.xlu1 %v189_v54, %s196_s0 }
  0x2a   :  { %116 = vrot.lane.b32.xlu0 %v191_v55, %s196_s0 }
  0x2c   :  { %122 = vrot.lane.b32.xlu1 %v193_v56, %s196_s0 }
  0x2e   :  { %120 = vrot.lane.b32.xlu0 %v195_v57, %s196_s0 }
  0x92   :  { %v113_v58 = vpop.permute.xlu1 %112 }
  0x93   :  { %v134_v59 = vmul.f32 %v113_v58, %v244_v13 }
  0x94   :  { %v109_v60 = vpop.permute.xlu0 %108 }
  0x95   :  { %v132_v61 = vmul.f32 %v109_v60, %v249_v18  ;;  %143 = vst.msk [vmem:[%s314_s3 + $0x10] sm:$0xff] %vm140_vm0, %v134_v59 }
  0x96   :  { %v115_v62 = vpop.permute.xlu1 %114 }
  0x97   :  { %141 = vst.msk [vmem:[%s314_s3] sm:$0xff] %vm140_vm0, %v132_v61  ;;  %v135_v63 = vmul.f32 %v115_v62, %v251_v19 }
  0x98   :  { %v111_v0 = vpop.permute.xlu0 %110 }
  0x99   :  { %v133_v1 = vmul.f32 %v111_v0, %v253_v20  ;;  %144 = vst.msk [vmem:[%s314_s3 + $0x18] sm:$0xff] %vm140_vm0, %v135_v63 }
  0x9a   :  { %v119_v2 = vpop.permute.xlu1 %118 }
  0x9b   :  { %142 = vst.msk [vmem:[%s314_s3 + $0x8] sm:$0xff] %vm140_vm0, %v133_v1  ;;  %v137_v3 = vmul.f32 %v119_v2, %v256_v23 }
  0x9c   :  { %v117_v4 = vpop.permute.xlu0 %116 }
  0x9d   :  { %v136_v5 = vmul.f32 %v117_v4, %v258_v24  ;;  %146 = vst.msk [vmem:[%s314_s3 + $0x28] sm:$0xff] %vm140_vm0, %v137_v3 }
  0x9e   :  { %v123_v6 = vpop.permute.xlu1 %122 }
  0x9f   :  { %145 = vst.msk [vmem:[%s314_s3 + $0x20] sm:$0xff] %vm140_vm0, %v136_v5  ;;  %v139_v7 = vmul.f32 %v123_v6, %v260_v25 }
  0xa0   :  { %v121_v8 = vpop.permute.xlu0 %120 }
  0xa1   :  { %v138_v9 = vmul.f32 %v121_v8, %v265_v29  ;;  %148 = vst.msk [vmem:[%s314_s3 + $0x38] sm:$0xff] %vm140_vm0, %v139_v7 }
  0xa3   :  { %147 = vst.msk [vmem:[%s314_s3 + $0x30] sm:$0xff] %vm140_vm0, %v138_v9 }

// kernel: manner_forward.109
= control target key start
LH: loop header
LB: loop body
LE: loop exit
PB: predicated region body
PF: predicated region fallthrough
CT: control target
= control target key end

     0   :  { %vm108_vm0 = vcmask 130048   ;;  %s245_s0 = inlined_call_operand.vmem [shape: f32[64,16], index: 0, kind: input, shape index: {}]   ;;  %s246_s1 = inlined_call_operand.vmem [shape: f32[1,16], index: 1, kind: input, shape index: {}]   ;;  %s247_s2 = inlined_call_operand.vmem [shape: f32[1,16], index: 2, kind: input, shape index: {}]   ;;  %s248_s3 = inlined_call_operand.vmem [shape: f32[64,16], index: 3, kind: output, shape index: {}]  }
   0x1   :  { %v14_v0 = vld [vmem:[%s245_s0] sm:$0xff]  ;;  %v15_v4 = vld [vmem:[%s245_s0 + $0x8] sm:$0xff]  ;;  %v16_v5 = vld [vmem:[%s245_s0 + $0x10] sm:$0xff] }
   0x2   :  { %v121_v1 = vld [vmem:[%s246_s1] ss:$0 sm:$0xff]  ;;  %v17_v6 = vld [vmem:[%s245_s0 + $0x18] sm:$0xff]  ;;  %v19_v11 = vld [vmem:[%s245_s0 + $0x28] sm:$0xff] }
   0x3   :  { %v122_v2 = vld [vmem:[%s247_s2] ss:$0 sm:$0xff]  ;;  %v29_v3 = vmul.f32 %v121_v1, %v14_v0  ;;  %v30_v7 = vmul.f32 %v121_v1, %v15_v4  ;;  %v31_v8 = vmul.f32 %v121_v1, %v16_v5  ;;  %v32_v9 = vmul.f32 %v121_v1, %v17_v6  ;;  %v20_v12 = vld [vmem:[%s245_s0 + $0x30] sm:$0xff]  ;;  %v21_v17 = vld [vmem:[%s245_s0 + $0x38] sm:$0xff] }
   0x4   :  { %v18_v10 = vld [vmem:[%s245_s0 + $0x20] sm:$0xff]  ;;  %v34_v15 = vmul.f32 %v121_v1, %v19_v11  ;;  %v35_v16 = vmul.f32 %v121_v1, %v20_v12  ;;  %v36_v21 = vmul.f32 %v121_v1, %v21_v17 }
   0x5   :  { %v44_v13 = vadd.f32 %v122_v2, %v29_v3  ;;  %v33_v14 = vmul.f32 %v121_v1, %v18_v10  ;;  %v45_v18 = vadd.f32 %v122_v2, %v30_v7  ;;  %v46_v19 = vadd.f32 %v122_v2, %v31_v8 }
   0x6   :  { %v47_v20 = vadd.f32 %v122_v2, %v32_v9  ;;  %v49_v24 = vadd.f32 %v122_v2, %v34_v15  ;;  %v50_v25 = vadd.f32 %v122_v2, %v35_v16  ;;  %v51_v29 = vadd.f32 %v122_v2, %v36_v21 }
   0x7   :  { %v123_v22 = vmul.f32 -1.442695, %v44_v13  ;;  %v48_v23 = vadd.f32 %v122_v2, %v33_v14  ;;  %v124_v26 = vmul.f32 -1.442695, %v45_v18  ;;  %v125_v27 = vmul.f32 -1.442695, %v46_v19 }
   0x8   :  { %v126_v28 = vmul.f32 -1.442695, %v47_v20  ;;  %v128_v31 = vmul.f32 -1.442695, %v49_v24  ;;  %v129_v32 = vmul.f32 -1.442695, %v50_v25 }
   0x9   :  { %131 = vpow2.f32 %v123_v22  ;;  %v127_v30 = vmul.f32 -1.442695, %v48_v23  ;;  %v130_v33 = vmul.f32 -1.442695, %v51_v29 }
   0xa   :  { %133 = vpow2.f32 %v124_v26 }
   0xb   :  { %135 = vpow2.f32 %v125_v27 }
   0xc   :  { %137 = vpow2.f32 %v126_v28 }
   0xd   :  { %139 = vpow2.f32 %v127_v30 }
   0xe   :  { %141 = vpow2.f32 %v128_v31 }
   0xf   :  { %143 = vpow2.f32 %v129_v32 }
  0x10   :  { %145 = vpow2.f32 %v130_v33 }
  0x13   :  { %v132_v34 = vpop.eup %131 }
  0x14   :  { %v134_v35 = vpop.eup %133  ;;  %v76_v36 = vadd.f32 1.0, %v132_v34 }
  0x15   :  { %v136_v37 = vpop.eup %135  ;;  %v77_v38 = vadd.f32 1.0, %v134_v35 }
  0x16   :  { %v138_v39 = vpop.eup %137  ;;  %147 = vrcp.f32 %v76_v36  ;;  %v78_v40 = vadd.f32 1.0, %v136_v37 }
  0x17   :  { %v140_v41 = vpop.eup %139  ;;  %149 = vrcp.f32 %v77_v38  ;;  %v79_v42 = vadd.f32 1.0, %v138_v39 }
  0x18   :  { %v142_v43 = vpop.eup %141  ;;  %151 = vrcp.f32 %v78_v40  ;;  %v80_v44 = vadd.f32 1.0, %v140_v41 }
  0x19   :  { %v144_v45 = vpop.eup %143  ;;  %153 = vrcp.f32 %v79_v42  ;;  %v81_v46 = vadd.f32 1.0, %v142_v43 }
  0x1a   :  { %v146_v47 = vpop.eup %145  ;;  %155 = vrcp.f32 %v80_v44  ;;  %v82_v48 = vadd.f32 1.0, %v144_v45 }
  0x1b   :  { %157 = vrcp.f32 %v81_v46  ;;  %v83_v49 = vadd.f32 1.0, %v146_v47 }
  0x1c   :  { %159 = vrcp.f32 %v82_v48 }
  0x1d   :  { %161 = vrcp.f32 %v83_v49 }
  0x20   :  { %v148_v50 = vpop.eup %147 }
  0x21   :  { %v150_v51 = vpop.eup %149  ;;  %v100_v52 = vmul.f32 %v148_v50, %v44_v13 }
  0x22   :  { %v152_v53 = vpop.eup %151  ;;  %v101_v54 = vmul.f32 %v150_v51, %v45_v18 }
  0x23   :  { %v154_v55 = vpop.eup %153  ;;  %109 = vst.msk [vmem:[%s248_s3] sm:$0xff] %vm108_vm0, %v100_v52  ;;  %v102_v56 = vmul.f32 %v152_v53, %v46_v19 }
  0x24   :  { %v156_v57 = vpop.eup %155  ;;  %110 = vst.msk [vmem:[%s248_s3 + $0x8] sm:$0xff] %vm108_vm0, %v101_v54  ;;  %v103_v58 = vmul.f32 %v154_v55, %v47_v20 }
  0x25   :  { %v158_v59 = vpop.eup %157  ;;  %111 = vst.msk [vmem:[%s248_s3 + $0x10] sm:$0xff] %vm108_vm0, %v102_v56  ;;  %v104_v60 = vmul.f32 %v156_v57, %v48_v23 }
  0x26   :  { %v160_v61 = vpop.eup %159  ;;  %112 = vst.msk [vmem:[%s248_s3 + $0x18] sm:$0xff] %vm108_vm0, %v103_v58  ;;  %v105_v62 = vmul.f32 %v158_v59, %v49_v24 }
  0x27   :  { %v162_v63 = vpop.eup %161  ;;  %113 = vst.msk [vmem:[%s248_s3 + $0x20] sm:$0xff] %vm108_vm0, %v104_v60  ;;  %v106_v0 = vmul.f32 %v160_v61, %v50_v25 }
  0x28   :  { %114 = vst.msk [vmem:[%s248_s3 + $0x28] sm:$0xff] %vm108_vm0, %v105_v62  ;;  %v107_v1 = vmul.f32 %v162_v63, %v51_v29 }
  0x29   :  { %115 = vst.msk [vmem:[%s248_s3 + $0x30] sm:$0xff] %vm108_vm0, %v106_v0 }
  0x2a   :  { %116 = vst.msk [vmem:[%s248_s3 + $0x38] sm:$0xff] %vm108_vm0, %v107_v1 }

// kernel: manner_forward.118
= control target key start
LH: loop header
LB: loop body
LE: loop exit
PB: predicated region body
PF: predicated region fallthrough
CT: control target
= control target key end

     0   :  { %vm62_vm0 = vcmask 64512   ;;  %s269_s0 = inlined_call_operand.vmem [shape: f32[136,8], index: 0, kind: input, shape index: {}]   ;;  %s270_s1 = inlined_call_operand.vmem [shape: f32[136,8], index: 1, kind: input, shape index: {}]   ;;  %s271_s2 = inlined_call_operand.vmem [shape: f32[136,8], index: 2, kind: output, shape index: {}]  }
   0x1   :  { %v11_v0 = vld [vmem:[%s269_s0] sm:$0xff]  ;;  %v12_v2 = vld [vmem:[%s269_s0 + $0x8] sm:$0xff]  ;;  %v13_v5 = vld [vmem:[%s269_s0 + $0x10] sm:$0xff] }
   0x2   :  { %v28_v1 = vld [vmem:[%s270_s1] sm:$0xff]  ;;  %v29_v4 = vld [vmem:[%s270_s1 + $0x8] sm:$0xff]  ;;  %v30_v6 = vld [vmem:[%s270_s1 + $0x10] sm:$0xff] }
   0x3   :  { %v45_v3 = vmul.f32 %v28_v1, %v11_v0  ;;  %v46_v7 = vmul.f32 %v29_v4, %v12_v2  ;;  %v47_v8 = vmul.f32 %v30_v6, %v13_v5  ;;  %v14_v9 = vld [vmem:[%s269_s0 + $0x18] sm:$0xff]  ;;  %v15_v11 = vld [vmem:[%s269_s0 + $0x20] sm:$0xff]  ;;  %v16_v14 = vld [vmem:[%s269_s0 + $0x28] sm:$0xff] }
   0x4   :  { %v31_v10 = vld [vmem:[%s270_s1 + $0x18] sm:$0xff]  ;;  %v32_v13 = vld [vmem:[%s270_s1 + $0x20] sm:$0xff]  ;;  %v33_v15 = vld [vmem:[%s270_s1 + $0x28] sm:$0xff] }
   0x5   :  { %63 = vst.msk [vmem:[%s271_s2] sm:$0xff] %vm62_vm0, %v45_v3  ;;  %v48_v12 = vmul.f32 %v31_v10, %v14_v9  ;;  %64 = vst.msk [vmem:[%s271_s2 + $0x8] sm:$0xff] %vm62_vm0, %v46_v7  ;;  %v49_v16 = vmul.f32 %v32_v13, %v15_v11  ;;  %v50_v17 = vmul.f32 %v33_v15, %v16_v14  ;;  %v17_v18 = vld [vmem:[%s269_s0 + $0x30] sm:$0xff]  ;;  %v18_v20 = vld [vmem:[%s269_s0 + $0x38] sm:$0xff] }
   0x6   :  { %65 = vst.msk [vmem:[%s271_s2 + $0x10] sm:$0xff] %vm62_vm0, %v47_v8  ;;  %v34_v19 = vld [vmem:[%s270_s1 + $0x30] sm:$0xff]  ;;  %v35_v22 = vld [vmem:[%s270_s1 + $0x38] sm:$0xff]  ;;  %v19_v23 = vld [vmem:[%s269_s0 + $0x40] sm:$0xff] }
   0x7   :  { %66 = vst.msk [vmem:[%s271_s2 + $0x18] sm:$0xff] %vm62_vm0, %v48_v12  ;;  %v51_v21 = vmul.f32 %v34_v19, %v17_v18  ;;  %v36_v24 = vld [vmem:[%s270_s1 + $0x40] sm:$0xff]  ;;  %67 = vst.msk [vmem:[%s271_s2 + $0x20] sm:$0xff] %vm62_vm0, %v49_v16  ;;  %v52_v25 = vmul.f32 %v35_v22, %v18_v20  ;;  %v20_v27 = vld [vmem:[%s269_s0 + $0x48] sm:$0xff] }
   0x8   :  { %68 = vst.msk [vmem:[%s271_s2 + $0x28] sm:$0xff] %vm62_vm0, %v50_v17  ;;  %v53_v26 = vmul.f32 %v36_v24, %v19_v23  ;;  %v37_v28 = vld [vmem:[%s270_s1 + $0x48] sm:$0xff]  ;;  %v21_v29 = vld [vmem:[%s269_s0 + $0x50] sm:$0xff]  ;;  %v22_v32 = vld [vmem:[%s269_s0 + $0x58] sm:$0xff] }
   0x9   :  { %69 = vst.msk [vmem:[%s271_s2 + $0x30] sm:$0xff] %vm62_vm0, %v51_v21  ;;  %v54_v30 = vmul.f32 %v37_v28, %v20_v27  ;;  %v38_v31 = vld [vmem:[%s270_s1 + $0x50] sm:$0xff]  ;;  %v39_v33 = vld [vmem:[%s270_s1 + $0x58] sm:$0xff]  ;;  %70 = vst.msk [vmem:[%s271_s2 + $0x38] sm:$0xff] %vm62_vm0, %v52_v25 }
   0xa   :  { %71 = vst.msk [vmem:[%s271_s2 + $0x40] sm:$0xff] %vm62_vm0, %v53_v26  ;;  %v55_v34 = vmul.f32 %v38_v31, %v21_v29  ;;  %v56_v35 = vmul.f32 %v39_v33, %v22_v32  ;;  %v23_v36 = vld [vmem:[%s269_s0 + $0x60] sm:$0xff]  ;;  %v24_v38 = vld [vmem:[%s269_s0 + $0x68] sm:$0xff]  ;;  %v25_v41 = vld [vmem:[%s269_s0 + $0x70] sm:$0xff] }
   0xb   :  { %v40_v37 = vld [vmem:[%s270_s1 + $0x60] sm:$0xff]  ;;  %72 = vst.msk [vmem:[%s271_s2 + $0x48] sm:$0xff] %vm62_vm0, %v54_v30  ;;  %v41_v40 = vld [vmem:[%s270_s1 + $0x68] sm:$0xff]  ;;  %v42_v42 = vld [vmem:[%s270_s1 + $0x70] sm:$0xff] }
   0xc   :  { %v57_v39 = vmul.f32 %v40_v37, %v23_v36  ;;  %73 = vst.msk [vmem:[%s271_s2 + $0x50] sm:$0xff] %vm62_vm0, %v55_v34  ;;  %74 = vst.msk [vmem:[%s271_s2 + $0x58] sm:$0xff] %vm62_vm0, %v56_v35  ;;  %v58_v43 = vmul.f32 %v41_v40, %v24_v38  ;;  %v59_v44 = vmul.f32 %v42_v42, %v25_v41  ;;  %v26_v45 = vld [vmem:[%s269_s0 + $0x78] sm:$0xff]  ;;  %v27_v47 = vld [vmem:[%s269_s0 + $0x80] sm:$0xff] }
   0xd   :  { %v43_v46 = vld [vmem:[%s270_s1 + $0x78] sm:$0xff]  ;;  %v44_v49 = vld [vmem:[%s270_s1 + $0x80] sm:$0xff] }
   0xe   :  { %75 = vst.msk [vmem:[%s271_s2 + $0x60] sm:$0xff] %vm62_vm0, %v57_v39  ;;  %v60_v48 = vmul.f32 %v43_v46, %v26_v45  ;;  %76 = vst.msk [vmem:[%s271_s2 + $0x68] sm:$0xff] %vm62_vm0, %v58_v43  ;;  %v61_v50 = vmul.f32 %v44_v49, %v27_v47 }
   0xf   :  { %77 = vst.msk [vmem:[%s271_s2 + $0x70] sm:$0xff] %vm62_vm0, %v59_v44 }
  0x10   :  { %78 = vst.msk [vmem:[%s271_s2 + $0x78] sm:$0xff] %vm62_vm0, %v60_v48  ;;  %79 = vst.msk [vmem:[%s271_s2 + $0x80] sm:$0xff] %vm62_vm0, %v61_v50 }

// kernel: manner_forward.116
= control target key start
LH: loop header
LB: loop body
LE: loop exit
PB: predicated region body
PF: predicated region fallthrough
CT: control target
= control target key end

     0   :  { %vm283_vm0 = vcmask 64512   ;;  %s696_s0 = inlined_call_operand.vmem [shape: f32[136,16], index: 0, kind: input, shape index: {}]   ;;  %s697_s1 = inlined_call_operand.vmem [shape: f32[1,16], index: 1, kind: input, shape index: {}]   ;;  %s698_s2 = inlined_call_operand.vmem [shape: f32[1,16], index: 2, kind: input, shape index: {}]   ;;  %s699_s3 = inlined_call_operand.vmem [shape: f32[136,8], index: 3, kind: output, shape index: {}]  }
   0x1   :  { %v14_v0 = vld [vmem:[%s696_s0] sm:$0xff]  ;;  %v16_v4 = vld [vmem:[%s696_s0 + $0x10] sm:$0xff]  ;;  %v15_v5 = vld [vmem:[%s696_s0 + $0x8] sm:$0xff] }
   0x2   :  { %v454_v1 = vld [vmem:[%s697_s1] ss:$0 sm:$0xff]  ;;  %v17_v6 = vld [vmem:[%s696_s0 + $0x18] sm:$0xff]  ;;  %v19_v11 = vld [vmem:[%s696_s0 + $0x28] sm:$0xff] }
   0x3   :  { %v459_v2 = vld [vmem:[%s698_s2] ss:$0 sm:$0xff]  ;;  %v38_v3 = vmul.f32 %v454_v1, %v14_v0  ;;  %v40_v7 = vmul.f32 %v454_v1, %v16_v4  ;;  %v39_v8 = vmul.f32 %v454_v1, %v15_v5  ;;  %v41_v9 = vmul.f32 %v454_v1, %v17_v6  ;;  %v20_v12 = vld [vmem:[%s696_s0 + $0x30] sm:$0xff]  ;;  %v21_v17 = vld [vmem:[%s696_s0 + $0x38] sm:$0xff] }
   0x4   :  { %v18_v10 = vld [vmem:[%s696_s0 + $0x20] sm:$0xff]  ;;  %v43_v15 = vmul.f32 %v454_v1, %v19_v11  ;;  %v44_v16 = vmul.f32 %v454_v1, %v20_v12  ;;  %v45_v21 = vmul.f32 %v454_v1, %v21_v17  ;;  %v23_v27 = vld [vmem:[%s696_s0 + $0x48] sm:$0xff]  ;;  %v24_v28 = vld [vmem:[%s696_s0 + $0x50] sm:$0xff] }
   0x5   :  { %v484_v13 = vadd.f32 %v459_v2, %v38_v3  ;;  %v42_v14 = vmul.f32 %v454_v1, %v18_v10  ;;  %v493_v18 = vadd.f32 %v459_v2, %v40_v7  ;;  %v496_v19 = vadd.f32 %v459_v2, %v39_v8  ;;  %v22_v22 = vld [vmem:[%s696_s0 + $0x40] sm:$0xff]  ;;  %v25_v29 = vld [vmem:[%s696_s0 + $0x58] sm:$0xff]  ;;  %v27_v56 = vld [vmem:[%s696_s0 + $0x68] sm:$0xff] }
   0x6   :  { %v499_v20 = vadd.f32 %v459_v2, %v41_v9  ;;  %v510_v25 = vadd.f32 %v459_v2, %v43_v15  ;;  %v513_v26 = vadd.f32 %v459_v2, %v44_v16  ;;  %v528_v33 = vadd.f32 %v459_v2, %v45_v21  ;;  %v26_v44 = vld [vmem:[%s696_s0 + $0x60] sm:$0xff]  ;;  %v28_v59 = vld [vmem:[%s696_s0 + $0x70] sm:$0xff]  ;;  %v29_v62 = vld [vmem:[%s696_s0 + $0x78] sm:$0xff] }
   0x7   :  { %v307_v23 = vmul.f32 -1.442695, %v484_v13  ;;  %v507_v24 = vadd.f32 %v459_v2, %v42_v14  ;;  %v309_v30 = vmul.f32 -1.442695, %v493_v18  ;;  %v308_v31 = vmul.f32 -1.442695, %v496_v19 }
   0x8   :  { %v310_v32 = vmul.f32 -1.442695, %v499_v20  ;;  %v312_v35 = vmul.f32 -1.442695, %v510_v25  ;;  %v46_v36 = vmul.f32 %v454_v1, %v22_v22  ;;  %v47_v37 = vmul.f32 %v454_v1, %v23_v27  ;;  %v30_v5 = vld [vmem:[%s696_s0 + $0x80] sm:$0xff]  ;;  %s427_s0 = smov 120  }
   0x9   :  { %325 = vpow2.f32 %v307_v23  ;;  %v311_v34 = vmul.f32 -1.442695, %v507_v24  ;;  %v313_v38 = vmul.f32 -1.442695, %v513_v26  ;;  %v48_v39 = vmul.f32 %v454_v1, %v24_v28 }
   0xa   :  { %327 = vpow2.f32 %v309_v30  ;;  %v49_v40 = vmul.f32 %v454_v1, %v25_v29  ;;  %v314_v41 = vmul.f32 -1.442695, %v528_v33  ;;  %v539_v42 = vadd.f32 %v459_v2, %v46_v36 }
   0xb   :  { %329 = vpow2.f32 %v308_v31  ;;  %v542_v43 = vadd.f32 %v459_v2, %v47_v37  ;;  %v548_v45 = vadd.f32 %v459_v2, %v48_v39  ;;  %v50_v49 = vmul.f32 %v454_v1, %v26_v44 }
   0xc   :  { %331 = vpow2.f32 %v310_v32  ;;  %v551_v46 = vadd.f32 %v459_v2, %v49_v40  ;;  %v315_v47 = vmul.f32 -1.442695, %v539_v42  ;;  %v51_v4 = vmul.f32 %v454_v1, %v27_v56 }
   0xd   :  { %333 = vpow2.f32 %v311_v34  ;;  %v316_v48 = vmul.f32 -1.442695, %v542_v43  ;;  %v317_v50 = vmul.f32 -1.442695, %v548_v45  ;;  %v559_v53 = vadd.f32 %v459_v2, %v50_v49 }
   0xe   :  { %335 = vpow2.f32 %v312_v35  ;;  %v318_v51 = vmul.f32 -1.442695, %v551_v46  ;;  %v52_v8 = vmul.f32 %v454_v1, %v28_v59  ;;  %v53_v11 = vmul.f32 %v454_v1, %v29_v62 }
   0xf   :  { %337 = vpow2.f32 %v313_v38  ;;  %v319_v3 = vmul.f32 -1.442695, %v559_v53  ;;  %v54_v14 = vmul.f32 %v454_v1, %v30_v5  ;;  %v579_v17 = vadd.f32 %v459_v2, %v51_v4 }
  0x10   :  { %339 = vpow2.f32 %v314_v41  ;;  %v582_v23 = vadd.f32 %v459_v2, %v52_v8  ;;  %v585_v28 = vadd.f32 %v459_v2, %v53_v11 }
  0x11   :  { %341 = vpow2.f32 %v315_v47  ;;  %v588_v1 = vadd.f32 %v459_v2, %v54_v14  ;;  %v320_v32 = vmul.f32 -1.442695, %v579_v17 }
  0x12   :  { %343 = vpow2.f32 %v316_v48  ;;  %v321_v35 = vmul.f32 -1.442695, %v582_v23  ;;  %v322_v37 = vmul.f32 -1.442695, %v585_v28 }
  0x13   :  { %v326_v52 = vpop.eup %325  ;;  %345 = vpow2.f32 %v317_v50  ;;  %v323_v2 = vmul.f32 -1.442695, %v588_v1 }
  0x14   :  { %v328_v54 = vpop.eup %327  ;;  %v147_v55 = vadd.f32 1.0, %v326_v52  ;;  %347 = vpow2.f32 %v318_v51 }
  0x15   :  { %v330_v57 = vpop.eup %329  ;;  %v149_v58 = vadd.f32 1.0, %v328_v54 }
  0x16   :  { %v332_v60 = vpop.eup %331  ;;  %349 = vrcp.f32 %v147_v55  ;;  %v148_v61 = vadd.f32 1.0, %v330_v57 }
  0x17   :  { %v334_v63 = vpop.eup %333  ;;  %351 = vrcp.f32 %v149_v58  ;;  %v150_v0 = vadd.f32 1.0, %v332_v60 }
  0x18   :  { %v336_v6 = vpop.eup %335  ;;  %353 = vrcp.f32 %v148_v61  ;;  %v151_v7 = vadd.f32 1.0, %v334_v63 }
  0x19   :  { %v338_v9 = vpop.eup %337  ;;  %355 = vrcp.f32 %v150_v0  ;;  %v152_v10 = vadd.f32 1.0, %v336_v6 }
  0x1a   :  { %v340_v12 = vpop.eup %339  ;;  %v153_v16 = vadd.f32 1.0, %v338_v9  ;;  %357 = vpow2.f32 %v319_v3 }
  0x1b   :  { %v342_v15 = vpop.eup %341  ;;  %359 = vrcp.f32 %v151_v7  ;;  %v154_v22 = vadd.f32 1.0, %v340_v12 }
  0x1c   :  { %v344_v21 = vpop.eup %343  ;;  %361 = vrcp.f32 %v152_v10  ;;  %v155_v27 = vadd.f32 1.0, %v342_v15 }
  0x1d   :  { %v346_v29 = vpop.eup %345  ;;  %v156_v30 = vadd.f32 1.0, %v344_v21  ;;  %363 = vrcp.f32 %v153_v16 }
  0x1e   :  { %v348_v31 = vpop.eup %347  ;;  %365 = vrcp.f32 %v154_v22  ;;  %v157_v40 = vadd.f32 1.0, %v346_v29 }
  0x1f   :  { %367 = vrcp.f32 %v155_v27  ;;  %v158_v44 = vadd.f32 1.0, %v348_v31 }
  0x20   :  { %v350_v34 = vpop.eup %349  ;;  %369 = vrcp.f32 %v156_v30 }
  0x21   :  { %v352_v36 = vpop.eup %351  ;;  %215 = vrot.lane.b32.xlu0 %v350_v34, %s427_s0  ;;  %371 = vpow2.f32 %v320_v32 }
  0x22   :  { %v354_v38 = vpop.eup %353  ;;  %219 = vrot.lane.b32.xlu1 %v352_v36, %s427_s0  ;;  %373 = vpow2.f32 %v321_v35 }
  0x23   :  { %v356_v39 = vpop.eup %355  ;;  %375 = vpow2.f32 %v322_v37 }
  0x24   :  { %v358_v41 = vpop.eup %357  ;;  %377 = vpow2.f32 %v323_v2 }
  0x25   :  { %217 = vrot.lane.b32.xlu0 %v354_v38, %s427_s0  ;;  %v360_v47 = vpop.eup %359  ;;  %379 = vrcp.f32 %v157_v40  ;;  %v159_v49 = vadd.f32 1.0, %v358_v41 }
  0x26   :  { %221 = vrot.lane.b32.xlu1 %v356_v39, %s427_s0  ;;  %v362_v48 = vpop.eup %361  ;;  %381 = vrcp.f32 %v158_v44 }
  0x27   :  { %v364_v50 = vpop.eup %363  ;;  %383 = vrcp.f32 %v159_v49 }
  0x28   :  { %v366_v51 = vpop.eup %365 }
  0x29   :  { %223 = vrot.lane.b32.xlu0 %v360_v47, %s427_s0  ;;  %v368_v52 = vpop.eup %367 }
  0x2a   :  { %225 = vrot.lane.b32.xlu1 %v362_v48, %s427_s0  ;;  %v370_v54 = vpop.eup %369 }
  0x2b   :  { %v372_v55 = vpop.eup %371 }
  0x2c   :  { %v374_v56 = vpop.eup %373  ;;  %v160_v57 = vadd.f32 1.0, %v372_v55 }
  0x2d   :  { %227 = vrot.lane.b32.xlu0 %v364_v50, %s427_s0  ;;  %v376_v58 = vpop.eup %375  ;;  %v161_v59 = vadd.f32 1.0, %v374_v56 }
  0x2e   :  { %229 = vrot.lane.b32.xlu1 %v366_v51, %s427_s0  ;;  %v378_v60 = vpop.eup %377  ;;  %385 = vrcp.f32 %v160_v57  ;;  %v162_v61 = vadd.f32 1.0, %v376_v58 }
  0x2f   :  { %387 = vrcp.f32 %v161_v59  ;;  %v163_v62 = vadd.f32 1.0, %v378_v60  ;;  %v380_v63 = vpop.eup %379 }
  0x30   :  { %389 = vrcp.f32 %v162_v61  ;;  %v382_v0 = vpop.eup %381 }
  0x31   :  { %231 = vrot.lane.b32.xlu0 %v368_v52, %s427_s0  ;;  %391 = vrcp.f32 %v163_v62  ;;  %v384_v3 = vpop.eup %383 }
  0x32   :  { %233 = vrot.lane.b32.xlu1 %v370_v54, %s427_s0  ;;  %393 = vtanh.f32 %v484_v13 }
  0x33   :  { %395 = vtanh.f32 %v493_v18 }
  0x34   :  { %397 = vtanh.f32 %v496_v19 }
  0x35   :  { %235 = vrot.lane.b32.xlu0 %v380_v63, %s427_s0  ;;  %399 = vtanh.f32 %v499_v20 }
  0x36   :  { %237 = vrot.lane.b32.xlu1 %v382_v0, %s427_s0  ;;  %401 = vtanh.f32 %v507_v24 }
  0x37   :  { %403 = vtanh.f32 %v510_v25 }
  0x38   :  { %v386_v4 = vpop.eup %385  ;;  %405 = vtanh.f32 %v513_v26 }
  0x39   :  { %239 = vrot.lane.b32.xlu0 %v384_v3, %s427_s0  ;;  %v388_v5 = vpop.eup %387  ;;  %407 = vtanh.f32 %v528_v33 }
  0x3a   :  { %241 = vrot.lane.b32.xlu1 %v386_v4, %s427_s0  ;;  %v390_v6 = vpop.eup %389  ;;  %409 = vtanh.f32 %v539_v42 }
  0x3b   :  { %v392_v7 = vpop.eup %391  ;;  %411 = vtanh.f32 %v542_v43 }
  0x3c   :  { %v394_v8 = vpop.eup %393  ;;  %413 = vtanh.f32 %v548_v45 }
  0x3d   :  { %243 = vrot.lane.b32.xlu0 %v388_v5, %s427_s0  ;;  %v396_v9 = vpop.eup %395  ;;  %415 = vtanh.f32 %v551_v46 }
  0x3e   :  { %245 = vrot.lane.b32.xlu1 %v390_v6, %s427_s0  ;;  %v398_v13 = vpop.eup %397  ;;  %417 = vtanh.f32 %v559_v53 }
  0x3f   :  { %v400_v14 = vpop.eup %399  ;;  %419 = vtanh.f32 %v579_v17 }
  0x40   :  { %v402_v25 = vpop.eup %401  ;;  %421 = vtanh.f32 %v582_v23 }
  0x41   :  { %247 = vrot.lane.b32.xlu0 %v392_v7, %s427_s0  ;;  %v404_v33 = vpop.eup %403  ;;  %423 = vtanh.f32 %v585_v28 }
  0x42   :  { %v406_v43 = vpop.eup %405  ;;  %425 = vtanh.f32 %v588_v1 }
  0x43   :  { %v408_v22 = vpop.eup %407 }
  0x44   :  { %v410_v30 = vpop.eup %409 }
  0x45   :  { %v412_v31 = vpop.eup %411 }
  0x46   :  { %v414_v35 = vpop.eup %413 }
  0x47   :  { %v416_v17 = vpop.eup %415 }
  0x48   :  { %v418_v2 = vpop.eup %417 }
  0x49   :  { %v420_v28 = vpop.eup %419 }
  0x4a   :  { %v422_v44 = vpop.eup %421 }
  0x4b   :  { %v424_v48 = vpop.eup %423 }
  0x4c   :  { %v426_v51 = vpop.eup %425 }
  0x93   :  { %v216_v10 = vpop.permute.xlu0 %215 }
  0x94   :  { %v266_v11 = vmul.f32 %v394_v8, %v216_v10  ;;  %v220_v12 = vpop.permute.xlu1 %219 }
  0x95   :  { %v268_v18 = vmul.f32 %v396_v9, %v220_v12 }
  0x96   :  { %284 = vst.msk [vmem:[%s699_s3] sm:$0xff] %vm283_vm0, %v266_v11 }
  0x97   :  { %286 = vst.msk [vmem:[%s699_s3 + $0x10] sm:$0xff] %vm283_vm0, %v268_v18  ;;  %v218_v19 = vpop.permute.xlu0 %217 }
  0x98   :  { %v267_v20 = vmul.f32 %v398_v13, %v218_v19  ;;  %v222_v24 = vpop.permute.xlu1 %221 }
  0x99   :  { %v269_v26 = vmul.f32 %v400_v14, %v222_v24 }
  0x9a   :  { %285 = vst.msk [vmem:[%s699_s3 + $0x8] sm:$0xff] %vm283_vm0, %v267_v20 }
  0x9b   :  { %287 = vst.msk [vmem:[%s699_s3 + $0x18] sm:$0xff] %vm283_vm0, %v269_v26  ;;  %v224_v15 = vpop.permute.xlu0 %223 }
  0x9c   :  { %v270_v42 = vmul.f32 %v402_v25, %v224_v15  ;;  %v226_v16 = vpop.permute.xlu1 %225 }
  0x9d   :  { %v271_v21 = vmul.f32 %v404_v33, %v226_v16 }
  0x9e   :  { %288 = vst.msk [vmem:[%s699_s3 + $0x20] sm:$0xff] %vm283_vm0, %v270_v42 }
  0x9f   :  { %289 = vst.msk [vmem:[%s699_s3 + $0x28] sm:$0xff] %vm283_vm0, %v271_v21  ;;  %v228_v27 = vpop.permute.xlu0 %227 }
  0xa0   :  { %v272_v45 = vmul.f32 %v406_v43, %v228_v27  ;;  %v230_v29 = vpop.permute.xlu1 %229 }
  0xa1   :  { %v273_v46 = vmul.f32 %v408_v22, %v230_v29 }
  0xa2   :  { %290 = vst.msk [vmem:[%s699_s3 + $0x30] sm:$0xff] %vm283_vm0, %v272_v45 }
  0xa3   :  { %291 = vst.msk [vmem:[%s699_s3 + $0x38] sm:$0xff] %vm283_vm0, %v273_v46  ;;  %v232_v32 = vpop.permute.xlu0 %231 }
  0xa4   :  { %v274_v53 = vmul.f32 %v410_v30, %v232_v32  ;;  %v234_v34 = vpop.permute.xlu1 %233 }
  0xa5   :  { %v275_v36 = vmul.f32 %v412_v31, %v234_v34 }
  0xa6   :  { %292 = vst.msk [vmem:[%s699_s3 + $0x40] sm:$0xff] %vm283_vm0, %v274_v53 }
  0xa7   :  { %293 = vst.msk [vmem:[%s699_s3 + $0x48] sm:$0xff] %vm283_vm0, %v275_v36  ;;  %v236_v37 = vpop.permute.xlu0 %235 }
  0xa8   :  { %v276_v23 = vmul.f32 %v414_v35, %v236_v37  ;;  %v238_v38 = vpop.permute.xlu1 %237 }
  0xa9   :  { %v277_v39 = vmul.f32 %v416_v17, %v238_v38 }
  0xaa   :  { %294 = vst.msk [vmem:[%s699_s3 + $0x50] sm:$0xff] %vm283_vm0, %v276_v23 }
  0xab   :  { %295 = vst.msk [vmem:[%s699_s3 + $0x58] sm:$0xff] %vm283_vm0, %v277_v39  ;;  %v240_v40 = vpop.permute.xlu0 %239 }
  0xac   :  { %v278_v41 = vmul.f32 %v418_v2, %v240_v40  ;;  %v242_v47 = vpop.permute.xlu1 %241 }
  0xad   :  { %v279_v1 = vmul.f32 %v420_v28, %v242_v47 }
  0xae   :  { %296 = vst.msk [vmem:[%s699_s3 + $0x60] sm:$0xff] %vm283_vm0, %v278_v41 }
  0xaf   :  { %v244_v49 = vpop.permute.xlu0 %243  ;;  %297 = vst.msk [vmem:[%s699_s3 + $0x68] sm:$0xff] %vm283_vm0, %v279_v1 }
  0xb0   :  { %v280_v50 = vmul.f32 %v422_v44, %v244_v49  ;;  %v246_v52 = vpop.permute.xlu1 %245 }
  0xb1   :  { %v281_v54 = vmul.f32 %v424_v48, %v246_v52 }
  0xb2   :  { %298 = vst.msk [vmem:[%s699_s3 + $0x70] sm:$0xff] %vm283_vm0, %v280_v50 }
  0xb3   :  { %v248_v55 = vpop.permute.xlu0 %247  ;;  %299 = vst.msk [vmem:[%s699_s3 + $0x78] sm:$0xff] %vm283_vm0, %v281_v54 }
  0xb4   :  { %v282_v56 = vmul.f32 %v426_v51, %v248_v55 }
  0xb6   :  { %300 = vst.msk [vmem:[%s699_s3 + $0x80] sm:$0xff] %vm283_vm0, %v282_v56 }

// kernel: manner_forward.117
= control target key start
LH: loop header
LB: loop body
LE: loop exit
PB: predicated region body
PF: predicated region fallthrough
CT: control target
= control target key end

     0   :  { %v492_v0 = vmov 0.0   ;;  %vm493_vm0 = vmmov 0   ;;  %vm129_vm1 = vcmask 130048   ;;  %s667_s1 = inlined_call_operand.vmem [shape: bf16[16,128], index: 1, kind: input, shape index: {}]   ;;  %s668_s0 = inlined_call_operand.vmem [shape: bf16[144,16], index: 0, kind: input, shape index: {}]   ;;  %s669_s2 = inlined_call_operand.vmem [shape: f32[1,128], index: 2, kind: input, shape index: {}]   ;;  %s670_s3 = inlined_call_operand.vmem [shape: f32[1,128], index: 3, kind: input, shape index: {}]   ;;  %s671_s4 = inlined_call_operand.vmem [shape: f32[144,128], index: 4, kind: output, shape index: {}]  }
   0x1   :  { %440 = vmatprep.subr.bf16.mxu0 %v492_v0  ;;  %v482_v1 = vld [vmem:[%s667_s1] sm:$0xff]   ;;  %442 = vmatprep.mubr.msk.bf16.mxu0 %vm493_vm0, %v492_v0  ;;  %v484_v3 = vld [vmem:[%s668_s0 + $0x28] sm:$0xff]   ;;  %v486_v5 = vld [vmem:[%s668_s0 + $0x30] sm:$0xff]  }
   0x2   :  { %v483_v2 = vld [vmem:[%s668_s0] sm:$0xff]   ;;  %478 = vmatprep.subr.bf16.mxu1 %v492_v0  ;;  %462 = vmatprep.mubr.msk.bf16.mxu1 %vm493_vm0, %v492_v0  ;;  %v485_v4 = vld [vmem:[%s668_s0 + $0x8] sm:$0xff]   ;;  %v487_v6 = vld [vmem:[%s668_s0 + $0x10] sm:$0xff]  }
   0x3   :  { %441 = vmatpush3.bf16.msra.mxu0 %v482_v1  ;;  %479 = vmatpush3.bf16.msra.mxu1 %v482_v1  ;;  %v488_v7 = vld [vmem:[%s668_s0 + $0x38] sm:$0xff]   ;;  %v490_v9 = vld [vmem:[%s668_s0 + $0x40] sm:$0xff]  }
   0x4   :  { %v489_v8 = vld [vmem:[%s668_s0 + $0x18] sm:$0xff]   ;;  %v491_v10 = vld [vmem:[%s668_s0 + $0x20] sm:$0xff]  }
   0x5   :  { %v570_v11 = vld [vmem:[%s669_s2] ss:$0 sm:$0xff] }
   0x6   :  { %443 = vmatmul.mubr.msk.bf16.vlgmr.msra.gmra.mrb[0].mxu0 %vm129_vm1, %v483_v2  ;;  %463 = vmatmul.mubr.msk.bf16.vlgmr.msra.gmra.mrb[0].mxu1 %vm129_vm1, %v484_v3  ;;  %v575_v13 = vld [vmem:[%s670_s3] ss:$0 sm:$0xff] }
   0x7   :  { %446 = vmatprep.mubr.msk.bf16.mxu0 %vm493_vm0, %v492_v0  ;;  %466 = vmatprep.mubr.msk.bf16.mxu1 %vm493_vm0, %v492_v0 }
   0xe   :  { %447 = vmatmul.mubr.msk.bf16.gmra.mrb[4].mxu0 %vm129_vm1, %v485_v4  ;;  %467 = vmatmul.mubr.msk.bf16.gmra.mrb[4].mxu1 %vm129_vm1, %v486_v5 }
   0xf   :  { %450 = vmatprep.mubr.msk.bf16.mxu0 %vm493_vm0, %v492_v0  ;;  %470 = vmatprep.mubr.msk.bf16.mxu1 %vm493_vm0, %v492_v0 }
  0x16   :  { %451 = vmatmul.mubr.msk.bf16.gmra.mrb[8].mxu0 %vm129_vm1, %v487_v6  ;;  %471 = vmatmul.mubr.msk.bf16.gmra.mrb[8].mxu1 %vm129_vm1, %v488_v7 }
  0x17   :  { %454 = vmatprep.mubr.msk.bf16.mxu0 %vm493_vm0, %v492_v0  ;;  %474 = vmatprep.mubr.msk.bf16.mxu1 %vm493_vm0, %v492_v0 }
  0x1e   :  { %455 = vmatmul.mubr.msk.bf16.gmra.mrb[12].mxu0 %vm129_vm1, %v489_v8  ;;  %475 = vmatmul.mubr.msk.bf16.gmra.mrb[12].mxu1 %vm129_vm1, %v490_v9 }
  0x1f   :  { %458 = vmatprep.mubr.msk.bf16.mxu0 %vm493_vm0, %v492_v0 }
  0x26   :  { %459 = vmatmul.mubr.msk.bf16.gmra.mrb[16].mxu0 %vm129_vm1, %v491_v10 }
  0xd9   :  { %v191_v12 = vpop.f32.mrb[0].mxu0  ;;  %v231_v14 = vpop.f32.mrb[0].mxu1 }
  0xda   :  { %v326_v15 = vmul.f32 %v570_v11, %v191_v12  ;;  %v444_v16 = vpop.f32.mrb[1].mxu0  ;;  %v336_v17 = vmul.f32 %v570_v11, %v231_v14  ;;  %v464_v18 = vpop.f32.mrb[1].mxu1 }
  0xdb   :  { %v194_v19 = vpop.f32.mrb[2].mxu0  ;;  %v234_v20 = vpop.f32.mrb[2].mxu1 }
  0xdc   :  { %v351_v21 = vadd.f32 %v575_v13, %v326_v15  ;;  %v327_v22 = vmul.f32 %v570_v11, %v194_v19  ;;  %v445_v23 = vpop.f32.mrb[3].mxu0  ;;  %v361_v24 = vadd.f32 %v575_v13, %v336_v17  ;;  %v337_v25 = vmul.f32 %v570_v11, %v234_v20  ;;  %v465_v26 = vpop.f32.mrb[3].mxu1 }
  0xde   :  { %v369_v27 = vmax.f32 %v351_v21, 0.0  ;;  %v352_v28 = vadd.f32 %v575_v13, %v327_v22  ;;  %v379_v29 = vmax.f32 %v361_v24, 0.0  ;;  %v362_v30 = vadd.f32 %v575_v13, %v337_v25 }
  0xe0   :  { %387 = vst [vmem:[%s671_s4] sm:$0xff] %v369_v27  ;;  %v370_v31 = vmax.f32 %v352_v28, 0.0  ;;  %397 = vst [vmem:[%s671_s4 + $0x50] sm:$0xff] %v379_v29  ;;  %v380_v32 = vmax.f32 %v362_v30, 0.0 }
  0xe1   :  { %v199_v33 = vpop.f32.mrb[4].mxu0  ;;  %v239_v34 = vpop.f32.mrb[4].mxu1 }
  0xe2   :  { %388 = vst [vmem:[%s671_s4 + $0x8] sm:$0xff] %v370_v31  ;;  %398 = vst [vmem:[%s671_s4 + $0x58] sm:$0xff] %v380_v32  ;;  %v328_v35 = vmul.f32 %v570_v11, %v199_v33  ;;  %v448_v36 = vpop.f32.mrb[5].mxu0  ;;  %v338_v37 = vmul.f32 %v570_v11, %v239_v34  ;;  %v468_v38 = vpop.f32.mrb[5].mxu1 }
  0xe3   :  { %v202_v39 = vpop.f32.mrb[6].mxu0  ;;  %v242_v40 = vpop.f32.mrb[6].mxu1 }
  0xe4   :  { %v353_v41 = vadd.f32 %v575_v13, %v328_v35  ;;  %v329_v42 = vmul.f32 %v570_v11, %v202_v39  ;;  %v449_v43 = vpop.f32.mrb[7].mxu0  ;;  %v363_v44 = vadd.f32 %v575_v13, %v338_v37  ;;  %v339_v45 = vmul.f32 %v570_v11, %v242_v40  ;;  %v469_v46 = vpop.f32.mrb[7].mxu1 }
  0xe6   :  { %v371_v47 = vmax.f32 %v353_v41, 0.0  ;;  %v354_v48 = vadd.f32 %v575_v13, %v329_v42  ;;  %v381_v49 = vmax.f32 %v363_v44, 0.0  ;;  %v364_v50 = vadd.f32 %v575_v13, %v339_v45 }
  0xe8   :  { %389 = vst [vmem:[%s671_s4 + $0x10] sm:$0xff] %v371_v47  ;;  %v372_v51 = vmax.f32 %v354_v48, 0.0  ;;  %399 = vst [vmem:[%s671_s4 + $0x60] sm:$0xff] %v381_v49  ;;  %v382_v52 = vmax.f32 %v364_v50, 0.0 }
  0xe9   :  { %v207_v53 = vpop.f32.mrb[8].mxu0  ;;  %v247_v54 = vpop.f32.mrb[8].mxu1 }
  0xea   :  { %390 = vst [vmem:[%s671_s4 + $0x18] sm:$0xff] %v372_v51  ;;  %400 = vst [vmem:[%s671_s4 + $0x68] sm:$0xff] %v382_v52  ;;  %v330_v55 = vmul.f32 %v570_v11, %v207_v53  ;;  %v452_v56 = vpop.f32.mrb[9].mxu0  ;;  %v340_v57 = vmul.f32 %v570_v11, %v247_v54  ;;  %v472_v58 = vpop.f32.mrb[9].mxu1 }
  0xeb   :  { %v210_v59 = vpop.f32.mrb[10].mxu0  ;;  %v250_v60 = vpop.f32.mrb[10].mxu1 }
  0xec   :  { %v355_v61 = vadd.f32 %v575_v13, %v330_v55  ;;  %v331_v62 = vmul.f32 %v570_v11, %v210_v59  ;;  %v453_v63 = vpop.f32.mrb[11].mxu0  ;;  %v365_v0 = vadd.f32 %v575_v13, %v340_v57  ;;  %v341_v1 = vmul.f32 %v570_v11, %v250_v60  ;;  %v473_v2 = vpop.f32.mrb[11].mxu1 }
  0xee   :  { %v373_v3 = vmax.f32 %v355_v61, 0.0  ;;  %v356_v4 = vadd.f32 %v575_v13, %v331_v62  ;;  %v383_v5 = vmax.f32 %v365_v0, 0.0  ;;  %v366_v6 = vadd.f32 %v575_v13, %v341_v1 }
  0xf0   :  { %391 = vst [vmem:[%s671_s4 + $0x20] sm:$0xff] %v373_v3  ;;  %v374_v7 = vmax.f32 %v356_v4, 0.0  ;;  %401 = vst [vmem:[%s671_s4 + $0x70] sm:$0xff] %v383_v5  ;;  %v384_v8 = vmax.f32 %v366_v6, 0.0 }
  0xf1   :  { %v215_v9 = vpop.f32.mrb[12].mxu0  ;;  %v255_v10 = vpop.f32.mrb[12].mxu1 }
  0xf2   :  { %392 = vst [vmem:[%s671_s4 + $0x28] sm:$0xff] %v374_v7  ;;  %402 = vst [vmem:[%s671_s4 + $0x78] sm:$0xff] %v384_v8  ;;  %v332_v12 = vmul.f32 %v570_v11, %v215_v9  ;;  %v456_v14 = vpop.f32.mrb[13].mxu0  ;;  %v342_v15 = vmul.f32 %v570_v11, %v255_v10  ;;  %v476_v16 = vpop.f32.mrb[13].mxu1 }
  0xf3   :  { %v218_v17 = vpop.f32.mrb[14].mxu0  ;;  %v258_v18 = vpop.f32.mrb[14].mxu1 }
  0xf4   :  { %v357_v19 = vadd.f32 %v575_v13, %v332_v12  ;;  %v333_v20 = vmul.f32 %v570_v11, %v218_v17  ;;  %v457_v21 = vpop.f32.mrb[15].mxu0  ;;  %v367_v22 = vadd.f32 %v575_v13, %v342_v15  ;;  %v343_v23 = vmul.f32 %v570_v11, %v258_v18  ;;  %v477_v24 = vpop.f32.mrb[15].mxu1 }
  0xf6   :  { %v375_v25 = vmax.f32 %v357_v19, 0.0  ;;  %v358_v26 = vadd.f32 %v575_v13, %v333_v20  ;;  %v385_v27 = vmax.f32 %v367_v22, 0.0  ;;  %v368_v28 = vadd.f32 %v575_v13, %v343_v23 }
  0xf8   :  { %393 = vst [vmem:[%s671_s4 + $0x30] sm:$0xff] %v375_v25  ;;  %v376_v29 = vmax.f32 %v358_v26, 0.0  ;;  %403 = vst [vmem:[%s671_s4 + $0x80] sm:$0xff] %v385_v27  ;;  %v386_v30 = vmax.f32 %v368_v28, 0.0 }
  0xf9   :  { %v223_v31 = vpop.f32.mrb[16].mxu0 }
  0xfa   :  { %394 = vst [vmem:[%s671_s4 + $0x38] sm:$0xff] %v376_v29  ;;  %404 = vst [vmem:[%s671_s4 + $0x88] sm:$0xff] %v386_v30  ;;  %v334_v32 = vmul.f32 %v570_v11, %v223_v31  ;;  %v460_v33 = vpop.f32.mrb[17].mxu0 }
  0xfb   :  { %v226_v34 = vpop.f32.mrb[18].mxu0 }
  0xfc   :  { %v359_v35 = vadd.f32 %v575_v13, %v334_v32  ;;  %v335_v36 = vmul.f32 %v570_v11, %v226_v34  ;;  %v461_v37 = vpop.f32.mrb[19].mxu0 }
  0xfe   :  { %v377_v38 = vmax.f32 %v359_v35, 0.0  ;;  %v360_v39 = vadd.f32 %v575_v13, %v335_v36 }
 0x100   :  { %395 = vst [vmem:[%s671_s4 + $0x40] sm:$0xff] %v377_v38  ;;  %v378_v40 = vmax.f32 %v360_v39, 0.0 }
 0x102   :  { %396 = vst [vmem:[%s671_s4 + $0x48] sm:$0xff] %v378_v40 }

// kernel: manner_forward.119
= control target key start
LH: loop header
LB: loop body
LE: loop exit
PB: predicated region body
PF: predicated region fallthrough
CT: control target
= control target key end

     0   :  { %v489_v0 = vmov 0.0   ;;  %vm490_vm0 = vmmov 0   ;;  %vm137_vm1 = vcmask 261120   ;;  %s667_s1 = inlined_call_operand.vmem [shape: bf16[32,128], index: 1, kind: input, shape index: {}]   ;;  %s668_s0 = inlined_call_operand.vmem [shape: bf16[144,32], index: 0, kind: input, shape index: {}]   ;;  %s669_s2 = inlined_call_operand.vmem [shape: f32[1,128], index: 2, kind: input, shape index: {}]   ;;  %s670_s3 = inlined_call_operand.vmem [shape: f32[1,128], index: 3, kind: input, shape index: {}]   ;;  %s671_s4 = inlined_call_operand.vmem [shape: f32[144,128], index: 4, kind: output, shape index: {}]  }
   0x1   :  { %432 = vmatprep.subr.bf16.mxu0 %v489_v0  ;;  %v478_v1 = vld [vmem:[%s667_s1] sm:$0xff]   ;;  %472 = vmatprep.subr.bf16.mxu1 %v489_v0  ;;  %v479_v2 = vld [vmem:[%s667_s1 + $0x8] sm:$0xff]   ;;  %v483_v6 = vld [vmem:[%s668_s0 + $0x30] sm:$0xff]  }
   0x2   :  { %436 = vmatprep.mubr.msk.bf16.mxu0 %vm490_vm0, %v489_v0  ;;  %456 = vmatprep.mubr.msk.bf16.mxu1 %vm490_vm0, %v489_v0  ;;  %v480_v3 = vld [vmem:[%s668_s0] sm:$0xff]   ;;  %v481_v4 = vld [vmem:[%s668_s0 + $0x28] sm:$0xff]   ;;  %v484_v7 = vld [vmem:[%s668_s0 + $0x10] sm:$0xff]  }
   0x3   :  { %433 = vmatpush3.bf16.msra.mxu0 %v478_v1  ;;  %474 = vmatpush3.bf16.msra.mxu1 %v478_v1  ;;  %v482_v5 = vld [vmem:[%s668_s0 + $0x8] sm:$0xff]   ;;  %v485_v8 = vld [vmem:[%s668_s0 + $0x38] sm:$0xff]   ;;  %v487_v10 = vld [vmem:[%s668_s0 + $0x40] sm:$0xff]  }
   0x4   :  { %434 = vmatprep.subr.bf16.mxu0 %v489_v0  ;;  %473 = vmatprep.subr.bf16.mxu1 %v489_v0  ;;  %v486_v9 = vld [vmem:[%s668_s0 + $0x18] sm:$0xff]   ;;  %v488_v11 = vld [vmem:[%s668_s0 + $0x20] sm:$0xff]  }
   0x5   :  { %v570_v12 = vld [vmem:[%s669_s2] ss:$0 sm:$0xff] }
   0x6   :  { %v575_v14 = vld [vmem:[%s670_s3] ss:$0 sm:$0xff] }
   0x7   :  { %435 = vmatpush3.bf16.msra.mxu0 %v479_v2  ;;  %475 = vmatpush3.bf16.msra.mxu1 %v479_v2 }
   0xa   :  { %437 = vmatmul.mubr.msk.bf16.vlgmr.msra.gmra.mrb[0].mxu0 %vm137_vm1, %v480_v3  ;;  %457 = vmatmul.mubr.msk.bf16.vlgmr.msra.gmra.mrb[0].mxu1 %vm137_vm1, %v481_v4 }
   0xb   :  { %440 = vmatprep.mubr.msk.bf16.mxu0 %vm490_vm0, %v489_v0  ;;  %460 = vmatprep.mubr.msk.bf16.mxu1 %vm490_vm0, %v489_v0 }
  0x12   :  { %441 = vmatmul.mubr.msk.bf16.gmra.mrb[4].mxu0 %vm137_vm1, %v482_v5  ;;  %461 = vmatmul.mubr.msk.bf16.gmra.mrb[4].mxu1 %vm137_vm1, %v483_v6 }
  0x13   :  { %444 = vmatprep.mubr.msk.bf16.mxu0 %vm490_vm0, %v489_v0  ;;  %464 = vmatprep.mubr.msk.bf16.mxu1 %vm490_vm0, %v489_v0 }
  0x1a   :  { %445 = vmatmul.mubr.msk.bf16.gmra.mrb[8].mxu0 %vm137_vm1, %v484_v7  ;;  %465 = vmatmul.mubr.msk.bf16.gmra.mrb[8].mxu1 %vm137_vm1, %v485_v8 }
  0x1b   :  { %448 = vmatprep.mubr.msk.bf16.mxu0 %vm490_vm0, %v489_v0  ;;  %468 = vmatprep.mubr.msk.bf16.mxu1 %vm490_vm0, %v489_v0 }
  0x22   :  { %449 = vmatmul.mubr.msk.bf16.gmra.mrb[12].mxu0 %vm137_vm1, %v486_v9  ;;  %469 = vmatmul.mubr.msk.bf16.gmra.mrb[12].mxu1 %vm137_vm1, %v487_v10 }
  0x23   :  { %452 = vmatprep.mubr.msk.bf16.mxu0 %vm490_vm0, %v489_v0 }
  0x2a   :  { %453 = vmatmul.mubr.msk.bf16.gmra.mrb[16].mxu0 %vm137_vm1, %v488_v11 }
  0xdd   :  { %v199_v13 = vpop.f32.mrb[0].mxu0  ;;  %v239_v15 = vpop.f32.mrb[0].mxu1 }
  0xde   :  { %v334_v16 = vmul.f32 %v570_v12, %v199_v13  ;;  %v438_v17 = vpop.f32.mrb[1].mxu0  ;;  %v344_v18 = vmul.f32 %v570_v12, %v239_v15  ;;  %v458_v19 = vpop.f32.mrb[1].mxu1 }
  0xdf   :  { %v202_v20 = vpop.f32.mrb[2].mxu0  ;;  %v242_v21 = vpop.f32.mrb[2].mxu1 }
  0xe0   :  { %v359_v22 = vadd.f32 %v575_v14, %v334_v16  ;;  %v335_v23 = vmul.f32 %v570_v12, %v202_v20  ;;  %v439_v24 = vpop.f32.mrb[3].mxu0  ;;  %v369_v25 = vadd.f32 %v575_v14, %v344_v18  ;;  %v345_v26 = vmul.f32 %v570_v12, %v242_v21  ;;  %v459_v27 = vpop.f32.mrb[3].mxu1 }
  0xe2   :  { %377 = vst [vmem:[%s671_s4] sm:$0xff] %v359_v22  ;;  %v360_v28 = vadd.f32 %v575_v14, %v335_v23  ;;  %387 = vst [vmem:[%s671_s4 + $0x50] sm:$0xff] %v369_v25  ;;  %v370_v29 = vadd.f32 %v575_v14, %v345_v26 }
  0xe4   :  { %378 = vst [vmem:[%s671_s4 + $0x8] sm:$0xff] %v360_v28  ;;  %388 = vst [vmem:[%s671_s4 + $0x58] sm:$0xff] %v370_v29 }
  0xe5   :  { %v207_v30 = vpop.f32.mrb[4].mxu0  ;;  %v247_v31 = vpop.f32.mrb[4].mxu1 }
  0xe6   :  { %v336_v32 = vmul.f32 %v570_v12, %v207_v30  ;;  %v442_v33 = vpop.f32.mrb[5].mxu0  ;;  %v346_v34 = vmul.f32 %v570_v12, %v247_v31  ;;  %v462_v35 = vpop.f32.mrb[5].mxu1 }
  0xe7   :  { %v210_v36 = vpop.f32.mrb[6].mxu0  ;;  %v250_v37 = vpop.f32.mrb[6].mxu1 }
  0xe8   :  { %v361_v38 = vadd.f32 %v575_v14, %v336_v32  ;;  %v337_v39 = vmul.f32 %v570_v12, %v210_v36  ;;  %v443_v40 = vpop.f32.mrb[7].mxu0  ;;  %v371_v41 = vadd.f32 %v575_v14, %v346_v34  ;;  %v347_v42 = vmul.f32 %v570_v12, %v250_v37  ;;  %v463_v43 = vpop.f32.mrb[7].mxu1 }
  0xea   :  { %379 = vst [vmem:[%s671_s4 + $0x10] sm:$0xff] %v361_v38  ;;  %v362_v44 = vadd.f32 %v575_v14, %v337_v39  ;;  %389 = vst [vmem:[%s671_s4 + $0x60] sm:$0xff] %v371_v41  ;;  %v372_v45 = vadd.f32 %v575_v14, %v347_v42 }
  0xec   :  { %380 = vst [vmem:[%s671_s4 + $0x18] sm:$0xff] %v362_v44  ;;  %390 = vst [vmem:[%s671_s4 + $0x68] sm:$0xff] %v372_v45 }
  0xed   :  { %v215_v46 = vpop.f32.mrb[8].mxu0  ;;  %v255_v47 = vpop.f32.mrb[8].mxu1 }
  0xee   :  { %v338_v48 = vmul.f32 %v570_v12, %v215_v46  ;;  %v446_v49 = vpop.f32.mrb[9].mxu0  ;;  %v348_v50 = vmul.f32 %v570_v12, %v255_v47  ;;  %v466_v51 = vpop.f32.mrb[9].mxu1 }
  0xef   :  { %v218_v52 = vpop.f32.mrb[10].mxu0  ;;  %v258_v53 = vpop.f32.mrb[10].mxu1 }
  0xf0   :  { %v363_v54 = vadd.f32 %v575_v14, %v338_v48  ;;  %v339_v55 = vmul.f32 %v570_v12, %v218_v52  ;;  %v447_v56 = vpop.f32.mrb[11].mxu0  ;;  %v373_v57 = vadd.f32 %v575_v14, %v348_v50  ;;  %v349_v58 = vmul.f32 %v570_v12, %v258_v53  ;;  %v467_v59 = vpop.f32.mrb[11].mxu1 }
  0xf2   :  { %381 = vst [vmem:[%s671_s4 + $0x20] sm:$0xff] %v363_v54  ;;  %v364_v60 = vadd.f32 %v575_v14, %v339_v55  ;;  %391 = vst [vmem:[%s671_s4 + $0x70] sm:$0xff] %v373_v57  ;;  %v374_v61 = vadd.f32 %v575_v14, %v349_v58 }
  0xf4   :  { %382 = vst [vmem:[%s671_s4 + $0x28] sm:$0xff] %v364_v60  ;;  %392 = vst [vmem:[%s671_s4 + $0x78] sm:$0xff] %v374_v61 }
  0xf5   :  { %v223_v62 = vpop.f32.mrb[12].mxu0  ;;  %v263_v63 = vpop.f32.mrb[12].mxu1 }
  0xf6   :  { %v340_v0 = vmul.f32 %v570_v12, %v223_v62  ;;  %v450_v1 = vpop.f32.mrb[13].mxu0  ;;  %v350_v2 = vmul.f32 %v570_v12, %v263_v63  ;;  %v470_v3 = vpop.f32.mrb[13].mxu1 }
  0xf7   :  { %v226_v4 = vpop.f32.mrb[14].mxu0  ;;  %v266_v5 = vpop.f32.mrb[14].mxu1 }
  0xf8   :  { %v365_v6 = vadd.f32 %v575_v14, %v340_v0  ;;  %v341_v7 = vmul.f32 %v570_v12, %v226_v4  ;;  %v451_v8 = vpop.f32.mrb[15].mxu0  ;;  %v375_v9 = vadd.f32 %v575_v14, %v350_v2  ;;  %v351_v10 = vmul.f32 %v570_v12, %v266_v5  ;;  %v471_v11 = vpop.f32.mrb[15].mxu1 }
  0xfa   :  { %383 = vst [vmem:[%s671_s4 + $0x30] sm:$0xff] %v365_v6  ;;  %v366_v13 = vadd.f32 %v575_v14, %v341_v7  ;;  %393 = vst [vmem:[%s671_s4 + $0x80] sm:$0xff] %v375_v9  ;;  %v376_v15 = vadd.f32 %v575_v14, %v351_v10 }
  0xfc   :  { %384 = vst [vmem:[%s671_s4 + $0x38] sm:$0xff] %v366_v13  ;;  %394 = vst [vmem:[%s671_s4 + $0x88] sm:$0xff] %v376_v15 }
  0xfd   :  { %v231_v16 = vpop.f32.mrb[16].mxu0 }
  0xfe   :  { %v342_v17 = vmul.f32 %v570_v12, %v231_v16  ;;  %v454_v18 = vpop.f32.mrb[17].mxu0 }
  0xff   :  { %v234_v19 = vpop.f32.mrb[18].mxu0 }
 0x100   :  { %v367_v20 = vadd.f32 %v575_v14, %v342_v17  ;;  %v343_v21 = vmul.f32 %v570_v12, %v234_v19  ;;  %v455_v22 = vpop.f32.mrb[19].mxu0 }
 0x102   :  { %385 = vst [vmem:[%s671_s4 + $0x40] sm:$0xff] %v367_v20  ;;  %v368_v23 = vadd.f32 %v575_v14, %v343_v21 }
 0x104   :  { %386 = vst [vmem:[%s671_s4 + $0x48] sm:$0xff] %v368_v23 }

</bundles_post_ra>
